<compile_context>
chip_gen: v7x
topology: tpu7x:2x2x1
jax: 0.10.0
libtpu: 0.0.40
codegen_flags: <defaults>
</compile_context>

<pallas_src>
import functools

import jax
import jax.numpy as jnp
from jax import lax
from jax.experimental import pallas as pl
from jax.experimental.pallas import tpu as pltpu


# ----------------------------------------------------------------------------
# Fused Pallas kernel (one batch element per grid step)
# ----------------------------------------------------------------------------
def _encoder_kernel(x_ref, *args, n_depth, z_dim):
    """Fully fused Encoder forward for one batch element.

    Argument layout (after x_ref):
      w_0, b_0, ..., w_{nc-1}, b_{nc-1}   inputs; nc = 2*n_depth + 1
                                          (last conv = fused mu|logvar head)
      mu_ref, lv_ref                      outputs
      pad_0, ..., pad_{nc-1}              VMEM halo scratch, one per conv

    w_k is pre-flattened to (9*Cin_k, Cout_k) in (ky, kx, cin) order (HWIO
    reshape), b_k is (1, Cout_k) float32.
    """
    n_conv = 2 * n_depth + 1
    w_refs = args[0:2 * n_conv:2]
    b_refs = args[1:2 * n_conv:2]
    mu_ref = args[2 * n_conv]
    lv_ref = args[2 * n_conv + 1]
    pad_refs = args[2 * n_conv + 2:]

    def conv3x3(x, pad_ref, w_ref, b_ref, relu):
        # x: (Hs, Ws, Cin) f32 value. One im2col matmul on the MXU.
        Hs, Ws, cin = x.shape
        cout = w_ref.shape[-1]
        # In-kernel 'same' padding: zero the halo buffer, write the interior.
        # (Zeroed every call: with a megacore-parallel batch axis each core has
        #  its own scratch, so a program_id==0-only init would be unsafe.)
        pad_ref[...] = jnp.zeros_like(pad_ref)
        pad_ref[1:1 + Hs, 1:1 + Ws, :] = x
        # im2col: (Hs*Ws, 9*Cin) patch slab -> single MXU pass with K = 9*Cin.
        cols = [pad_ref[dy:dy + Hs, dx:dx + Ws, :]
                for dy in range(3) for dx in range(3)]
        patch = jnp.concatenate(cols, axis=-1).reshape(Hs * Ws, 9 * cin)
        acc = jnp.dot(patch.astype(w_ref.dtype), w_ref[...],
                      preferred_element_type=jnp.float32)
        acc = acc + b_ref[...]                  # bias once, f32 epilogue
        if relu:
            acc = jnp.maximum(acc, 0.0)
        return acc.reshape(Hs, Ws, cout)

    def maxpool2(x):
        # 2x2/stride-2 max pool on f32 values already resident (VPU only).
        Hs, Ws, c = x.shape
        xw = jnp.max(x.reshape(Hs, Ws // 2, 2, c), axis=2)
        return jnp.max(xw.reshape(Hs // 2, 2, Ws // 2, c), axis=1)

    x = x_ref[0].astype(jnp.float32)            # (H, W, Cin)
    ci = 0
    for _ in range(n_depth):
        x = conv3x3(x, pad_refs[ci], w_refs[ci], b_refs[ci], relu=True); ci += 1
        x = conv3x3(x, pad_refs[ci], w_refs[ci], b_refs[ci], relu=True); ci += 1
        x = maxpool2(x)                          # fused pool, no HBM round trip
    # Fused mu|logvar head: one conv with Cout = 2*z_dim, then split.
    head = conv3x3(x, pad_refs[ci], w_refs[ci], b_refs[ci], relu=False)
    mu_ref[0] = head[:, :, :z_dim].astype(mu_ref.dtype)
    lv_ref[0] = head[:, :, z_dim:].astype(lv_ref.dtype)


# ----------------------------------------------------------------------------
# Wrapper
# ----------------------------------------------------------------------------
def encoder_forward(params, x_nchw, *, compute_dtype=jnp.bfloat16):
    """Mirrors Encoder.forward: DownConv blocks then convmu / convlogvar heads."""
    x = jnp.transpose(x_nchw, (0, 2, 3, 1)).astype(jnp.float32)   # NCHW -> NHWC
    B, H, W, Cin = x.shape
    n_depth = len(params["down"])
    z_dim = params["wmu"].shape[-1]

    # Gather conv weights in execution order; fuse mu/logvar heads along Cout.
    ws, bs = [], []
    for (w1, b1, w2, b2) in params["down"]:
        ws += [w1, w2]
        bs += [b1, b2]
    ws.append(jnp.concatenate([params["wmu"], params["wlv"]], axis=-1))
    bs.append(jnp.concatenate([params["bmu"], params["blv"]], axis=-1))

    # Flatten HWIO (3,3,Cin,Cout) -> im2col (9*Cin, Cout); MXU inputs in bf16.
    w_flat = [w.reshape(-1, w.shape[-1]).astype(compute_dtype) for w in ws]
    b_flat = [b.reshape(1, -1).astype(jnp.float32) for b in bs]

    # Per-conv halo-padded scratch shapes (f32, VMEM).
    pad_shapes = []
    h, w_, c = H, W, Cin
    for d in range(n_depth):
        cout = ws[2 * d].shape[-1]
        pad_shapes.append((h + 2, w_ + 2, c))       # conv1 of block
        pad_shapes.append((h + 2, w_ + 2, cout))    # conv2 of block
        c = cout
        h, w_ = h // 2, w_ // 2
    pad_shapes.append((h + 2, w_ + 2, c))           # fused head
    Ho, Wo = h, w_

    kernel = functools.partial(_encoder_kernel, n_depth=n_depth, z_dim=z_dim)

    in_specs = [pl.BlockSpec((1, H, W, Cin), lambda i: (i, 0, 0, 0))]
    wb_args = []
    for wf, bf in zip(w_flat, b_flat):
        in_specs.append(pl.BlockSpec(wf.shape, lambda i: (0, 0)))
        in_specs.append(pl.BlockSpec(bf.shape, lambda i: (0, 0)))
        wb_args += [wf, bf]

    out_spec = pl.BlockSpec((1, Ho, Wo, z_dim), lambda i: (i, 0, 0, 0))

    mu, lv = pl.pallas_call(
        kernel,
        out_shape=(jax.ShapeDtypeStruct((B, Ho, Wo, z_dim), jnp.float32),
                   jax.ShapeDtypeStruct((B, Ho, Wo, z_dim), jnp.float32)),
        grid=(B,),
        in_specs=in_specs,
        out_specs=(out_spec, out_spec),
        scratch_shapes=[pltpu.VMEM(s, jnp.float32) for s in pad_shapes],
        compiler_params=pltpu.CompilerParams(
            dimension_semantics=("parallel",)),   # v7x: batch split over 2 TCs
    )(x, *wb_args)

    # NHWC -> NCHW to match the PyTorch output convention.
    return jnp.transpose(mu, (0, 3, 1, 2)), jnp.transpose(lv, (0, 3, 1, 2))


# ----------------------------------------------------------------------------
# Parameters
# ----------------------------------------------------------------------------
def init_encoder_params(key, *, z_dim=4, in_channels=1, init_filters=32, n_depth=2):
    """Deterministic synthetic init. Weights stored HWIO (3, 3, Cin, Cout)."""
    params = {"down": []}

    def conv_init(k, cin, cout):
        kw, kb = jax.random.split(k)
        fan_in = cin * 9
        w = jax.random.normal(kw, (3, 3, cin, cout), jnp.float32) * (1.0 / jnp.sqrt(fan_in))
        b = jax.random.normal(kb, (cout,), jnp.float32) * 0.01
        return w, b

    keys = jax.random.split(key, 2 * n_depth + 2)
    outs = in_channels
    for i in range(n_depth):
        ins = in_channels if i == 0 else outs
        outs = init_filters * 2 ** i
        w1, b1 = conv_init(keys[2 * i], ins, outs)
        w2, b2 = conv_init(keys[2 * i + 1], outs, outs)
        params["down"].append((w1, b1, w2, b2))
    head_in = init_filters * 2 ** (n_depth - 1)
    params["wmu"], params["bmu"] = conv_init(keys[-2], head_in, z_dim)
    params["wlv"], params["blv"] = conv_init(keys[-1], head_in, z_dim)
    return params


# ----------------------------------------------------------------------------
# Pure-JAX reference (same bf16-input / f32-accumulate numerics) for checking
# ----------------------------------------------------------------------------
def _ref_conv(x, w, b, relu, compute_dtype):
    y = lax.conv_general_dilated(
        x.astype(compute_dtype), w.astype(compute_dtype), (1, 1), "SAME",
        dimension_numbers=("NHWC", "HWIO", "NHWC"),
        preferred_element_type=jnp.float32) + b
    return jnp.maximum(y, 0.0) if relu else y


def _ref_pool(x):
    return lax.reduce_window(x, -jnp.inf, lax.max, (1, 2, 2, 1), (1, 2, 2, 1), "VALID")


def encoder_forward_ref(params, x_nchw, *, compute_dtype=jnp.bfloat16):
    x = jnp.transpose(x_nchw, (0, 2, 3, 1)).astype(jnp.float32)
    for (w1, b1, w2, b2) in params["down"]:
        x = _ref_conv(x, w1, b1, True, compute_dtype)
        x = _ref_conv(x, w2, b2, True, compute_dtype)
        x = _ref_pool(x)
    mu = _ref_conv(x, params["wmu"], params["bmu"], False, compute_dtype)
    logvar = _ref_conv(x, params["wlv"], params["blv"], False, compute_dtype)
    return jnp.transpose(mu, (0, 3, 1, 2)), jnp.transpose(logvar, (0, 3, 1, 2))


# ----------------------------------------------------------------------------
if __name__ == "__main__":
    key = jax.random.PRNGKey(0)
    kx, kp = jax.random.split(key)

    B, Cin, H, W = 2, 1, 16, 16                      # NCHW (PyTorch convention)
    x = jax.random.normal(kx, (B, Cin, H, W), jnp.float32)
    params = init_encoder_params(kp, z_dim=4, in_channels=Cin,
                                 init_filters=32, n_depth=2)

    mu, logvar = jax.jit(encoder_forward)(params, x)
    jax.block_until_ready((mu, logvar))

    mu_ref, logvar_ref = encoder_forward_ref(params, x)
    assert mu.shape == (B, 4, H // 4, W // 4)
    assert logvar.shape == (B, 4, H // 4, W // 4)
    assert jnp.allclose(mu, mu_ref, rtol=2e-2, atol=2e-2)
    assert jnp.allclose(logvar, logvar_ref, rtol=2e-2, atol=2e-2)

    print("KERNEL_OK")
</pallas_src>

<mosaic_0001>
module attributes {stable_mosaic.version = 11 : i64} {
  func.func @_encoder_kernel(%arg0: i32, %arg1: memref<1x16x16x1xf32, #tpu.memory_space<vmem>>, %arg2: memref<9x32xbf16, #tpu.memory_space<vmem>>, %arg3: memref<1x32xf32, #tpu.memory_space<vmem>>, %arg4: memref<288x32xbf16, #tpu.memory_space<vmem>>, %arg5: memref<1x32xf32, #tpu.memory_space<vmem>>, %arg6: memref<288x64xbf16, #tpu.memory_space<vmem>>, %arg7: memref<1x64xf32, #tpu.memory_space<vmem>>, %arg8: memref<576x64xbf16, #tpu.memory_space<vmem>>, %arg9: memref<1x64xf32, #tpu.memory_space<vmem>>, %arg10: memref<576x8xbf16, #tpu.memory_space<vmem>>, %arg11: memref<1x8xf32, #tpu.memory_space<vmem>>, %arg12: memref<1x4x4x4xf32, #tpu.memory_space<vmem>>, %arg13: memref<1x4x4x4xf32, #tpu.memory_space<vmem>>, %arg14: memref<18x18x1xf32, #tpu.memory_space<vmem>>, %arg15: memref<18x18x32xf32, #tpu.memory_space<vmem>>, %arg16: memref<10x10x32xf32, #tpu.memory_space<vmem>>, %arg17: memref<10x10x64xf32, #tpu.memory_space<vmem>>, %arg18: memref<6x6x64xf32, #tpu.memory_space<vmem>>) attributes {dimension_semantics = [#tpu.dimension_semantics<parallel>], iteration_bounds = array<i64: 2>, scalar_prefetch = 0 : i64, scratch_operands = 5 : i64, tpu.core_type = #tpu.core_type<tc>, window_params = [{transform_indices = @transform_0, window_bounds = array<i64: 1, 16, 16, 1>}, {pipeline_mode = #tpu.pipeline_mode<synchronous>, transform_indices = @transform_1, window_bounds = array<i64: 9, 32>}, {pipeline_mode = #tpu.pipeline_mode<synchronous>, transform_indices = @transform_2, window_bounds = array<i64: 1, 32>}, {pipeline_mode = #tpu.pipeline_mode<synchronous>, transform_indices = @transform_3, window_bounds = array<i64: 288, 32>}, {pipeline_mode = #tpu.pipeline_mode<synchronous>, transform_indices = @transform_4, window_bounds = array<i64: 1, 32>}, {pipeline_mode = #tpu.pipeline_mode<synchronous>, transform_indices = @transform_5, window_bounds = array<i64: 288, 64>}, {pipeline_mode = #tpu.pipeline_mode<synchronous>, transform_indices = @transform_6, window_bounds = array<i64: 1, 64>}, {pipeline_mode = #tpu.pipeline_mode<synchronous>, transform_indices = @transform_7, window_bounds = array<i64: 576, 64>}, {pipeline_mode = #tpu.pipeline_mode<synchronous>, transform_indices = @transform_8, window_bounds = array<i64: 1, 64>}, {pipeline_mode = #tpu.pipeline_mode<synchronous>, transform_indices = @transform_9, window_bounds = array<i64: 576, 8>}, {pipeline_mode = #tpu.pipeline_mode<synchronous>, transform_indices = @transform_10, window_bounds = array<i64: 1, 8>}, {transform_indices = @transform_11, window_bounds = array<i64: 1, 4, 4, 4>}, {transform_indices = @transform_12, window_bounds = array<i64: 1, 4, 4, 4>}]} {
    %c0 = arith.constant 0 : index
    %c0_0 = arith.constant 0 : index
    %c0_1 = arith.constant 0 : index
    %c0_2 = arith.constant 0 : index
    %0 = vector.load %arg1[%c0, %c0_0, %c0_1, %c0_2] : memref<1x16x16x1xf32, #tpu.memory_space<vmem>>, vector<1x16x16x1xf32>
    %1 = vector.shape_cast %0 : vector<1x16x16x1xf32> to vector<16x16x1xf32>
    %cst = arith.constant 0.000000e+00 : f32
    %2 = vector.broadcast %cst : f32 to vector<18x18x1xf32>
    %c0_3 = arith.constant 0 : index
    %c0_4 = arith.constant 0 : index
    %c0_5 = arith.constant 0 : index
    %3 = vector.load %arg14[%c0_3, %c0_4, %c0_5] : memref<18x18x1xf32, #tpu.memory_space<vmem>>, vector<18x18x1xf32>
    tpu.vector_store %arg14[%c0_3, %c0_4, %c0_5], %2 {strides = array<i32>} : memref<18x18x1xf32, #tpu.memory_space<vmem>>, vector<18x18x1xf32>,
    %c1 = arith.constant 1 : index
    %c1_6 = arith.constant 1 : index
    %c0_7 = arith.constant 0 : index
    %4 = vector.load %arg14[%c1, %c1_6, %c0_7] : memref<18x18x1xf32, #tpu.memory_space<vmem>>, vector<16x16x1xf32>
    tpu.vector_store %arg14[%c1, %c1_6, %c0_7], %1 {strides = array<i32>} : memref<18x18x1xf32, #tpu.memory_space<vmem>>, vector<16x16x1xf32>,
    %c0_8 = arith.constant 0 : index
    %c0_9 = arith.constant 0 : index
    %c0_10 = arith.constant 0 : index
    %5 = vector.load %arg14[%c0_8, %c0_9, %c0_10] : memref<18x18x1xf32, #tpu.memory_space<vmem>>, vector<16x16x1xf32>
    %c0_11 = arith.constant 0 : index
    %c1_12 = arith.constant 1 : index
    %c0_13 = arith.constant 0 : index
    %6 = vector.load %arg14[%c0_11, %c1_12, %c0_13] : memref<18x18x1xf32, #tpu.memory_space<vmem>>, vector<16x16x1xf32>
    %c0_14 = arith.constant 0 : index
    %c2 = arith.constant 2 : index
    %c0_15 = arith.constant 0 : index
    %7 = vector.load %arg14[%c0_14, %c2, %c0_15] : memref<18x18x1xf32, #tpu.memory_space<vmem>>, vector<16x16x1xf32>
    %c1_16 = arith.constant 1 : index
    %c0_17 = arith.constant 0 : index
    %c0_18 = arith.constant 0 : index
    %8 = vector.load %arg14[%c1_16, %c0_17, %c0_18] : memref<18x18x1xf32, #tpu.memory_space<vmem>>, vector<16x16x1xf32>
    %c1_19 = arith.constant 1 : index
    %c1_20 = arith.constant 1 : index
    %c0_21 = arith.constant 0 : index
    %9 = vector.load %arg14[%c1_19, %c1_20, %c0_21] : memref<18x18x1xf32, #tpu.memory_space<vmem>>, vector<16x16x1xf32>
    %c1_22 = arith.constant 1 : index
    %c2_23 = arith.constant 2 : index
    %c0_24 = arith.constant 0 : index
    %10 = vector.load %arg14[%c1_22, %c2_23, %c0_24] : memref<18x18x1xf32, #tpu.memory_space<vmem>>, vector<16x16x1xf32>
    %c2_25 = arith.constant 2 : index
    %c0_26 = arith.constant 0 : index
    %c0_27 = arith.constant 0 : index
    %11 = vector.load %arg14[%c2_25, %c0_26, %c0_27] : memref<18x18x1xf32, #tpu.memory_space<vmem>>, vector<16x16x1xf32>
    %c2_28 = arith.constant 2 : index
    %c1_29 = arith.constant 1 : index
    %c0_30 = arith.constant 0 : index
    %12 = vector.load %arg14[%c2_28, %c1_29, %c0_30] : memref<18x18x1xf32, #tpu.memory_space<vmem>>, vector<16x16x1xf32>
    %c2_31 = arith.constant 2 : index
    %c2_32 = arith.constant 2 : index
    %c0_33 = arith.constant 0 : index
    %13 = vector.load %arg14[%c2_31, %c2_32, %c0_33] : memref<18x18x1xf32, #tpu.memory_space<vmem>>, vector<16x16x1xf32>
    %14 = tpu.concatenate %5, %6, %7, %8, %9, %10, %11, %12, %13 in 2 : vector<16x16x1xf32>, vector<16x16x1xf32>, vector<16x16x1xf32>, vector<16x16x1xf32>, vector<16x16x1xf32>, vector<16x16x1xf32>, vector<16x16x1xf32>, vector<16x16x1xf32>, vector<16x16x1xf32> -> vector<16x16x9xf32>
    %15 = vector.shape_cast %14 : vector<16x16x9xf32> to vector<256x9xf32>
    %16 = arith.truncf %15 : vector<256x9xf32> to vector<256x9xbf16>
    %c0_34 = arith.constant 0 : index
    %c0_35 = arith.constant 0 : index
    %17 = vector.load %arg2[%c0_34, %c0_35] : memref<9x32xbf16, #tpu.memory_space<vmem>>, vector<9x32xbf16>
    %cst_36 = arith.constant dense<0.000000e+00> : vector<256x32xf32>
    %18 = tpu.matmul %16, %17, %cst_36 {dimension_numbers = #tpu.dot_dimension_numbers<[1], [0], [0], [1], [0, 0, 1, 1], [], []>} : vector<256x9xbf16>, vector<9x32xbf16>, vector<256x32xf32> -> vector<256x32xf32>
    %c0_37 = arith.constant 0 : index
    %c0_38 = arith.constant 0 : index
    %19 = vector.load %arg3[%c0_37, %c0_38] : memref<1x32xf32, #tpu.memory_space<vmem>>, vector<1x32xf32>
    %20 = vector.broadcast %19 : vector<1x32xf32> to vector<256x32xf32>
    %21 = arith.addf %18, %20 : vector<256x32xf32>
    %cst_39 = arith.constant 0.000000e+00 : f32
    %22 = vector.broadcast %cst_39 : f32 to vector<256x32xf32>
    %23 = arith.maximumf %21, %22 : vector<256x32xf32>
    %24 = vector.shape_cast %23 : vector<256x32xf32> to vector<16x16x32xf32>
    %cst_40 = arith.constant 0.000000e+00 : f32
    %25 = vector.broadcast %cst_40 : f32 to vector<18x18x32xf32>
    %c0_41 = arith.constant 0 : index
    %c0_42 = arith.constant 0 : index
    %c0_43 = arith.constant 0 : index
    %26 = vector.load %arg15[%c0_41, %c0_42, %c0_43] : memref<18x18x32xf32, #tpu.memory_space<vmem>>, vector<18x18x32xf32>
    tpu.vector_store %arg15[%c0_41, %c0_42, %c0_43], %25 {strides = array<i32>} : memref<18x18x32xf32, #tpu.memory_space<vmem>>, vector<18x18x32xf32>,
    %c1_44 = arith.constant 1 : index
    %c1_45 = arith.constant 1 : index
    %c0_46 = arith.constant 0 : index
    %27 = vector.load %arg15[%c1_44, %c1_45, %c0_46] : memref<18x18x32xf32, #tpu.memory_space<vmem>>, vector<16x16x32xf32>
    tpu.vector_store %arg15[%c1_44, %c1_45, %c0_46], %24 {strides = array<i32>} : memref<18x18x32xf32, #tpu.memory_space<vmem>>, vector<16x16x32xf32>,
    %c0_47 = arith.constant 0 : index
    %c0_48 = arith.constant 0 : index
    %c0_49 = arith.constant 0 : index
    %28 = vector.load %arg15[%c0_47, %c0_48, %c0_49] : memref<18x18x32xf32, #tpu.memory_space<vmem>>, vector<16x16x32xf32>
    %c0_50 = arith.constant 0 : index
    %c1_51 = arith.constant 1 : index
    %c0_52 = arith.constant 0 : index
    %29 = vector.load %arg15[%c0_50, %c1_51, %c0_52] : memref<18x18x32xf32, #tpu.memory_space<vmem>>, vector<16x16x32xf32>
    %c0_53 = arith.constant 0 : index
    %c2_54 = arith.constant 2 : index
    %c0_55 = arith.constant 0 : index
    %30 = vector.load %arg15[%c0_53, %c2_54, %c0_55] : memref<18x18x32xf32, #tpu.memory_space<vmem>>, vector<16x16x32xf32>
    %c1_56 = arith.constant 1 : index
    %c0_57 = arith.constant 0 : index
    %c0_58 = arith.constant 0 : index
    %31 = vector.load %arg15[%c1_56, %c0_57, %c0_58] : memref<18x18x32xf32, #tpu.memory_space<vmem>>, vector<16x16x32xf32>
    %c1_59 = arith.constant 1 : index
    %c1_60 = arith.constant 1 : index
    %c0_61 = arith.constant 0 : index
    %32 = vector.load %arg15[%c1_59, %c1_60, %c0_61] : memref<18x18x32xf32, #tpu.memory_space<vmem>>, vector<16x16x32xf32>
    %c1_62 = arith.constant 1 : index
    %c2_63 = arith.constant 2 : index
    %c0_64 = arith.constant 0 : index
    %33 = vector.load %arg15[%c1_62, %c2_63, %c0_64] : memref<18x18x32xf32, #tpu.memory_space<vmem>>, vector<16x16x32xf32>
    %c2_65 = arith.constant 2 : index
    %c0_66 = arith.constant 0 : index
    %c0_67 = arith.constant 0 : index
    %34 = vector.load %arg15[%c2_65, %c0_66, %c0_67] : memref<18x18x32xf32, #tpu.memory_space<vmem>>, vector<16x16x32xf32>
    %c2_68 = arith.constant 2 : index
    %c1_69 = arith.constant 1 : index
    %c0_70 = arith.constant 0 : index
    %35 = vector.load %arg15[%c2_68, %c1_69, %c0_70] : memref<18x18x32xf32, #tpu.memory_space<vmem>>, vector<16x16x32xf32>
    %c2_71 = arith.constant 2 : index
    %c2_72 = arith.constant 2 : index
    %c0_73 = arith.constant 0 : index
    %36 = vector.load %arg15[%c2_71, %c2_72, %c0_73] : memref<18x18x32xf32, #tpu.memory_space<vmem>>, vector<16x16x32xf32>
    %37 = tpu.concatenate %28, %29, %30, %31, %32, %33, %34, %35, %36 in 2 : vector<16x16x32xf32>, vector<16x16x32xf32>, vector<16x16x32xf32>, vector<16x16x32xf32>, vector<16x16x32xf32>, vector<16x16x32xf32>, vector<16x16x32xf32>, vector<16x16x32xf32>, vector<16x16x32xf32> -> vector<16x16x288xf32>
    %38 = vector.shape_cast %37 : vector<16x16x288xf32> to vector<256x288xf32>
    %39 = arith.truncf %38 : vector<256x288xf32> to vector<256x288xbf16>
    %c0_74 = arith.constant 0 : index
    %c0_75 = arith.constant 0 : index
    %40 = vector.load %arg4[%c0_74, %c0_75] : memref<288x32xbf16, #tpu.memory_space<vmem>>, vector<288x32xbf16>
    %cst_76 = arith.constant dense<0.000000e+00> : vector<256x32xf32>
    %41 = tpu.matmul %39, %40, %cst_76 {dimension_numbers = #tpu.dot_dimension_numbers<[1], [0], [0], [1], [0, 0, 1, 1], [], []>} : vector<256x288xbf16>, vector<288x32xbf16>, vector<256x32xf32> -> vector<256x32xf32>
    %c0_77 = arith.constant 0 : index
    %c0_78 = arith.constant 0 : index
    %42 = vector.load %arg5[%c0_77, %c0_78] : memref<1x32xf32, #tpu.memory_space<vmem>>, vector<1x32xf32>
    %43 = vector.broadcast %42 : vector<1x32xf32> to vector<256x32xf32>
    %44 = arith.addf %41, %43 : vector<256x32xf32>
    %cst_79 = arith.constant 0.000000e+00 : f32
    %45 = vector.broadcast %cst_79 : f32 to vector<256x32xf32>
    %46 = arith.maximumf %44, %45 : vector<256x32xf32>
    %47 = vector.shape_cast %46 : vector<256x32xf32> to vector<16x16x32xf32>
    %48 = vector.shape_cast %47 : vector<16x16x32xf32> to vector<16x8x2x32xf32>
    %cst_80 = arith.constant dense<0xFF800000> : vector<16x8x32xf32>
    %49 = vector.multi_reduction <maximumf>, %48, %cst_80 [2] : vector<16x8x2x32xf32> to vector<16x8x32xf32>
    %50 = vector.shape_cast %49 : vector<16x8x32xf32> to vector<8x2x8x32xf32>
    %cst_81 = arith.constant dense<0xFF800000> : vector<8x8x32xf32>
    %51 = vector.multi_reduction <maximumf>, %50, %cst_81 [1] : vector<8x2x8x32xf32> to vector<8x8x32xf32>
    %cst_82 = arith.constant 0.000000e+00 : f32
    %52 = vector.broadcast %cst_82 : f32 to vector<10x10x32xf32>
    %c0_83 = arith.constant 0 : index
    %c0_84 = arith.constant 0 : index
    %c0_85 = arith.constant 0 : index
    %53 = vector.load %arg16[%c0_83, %c0_84, %c0_85] : memref<10x10x32xf32, #tpu.memory_space<vmem>>, vector<10x10x32xf32>
    tpu.vector_store %arg16[%c0_83, %c0_84, %c0_85], %52 {strides = array<i32>} : memref<10x10x32xf32, #tpu.memory_space<vmem>>, vector<10x10x32xf32>,
    %c1_86 = arith.constant 1 : index
    %c1_87 = arith.constant 1 : index
    %c0_88 = arith.constant 0 : index
    %54 = vector.load %arg16[%c1_86, %c1_87, %c0_88] : memref<10x10x32xf32, #tpu.memory_space<vmem>>, vector<8x8x32xf32>
    tpu.vector_store %arg16[%c1_86, %c1_87, %c0_88], %51 {strides = array<i32>} : memref<10x10x32xf32, #tpu.memory_space<vmem>>, vector<8x8x32xf32>,
    %c0_89 = arith.constant 0 : index
    %c0_90 = arith.constant 0 : index
    %c0_91 = arith.constant 0 : index
    %55 = vector.load %arg16[%c0_89, %c0_90, %c0_91] : memref<10x10x32xf32, #tpu.memory_space<vmem>>, vector<8x8x32xf32>
    %c0_92 = arith.constant 0 : index
    %c1_93 = arith.constant 1 : index
    %c0_94 = arith.constant 0 : index
    %56 = vector.load %arg16[%c0_92, %c1_93, %c0_94] : memref<10x10x32xf32, #tpu.memory_space<vmem>>, vector<8x8x32xf32>
    %c0_95 = arith.constant 0 : index
    %c2_96 = arith.constant 2 : index
    %c0_97 = arith.constant 0 : index
    %57 = vector.load %arg16[%c0_95, %c2_96, %c0_97] : memref<10x10x32xf32, #tpu.memory_space<vmem>>, vector<8x8x32xf32>
    %c1_98 = arith.constant 1 : index
    %c0_99 = arith.constant 0 : index
    %c0_100 = arith.constant 0 : index
    %58 = vector.load %arg16[%c1_98, %c0_99, %c0_100] : memref<10x10x32xf32, #tpu.memory_space<vmem>>, vector<8x8x32xf32>
    %c1_101 = arith.constant 1 : index
    %c1_102 = arith.constant 1 : index
    %c0_103 = arith.constant 0 : index
    %59 = vector.load %arg16[%c1_101, %c1_102, %c0_103] : memref<10x10x32xf32, #tpu.memory_space<vmem>>, vector<8x8x32xf32>
    %c1_104 = arith.constant 1 : index
    %c2_105 = arith.constant 2 : index
    %c0_106 = arith.constant 0 : index
    %60 = vector.load %arg16[%c1_104, %c2_105, %c0_106] : memref<10x10x32xf32, #tpu.memory_space<vmem>>, vector<8x8x32xf32>
    %c2_107 = arith.constant 2 : index
    %c0_108 = arith.constant 0 : index
    %c0_109 = arith.constant 0 : index
    %61 = vector.load %arg16[%c2_107, %c0_108, %c0_109] : memref<10x10x32xf32, #tpu.memory_space<vmem>>, vector<8x8x32xf32>
    %c2_110 = arith.constant 2 : index
    %c1_111 = arith.constant 1 : index
    %c0_112 = arith.constant 0 : index
    %62 = vector.load %arg16[%c2_110, %c1_111, %c0_112] : memref<10x10x32xf32, #tpu.memory_space<vmem>>, vector<8x8x32xf32>
    %c2_113 = arith.constant 2 : index
    %c2_114 = arith.constant 2 : index
    %c0_115 = arith.constant 0 : index
    %63 = vector.load %arg16[%c2_113, %c2_114, %c0_115] : memref<10x10x32xf32, #tpu.memory_space<vmem>>, vector<8x8x32xf32>
    %64 = tpu.concatenate %55, %56, %57, %58, %59, %60, %61, %62, %63 in 2 : vector<8x8x32xf32>, vector<8x8x32xf32>, vector<8x8x32xf32>, vector<8x8x32xf32>, vector<8x8x32xf32>, vector<8x8x32xf32>, vector<8x8x32xf32>, vector<8x8x32xf32>, vector<8x8x32xf32> -> vector<8x8x288xf32>
    %65 = vector.shape_cast %64 : vector<8x8x288xf32> to vector<64x288xf32>
    %66 = arith.truncf %65 : vector<64x288xf32> to vector<64x288xbf16>
    %c0_116 = arith.constant 0 : index
    %c0_117 = arith.constant 0 : index
    %67 = vector.load %arg6[%c0_116, %c0_117] : memref<288x64xbf16, #tpu.memory_space<vmem>>, vector<288x64xbf16>
    %cst_118 = arith.constant dense<0.000000e+00> : vector<64x64xf32>
    %68 = tpu.matmul %66, %67, %cst_118 {dimension_numbers = #tpu.dot_dimension_numbers<[1], [0], [0], [1], [0, 0, 1, 1], [], []>} : vector<64x288xbf16>, vector<288x64xbf16>, vector<64x64xf32> -> vector<64x64xf32>
    %c0_119 = arith.constant 0 : index
    %c0_120 = arith.constant 0 : index
    %69 = vector.load %arg7[%c0_119, %c0_120] : memref<1x64xf32, #tpu.memory_space<vmem>>, vector<1x64xf32>
    %70 = vector.broadcast %69 : vector<1x64xf32> to vector<64x64xf32>
    %71 = arith.addf %68, %70 : vector<64x64xf32>
    %cst_121 = arith.constant 0.000000e+00 : f32
    %72 = vector.broadcast %cst_121 : f32 to vector<64x64xf32>
    %73 = arith.maximumf %71, %72 : vector<64x64xf32>
    %74 = vector.shape_cast %73 : vector<64x64xf32> to vector<8x8x64xf32>
    %cst_122 = arith.constant 0.000000e+00 : f32
    %75 = vector.broadcast %cst_122 : f32 to vector<10x10x64xf32>
    %c0_123 = arith.constant 0 : index
    %c0_124 = arith.constant 0 : index
    %c0_125 = arith.constant 0 : index
    %76 = vector.load %arg17[%c0_123, %c0_124, %c0_125] : memref<10x10x64xf32, #tpu.memory_space<vmem>>, vector<10x10x64xf32>
    tpu.vector_store %arg17[%c0_123, %c0_124, %c0_125], %75 {strides = array<i32>} : memref<10x10x64xf32, #tpu.memory_space<vmem>>, vector<10x10x64xf32>,
    %c1_126 = arith.constant 1 : index
    %c1_127 = arith.constant 1 : index
    %c0_128 = arith.constant 0 : index
    %77 = vector.load %arg17[%c1_126, %c1_127, %c0_128] : memref<10x10x64xf32, #tpu.memory_space<vmem>>, vector<8x8x64xf32>
    tpu.vector_store %arg17[%c1_126, %c1_127, %c0_128], %74 {strides = array<i32>} : memref<10x10x64xf32, #tpu.memory_space<vmem>>, vector<8x8x64xf32>,
    %c0_129 = arith.constant 0 : index
    %c0_130 = arith.constant 0 : index
    %c0_131 = arith.constant 0 : index
    %78 = vector.load %arg17[%c0_129, %c0_130, %c0_131] : memref<10x10x64xf32, #tpu.memory_space<vmem>>, vector<8x8x64xf32>
    %c0_132 = arith.constant 0 : index
    %c1_133 = arith.constant 1 : index
    %c0_134 = arith.constant 0 : index
    %79 = vector.load %arg17[%c0_132, %c1_133, %c0_134] : memref<10x10x64xf32, #tpu.memory_space<vmem>>, vector<8x8x64xf32>
    %c0_135 = arith.constant 0 : index
    %c2_136 = arith.constant 2 : index
    %c0_137 = arith.constant 0 : index
    %80 = vector.load %arg17[%c0_135, %c2_136, %c0_137] : memref<10x10x64xf32, #tpu.memory_space<vmem>>, vector<8x8x64xf32>
    %c1_138 = arith.constant 1 : index
    %c0_139 = arith.constant 0 : index
    %c0_140 = arith.constant 0 : index
    %81 = vector.load %arg17[%c1_138, %c0_139, %c0_140] : memref<10x10x64xf32, #tpu.memory_space<vmem>>, vector<8x8x64xf32>
    %c1_141 = arith.constant 1 : index
    %c1_142 = arith.constant 1 : index
    %c0_143 = arith.constant 0 : index
    %82 = vector.load %arg17[%c1_141, %c1_142, %c0_143] : memref<10x10x64xf32, #tpu.memory_space<vmem>>, vector<8x8x64xf32>
    %c1_144 = arith.constant 1 : index
    %c2_145 = arith.constant 2 : index
    %c0_146 = arith.constant 0 : index
    %83 = vector.load %arg17[%c1_144, %c2_145, %c0_146] : memref<10x10x64xf32, #tpu.memory_space<vmem>>, vector<8x8x64xf32>
    %c2_147 = arith.constant 2 : index
    %c0_148 = arith.constant 0 : index
    %c0_149 = arith.constant 0 : index
    %84 = vector.load %arg17[%c2_147, %c0_148, %c0_149] : memref<10x10x64xf32, #tpu.memory_space<vmem>>, vector<8x8x64xf32>
    %c2_150 = arith.constant 2 : index
    %c1_151 = arith.constant 1 : index
    %c0_152 = arith.constant 0 : index
    %85 = vector.load %arg17[%c2_150, %c1_151, %c0_152] : memref<10x10x64xf32, #tpu.memory_space<vmem>>, vector<8x8x64xf32>
    %c2_153 = arith.constant 2 : index
    %c2_154 = arith.constant 2 : index
    %c0_155 = arith.constant 0 : index
    %86 = vector.load %arg17[%c2_153, %c2_154, %c0_155] : memref<10x10x64xf32, #tpu.memory_space<vmem>>, vector<8x8x64xf32>
    %87 = tpu.concatenate %78, %79, %80, %81, %82, %83, %84, %85, %86 in 2 : vector<8x8x64xf32>, vector<8x8x64xf32>, vector<8x8x64xf32>, vector<8x8x64xf32>, vector<8x8x64xf32>, vector<8x8x64xf32>, vector<8x8x64xf32>, vector<8x8x64xf32>, vector<8x8x64xf32> -> vector<8x8x576xf32>
    %88 = vector.shape_cast %87 : vector<8x8x576xf32> to vector<64x576xf32>
    %89 = arith.truncf %88 : vector<64x576xf32> to vector<64x576xbf16>
    %c0_156 = arith.constant 0 : index
    %c0_157 = arith.constant 0 : index
    %90 = vector.load %arg8[%c0_156, %c0_157] : memref<576x64xbf16, #tpu.memory_space<vmem>>, vector<576x64xbf16>
    %cst_158 = arith.constant dense<0.000000e+00> : vector<64x64xf32>
    %91 = tpu.matmul %89, %90, %cst_158 {dimension_numbers = #tpu.dot_dimension_numbers<[1], [0], [0], [1], [0, 0, 1, 1], [], []>} : vector<64x576xbf16>, vector<576x64xbf16>, vector<64x64xf32> -> vector<64x64xf32>
    %c0_159 = arith.constant 0 : index
    %c0_160 = arith.constant 0 : index
    %92 = vector.load %arg9[%c0_159, %c0_160] : memref<1x64xf32, #tpu.memory_space<vmem>>, vector<1x64xf32>
    %93 = vector.broadcast %92 : vector<1x64xf32> to vector<64x64xf32>
    %94 = arith.addf %91, %93 : vector<64x64xf32>
    %cst_161 = arith.constant 0.000000e+00 : f32
    %95 = vector.broadcast %cst_161 : f32 to vector<64x64xf32>
    %96 = arith.maximumf %94, %95 : vector<64x64xf32>
    %97 = vector.shape_cast %96 : vector<64x64xf32> to vector<8x8x64xf32>
    %98 = vector.shape_cast %97 : vector<8x8x64xf32> to vector<8x4x2x64xf32>
    %cst_162 = arith.constant dense<0xFF800000> : vector<8x4x64xf32>
    %99 = vector.multi_reduction <maximumf>, %98, %cst_162 [2] : vector<8x4x2x64xf32> to vector<8x4x64xf32>
    %100 = vector.shape_cast %99 : vector<8x4x64xf32> to vector<4x2x4x64xf32>
    %cst_163 = arith.constant dense<0xFF800000> : vector<4x4x64xf32>
    %101 = vector.multi_reduction <maximumf>, %100, %cst_163 [1] : vector<4x2x4x64xf32> to vector<4x4x64xf32>
    %cst_164 = arith.constant 0.000000e+00 : f32
    %102 = vector.broadcast %cst_164 : f32 to vector<6x6x64xf32>
    %c0_165 = arith.constant 0 : index
    %c0_166 = arith.constant 0 : index
    %c0_167 = arith.constant 0 : index
    %103 = vector.load %arg18[%c0_165, %c0_166, %c0_167] : memref<6x6x64xf32, #tpu.memory_space<vmem>>, vector<6x6x64xf32>
    tpu.vector_store %arg18[%c0_165, %c0_166, %c0_167], %102 {strides = array<i32>} : memref<6x6x64xf32, #tpu.memory_space<vmem>>, vector<6x6x64xf32>,
    %c1_168 = arith.constant 1 : index
    %c1_169 = arith.constant 1 : index
    %c0_170 = arith.constant 0 : index
    %104 = vector.load %arg18[%c1_168, %c1_169, %c0_170] : memref<6x6x64xf32, #tpu.memory_space<vmem>>, vector<4x4x64xf32>
    tpu.vector_store %arg18[%c1_168, %c1_169, %c0_170], %101 {strides = array<i32>} : memref<6x6x64xf32, #tpu.memory_space<vmem>>, vector<4x4x64xf32>,
    %c0_171 = arith.constant 0 : index
    %c0_172 = arith.constant 0 : index
    %c0_173 = arith.constant 0 : index
    %105 = vector.load %arg18[%c0_171, %c0_172, %c0_173] : memref<6x6x64xf32, #tpu.memory_space<vmem>>, vector<4x4x64xf32>
    %c0_174 = arith.constant 0 : index
    %c1_175 = arith.constant 1 : index
    %c0_176 = arith.constant 0 : index
    %106 = vector.load %arg18[%c0_174, %c1_175, %c0_176] : memref<6x6x64xf32, #tpu.memory_space<vmem>>, vector<4x4x64xf32>
    %c0_177 = arith.constant 0 : index
    %c2_178 = arith.constant 2 : index
    %c0_179 = arith.constant 0 : index
    %107 = vector.load %arg18[%c0_177, %c2_178, %c0_179] : memref<6x6x64xf32, #tpu.memory_space<vmem>>, vector<4x4x64xf32>
    %c1_180 = arith.constant 1 : index
    %c0_181 = arith.constant 0 : index
    %c0_182 = arith.constant 0 : index
    %108 = vector.load %arg18[%c1_180, %c0_181, %c0_182] : memref<6x6x64xf32, #tpu.memory_space<vmem>>, vector<4x4x64xf32>
    %c1_183 = arith.constant 1 : index
    %c1_184 = arith.constant 1 : index
    %c0_185 = arith.constant 0 : index
    %109 = vector.load %arg18[%c1_183, %c1_184, %c0_185] : memref<6x6x64xf32, #tpu.memory_space<vmem>>, vector<4x4x64xf32>
    %c1_186 = arith.constant 1 : index
    %c2_187 = arith.constant 2 : index
    %c0_188 = arith.constant 0 : index
    %110 = vector.load %arg18[%c1_186, %c2_187, %c0_188] : memref<6x6x64xf32, #tpu.memory_space<vmem>>, vector<4x4x64xf32>
    %c2_189 = arith.constant 2 : index
    %c0_190 = arith.constant 0 : index
    %c0_191 = arith.constant 0 : index
    %111 = vector.load %arg18[%c2_189, %c0_190, %c0_191] : memref<6x6x64xf32, #tpu.memory_space<vmem>>, vector<4x4x64xf32>
    %c2_192 = arith.constant 2 : index
    %c1_193 = arith.constant 1 : index
    %c0_194 = arith.constant 0 : index
    %112 = vector.load %arg18[%c2_192, %c1_193, %c0_194] : memref<6x6x64xf32, #tpu.memory_space<vmem>>, vector<4x4x64xf32>
    %c2_195 = arith.constant 2 : index
    %c2_196 = arith.constant 2 : index
    %c0_197 = arith.constant 0 : index
    %113 = vector.load %arg18[%c2_195, %c2_196, %c0_197] : memref<6x6x64xf32, #tpu.memory_space<vmem>>, vector<4x4x64xf32>
    %114 = tpu.concatenate %105, %106, %107, %108, %109, %110, %111, %112, %113 in 2 : vector<4x4x64xf32>, vector<4x4x64xf32>, vector<4x4x64xf32>, vector<4x4x64xf32>, vector<4x4x64xf32>, vector<4x4x64xf32>, vector<4x4x64xf32>, vector<4x4x64xf32>, vector<4x4x64xf32> -> vector<4x4x576xf32>
    %115 = vector.shape_cast %114 : vector<4x4x576xf32> to vector<16x576xf32>
    %116 = arith.truncf %115 : vector<16x576xf32> to vector<16x576xbf16>
    %c0_198 = arith.constant 0 : index
    %c0_199 = arith.constant 0 : index
    %117 = vector.load %arg10[%c0_198, %c0_199] : memref<576x8xbf16, #tpu.memory_space<vmem>>, vector<576x8xbf16>
    %cst_200 = arith.constant dense<0.000000e+00> : vector<16x8xf32>
    %118 = tpu.matmul %116, %117, %cst_200 {dimension_numbers = #tpu.dot_dimension_numbers<[1], [0], [0], [1], [0, 0, 1, 1], [], []>} : vector<16x576xbf16>, vector<576x8xbf16>, vector<16x8xf32> -> vector<16x8xf32>
    %c0_201 = arith.constant 0 : index
    %c0_202 = arith.constant 0 : index
    %119 = vector.load %arg11[%c0_201, %c0_202] : memref<1x8xf32, #tpu.memory_space<vmem>>, vector<1x8xf32>
    %120 = vector.broadcast %119 : vector<1x8xf32> to vector<16x8xf32>
    %121 = arith.addf %118, %120 : vector<16x8xf32>
    %122 = vector.shape_cast %121 : vector<16x8xf32> to vector<4x4x8xf32>
    %123 = vector.extract_strided_slice %122 {offsets = [0, 0, 0], sizes = [4, 4, 4], strides = [1, 1, 1]} : vector<4x4x8xf32> to vector<4x4x4xf32>
    %c0_203 = arith.constant 0 : index
    %c0_204 = arith.constant 0 : index
    %c0_205 = arith.constant 0 : index
    %c0_206 = arith.constant 0 : index
    %124 = vector.load %arg12[%c0_203, %c0_204, %c0_205, %c0_206] : memref<1x4x4x4xf32, #tpu.memory_space<vmem>>, vector<1x4x4x4xf32>
    %125 = vector.shape_cast %124 : vector<1x4x4x4xf32> to vector<4x4x4xf32>
    %126 = vector.shape_cast %123 : vector<4x4x4xf32> to vector<1x4x4x4xf32>
    tpu.vector_store %arg12[%c0_203, %c0_204, %c0_205, %c0_206], %126 {strides = array<i32>} : memref<1x4x4x4xf32, #tpu.memory_space<vmem>>, vector<1x4x4x4xf32>,
    %127 = vector.extract_strided_slice %122 {offsets = [0, 0, 4], sizes = [4, 4, 4], strides = [1, 1, 1]} : vector<4x4x8xf32> to vector<4x4x4xf32>
    %c0_207 = arith.constant 0 : index
    %c0_208 = arith.constant 0 : index
    %c0_209 = arith.constant 0 : index
    %c0_210 = arith.constant 0 : index
    %128 = vector.load %arg13[%c0_207, %c0_208, %c0_209, %c0_210] : memref<1x4x4x4xf32, #tpu.memory_space<vmem>>, vector<1x4x4x4xf32>
    %129 = vector.shape_cast %128 : vector<1x4x4x4xf32> to vector<4x4x4xf32>
    %130 = vector.shape_cast %127 : vector<4x4x4xf32> to vector<1x4x4x4xf32>
    tpu.vector_store %arg13[%c0_207, %c0_208, %c0_209, %c0_210], %130 {strides = array<i32>} : memref<1x4x4x4xf32, #tpu.memory_space<vmem>>, vector<1x4x4x4xf32>,
    return
  }
  func.func @transform_0(%arg0: i32) -> (i32, i32, i32, i32) {
    %c0_i32 = arith.constant 0 : i32
    %c0_i32_0 = arith.constant 0 : i32
    %c0_i32_1 = arith.constant 0 : i32
    %c0_i32_2 = arith.constant 0 : i32
    return %arg0, %c0_i32, %c0_i32_0, %c0_i32_1 : i32, i32, i32, i32
  }
  func.func @transform_1(%arg0: i32) -> (i32, i32) {
    %c0_i32 = arith.constant 0 : i32
    %c0_i32_0 = arith.constant 0 : i32
    %c0_i32_1 = arith.constant 0 : i32
    return %c0_i32, %c0_i32_0 : i32, i32
  }
  func.func @transform_2(%arg0: i32) -> (i32, i32) {
    %c0_i32 = arith.constant 0 : i32
    %c0_i32_0 = arith.constant 0 : i32
    %c0_i32_1 = arith.constant 0 : i32
    return %c0_i32, %c0_i32_0 : i32, i32
  }
  func.func @transform_3(%arg0: i32) -> (i32, i32) {
    %c0_i32 = arith.constant 0 : i32
    %c0_i32_0 = arith.constant 0 : i32
    %c0_i32_1 = arith.constant 0 : i32
    return %c0_i32, %c0_i32_0 : i32, i32
  }
  func.func @transform_4(%arg0: i32) -> (i32, i32) {
    %c0_i32 = arith.constant 0 : i32
    %c0_i32_0 = arith.constant 0 : i32
    %c0_i32_1 = arith.constant 0 : i32
    return %c0_i32, %c0_i32_0 : i32, i32
  }
  func.func @transform_5(%arg0: i32) -> (i32, i32) {
    %c0_i32 = arith.constant 0 : i32
    %c0_i32_0 = arith.constant 0 : i32
    %c0_i32_1 = arith.constant 0 : i32
    return %c0_i32, %c0_i32_0 : i32, i32
  }
  func.func @transform_6(%arg0: i32) -> (i32, i32) {
    %c0_i32 = arith.constant 0 : i32
    %c0_i32_0 = arith.constant 0 : i32
    %c0_i32_1 = arith.constant 0 : i32
    return %c0_i32, %c0_i32_0 : i32, i32
  }
  func.func @transform_7(%arg0: i32) -> (i32, i32) {
    %c0_i32 = arith.constant 0 : i32
    %c0_i32_0 = arith.constant 0 : i32
    %c0_i32_1 = arith.constant 0 : i32
    return %c0_i32, %c0_i32_0 : i32, i32
  }
  func.func @transform_8(%arg0: i32) -> (i32, i32) {
    %c0_i32 = arith.constant 0 : i32
    %c0_i32_0 = arith.constant 0 : i32
    %c0_i32_1 = arith.constant 0 : i32
    return %c0_i32, %c0_i32_0 : i32, i32
  }
  func.func @transform_9(%arg0: i32) -> (i32, i32) {
    %c0_i32 = arith.constant 0 : i32
    %c0_i32_0 = arith.constant 0 : i32
    %c0_i32_1 = arith.constant 0 : i32
    return %c0_i32, %c0_i32_0 : i32, i32
  }
  func.func @transform_10(%arg0: i32) -> (i32, i32) {
    %c0_i32 = arith.constant 0 : i32
    %c0_i32_0 = arith.constant 0 : i32
    %c0_i32_1 = arith.constant 0 : i32
    return %c0_i32, %c0_i32_0 : i32, i32
  }
  func.func @transform_11(%arg0: i32) -> (i32, i32, i32, i32) {
    %c0_i32 = arith.constant 0 : i32
    %c0_i32_0 = arith.constant 0 : i32
    %c0_i32_1 = arith.constant 0 : i32
    %c0_i32_2 = arith.constant 0 : i32
    return %arg0, %c0_i32, %c0_i32_0, %c0_i32_1 : i32, i32, i32, i32
  }
  func.func @transform_12(%arg0: i32) -> (i32, i32, i32, i32) {
    %c0_i32 = arith.constant 0 : i32
    %c0_i32_0 = arith.constant 0 : i32
    %c0_i32_1 = arith.constant 0 : i32
    %c0_i32_2 = arith.constant 0 : i32
    return %arg0, %c0_i32, %c0_i32_0, %c0_i32_1 : i32, i32, i32, i32
  }
}

</mosaic_0001>

<bundles_post_ra>
// kernel: encoder_forward.1
= control target key start
LH: loop header
LB: loop body
LE: loop exit
PB: predicated region body
PF: predicated region fallthrough
CT: control target
= control target key end

     0   :  { %s11106_s21 = smov 0   ;;  %s14789_s0 = inlined_call_operand.vmem [shape: f32[2,16,16,1], index: 0, kind: input, shape index: {}]   ;;  %s14790_s1 = inlined_call_operand.vmem [shape: bf16[9,32], index: 1, kind: input, shape index: {}]   ;;  %s14791_s2 = inlined_call_operand.vmem [shape: f32[1,32], index: 2, kind: input, shape index: {}]   ;;  %s14792_s3 = inlined_call_operand.vmem [shape: bf16[288,32], index: 3, kind: input, shape index: {}]   ;;  %s14793_s4 = inlined_call_operand.vmem [shape: f32[1,32], index: 4, kind: input, shape index: {}]   ;;  %s14794_s5 = inlined_call_operand.vmem [shape: bf16[288,64], index: 5, kind: input, shape index: {}]   ;;  %s14795_s6 = inlined_call_operand.vmem [shape: f32[1,64], index: 6, kind: input, shape index: {}]   ;;  %s14796_s7 = inlined_call_operand.vmem [shape: bf16[576,64], index: 7, kind: input, shape index: {}]   ;;  %s14797_s8 = inlined_call_operand.vmem [shape: f32[1,64], index: 8, kind: input, shape index: {}]   ;;  %s14798_s9 = inlined_call_operand.vmem [shape: bf16[576,8], index: 9, kind: input, shape index: {}]   ;;  %s14799_s10 = inlined_call_operand.vmem [shape: f32[1,8], index: 10, kind: input, shape index: {}]   ;;  %s14800_s11 = inlined_call_operand.vmem [shape: f32[2,4,4,4], index: 11, kind: output, shape index: {0}]   ;;  %s14801_s12 = inlined_call_operand.vmem [shape: f32[2,4,4,4], index: 12, kind: output, shape index: {1}]  }
   0x1 LB: > { %s8919_s22 = sadd.s32 4294967295, %s11023_s21   ;;  %p8923_p0 = scmp.ge.s32.totalorder %s11023_s21, 1  ;;  %s11023_s21 = sphi %s11106_s21, %s23_s21  }
   0x2   : > { %p365_p1 = scmp.lt.s32.totalorder %s11023_s21, 3 }
   0x4   : > { %p366_p2 = pnand %p8923_p0, %p365_p1 }
   0x6   : > { %369 = sbr.rel (%p366_p2) target bundleno = 2461 (0x99d), region = 64 }
   0xd   : > { %vm460_vm0 = vcmask 7168   ;;  %vm463_vm1 = vcmask 1024   ;;  %v14802_v0 = vmov 0.0   ;;  %p412_p3 = scmp.lt.s32.totalorder %s8919_s22, 1  ;;  %s11026_s27 = smov 2   ;;  %vm2204_vm2 = vcmask 1043456  }
   0xe   : > { %461 = vst.msk [vmem:[#allocation2] sm:$0xff] %vm460_vm0, %v14802_v0  ;;  %462 = vst.msk [vmem:[#allocation2 + $0x8] sm:$0xff] %vm460_vm0, %v14802_v0  ;;  %s11027_s28 = smov 1   ;;  %s11028_s29 = smov 3   ;;  %vm2205_vm3 = vcmask 1044480   ;;  %v11030_v45 = vmov 65535  }
   0xf   : > { %464 = vst.msk [vmem:[#allocation2 + $0x10] sm:$0x3] %vm463_vm1, %v14802_v0  ;;  %467 = vst.msk [vmem:[#allocation2 + $0x28] sm:$0x3] %vm463_vm1, %v14802_v0  ;;  %s14816_s22 = smov (!%p412_p3, %s8919_s22), 1  ;;  %s11029_s30 = smov 4  }
  0x10   : > { %465 = vst.msk [vmem:[#allocation2 + $0x18] sm:$0xff] %vm460_vm0, %v14802_v0  ;;  %466 = vst.msk [vmem:[#allocation2 + $0x20] sm:$0xff] %vm460_vm0, %v14802_v0  ;;  %s9095_s23 = sshll.u32 %s14816_s22, 8  ;;  %v2206_v46 = vsel %vm2204_vm2, 4294967295, %v11030_v45  ;;  %s11031_s13 = smov 5   ;;  %vm1894_vm4 = vcmask 15360  }
  0x11   : > { %468 = vst.msk [vmem:[#allocation2 + $0x30] sm:$0xff] %vm460_vm0, %v14802_v0  ;;  %469 = vst.msk [vmem:[#allocation2 + $0x38] sm:$0xff] %vm460_vm0, %v14802_v0  ;;  %s11232_s26 = scalar_lea.vmem %s14789_s0, %s9095_s23  ;;  %v2207_v50 = vsel %vm2205_vm3, %v2206_v46, 0  ;;  %v10882_v55 = vld [vmem:[%s14790_s1] sm:$0x1f]   ;;  %s11032_s16 = smov 6  }
  0x12   : > { %470 = vst.msk [vmem:[#allocation2 + $0x40] sm:$0x3] %vm463_vm1, %v14802_v0  ;;  %473 = vst.msk [vmem:[#allocation2 + $0x58] sm:$0x3] %vm463_vm1, %v14802_v0  ;;  %v428_v1 = vld [vmem:[%s11232_s26] sm:$0xff]  ;;  %v429_v2 = vld [vmem:[%s11232_s26 + $0x8] sm:$0xff]  ;;  %v2209_v59 = vand.u32 %v10882_v55, %v2207_v50 }
  0x13   : > { %471 = vst.msk [vmem:[#allocation2 + $0x48] sm:$0xff] %vm460_vm0, %v14802_v0  ;;  %472 = vst.msk [vmem:[#allocation2 + $0x50] sm:$0xff] %vm460_vm0, %v14802_v0  ;;  %v430_v3 = vld [vmem:[%s11232_s26 + $0x10] sm:$0xff]  ;;  %v431_v9 = vld [vmem:[%s11232_s26 + $0x18] sm:$0xff]  ;;  %s11033_s17 = smov 7   ;;  %s11034_s18 = smov 8  }
  0x14   : > { %474 = vst.msk [vmem:[#allocation2 + $0x60] sm:$0xff] %vm460_vm0, %v14802_v0  ;;  %475 = vst.msk [vmem:[#allocation2 + $0x68] sm:$0xff] %vm460_vm0, %v14802_v0  ;;  %v432_v10 = vld [vmem:[%s11232_s26 + $0x20] sm:$0xff]  ;;  %v433_v12 = vld [vmem:[%s11232_s26 + $0x28] sm:$0xff]  ;;  %9428 = vmatprep.subr.bf16.mxu0 %v2209_v59  ;;  %vm1927_vm5 = vcmask 23552   ;;  %vm1960_vm6 = vcmask 31744  }
  0x15   : > { %476 = vst.msk [vmem:[#allocation2 + $0x70] sm:$0x3] %vm463_vm1, %v14802_v0  ;;  %479 = vst.msk [vmem:[#allocation2 + $0x88] sm:$0x3] %vm463_vm1, %v14802_v0  ;;  %v613_v4 = vld [vmem:[#allocation2 + $0x2] sm:$0xff]  ;;  %v434_v13 = vld [vmem:[%s11232_s26 + $0x30] sm:$0xff]  ;;  %9429 = vmatpush3.bf16.msra.mxu0 %v2209_v59 }
  0x16   : > { %477 = vst.msk [vmem:[#allocation2 + $0x78] sm:$0xff] %vm460_vm0, %v14802_v0  ;;  %478 = vst.msk [vmem:[#allocation2 + $0x80] sm:$0xff] %vm460_vm0, %v14802_v0  ;;  %v614_v5 = vld [vmem:[#allocation2 + $0xa] sm:$0xff]  ;;  %v581_v6 = vld [vmem:[#allocation2 + $0x1] sm:$0xff]  ;;  %vm1993_vm7 = vcmask 39936   ;;  %vm2026_vm8 = vcmask 48128  }
  0x17   : > { %480 = vst.msk [vmem:[#allocation2 + $0x90] sm:$0xff] %vm460_vm0, %v14802_v0  ;;  %481 = vst.msk [vmem:[#allocation2 + $0x98] sm:$0xff] %vm460_vm0, %v14802_v0  ;;  %v9567_v7 = vpack.i.bf16 %v614_v5, %v613_v4  ;;  %v582_v8 = vld [vmem:[#allocation2 + $0x9] sm:$0xff]  ;;  %v435_v14 = vld [vmem:[%s11232_s26 + $0x38] sm:$0xff]  ;;  %vm2059_vm9 = vcmask 56320   ;;  %vm2092_vm10 = vcmask 64512  }
  0x18   : > { %482 = vst.msk [vmem:[#allocation2 + $0xa0] sm:$0x3] %vm463_vm1, %v14802_v0  ;;  %485 = vst.msk [vmem:[#allocation2 + $0xb8] sm:$0x3] %vm463_vm1, %v14802_v0  ;;  %v9562_v11 = vpack.i.bf16 %v582_v8, %v581_v6  ;;  %v436_v15 = vld [vmem:[%s11232_s26 + $0x40] sm:$0xff]  ;;  %v437_v16 = vld [vmem:[%s11232_s26 + $0x48] sm:$0xff] }
  0x19   : > { %483 = vst.msk [vmem:[#allocation2 + $0xa8] sm:$0xff] %vm460_vm0, %v14802_v0  ;;  %484 = vst.msk [vmem:[#allocation2 + $0xb0] sm:$0xff] %vm460_vm0, %v14802_v0  ;;  %9568 = vrot.lane.b32.xlu1 %v9567_v7, %s11026_s27  ;;  %v438_v17 = vld [vmem:[%s11232_s26 + $0x50] sm:$0xff]  ;;  %v439_v18 = vld [vmem:[%s11232_s26 + $0x58] sm:$0xff]  ;;  %vm2155_vm11 = vcmask 72704   ;;  %vm2404_vm12 = vcmask 261120  }
  0x1a   : > { %486 = vst.msk [vmem:[#allocation2 + $0xc0] sm:$0xff] %vm460_vm0, %v14802_v0  ;;  %487 = vst.msk [vmem:[#allocation2 + $0xc8] sm:$0xff] %vm460_vm0, %v14802_v0  ;;  %9563 = vrot.lane.b32.xlu0 %v9562_v11, %s11027_s28  ;;  %v440_v19 = vld [vmem:[%s11232_s26 + $0x60] sm:$0xff]  ;;  %v441_v20 = vld [vmem:[%s11232_s26 + $0x68] sm:$0xff]  ;;  %vm2407_vm13 = vcmask 254976   ;;  %s11035_s19 = smov 32  }
  0x1b   : > { %488 = vst.msk [vmem:[#allocation2 + $0xd0] sm:$0x3] %vm463_vm1, %v14802_v0  ;;  %491 = vst.msk [vmem:[#allocation2 + $0xe8] sm:$0x3] %vm463_vm1, %v14802_v0  ;;  %v442_v21 = vld [vmem:[%s11232_s26 + $0x70] sm:$0xff]  ;;  %v443_v22 = vld [vmem:[%s11232_s26 + $0x78] sm:$0xff] }
  0x1c   : > { %489 = vst.msk [vmem:[#allocation2 + $0xd8] sm:$0xff] %vm460_vm0, %v14802_v0  ;;  %490 = vst.msk [vmem:[#allocation2 + $0xe0] sm:$0xff] %vm460_vm0, %v14802_v0  ;;  %v444_v23 = vld [vmem:[%s11232_s26 + $0x80] sm:$0xff]  ;;  %v445_v24 = vld [vmem:[%s11232_s26 + $0x88] sm:$0xff]  ;;  %s11036_s20 = smov 64   ;;  %vm3582_vm14 = vcmask 523264  }
  0x1d   : > { %492 = vst.msk [vmem:[#allocation2 + $0xf0] sm:$0xff] %vm460_vm0, %v14802_v0  ;;  %493 = vst.msk [vmem:[#allocation2 + $0xf8] sm:$0xff] %vm460_vm0, %v14802_v0  ;;  %v446_v53 = vld [vmem:[%s11232_s26 + $0x90] sm:$0xff]  ;;  %v447_v54 = vld [vmem:[%s11232_s26 + $0x98] sm:$0xff]  ;;  %vm3615_vm15 = vcmask 785408   ;;  %vm6225_vm2 = vcmask 1043459  }
  0x1e   : > { %494 = vst.msk [vmem:[#allocation2 + $0x100] sm:$0x3] %vm463_vm1, %v14802_v0  ;;  %497 = vst.msk [vmem:[#allocation2 + $0x118] sm:$0x3] %vm463_vm1, %v14802_v0  ;;  %v448_v57 = vld [vmem:[%s11232_s26 + $0xa0] sm:$0xff]  ;;  %v449_v58 = vld [vmem:[%s11232_s26 + $0xa8] sm:$0xff] }
  0x1f   : > { %495 = vst.msk [vmem:[#allocation2 + $0x108] sm:$0xff] %vm460_vm0, %v14802_v0  ;;  %496 = vst.msk [vmem:[#allocation2 + $0x110] sm:$0xff] %vm460_vm0, %v14802_v0  ;;  %v450_v63 = vld [vmem:[%s11232_s26 + $0xb0] sm:$0xff]  ;;  %v452_v8 = vld [vmem:[%s11232_s26 + $0xc0] sm:$0xff]  ;;  %vm6227_vm3 = vcmask 1044484   ;;  %s9096_s24 = sshll.u32 %s14816_s22, 4 }
  0x20   : > { %498 = vst.msk [vmem:[#allocation2 + $0x120] sm:$0xff] %vm460_vm0, %v14802_v0  ;;  %499 = vst.msk [vmem:[#allocation2 + $0x128] sm:$0xff] %vm460_vm0, %v14802_v0  ;;  %v453_v11 = vld [vmem:[%s11232_s26 + $0xc8] sm:$0xff]  ;;  %v459_v45 = vld [vmem:[%s11232_s26 + $0xf8] sm:$0xff]  ;;  %s421_s25 = scalar_lea.vmem %s14800_s11, %s9096_s24  ;;  %s11040_s22 = smov 124  }
  0x21   : > { %500 = vst.msk [vmem:[#allocation2 + $0x130] sm:$0x3] %vm463_vm1, %v14802_v0  ;;  %503 = vst.msk [vmem:[#allocation2 + $0x148] sm:$0x3] %vm463_vm1, %v14802_v0 }
  0x22   : > { %501 = vst.msk [vmem:[#allocation2 + $0x138] sm:$0xff] %vm460_vm0, %v14802_v0  ;;  %502 = vst.msk [vmem:[#allocation2 + $0x140] sm:$0xff] %vm460_vm0, %v14802_v0 }
  0x23   : > { %504 = vst.msk [vmem:[#allocation2 + $0x150] sm:$0xff] %vm460_vm0, %v14802_v0  ;;  %505 = vst.msk [vmem:[#allocation2 + $0x158] sm:$0xff] %vm460_vm0, %v14802_v0 }
  0x24   : > { %506 = vst.msk [vmem:[#allocation2 + $0x160] sm:$0x3] %vm463_vm1, %v14802_v0  ;;  %509 = vst.msk [vmem:[#allocation2 + $0x178] sm:$0x3] %vm463_vm1, %v14802_v0 }
  0x25   : > { %507 = vst.msk [vmem:[#allocation2 + $0x168] sm:$0xff] %vm460_vm0, %v14802_v0  ;;  %508 = vst.msk [vmem:[#allocation2 + $0x170] sm:$0xff] %vm460_vm0, %v14802_v0 }
  0x26   : > { %510 = vst.msk [vmem:[#allocation2 + $0x180] sm:$0xff] %vm460_vm0, %v14802_v0  ;;  %511 = vst.msk [vmem:[#allocation2 + $0x188] sm:$0xff] %vm460_vm0, %v14802_v0 }
  0x27   : > { %512 = vst.msk [vmem:[#allocation2 + $0x190] sm:$0x3] %vm463_vm1, %v14802_v0  ;;  %515 = vst.msk [vmem:[#allocation2 + $0x1a8] sm:$0x3] %vm463_vm1, %v14802_v0  ;;  %vm6223_vm1 = vcmask 1042434  }
  0x28   : > { %513 = vst.msk [vmem:[#allocation2 + $0x198] sm:$0xff] %vm460_vm0, %v14802_v0  ;;  %514 = vst.msk [vmem:[#allocation2 + $0x1a0] sm:$0xff] %vm460_vm0, %v14802_v0 }
  0x29   : > { %517 = vst.msk [vmem:[#allocation2 + $0x19] sm:$0xff] %vm460_vm0, %v428_v1  ;;  %518 = vst.msk [vmem:[#allocation2 + $0x21] sm:$0xff] %vm460_vm0, %v429_v2  ;;  %v451_v1 = vld [vmem:[%s11232_s26 + $0xb8] sm:$0xff] }
  0x2a   : > { %519 = vst.msk [vmem:[#allocation2 + $0x31] sm:$0xff] %vm460_vm0, %v430_v3  ;;  %520 = vst.msk [vmem:[#allocation2 + $0x39] sm:$0xff] %vm460_vm0, %v431_v9 }
  0x2b   : > { %521 = vst.msk [vmem:[#allocation2 + $0x49] sm:$0xff] %vm460_vm0, %v432_v10  ;;  %522 = vst.msk [vmem:[#allocation2 + $0x51] sm:$0xff] %vm460_vm0, %v433_v12 }
  0x2c   : > { %523 = vst.msk [vmem:[#allocation2 + $0x61] sm:$0xff] %vm460_vm0, %v434_v13  ;;  %524 = vst.msk [vmem:[#allocation2 + $0x69] sm:$0xff] %vm460_vm0, %v435_v14 }
  0x2d   : > { %525 = vst.msk [vmem:[#allocation2 + $0x79] sm:$0xff] %vm460_vm0, %v436_v15  ;;  %526 = vst.msk [vmem:[#allocation2 + $0x81] sm:$0xff] %vm460_vm0, %v437_v16 }
  0x2e   : > { %527 = vst.msk [vmem:[#allocation2 + $0x91] sm:$0xff] %vm460_vm0, %v438_v17  ;;  %528 = vst.msk [vmem:[#allocation2 + $0x99] sm:$0xff] %vm460_vm0, %v439_v18 }
  0x2f   : > { %529 = vst.msk [vmem:[#allocation2 + $0xa9] sm:$0xff] %vm460_vm0, %v440_v19  ;;  %530 = vst.msk [vmem:[#allocation2 + $0xb1] sm:$0xff] %vm460_vm0, %v441_v20  ;;  %v454_v20 = vld [vmem:[%s11232_s26 + $0xd0] sm:$0xff] }
  0x30   : > { %531 = vst.msk [vmem:[#allocation2 + $0xc1] sm:$0xff] %vm460_vm0, %v442_v21  ;;  %532 = vst.msk [vmem:[#allocation2 + $0xc9] sm:$0xff] %vm460_vm0, %v443_v22  ;;  %v615_v25 = vld [vmem:[#allocation2 + $0x1a] sm:$0xff]  ;;  %v616_v26 = vld [vmem:[#allocation2 + $0x22] sm:$0xff] }
  0x31   : > { %v583_v27 = vld [vmem:[#allocation2 + $0x19] sm:$0xff]  ;;  %533 = vst.msk [vmem:[#allocation2 + $0xd9] sm:$0xff] %vm460_vm0, %v444_v23  ;;  %534 = vst.msk [vmem:[#allocation2 + $0xe1] sm:$0xff] %vm460_vm0, %v445_v24  ;;  %v9577_v28 = vpack.i.bf16 %v616_v26, %v615_v25  ;;  %v584_v29 = vld [vmem:[#allocation2 + $0x21] sm:$0xff] }
  0x32   : > { %v647_v30 = vld [vmem:[#allocation2 + $0x30] sm:$0xff]  ;;  %v11272_v31 = vld [vmem:[#allocation2 + $0x18] sm:$0xff]  ;;  %v9572_v32 = vpack.i.bf16 %v584_v29, %v583_v27  ;;  %v11274_v34 = vld [vmem:[#allocation2 + $0x20] sm:$0xff]  ;;  %535 = vst.msk [vmem:[#allocation2 + $0xf1] sm:$0xff] %vm460_vm0, %v446_v53 }
  0x33   : > { %v648_v33 = vld [vmem:[#allocation2 + $0x38] sm:$0xff]  ;;  %9578 = vrot.lane.b32.xlu1 %v9577_v28, %s11026_s27  ;;  %v9582_v36 = vpack.i.bf16 %v11274_v34, %v11272_v31  ;;  %v744_v43 = vld [vmem:[#allocation2 + $0x48] sm:$0xff]  ;;  %v745_v44 = vld [vmem:[#allocation2 + $0x50] sm:$0xff]  ;;  %536 = vst.msk [vmem:[#allocation2 + $0xf9] sm:$0xff] %vm460_vm0, %v447_v54 }
  0x34   : > { %v9587_v35 = vpack.i.bf16 %v648_v33, %v647_v30  ;;  %9573 = vrot.lane.b32.xlu0 %v9572_v32, %s11027_s28  ;;  %v679_v37 = vld [vmem:[#allocation2 + $0x31] sm:$0xff]  ;;  %v680_v38 = vld [vmem:[#allocation2 + $0x39] sm:$0xff]  ;;  %v9617_v47 = vpack.i.bf16 %v745_v44, %v744_v43  ;;  %v776_v48 = vld [vmem:[#allocation2 + $0x49] sm:$0xff]  ;;  %537 = vst.msk [vmem:[#allocation2 + $0x109] sm:$0xff] %vm460_vm0, %v448_v57 }
  0x35   : > { %v9597_v39 = vpack.i.bf16 %v680_v38, %v679_v37  ;;  %v711_v40 = vld [vmem:[#allocation2 + $0x32] sm:$0xff]  ;;  %v712_v41 = vld [vmem:[#allocation2 + $0x3a] sm:$0xff]  ;;  %v808_v51 = vld [vmem:[#allocation2 + $0x4a] sm:$0xff]  ;;  %538 = vst.msk [vmem:[#allocation2 + $0x111] sm:$0xff] %vm460_vm0, %v449_v58 }
  0x36   : > { %v9607_v42 = vpack.i.bf16 %v712_v41, %v711_v40  ;;  %v777_v49 = vld [vmem:[#allocation2 + $0x51] sm:$0xff]  ;;  %v651_v61 = vld [vmem:[#allocation2 + $0x60] sm:$0xff]  ;;  %v652_v62 = vld [vmem:[#allocation2 + $0x68] sm:$0xff]  ;;  %539 = vst.msk [vmem:[#allocation2 + $0x121] sm:$0xff] %vm460_vm0, %v450_v63 }
  0x37   : > { %9588 = vrot.lane.b32.xlu1 %v9587_v35, %s11028_s29  ;;  %v809_v52 = vld [vmem:[#allocation2 + $0x52] sm:$0xff]  ;;  %v9627_v56 = vpack.i.bf16 %v777_v49, %v776_v48  ;;  %540 = vst.msk [vmem:[#allocation2 + $0x129] sm:$0xff] %vm460_vm0, %v451_v1  ;;  %v683_v2 = vld [vmem:[#allocation2 + $0x61] sm:$0xff]  ;;  %v684_v3 = vld [vmem:[#allocation2 + $0x69] sm:$0xff]  ;;  %v9667_v4 = vpack.i.bf16 %v652_v62, %v651_v61 }
  0x38   : > { %9583 = vrot.lane.b32.xlu0 %v9582_v36, %s11028_s29  ;;  %v9637_v60 = vpack.i.bf16 %v809_v52, %v808_v51  ;;  %v715_v5 = vld [vmem:[#allocation2 + $0x62] sm:$0xff]  ;;  %v716_v6 = vld [vmem:[#allocation2 + $0x6a] sm:$0xff]  ;;  %v9677_v7 = vpack.i.bf16 %v684_v3, %v683_v2  ;;  %v748_v9 = vld [vmem:[#allocation2 + $0x78] sm:$0xff]  ;;  %541 = vst.msk [vmem:[#allocation2 + $0x139] sm:$0xff] %vm460_vm0, %v452_v8 }
  0x39   : > { %v749_v10 = vld [vmem:[#allocation2 + $0x80] sm:$0xff]  ;;  %v9687_v12 = vpack.i.bf16 %v716_v6, %v715_v5  ;;  %542 = vst.msk [vmem:[#allocation2 + $0x141] sm:$0xff] %vm460_vm0, %v453_v11  ;;  %v455_v21 = vld [vmem:[%s11232_s26 + $0xd8] sm:$0xff]  ;;  %v655_v22 = vld [vmem:[#allocation2 + $0x90] sm:$0xff] }
  0x3a   : > { %v780_v13 = vld [vmem:[#allocation2 + $0x79] sm:$0xff]  ;;  %v781_v14 = vld [vmem:[#allocation2 + $0x81] sm:$0xff]  ;;  %v9697_v15 = vpack.i.bf16 %v749_v10, %v748_v9  ;;  %543 = vst.msk [vmem:[#allocation2 + $0x151] sm:$0xff] %vm460_vm0, %v454_v20  ;;  %544 = vst.msk [vmem:[#allocation2 + $0x159] sm:$0xff] %vm460_vm0, %v455_v21 }
  0x3b   : > { %9598 = vrot.lane.b32.xlu1 %v9597_v39, %s11029_s30  ;;  %v812_v16 = vld [vmem:[#allocation2 + $0x7a] sm:$0xff]  ;;  %v813_v17 = vld [vmem:[#allocation2 + $0x82] sm:$0xff]  ;;  %v9707_v18 = vpack.i.bf16 %v781_v14, %v780_v13  ;;  %v687_v24 = vld [vmem:[#allocation2 + $0x91] sm:$0xff]  ;;  %548 = vst.msk [vmem:[#allocation2 + $0x189] sm:$0xff] %vm460_vm0, %v459_v45 }
  0x3c   : > { %9593 = vrot.lane.b32.xlu0 %v9572_v32, %s11029_s30  ;;  %v9717_v19 = vpack.i.bf16 %v813_v17, %v812_v16  ;;  %v656_v23 = vld [vmem:[#allocation2 + $0x98] sm:$0xff]  ;;  %v456_v30 = vld [vmem:[%s11232_s26 + $0xe0] sm:$0xff]  ;;  %v752_v32 = vld [vmem:[#allocation2 + $0xa8] sm:$0xff]  ;;  %2412 = vst.msk [vmem:[#allocation3 + $0x30] sm:$0xff] %vm2404_vm12, %v14802_v0 }
  0x3d   : > { %v688_v25 = vld [vmem:[#allocation2 + $0x99] sm:$0xff]  ;;  %v9747_v26 = vpack.i.bf16 %v656_v23, %v655_v22  ;;  %v753_v33 = vld [vmem:[#allocation2 + $0xb0] sm:$0xff]  ;;  %545 = vst.msk [vmem:[#allocation2 + $0x169] sm:$0xff] %vm460_vm0, %v456_v30  ;;  %v691_v48 = vld [vmem:[#allocation2 + $0xc1] sm:$0xff] }
  0x3e   : > { %v719_v27 = vld [vmem:[#allocation2 + $0x92] sm:$0xff]  ;;  %v9757_v29 = vpack.i.bf16 %v688_v25, %v687_v24  ;;  %v784_v37 = vld [vmem:[#allocation2 + $0xa9] sm:$0xff]  ;;  %v659_v46 = vld [vmem:[#allocation2 + $0xc0] sm:$0xff]  ;;  %2413 = vst.msk [vmem:[#allocation3 + $0x38] sm:$0xff] %vm2404_vm12, %v14802_v0 }
  0x3f   : > { %9608 = vrot.lane.b32.xlu1 %v9607_v42, %s11031_s13  ;;  %v785_v38 = vld [vmem:[#allocation2 + $0xb1] sm:$0xff]  ;;  %v692_v49 = vld [vmem:[#allocation2 + $0xc9] sm:$0xff]  ;;  %v789_v61 = vld [vmem:[#allocation2 + $0xe1] sm:$0xff]  ;;  %2405 = vst.msk [vmem:[#allocation3] sm:$0xff] %vm2404_vm12, %v14802_v0 }
  0x40   : > { %9603 = vrot.lane.b32.xlu0 %v9577_v28, %s11031_s13  ;;  %v720_v28 = vld [vmem:[#allocation2 + $0x9a] sm:$0xff]  ;;  %v9787_v40 = vpack.i.bf16 %v785_v38, %v784_v37  ;;  %v816_v41 = vld [vmem:[#allocation2 + $0xaa] sm:$0xff]  ;;  %v723_v51 = vld [vmem:[#allocation2 + $0xc2] sm:$0xff]  ;;  %v9837_v53 = vpack.i.bf16 %v692_v49, %v691_v48  ;;  %2406 = vst.msk [vmem:[#allocation3 + $0x8] sm:$0xff] %vm2404_vm12, %v14802_v0 }
  0x41   : > { %v9767_v36 = vpack.i.bf16 %v720_v28, %v719_v27  ;;  %v458_v44 = vld [vmem:[%s11232_s26 + $0xf0] sm:$0xff]  ;;  %v756_v55 = vld [vmem:[#allocation2 + $0xd8] sm:$0xff]  ;;  %v821_v1 = vld [vmem:[#allocation2 + $0xe2] sm:$0xff]  ;;  %2409 = vst.msk [vmem:[#allocation3 + $0x18] sm:$0xff] %vm2404_vm12, %v14802_v0 }
  0x42   : > { %547 = vst.msk [vmem:[#allocation2 + $0x181] sm:$0xff] %vm460_vm0, %v458_v44  ;;  %v724_v52 = vld [vmem:[#allocation2 + $0xca] sm:$0xff]  ;;  %v820_v63 = vld [vmem:[#allocation2 + $0xda] sm:$0xff]  ;;  %v727_v23 = vld [vmem:[#allocation2 + $0xf2] sm:$0xff] }
  0x43   : > { %9618 = vrot.lane.b32.xlu1 %v9617_v47, %s11032_s16  ;;  %v11362_v54 = vpack.i.bf16 %v724_v52, %v723_v51  ;;  %v663_v11 = vld [vmem:[#allocation2 + $0xf0] sm:$0xff]  ;;  %v550_v13 = vld [vmem:[#allocation2 + $0x8] sm:$0xff]  ;;  %v549_v14 = vld [vmem:[#allocation2] sm:$0xff]  ;;  %2410 = vst.msk [vmem:[#allocation3 + $0x20] sm:$0xff] %vm2404_vm12, %v14802_v0 }
  0x44   : > { %9613 = vrot.lane.b32.xlu0 %v9587_v35, %s11032_s16  ;;  %v457_v35 = vld [vmem:[%s11232_s26 + $0xe8] sm:$0xff]  ;;  %v695_v21 = vld [vmem:[#allocation2 + $0xf1] sm:$0xff]  ;;  %v696_v22 = vld [vmem:[#allocation2 + $0xf9] sm:$0xff]  ;;  %2415 = vst.msk [vmem:[#allocation3 + $0x48] sm:$0xff] %vm2404_vm12, %v14802_v0 }
  0x45   : > { %546 = vst.msk [vmem:[#allocation2 + $0x171] sm:$0xff] %vm460_vm0, %v457_v35  ;;  %v760_v30 = vld [vmem:[#allocation2 + $0x108] sm:$0xff] }
  0x46   : > { %2416 = vst.msk [vmem:[#allocation3 + $0x50] sm:$0xff] %vm2404_vm12, %v14802_v0  ;;  %2418 = vst.msk [vmem:[#allocation3 + $0x60] sm:$0xff] %vm2404_vm12, %v14802_v0 }
  0x47   : > { %9628 = vrot.lane.b32.xlu1 %v9627_v56, %s11033_s17  ;;  %2419 = vst.msk [vmem:[#allocation3 + $0x68] sm:$0xff] %vm2404_vm12, %v14802_v0  ;;  %2421 = vst.msk [vmem:[#allocation3 + $0x78] sm:$0xff] %vm2404_vm12, %v14802_v0 }
  0x48   : > { %9623 = vrot.lane.b32.xlu0 %v9597_v39, %s11033_s17  ;;  %2422 = vst.msk [vmem:[#allocation3 + $0x80] sm:$0xff] %vm2404_vm12, %v14802_v0  ;;  %2424 = vst.msk [vmem:[#allocation3 + $0x90] sm:$0xff] %vm2404_vm12, %v14802_v0 }
  0x49   : > { %2425 = vst.msk [vmem:[#allocation3 + $0x98] sm:$0xff] %vm2404_vm12, %v14802_v0  ;;  %2427 = vst.msk [vmem:[#allocation3 + $0xa8] sm:$0xff] %vm2404_vm12, %v14802_v0 }
  0x4a   : > { %2428 = vst.msk [vmem:[#allocation3 + $0xb0] sm:$0xff] %vm2404_vm12, %v14802_v0  ;;  %2430 = vst.msk [vmem:[#allocation3 + $0xc0] sm:$0xff] %vm2404_vm12, %v14802_v0 }
  0x4b   : > { %9638 = vrot.lane.b32.xlu1 %v9637_v60, %s11034_s18  ;;  %2431 = vst.msk [vmem:[#allocation3 + $0xc8] sm:$0xff] %vm2404_vm12, %v14802_v0  ;;  %2433 = vst.msk [vmem:[#allocation3 + $0xd8] sm:$0xff] %vm2404_vm12, %v14802_v0 }
  0x4c   : > { %9633 = vrot.lane.b32.xlu0 %v9607_v42, %s11034_s18  ;;  %2434 = vst.msk [vmem:[#allocation3 + $0xe0] sm:$0xff] %vm2404_vm12, %v14802_v0  ;;  %2436 = vst.msk [vmem:[#allocation3 + $0xf0] sm:$0xff] %vm2404_vm12, %v14802_v0 }
  0x4d   : > { %2437 = vst.msk [vmem:[#allocation3 + $0xf8] sm:$0xff] %vm2404_vm12, %v14802_v0  ;;  %2439 = vst.msk [vmem:[#allocation3 + $0x108] sm:$0xff] %vm2404_vm12, %v14802_v0 }
  0x4e   : > { %2440 = vst.msk [vmem:[#allocation3 + $0x110] sm:$0xff] %vm2404_vm12, %v14802_v0  ;;  %2442 = vst.msk [vmem:[#allocation3 + $0x120] sm:$0xff] %vm2404_vm12, %v14802_v0 }
  0x4f   : > { %9648 = vrot.lane.b32.xlu1 %v9627_v56, %s11027_s28  ;;  %2443 = vst.msk [vmem:[#allocation3 + $0x128] sm:$0xff] %vm2404_vm12, %v14802_v0  ;;  %2445 = vst.msk [vmem:[#allocation3 + $0x138] sm:$0xff] %vm2404_vm12, %v14802_v0 }
  0x50   : > { %9643 = vrot.lane.b32.xlu0 %v9597_v39, %s11027_s28  ;;  %v9777_v39 = vpack.i.bf16 %v753_v33, %v752_v32  ;;  %v761_v32 = vld [vmem:[#allocation2 + $0x110] sm:$0xff]  ;;  %2446 = vst.msk [vmem:[#allocation3 + $0x140] sm:$0xff] %vm2404_vm12, %v14802_v0  ;;  %2448 = vst.msk [vmem:[#allocation3 + $0x150] sm:$0xff] %vm2404_vm12, %v14802_v0 }
  0x51   : > { %2449 = vst.msk [vmem:[#allocation3 + $0x158] sm:$0xff] %vm2404_vm12, %v14802_v0  ;;  %2451 = vst.msk [vmem:[#allocation3 + $0x168] sm:$0xff] %vm2404_vm12, %v14802_v0 }
  0x52   : > { %2452 = vst.msk [vmem:[#allocation3 + $0x170] sm:$0xff] %vm2404_vm12, %v14802_v0  ;;  %2454 = vst.msk [vmem:[#allocation3 + $0x180] sm:$0xff] %vm2404_vm12, %v14802_v0 }
  0x53   : > { %9658 = vrot.lane.b32.xlu1 %v9637_v60, %s11026_s27  ;;  %2455 = vst.msk [vmem:[#allocation3 + $0x188] sm:$0xff] %vm2404_vm12, %v14802_v0  ;;  %2457 = vst.msk [vmem:[#allocation3 + $0x198] sm:$0xff] %vm2404_vm12, %v14802_v0 }
  0x54   : > { %9653 = vrot.lane.b32.xlu0 %v9607_v42, %s11026_s27  ;;  %v817_v42 = vld [vmem:[#allocation2 + $0xb2] sm:$0xff]  ;;  %2458 = vst.msk [vmem:[#allocation3 + $0x1a0] sm:$0xff] %vm2404_vm12, %v14802_v0  ;;  %6137 = vst.msk [vmem:[#allocation4] sm:$0xff] %vm2404_vm12, %v14802_v0 }
  0x55   : > { %v9797_v43 = vpack.i.bf16 %v817_v42, %v816_v41  ;;  %6139 = vst.msk [vmem:[#allocation4 + $0x10] sm:$0xff] %vm2404_vm12, %v14802_v0  ;;  %6141 = vst.msk [vmem:[#allocation4 + $0x20] sm:$0xff] %vm2404_vm12, %v14802_v0 }
  0x56   : > { %6143 = vst.msk [vmem:[#allocation4 + $0x30] sm:$0xff] %vm2404_vm12, %v14802_v0  ;;  %6145 = vst.msk [vmem:[#allocation4 + $0x40] sm:$0xff] %vm2404_vm12, %v14802_v0 }
  0x57   : > { %9668 = vrot.lane.b32.xlu1 %v9667_v4, %s11028_s29  ;;  %6147 = vst.msk [vmem:[#allocation4 + $0x50] sm:$0xff] %vm2404_vm12, %v14802_v0  ;;  %6149 = vst.msk [vmem:[#allocation4 + $0x60] sm:$0xff] %vm2404_vm12, %v14802_v0 }
  0x58   : > { %9663 = vrot.lane.b32.xlu0 %v9617_v47, %s11028_s29  ;;  %v660_v47 = vld [vmem:[#allocation2 + $0xc8] sm:$0xff]  ;;  %6151 = vst.msk [vmem:[#allocation4 + $0x70] sm:$0xff] %vm2404_vm12, %v14802_v0  ;;  %6153 = vst.msk [vmem:[#allocation4 + $0x80] sm:$0xff] %vm2404_vm12, %v14802_v0 }
  0x59   : > { %v9827_v50 = vpack.i.bf16 %v660_v47, %v659_v46  ;;  %6155 = vst.msk [vmem:[#allocation4 + $0x90] sm:$0xff] %vm2404_vm12, %v14802_v0 }
  0x5a   : > { %2414 = vst.msk [vmem:[#allocation3 + $0x40] sm:$0x3] %vm2407_vm13, %v14802_v0  ;;  %2408 = vst.msk [vmem:[#allocation3 + $0x10] sm:$0x3] %vm2407_vm13, %v14802_v0 }
  0x5b   : > { %9678 = vrot.lane.b32.xlu1 %v9677_v7, %s11029_s30  ;;  %2411 = vst.msk [vmem:[#allocation3 + $0x28] sm:$0x3] %vm2407_vm13, %v14802_v0  ;;  %2417 = vst.msk [vmem:[#allocation3 + $0x58] sm:$0x3] %vm2407_vm13, %v14802_v0 }
  0x5c   : > { %9673 = vrot.lane.b32.xlu0 %v9627_v56, %s11029_s30  ;;  %v757_v56 = vld [vmem:[#allocation2 + $0xe0] sm:$0xff]  ;;  %2420 = vst.msk [vmem:[#allocation3 + $0x70] sm:$0x3] %vm2407_vm13, %v14802_v0  ;;  %2423 = vst.msk [vmem:[#allocation3 + $0x88] sm:$0x3] %vm2407_vm13, %v14802_v0 }
  0x5d   : > { %v11369_v58 = vpack.i.bf16 %v757_v56, %v756_v55  ;;  %2426 = vst.msk [vmem:[#allocation3 + $0xa0] sm:$0x3] %vm2407_vm13, %v14802_v0  ;;  %2429 = vst.msk [vmem:[#allocation3 + $0xb8] sm:$0x3] %vm2407_vm13, %v14802_v0 }
  0x5e   : > { %2432 = vst.msk [vmem:[#allocation3 + $0xd0] sm:$0x3] %vm2407_vm13, %v14802_v0  ;;  %2435 = vst.msk [vmem:[#allocation3 + $0xe8] sm:$0x3] %vm2407_vm13, %v14802_v0 }
  0x5f   : > { %9688 = vrot.lane.b32.xlu1 %v9687_v12, %s11031_s13  ;;  %2438 = vst.msk [vmem:[#allocation3 + $0x100] sm:$0x3] %vm2407_vm13, %v14802_v0  ;;  %2441 = vst.msk [vmem:[#allocation3 + $0x118] sm:$0x3] %vm2407_vm13, %v14802_v0 }
  0x60   : > { %9683 = vrot.lane.b32.xlu0 %v9637_v60, %s11031_s13  ;;  %v788_v60 = vld [vmem:[#allocation2 + $0xd9] sm:$0xff]  ;;  %2444 = vst.msk [vmem:[#allocation3 + $0x130] sm:$0x3] %vm2407_vm13, %v14802_v0  ;;  %2447 = vst.msk [vmem:[#allocation3 + $0x148] sm:$0x3] %vm2407_vm13, %v14802_v0 }
  0x61   : > { %v11374_v62 = vpack.i.bf16 %v789_v61, %v788_v60  ;;  %2450 = vst.msk [vmem:[#allocation3 + $0x160] sm:$0x3] %vm2407_vm13, %v14802_v0  ;;  %2453 = vst.msk [vmem:[#allocation3 + $0x178] sm:$0x3] %vm2407_vm13, %v14802_v0 }
  0x62   : > { %2456 = vst.msk [vmem:[#allocation3 + $0x190] sm:$0x3] %vm2407_vm13, %v14802_v0  ;;  %2459 = vst.msk [vmem:[#allocation3 + $0x1a8] sm:$0x3] %vm2407_vm13, %v14802_v0 }
  0x63   : > { %9698 = vrot.lane.b32.xlu1 %v9697_v15, %s11032_s16  ;;  %6138 = vst.msk [vmem:[#allocation4 + $0x8] sm:$0x3] %vm2407_vm13, %v14802_v0  ;;  %6140 = vst.msk [vmem:[#allocation4 + $0x18] sm:$0x3] %vm2407_vm13, %v14802_v0 }
  0x64   : > { %9693 = vrot.lane.b32.xlu0 %v9667_v4, %s11032_s16  ;;  %v11379_v4 = vpack.i.bf16 %v821_v1, %v820_v63  ;;  %6142 = vst.msk [vmem:[#allocation4 + $0x28] sm:$0x3] %vm2407_vm13, %v14802_v0  ;;  %6144 = vst.msk [vmem:[#allocation4 + $0x38] sm:$0x3] %vm2407_vm13, %v14802_v0 }
  0x65   : > { %6146 = vst.msk [vmem:[#allocation4 + $0x48] sm:$0x3] %vm2407_vm13, %v14802_v0  ;;  %6148 = vst.msk [vmem:[#allocation4 + $0x58] sm:$0x3] %vm2407_vm13, %v14802_v0 }
  0x66   : > { %6150 = vst.msk [vmem:[#allocation4 + $0x68] sm:$0x3] %vm2407_vm13, %v14802_v0  ;;  %6152 = vst.msk [vmem:[#allocation4 + $0x78] sm:$0x3] %vm2407_vm13, %v14802_v0 }
  0x67   : > { %9708 = vrot.lane.b32.xlu1 %v9707_v18, %s11033_s17  ;;  %6154 = vst.msk [vmem:[#allocation4 + $0x88] sm:$0x3] %vm2407_vm13, %v14802_v0  ;;  %6156 = vst.msk [vmem:[#allocation4 + $0x98] sm:$0x3] %vm2407_vm13, %v14802_v0 }
  0x68   : > { %9703 = vrot.lane.b32.xlu0 %v9677_v7, %s11033_s17  ;;  %6927 = vst.msk [vmem:[#allocation5] sm:$0xff] %vm3582_vm14, %v14802_v0  ;;  %6930 = vst.msk [vmem:[#allocation5 + $0x10] sm:$0xff] %vm3582_vm14, %v14802_v0 }
  0x69   : > { %6932 = vst.msk [vmem:[#allocation5 + $0x20] sm:$0xff] %vm3582_vm14, %v14802_v0  ;;  %6934 = vst.msk [vmem:[#allocation5 + $0x30] sm:$0xff] %vm3582_vm14, %v14802_v0 }
  0x6a   : > { %6936 = vst.msk [vmem:[#allocation5 + $0x40] sm:$0xff] %vm3582_vm14, %v14802_v0  ;;  %6938 = vst.msk [vmem:[#allocation5 + $0x50] sm:$0xff] %vm3582_vm14, %v14802_v0 }
  0x6b   : > { %9718 = vrot.lane.b32.xlu1 %v9717_v19, %s11034_s18  ;;  %6940 = vst.msk [vmem:[#allocation5 + $0x60] sm:$0xff] %vm3582_vm14, %v14802_v0  ;;  %6942 = vst.msk [vmem:[#allocation5 + $0x70] sm:$0xff] %vm3582_vm14, %v14802_v0 }
  0x6c   : > { %9713 = vrot.lane.b32.xlu0 %v9687_v12, %s11034_s18  ;;  %6944 = vst.msk [vmem:[#allocation5 + $0x80] sm:$0xff] %vm3582_vm14, %v14802_v0  ;;  %6946 = vst.msk [vmem:[#allocation5 + $0x90] sm:$0xff] %vm3582_vm14, %v14802_v0 }
  0x6f   : > { %9728 = vrot.lane.b32.xlu1 %v9707_v18, %s11027_s28 }
  0x70   : > { %9723 = vrot.lane.b32.xlu0 %v9677_v7, %s11027_s28 }
  0x73   : > { %9738 = vrot.lane.b32.xlu1 %v9717_v19, %s11026_s27 }
  0x74   : > { %9733 = vrot.lane.b32.xlu0 %v9687_v12, %s11026_s27  ;;  %v664_v12 = vld [vmem:[#allocation2 + $0xf8] sm:$0xff] }
  0x75   : > { %v11399_v20 = vpack.i.bf16 %v664_v12, %v663_v11 }
  0x77   : > { %9748 = vrot.lane.b32.xlu1 %v9747_v26, %s11028_s29 }
  0x78   : > { %9743 = vrot.lane.b32.xlu0 %v9697_v15, %s11028_s29 }
  0x7b   : > { %9758 = vrot.lane.b32.xlu1 %v9757_v29, %s11029_s30 }
  0x7c   : > { %9753 = vrot.lane.b32.xlu0 %v9707_v18, %s11029_s30 }
  0x7f   : > { %9768 = vrot.lane.b32.xlu1 %v9767_v36, %s11031_s13 }
  0x80   : > { %9763 = vrot.lane.b32.xlu0 %v9717_v19, %s11031_s13 }
  0x83   : > { %9778 = vrot.lane.b32.xlu1 %v9777_v39, %s11032_s16 }
  0x84   : > { %9773 = vrot.lane.b32.xlu0 %v9747_v26, %s11032_s16 }
  0x87   : > { %9788 = vrot.lane.b32.xlu1 %v9787_v40, %s11033_s17 }
  0x88   : > { %9783 = vrot.lane.b32.xlu0 %v9757_v29, %s11033_s17 }
  0x8b   : > { %9798 = vrot.lane.b32.xlu1 %v9797_v43, %s11034_s18  ;;  %v11367_v57 = vpop.permute.xlu1 %9568 }
  0x8c   : > { %9793 = vrot.lane.b32.xlu0 %v9767_v36, %s11034_s18  ;;  %v9564_v59 = vpop.permute.xlu0 %9563  ;;  %v9571_v17 = vunpack.i.h.bf16 %v11367_v57  ;;  %v9570_v18 = vunpack.i.l.bf16 %v11367_v57 }
  0x8d   : > { %v9566_v8 = vunpack.i.h.bf16 %v9564_v59  ;;  %v9565_v9 = vunpack.i.l.bf16 %v9564_v59 }
  0x8f   : > { %9808 = vrot.lane.b32.xlu1 %v9787_v40, %s11027_s28  ;;  %v1863_v24 = vsel %vm460_vm0, %v550_v13, %v9566_v8  ;;  %v1862_v25 = vsel %vm460_vm0, %v549_v14, %v9565_v9 }
  0x90   : > { %9803 = vrot.lane.b32.xlu0 %v9757_v29, %s11027_s28  ;;  %v728_v29 = vld [vmem:[#allocation2 + $0xfa] sm:$0xff]  ;;  %v1896_v41 = vsel %vm1894_vm4, %v1863_v24, %v9571_v17 }
  0x91   : > { %v11417_v42 = vpack.i.bf16 %v728_v29, %v727_v23 }
  0x93   : > { %9818 = vrot.lane.b32.xlu1 %v9797_v43, %s11026_s27 }
  0x94   : > { %9813 = vrot.lane.b32.xlu0 %v9767_v36, %s11026_s27 }
  0x97   : > { %9828 = vrot.lane.b32.xlu1 %v9827_v50, %s11028_s29 }
  0x98   : > { %9823 = vrot.lane.b32.xlu0 %v9777_v39, %s11028_s29 }
  0x9b   : > { %9838 = vrot.lane.b32.xlu1 %v9837_v53, %s11029_s30 }
  0x9c   : > { %9833 = vrot.lane.b32.xlu0 %v9787_v40, %s11029_s30  ;;  %v11413_v40 = vpack.i.bf16 %v696_v22, %v695_v21 }
  0x9f   : > { %9848 = vrot.lane.b32.xlu1 %v11362_v54, %s11031_s13 }
  0xa0   : > { %9843 = vrot.lane.b32.xlu0 %v9797_v43, %s11031_s13  ;;  %v11419_v43 = vpack.i.bf16 %v761_v32, %v760_v30 }
  0xa3   : > { %9858 = vrot.lane.b32.xlu1 %v11369_v58, %s11032_s16 }
  0xa4   : > { %9853 = vrot.lane.b32.xlu0 %v9827_v50, %s11032_s16 }
  0xa5   : > { %v9579_v2 = vpop.permute.xlu1 %9578 }
  0xa6   : > { %v9574_v3 = vpop.permute.xlu0 %9573  ;;  %v9581_v26 = vunpack.i.h.bf16 %v9579_v2  ;;  %v9580_v27 = vunpack.i.l.bf16 %v9579_v2 }
  0xa7   : > { %9868 = vrot.lane.b32.xlu1 %v11374_v62, %s11033_s17  ;;  %v9576_v15 = vunpack.i.h.bf16 %v9574_v3  ;;  %v9575_v16 = vunpack.i.l.bf16 %v9574_v3 }
  0xa8   : > { %9863 = vrot.lane.b32.xlu0 %v9837_v53, %s11033_s17 }
  0xa9   : > { %v9589_v5 = vpop.permute.xlu1 %9588  ;;  %v1864_v33 = vsel %vm460_vm0, %v11272_v31, %v9575_v16  ;;  %v1865_v35 = vsel %vm460_vm0, %v11274_v34, %v9576_v15  ;;  %v1895_v31 = vsel %vm1894_vm4, %v1862_v25, %v9570_v18 }
  0xaa   : > { %v11382_v6 = vpop.permute.xlu0 %9583  ;;  %v9591_v36 = vunpack.i.h.bf16 %v9589_v5  ;;  %v9590_v37 = vunpack.i.l.bf16 %v9589_v5  ;;  %v1897_v44 = vsel %vm1894_vm4, %v1864_v33, %v9580_v27  ;;  %v1898_v45 = vsel %vm1894_vm4, %v1865_v35, %v9581_v26  ;;  %v792_v33 = vld [vmem:[#allocation2 + $0x109] sm:$0xff]  ;;  %v793_v35 = vld [vmem:[#allocation2 + $0x111] sm:$0xff] }
  0xab   : > { %9878 = vrot.lane.b32.xlu1 %v11379_v4, %s11034_s18  ;;  %v9586_v38 = vunpack.i.h.bf16 %v11382_v6  ;;  %v9585_v39 = vunpack.i.l.bf16 %v11382_v6 }
  0xac   : > { %9873 = vrot.lane.b32.xlu0 %v11362_v54, %s11034_s18  ;;  %v1930_v49 = vsel %vm1927_vm5, %v1897_v44, %v9590_v37  ;;  %v1931_v50 = vsel %vm1927_vm5, %v1898_v45, %v9591_v36  ;;  %v825_v44 = vld [vmem:[#allocation2 + $0x112] sm:$0xff] }
  0xad   : > { %v11388_v7 = vpop.permute.xlu1 %9598 }
  0xae   : > { %v11390_v10 = vpop.permute.xlu0 %9593  ;;  %v9601_v46 = vunpack.i.h.bf16 %v11388_v7  ;;  %v9600_v47 = vunpack.i.l.bf16 %v11388_v7 }
  0xaf   : > { %9888 = vrot.lane.b32.xlu1 %v11374_v62, %s11027_s28  ;;  %v9596_v51 = vunpack.i.h.bf16 %v11390_v10  ;;  %v9595_v52 = vunpack.i.l.bf16 %v11390_v10 }
  0xb0   : > { %9883 = vrot.lane.b32.xlu0 %v9837_v53, %s11027_s28  ;;  %v1929_v53 = vsel %vm1927_vm5, %v1896_v41, %v9586_v38  ;;  %v1963_v1 = vsel %vm1960_vm6, %v1930_v49, %v9600_v47  ;;  %v1964_v2 = vsel %vm1960_vm6, %v1931_v50, %v9601_v46 }
  0xb1   : > { %v11397_v19 = vpop.permute.xlu1 %9608  ;;  %v1962_v8 = vsel %vm1960_vm6, %v1929_v53, %v9596_v51  ;;  %v667_v51 = vld [vmem:[#allocation2 + $0x120] sm:$0xff] }
  0xb2   : > { %v9604_v28 = vpop.permute.xlu0 %9603  ;;  %v9611_v55 = vunpack.i.h.bf16 %v11397_v19  ;;  %v9610_v56 = vunpack.i.l.bf16 %v11397_v19  ;;  %v699_v53 = vld [vmem:[#allocation2 + $0x121] sm:$0xff] }
  0xb3   : > { %9898 = vrot.lane.b32.xlu1 %v11379_v4, %s11026_s27  ;;  %v9606_v57 = vunpack.i.h.bf16 %v9604_v28  ;;  %v9605_v59 = vunpack.i.l.bf16 %v9604_v28 }
  0xb4   : > { %9893 = vrot.lane.b32.xlu0 %v11362_v54, %s11026_s27  ;;  %v1928_v54 = vsel %vm1927_vm5, %v1895_v31, %v9585_v39  ;;  %v1997_v11 = vsel %vm1993_vm7, %v1964_v2, %v9611_v55  ;;  %v731_v55 = vld [vmem:[#allocation2 + $0x122] sm:$0xff] }
  0xb5   : > { %v9619_v34 = vpop.permute.xlu1 %9618  ;;  %v1961_v7 = vsel %vm1960_vm6, %v1928_v54, %v9595_v52  ;;  %v1995_v15 = vsel %vm1993_vm7, %v1962_v8, %v9606_v57  ;;  %v668_v52 = vld [vmem:[#allocation2 + $0x128] sm:$0xff] }
  0xb6   : > { %v9614_v48 = vpop.permute.xlu0 %9613  ;;  %v9621_v60 = vunpack.i.h.bf16 %v9619_v34  ;;  %v9620_v61 = vunpack.i.l.bf16 %v9619_v34  ;;  %v1994_v14 = vsel %vm1993_vm7, %v1961_v7, %v9605_v59  ;;  %v11467_v34 = vpack.i.bf16 %v793_v35, %v792_v33  ;;  %v700_v54 = vld [vmem:[#allocation2 + $0x129] sm:$0xff] }
  0xb7   : > { %9908 = vrot.lane.b32.xlu1 %v11399_v20, %s11028_s29  ;;  %v9616_v3 = vunpack.i.h.bf16 %v9614_v48  ;;  %v9615_v5 = vunpack.i.l.bf16 %v9614_v48  ;;  %v732_v59 = vld [vmem:[#allocation2 + $0x12a] sm:$0xff] }
  0xb8   : > { %9903 = vrot.lane.b32.xlu0 %v11369_v58, %s11028_s29  ;;  %v1996_v58 = vsel %vm1993_vm7, %v1963_v1, %v9610_v56  ;;  %v2030_v17 = vsel %vm2026_vm8, %v1997_v11, %v9621_v60  ;;  %v764_v60 = vld [vmem:[#allocation2 + $0x138] sm:$0xff] }
  0xb9   : > { %v9629_v63 = vpop.permute.xlu1 %9628  ;;  %v2029_v16 = vsel %vm2026_vm8, %v1996_v58, %v9620_v61  ;;  %v2027_v23 = vsel %vm2026_vm8, %v1994_v14, %v9615_v5  ;;  %v2028_v24 = vsel %vm2026_vm8, %v1995_v15, %v9616_v3  ;;  %v765_v61 = vld [vmem:[#allocation2 + $0x140] sm:$0xff]  ;;  %v10994_v15 = vld [vmem:[#allocation2 + $0x48] sm:$0xff] }
  0xba   : > { %v9624_v6 = vpop.permute.xlu0 %9623  ;;  %v9631_v9 = vunpack.i.h.bf16 %v9629_v63  ;;  %v9630_v10 = vunpack.i.l.bf16 %v9629_v63 }
  0xbb   : > { %9918 = vrot.lane.b32.xlu1 %v11413_v40, %s11029_s30  ;;  %v9626_v12 = vunpack.i.h.bf16 %v9624_v6  ;;  %v9625_v13 = vunpack.i.l.bf16 %v9624_v6 }
  0xbc   : > { %9913 = vrot.lane.b32.xlu0 %v11374_v62, %s11029_s30  ;;  %v2062_v25 = vsel %vm2059_vm9, %v2029_v16, %v9630_v10  ;;  %v2063_v62 = vsel %vm2059_vm9, %v2030_v17, %v9631_v9  ;;  %v11491_v9 = vpack.i.bf16 %v668_v52, %v667_v51  ;;  %v11493_v10 = vpack.i.bf16 %v700_v54, %v699_v53 }
  0xbd   : > { %v9639_v18 = vpop.permute.xlu1 %9638  ;;  %v2060_v30 = vsel %vm2059_vm9, %v2027_v23, %v9625_v13  ;;  %v2061_v32 = vsel %vm2059_vm9, %v2028_v24, %v9626_v12  ;;  %v11499_v12 = vpack.i.bf16 %v765_v61, %v764_v60  ;;  %v10993_v13 = vld [vmem:[#allocation2 + $0x50] sm:$0xff] }
  0xbe   : > { %v9641_v19 = vunpack.i.h.bf16 %v9639_v18  ;;  %v9640_v21 = vunpack.i.l.bf16 %v9639_v18  ;;  %v9634_v22 = vpop.permute.xlu0 %9633 }
  0xbf   : > { %v9636_v26 = vunpack.i.h.bf16 %v9634_v22  ;;  %v9635_v27 = vunpack.i.l.bf16 %v9634_v22  ;;  %9928 = vrot.lane.b32.xlu1 %v11417_v42, %s11031_s13  ;;  %v10996_v22 = vld [vmem:[#allocation2 + $0x30] sm:$0xff] }
  0xc0   : > { %v2095_v28 = vsel %vm2092_vm10, %v2062_v25, %v9640_v21  ;;  %v2096_v29 = vsel %vm2092_vm10, %v2063_v62, %v9641_v19  ;;  %9923 = vrot.lane.b32.xlu0 %v11379_v4, %s11031_s13  ;;  %v824_v4 = vld [vmem:[#allocation2 + $0x10a] sm:$0xff]  ;;  %v10995_v19 = vld [vmem:[#allocation2 + $0x38] sm:$0xff] }
  0xc1   : > { %v9649_v36 = vpop.permute.xlu1 %9648  ;;  %v2093_v37 = vsel %vm2092_vm10, %v2060_v30, %v9635_v27  ;;  %v2094_v38 = vsel %vm2092_vm10, %v2061_v32, %v9636_v26  ;;  %v2126_v39 = vpack.c.bf16 %v2096_v29, %v2095_v28  ;;  %v11475_v47 = vpack.i.bf16 %v825_v44, %v824_v4 }
  0xc2   : > { %v9644_v31 = vpop.permute.xlu0 %9643  ;;  %v2125_v41 = vpack.c.bf16 %v2094_v38, %v2093_v37  ;;  %v9651_v56 = vunpack.i.h.bf16 %v9649_v36  ;;  %v9650_v57 = vunpack.i.l.bf16 %v9649_v36 }
  0xc3   : > { %9938 = vrot.lane.b32.xlu1 %v11419_v43, %s11032_s16  ;;  %v9646_v63 = vunpack.i.h.bf16 %v9644_v31  ;;  %v9645_v1 = vunpack.i.l.bf16 %v9644_v31 }
  0xc4   : > { %9933 = vrot.lane.b32.xlu0 %v11399_v20, %s11032_s16  ;;  %9430 = vmatprep.mubr.msk.bf16.mxu0 %vm2155_vm11, %v2125_v41  ;;  %v1869_v14 = vsel %vm460_vm0, %v10993_v13, %v9651_v56  ;;  %v1868_v16 = vsel %vm460_vm0, %v10994_v15, %v9650_v57 }
  0xc5   : > { %9431 = vmatmul.mubr.msk.bf16.vlgmr.msra.gmra.mrb[0].mxu0 %vm2155_vm11, %v2126_v39  ;;  %v9659_v45 = vpop.permute.xlu1 %9658  ;;  %v1867_v21 = vsel %vm460_vm0, %v10995_v19, %v9646_v63  ;;  %v1866_v23 = vsel %vm460_vm0, %v10996_v22, %v9645_v1 }
  0xc6   : > { %v9654_v46 = vpop.permute.xlu0 %9653  ;;  %v9661_v2 = vunpack.i.h.bf16 %v9659_v45  ;;  %v9660_v3 = vunpack.i.l.bf16 %v9659_v45 }
  0xc7   : > { %9948 = vrot.lane.b32.xlu1 %v11467_v34, %s11033_s17  ;;  %v9656_v6 = vunpack.i.h.bf16 %v9654_v46  ;;  %v9655_v7 = vunpack.i.l.bf16 %v9654_v46 }
  0xc8   : > { %9943 = vrot.lane.b32.xlu0 %v11413_v40, %s11033_s17  ;;  %v1901_v24 = vsel %vm1894_vm4, %v1868_v16, %v9660_v3  ;;  %v1902_v25 = vsel %vm1894_vm4, %v1869_v14, %v9661_v2 }
  0xc9   : > { %v9669_v48 = vpop.permute.xlu1 %9668  ;;  %v1899_v26 = vsel %vm1894_vm4, %v1866_v23, %v9655_v7  ;;  %v1900_v27 = vsel %vm1894_vm4, %v1867_v21, %v9656_v6 }
  0xca   : > { %v9664_v49 = vpop.permute.xlu0 %9663  ;;  %v9671_v58 = vunpack.i.h.bf16 %v9669_v48  ;;  %v9670_v11 = vunpack.i.l.bf16 %v9669_v48 }
  0xcb   : > { %9958 = vrot.lane.b32.xlu1 %v11475_v47, %s11034_s18  ;;  %v9666_v17 = vunpack.i.h.bf16 %v9664_v49  ;;  %v9665_v18 = vunpack.i.l.bf16 %v9664_v49 }
  0xcc   : > { %9953 = vrot.lane.b32.xlu0 %v11417_v42, %s11034_s18  ;;  %v1934_v30 = vsel %vm1927_vm5, %v1901_v24, %v9670_v11  ;;  %v1935_v32 = vsel %vm1927_vm5, %v1902_v25, %v9671_v58 }
  0xcd   : > { %v11483_v20 = vpop.permute.xlu1 %9678  ;;  %v1932_v36 = vsel %vm1927_vm5, %v1899_v26, %v9665_v18  ;;  %v1933_v37 = vsel %vm1927_vm5, %v1900_v27, %v9666_v17  ;;  %v796_v17 = vld [vmem:[#allocation2 + $0x139] sm:$0xff]  ;;  %v797_v18 = vld [vmem:[#allocation2 + $0x141] sm:$0xff] }
  0xce   : > { %v11485_v50 = vpop.permute.xlu0 %9673  ;;  %v9681_v28 = vunpack.i.h.bf16 %v11483_v20  ;;  %v9680_v29 = vunpack.i.l.bf16 %v11483_v20  ;;  %v829_v26 = vld [vmem:[#allocation2 + $0x142] sm:$0xff] }
  0xcf   : > { %9968 = vrot.lane.b32.xlu1 %v11467_v34, %s11027_s28  ;;  %v9676_v33 = vunpack.i.h.bf16 %v11485_v50  ;;  %v9675_v35 = vunpack.i.l.bf16 %v11485_v50 }
  0xd0   : > { %9963 = vrot.lane.b32.xlu0 %v11413_v40, %s11027_s28  ;;  %v11497_v40 = vpack.i.bf16 %v732_v59, %v731_v55  ;;  %v1967_v46 = vsel %vm1960_vm6, %v1934_v30, %v9680_v29  ;;  %v1968_v48 = vsel %vm1960_vm6, %v1935_v32, %v9681_v28 }
  0xd1   : > { %v9689_v5 = vpop.permute.xlu1 %9688  ;;  %v1965_v51 = vsel %vm1960_vm6, %v1932_v36, %v9675_v35  ;;  %v1966_v52 = vsel %vm1960_vm6, %v1933_v37, %v9676_v33  ;;  %v671_v33 = vld [vmem:[#allocation2 + $0x150] sm:$0xff]  ;;  %v672_v35 = vld [vmem:[#allocation2 + $0x158] sm:$0xff] }
  0xd2   : > { %v9684_v8 = vpop.permute.xlu0 %9683  ;;  %v9691_v38 = vunpack.i.h.bf16 %v9689_v5  ;;  %v9690_v39 = vunpack.i.l.bf16 %v9689_v5  ;;  %v703_v36 = vld [vmem:[#allocation2 + $0x151] sm:$0xff]  ;;  %v704_v37 = vld [vmem:[#allocation2 + $0x159] sm:$0xff] }
  0xd3   : > { %9978 = vrot.lane.b32.xlu1 %v11475_v47, %s11026_s27  ;;  %v9686_v31 = vunpack.i.h.bf16 %v9684_v8  ;;  %v9685_v41 = vunpack.i.l.bf16 %v9684_v8 }
  0xd4   : > { %9973 = vrot.lane.b32.xlu0 %v11417_v42, %s11026_s27  ;;  %v2001_v55 = vsel %vm1993_vm7, %v1968_v48, %v9691_v38  ;;  %v735_v38 = vld [vmem:[#allocation2 + $0x152] sm:$0xff] }
  0xd5   : > { %v9699_v62 = vpop.permute.xlu1 %9698  ;;  %v1998_v59 = vsel %vm1993_vm7, %v1965_v51, %v9685_v41  ;;  %v1999_v60 = vsel %vm1993_vm7, %v1966_v52, %v9686_v31  ;;  %v736_v41 = vld [vmem:[#allocation2 + $0x15a] sm:$0xff] }
  0xd6   : > { %v9694_v42 = vpop.permute.xlu0 %9693  ;;  %v9701_v4 = vunpack.i.h.bf16 %v9699_v62  ;;  %v9700_v44 = vunpack.i.l.bf16 %v9699_v62  ;;  %v11553_v62 = vpack.i.bf16 %v797_v18, %v796_v17 }
  0xd7   : > { %9988 = vrot.lane.b32.xlu1 %v11491_v9, %s11028_s29  ;;  %v9696_v49 = vunpack.i.h.bf16 %v9694_v42  ;;  %v9695_v20 = vunpack.i.l.bf16 %v9694_v42 }
  0xd8   : > { %9983 = vrot.lane.b32.xlu0 %v11419_v43, %s11028_s29  ;;  %v2000_v43 = vsel %vm1993_vm7, %v1967_v46, %v9690_v39  ;;  %v2034_v63 = vsel %vm2026_vm8, %v2001_v55, %v9701_v4  ;;  %v768_v4 = vld [vmem:[#allocation2 + $0x168] sm:$0xff] }
  0xd9   : > { %v9709_v45 = vpop.permute.xlu1 %9708  ;;  %v2033_v61 = vsel %vm2026_vm8, %v2000_v43, %v9700_v44  ;;  %v2031_v2 = vsel %vm2026_vm8, %v1998_v59, %v9695_v20  ;;  %v2032_v3 = vsel %vm2026_vm8, %v1999_v60, %v9696_v49  ;;  %v769_v44 = vld [vmem:[#allocation2 + $0x170] sm:$0xff]  ;;  %v10998_v60 = vld [vmem:[#allocation2 + $0x78] sm:$0xff] }
  0xda   : > { %v9704_v50 = vpop.permute.xlu0 %9703  ;;  %v9711_v53 = vunpack.i.h.bf16 %v9709_v45  ;;  %v9710_v54 = vunpack.i.l.bf16 %v9709_v45 }
  0xdb   : > { %9998 = vrot.lane.b32.xlu1 %v11493_v10, %s11029_s30  ;;  %v9706_v56 = vunpack.i.h.bf16 %v9704_v50  ;;  %v9705_v57 = vunpack.i.l.bf16 %v9704_v50 }
  0xdc   : > { %9993 = vrot.lane.b32.xlu0 %v11467_v34, %s11029_s30  ;;  %v2066_v8 = vsel %vm2059_vm9, %v2033_v61, %v9710_v54  ;;  %v2067_v34 = vsel %vm2059_vm9, %v2034_v63, %v9711_v53  ;;  %v11577_v53 = vpack.i.bf16 %v672_v35, %v671_v33  ;;  %v11579_v54 = vpack.i.bf16 %v704_v37, %v703_v36 }
  0xdd   : > { %v9719_v1 = vpop.permute.xlu1 %9718  ;;  %v2064_v13 = vsel %vm2059_vm9, %v2031_v2, %v9705_v57  ;;  %v2065_v14 = vsel %vm2059_vm9, %v2032_v3, %v9706_v56  ;;  %v11585_v56 = vpack.i.bf16 %v769_v44, %v768_v4  ;;  %v10997_v57 = vld [vmem:[#allocation2 + $0x80] sm:$0xff]  ;;  %v10999_v2 = vld [vmem:[#allocation2 + $0x68] sm:$0xff] }
  0xde   : > { %v9721_v5 = vunpack.i.h.bf16 %v9719_v1  ;;  %v9720_v6 = vunpack.i.l.bf16 %v9719_v1  ;;  %v9714_v7 = vpop.permute.xlu0 %9713 }
  0xdf   : > { %v9716_v58 = vunpack.i.h.bf16 %v9714_v7  ;;  %v9715_v11 = vunpack.i.l.bf16 %v9714_v7  ;;  %10008 = vrot.lane.b32.xlu1 %v11497_v40, %s11031_s13 }
  0xe0   : > { %v2099_v15 = vsel %vm2092_vm10, %v2066_v8, %v9720_v6  ;;  %v2100_v16 = vsel %vm2092_vm10, %v2067_v34, %v9721_v5  ;;  %10003 = vrot.lane.b32.xlu0 %v11475_v47, %s11031_s13  ;;  %v828_v47 = vld [vmem:[#allocation2 + $0x13a] sm:$0xff] }
  0xe1   : > { %v2097_v19 = vsel %vm2092_vm10, %v2064_v13, %v9715_v11  ;;  %v2098_v21 = vsel %vm2092_vm10, %v2065_v14, %v9716_v58  ;;  %v9729_v22 = vpop.permute.xlu1 %9728  ;;  %v2128_v23 = vpack.c.bf16 %v2100_v16, %v2099_v15  ;;  %v11561_v29 = vpack.i.bf16 %v829_v26, %v828_v47  ;;  %v11000_v5 = vld [vmem:[#allocation2 + $0x60] sm:$0xff] }
  0xe2   : > { %v9724_v24 = vpop.permute.xlu0 %9723  ;;  %v2127_v25 = vpack.c.bf16 %v2098_v21, %v2097_v19  ;;  %v9731_v39 = vunpack.i.h.bf16 %v9729_v22  ;;  %v9730_v31 = vunpack.i.l.bf16 %v9729_v22 }
  0xe3   : > { %10018 = vrot.lane.b32.xlu1 %v11499_v12, %s11032_s16  ;;  %v9726_v45 = vunpack.i.h.bf16 %v9724_v24  ;;  %v9725_v46 = vunpack.i.l.bf16 %v9724_v24 }
  0xe4   : > { %10013 = vrot.lane.b32.xlu0 %v11491_v9, %s11032_s16  ;;  %9434 = vmatprep.mubr.msk.bf16.mxu0 %vm2155_vm11, %v2127_v25  ;;  %v1873_v59 = vsel %vm460_vm0, %v10997_v57, %v9731_v39  ;;  %v1872_v61 = vsel %vm460_vm0, %v10998_v60, %v9730_v31 }
  0xe5   : > { %9435 = vmatmul.mubr.msk.bf16.gmra.mrb[4].mxu0 %vm2155_vm11, %v2128_v23  ;;  %v9739_v27 = vpop.permute.xlu1 %9738  ;;  %v1871_v3 = vsel %vm460_vm0, %v10999_v2, %v9726_v45  ;;  %v1870_v6 = vsel %vm460_vm0, %v11000_v5, %v9725_v46 }
  0xe6   : > { %v9734_v28 = vpop.permute.xlu0 %9733  ;;  %v9741_v48 = vunpack.i.h.bf16 %v9739_v27  ;;  %v9740_v49 = vunpack.i.l.bf16 %v9739_v27 }
  0xe7   : > { %10028 = vrot.lane.b32.xlu1 %v11553_v62, %s11033_s17  ;;  %v9736_v50 = vunpack.i.h.bf16 %v9734_v28  ;;  %v9735_v51 = vunpack.i.l.bf16 %v9734_v28 }
  0xe8   : > { %10023 = vrot.lane.b32.xlu0 %v11493_v10, %s11033_s17  ;;  %v1905_v7 = vsel %vm1894_vm4, %v1872_v61, %v9740_v49  ;;  %v1906_v8 = vsel %vm1894_vm4, %v1873_v59, %v9741_v48 }
  0xe9   : > { %v9749_v42 = vpop.permute.xlu1 %9748  ;;  %v1903_v58 = vsel %vm1894_vm4, %v1870_v6, %v9735_v51  ;;  %v1904_v11 = vsel %vm1894_vm4, %v1871_v3, %v9736_v50 }
  0xea   : > { %v9744_v30 = vpop.permute.xlu0 %9743  ;;  %v9751_v43 = vunpack.i.h.bf16 %v9749_v42  ;;  %v9750_v55 = vunpack.i.l.bf16 %v9749_v42 }
  0xeb   : > { %10038 = vrot.lane.b32.xlu1 %v11561_v29, %s11034_s18  ;;  %v9746_v63 = vunpack.i.h.bf16 %v9744_v30  ;;  %v9745_v1 = vunpack.i.l.bf16 %v9744_v30 }
  0xec   : > { %10033 = vrot.lane.b32.xlu0 %v11497_v40, %s11034_s18  ;;  %v1938_v15 = vsel %vm1927_vm5, %v1905_v7, %v9750_v55  ;;  %v1939_v16 = vsel %vm1927_vm5, %v1906_v8, %v9751_v43 }
  0xed   : > { %v11569_v9 = vpop.permute.xlu1 %9758  ;;  %v1936_v19 = vsel %vm1927_vm5, %v1903_v58, %v9745_v1  ;;  %v1937_v21 = vsel %vm1927_vm5, %v1904_v11, %v9746_v63  ;;  %v800_v63 = vld [vmem:[#allocation2 + $0x169] sm:$0xff]  ;;  %v801_v1 = vld [vmem:[#allocation2 + $0x171] sm:$0xff] }
  0xee   : > { %v11571_v32 = vpop.permute.xlu0 %9753  ;;  %v9761_v13 = vunpack.i.h.bf16 %v11569_v9  ;;  %v9760_v14 = vunpack.i.l.bf16 %v11569_v9  ;;  %v833_v58 = vld [vmem:[#allocation2 + $0x172] sm:$0xff] }
  0xef   : > { %10048 = vrot.lane.b32.xlu1 %v11553_v62, %s11027_s28  ;;  %v9756_v17 = vunpack.i.h.bf16 %v11571_v32  ;;  %v9755_v18 = vunpack.i.l.bf16 %v11571_v32 }
  0xf0   : > { %10043 = vrot.lane.b32.xlu0 %v11493_v10, %s11027_s28  ;;  %v11583_v10 = vpack.i.bf16 %v736_v41, %v735_v38  ;;  %v1971_v28 = vsel %vm1960_vm6, %v1938_v15, %v9760_v14  ;;  %v1972_v42 = vsel %vm1960_vm6, %v1939_v16, %v9761_v13  ;;  %v675_v16 = vld [vmem:[#allocation2 + $0x180] sm:$0xff] }
  0xf1   : > { %v9769_v20 = vpop.permute.xlu1 %9768  ;;  %v1969_v33 = vsel %vm1960_vm6, %v1936_v19, %v9755_v18  ;;  %v1970_v35 = vsel %vm1960_vm6, %v1937_v21, %v9756_v17  ;;  %v676_v17 = vld [vmem:[#allocation2 + $0x188] sm:$0xff] }
  0xf2   : > { %v9764_v52 = vpop.permute.xlu0 %9763  ;;  %v9771_v22 = vunpack.i.h.bf16 %v9769_v20  ;;  %v9770_v23 = vunpack.i.l.bf16 %v9769_v20  ;;  %v707_v19 = vld [vmem:[#allocation2 + $0x181] sm:$0xff]  ;;  %v708_v21 = vld [vmem:[#allocation2 + $0x189] sm:$0xff] }
  0xf3   : > { %10058 = vrot.lane.b32.xlu1 %v11561_v29, %s11026_s27  ;;  %v9766_v24 = vunpack.i.h.bf16 %v9764_v52  ;;  %v9765_v25 = vunpack.i.l.bf16 %v9764_v52 }
  0xf4   : > { %10053 = vrot.lane.b32.xlu0 %v11497_v40, %s11026_s27  ;;  %v2005_v38 = vsel %vm1993_vm7, %v1972_v42, %v9771_v22  ;;  %v739_v22 = vld [vmem:[#allocation2 + $0x182] sm:$0xff] }
  0xf5   : > { %v9779_v34 = vpop.permute.xlu1 %9778  ;;  %v2002_v41 = vsel %vm1993_vm7, %v1969_v33, %v9765_v25  ;;  %v2003_v4 = vsel %vm1993_vm7, %v1970_v35, %v9766_v24  ;;  %v740_v25 = vld [vmem:[#allocation2 + $0x18a] sm:$0xff] }
  0xf6   : > { %v9774_v40 = vpop.permute.xlu0 %9773  ;;  %v9781_v47 = vunpack.i.h.bf16 %v9779_v34  ;;  %v9780_v26 = vunpack.i.l.bf16 %v9779_v34  ;;  %v11639_v34 = vpack.i.bf16 %v801_v1, %v800_v63 }
  0xf7   : > { %10068 = vrot.lane.b32.xlu1 %v11577_v53, %s11028_s29  ;;  %v9776_v30 = vunpack.i.h.bf16 %v9774_v40  ;;  %v9775_v9 = vunpack.i.l.bf16 %v9774_v40 }
  0xf8   : > { %10063 = vrot.lane.b32.xlu0 %v11499_v12, %s11028_s29  ;;  %v2004_v12 = vsel %vm1993_vm7, %v1971_v28, %v9770_v23  ;;  %v2038_v45 = vsel %vm2026_vm8, %v2005_v38, %v9781_v47  ;;  %v11663_v47 = vld [vmem:[#allocation2 + $0x198] sm:$0xff]  ;;  %v564_v28 = vld [vmem:[#allocation2 + $0xb0] sm:$0xff] }
  0xf9   : > { %v9789_v27 = vpop.permute.xlu1 %9788  ;;  %v2037_v44 = vsel %vm2026_vm8, %v2004_v12, %v9780_v26  ;;  %v2035_v48 = vsel %vm2026_vm8, %v2002_v41, %v9775_v9  ;;  %v2036_v49 = vsel %vm2026_vm8, %v2003_v4, %v9776_v30  ;;  %v11665_v26 = vld [vmem:[#allocation2 + $0x1a0] sm:$0xff]  ;;  %v561_v9 = vld [vmem:[#allocation2 + $0x90] sm:$0xff]  ;;  %v11677_v41 = vpack.i.bf16 %v740_v25, %v739_v22 }
  0xfa   : > { %v9784_v32 = vpop.permute.xlu0 %9783  ;;  %v9791_v36 = vunpack.i.h.bf16 %v9789_v27  ;;  %v9790_v37 = vunpack.i.l.bf16 %v9789_v27  ;;  %v563_v27 = vld [vmem:[#allocation2 + $0xa8] sm:$0xff]  ;;  %v10177_v4 = vpack.i.bf16 %v11665_v26, %v11663_v47  ;;  %v2525_v47 = vld [vmem:[#allocation3 + $0x1] sm:$0xff]  ;;  %v2526_v26 = vld [vmem:[#allocation3 + $0x9] sm:$0xff] }
  0xfb   : > { %10078 = vrot.lane.b32.xlu1 %v11579_v54, %s11029_s30  ;;  %v9786_v39 = vunpack.i.h.bf16 %v9784_v32  ;;  %v9785_v31 = vunpack.i.l.bf16 %v9784_v32  ;;  %v562_v32 = vld [vmem:[#allocation2 + $0x98] sm:$0xff] }
  0xfc   : > { %10073 = vrot.lane.b32.xlu0 %v11553_v62, %s11029_s30  ;;  %v2070_v52 = vsel %vm2059_vm9, %v2037_v44, %v9790_v37  ;;  %v2071_v62 = vsel %vm2059_vm9, %v2038_v45, %v9791_v36 }
  0xfd   : > { %v9799_v46 = vpop.permute.xlu1 %9798  ;;  %v2068_v57 = vsel %vm2059_vm9, %v2035_v48, %v9785_v31  ;;  %v2069_v59 = vsel %vm2059_vm9, %v2036_v49, %v9786_v39  ;;  %v11673_v39 = vpack.i.bf16 %v676_v17, %v675_v16  ;;  %v11675_v31 = vpack.i.bf16 %v708_v21, %v707_v19 }
  0xfe   : > { %v9801_v20 = vunpack.i.h.bf16 %v9799_v46  ;;  %v9800_v50 = vunpack.i.l.bf16 %v9799_v46  ;;  %v9794_v51 = vpop.permute.xlu0 %9793 }
  0xff   : > { %v9796_v43 = vunpack.i.h.bf16 %v9794_v51  ;;  %v9795_v55 = vunpack.i.l.bf16 %v9794_v51  ;;  %10088 = vrot.lane.b32.xlu1 %v11583_v10, %s11031_s13 }
 0x100   : > { %v2103_v60 = vsel %vm2092_vm10, %v2070_v52, %v9800_v50  ;;  %v2104_v61 = vsel %vm2092_vm10, %v2071_v62, %v9801_v20  ;;  %10083 = vrot.lane.b32.xlu0 %v11561_v29, %s11031_s13  ;;  %v832_v29 = vld [vmem:[#allocation2 + $0x16a] sm:$0xff] }
 0x101   : > { %v2101_v2 = vsel %vm2092_vm10, %v2068_v57, %v9795_v55  ;;  %v2102_v3 = vsel %vm2092_vm10, %v2069_v59, %v9796_v43  ;;  %v9809_v5 = vpop.permute.xlu1 %9808  ;;  %v2130_v6 = vpack.c.bf16 %v2104_v61, %v2103_v60  ;;  %v11647_v14 = vpack.i.bf16 %v833_v58, %v832_v29 }
 0x102   : > { %v9804_v7 = vpop.permute.xlu0 %9803  ;;  %v2129_v8 = vpack.c.bf16 %v2102_v3, %v2101_v2  ;;  %v9811_v23 = vunpack.i.h.bf16 %v9809_v5  ;;  %v9810_v24 = vunpack.i.l.bf16 %v9809_v5 }
 0x103   : > { %10098 = vrot.lane.b32.xlu1 %v11585_v56, %s11032_s16  ;;  %v9806_v42 = vunpack.i.h.bf16 %v9804_v7  ;;  %v9805_v30 = vunpack.i.l.bf16 %v9804_v7 }
 0x104   : > { %10093 = vrot.lane.b32.xlu0 %v11577_v53, %s11032_s16  ;;  %9438 = vmatprep.mubr.msk.bf16.mxu0 %vm2155_vm11, %v2129_v8  ;;  %v1876_v44 = vsel %vm460_vm0, %v563_v27, %v9810_v24 }
 0x105   : > { %9439 = vmatmul.mubr.msk.bf16.gmra.mrb[8].mxu0 %vm2155_vm11, %v2130_v6  ;;  %v9819_v11 = vpop.permute.xlu1 %9818  ;;  %v1875_v48 = vsel %vm460_vm0, %v562_v32, %v9806_v42  ;;  %v1874_v49 = vsel %vm460_vm0, %v561_v9, %v9805_v30 }
 0x106   : > { %v9814_v13 = vpop.permute.xlu0 %9813  ;;  %v9821_v33 = vunpack.i.h.bf16 %v9819_v11  ;;  %v9820_v35 = vunpack.i.l.bf16 %v9819_v11 }
 0x107   : > { %10108 = vrot.lane.b32.xlu1 %v11639_v34, %s11033_s17  ;;  %v9816_v36 = vunpack.i.h.bf16 %v9814_v13  ;;  %v9815_v37 = vunpack.i.l.bf16 %v9814_v13 }
 0x108   : > { %10103 = vrot.lane.b32.xlu0 %v11579_v54, %s11033_s17  ;;  %v1909_v51 = vsel %vm1894_vm4, %v1876_v44, %v9820_v35 }
 0x109   : > { %v9829_v40 = vpop.permute.xlu1 %9828  ;;  %v11694_v62 = vsel %vm1894_vm4, %v1874_v49, %v9815_v37  ;;  %v11697_v43 = vsel %vm1894_vm4, %v1875_v48, %v9816_v36  ;;  %v804_v48 = vld [vmem:[#allocation2 + $0x199] sm:$0xff]  ;;  %v805_v49 = vld [vmem:[#allocation2 + $0x1a1] sm:$0xff] }
 0x10a   : > { %v11651_v15 = vpop.permute.xlu0 %9823  ;;  %v9831_v45 = vunpack.i.h.bf16 %v9829_v40  ;;  %v9830_v46 = vunpack.i.l.bf16 %v9829_v40 }
 0x10b   : > { %10118 = vrot.lane.b32.xlu1 %v11647_v14, %s11034_s18  ;;  %v9826_v20 = vunpack.i.h.bf16 %v11651_v15  ;;  %v9825_v50 = vunpack.i.l.bf16 %v11651_v15 }
 0x10c   : > { %10113 = vrot.lane.b32.xlu0 %v11583_v10, %s11034_s18 }
 0x10d   : > { %v11657_v53 = vpop.permute.xlu1 %9838  ;;  %v1940_v2 = vsel %vm1927_vm5, %v11694_v62, %v9825_v50  ;;  %v1941_v3 = vsel %vm1927_vm5, %v11697_v43, %v9826_v20 }
 0x10e   : > { %v11659_v18 = vpop.permute.xlu0 %9833  ;;  %v9841_v57 = vunpack.i.h.bf16 %v11657_v53  ;;  %v9840_v59 = vunpack.i.l.bf16 %v11657_v53 }
 0x10f   : > { %10128 = vrot.lane.b32.xlu1 %v11639_v34, %s11027_s28  ;;  %v9836_v63 = vunpack.i.h.bf16 %v11659_v18  ;;  %v9835_v1 = vunpack.i.l.bf16 %v11659_v18 }
 0x110   : > { %10123 = vrot.lane.b32.xlu0 %v11579_v54, %s11027_s28  ;;  %v1877_v54 = vsel %vm460_vm0, %v564_v28, %v9811_v23 }
 0x111   : > { %v11669_v12 = vpop.permute.xlu1 %9848  ;;  %v1910_v52 = vsel %vm1894_vm4, %v1877_v54, %v9821_v33  ;;  %v1973_v17 = vsel %vm1960_vm6, %v1940_v2, %v9835_v1  ;;  %v1974_v19 = vsel %vm1960_vm6, %v1941_v3, %v9836_v63  ;;  %v2557_v63 = vld [vmem:[#allocation3 + $0x2] sm:$0xff]  ;;  %v2558_v1 = vld [vmem:[#allocation3 + $0xa] sm:$0xff] }
 0x112   : > { %v11671_v38 = vpop.permute.xlu0 %9843  ;;  %v11709_v61 = vsel %vm1927_vm5, %v1910_v52, %v9831_v45  ;;  %v9851_v5 = vunpack.i.h.bf16 %v11669_v12  ;;  %v9850_v6 = vunpack.i.l.bf16 %v11669_v12 }
 0x113   : > { %10138 = vrot.lane.b32.xlu1 %v11647_v14, %s11026_s27  ;;  %v9846_v7 = vunpack.i.h.bf16 %v11671_v38  ;;  %v9845_v8 = vunpack.i.l.bf16 %v11671_v38  ;;  %v1976_v40 = vsel %vm1960_vm6, %v11709_v61, %v9841_v57  ;;  %v837_v57 = vld [vmem:[#allocation2 + $0x1a2] sm:$0xff] }
 0x114   : > { %10133 = vrot.lane.b32.xlu0 %v11583_v10, %s11026_s27  ;;  %v11706_v10 = vsel %vm1927_vm5, %v1909_v51, %v9830_v46  ;;  %v2009_v23 = vsel %vm1993_vm7, %v1976_v40, %v9851_v5  ;;  %v10207_v5 = vpack.i.bf16 %v2558_v1, %v2557_v63 }
 0x115   : > { %v11699_v55 = vpop.permute.xlu1 %9858  ;;  %v1975_v13 = vsel %vm1960_vm6, %v11706_v10, %v9840_v59  ;;  %v2006_v27 = vsel %vm1993_vm7, %v1973_v17, %v9845_v8  ;;  %v2007_v18 = vsel %vm1993_vm7, %v1974_v19, %v9846_v7  ;;  %v567_v7 = vld [vmem:[#allocation2 + $0xd8] sm:$0xff]  ;;  %v568_v8 = vld [vmem:[#allocation2 + $0xe0] sm:$0xff] }
 0x116   : > { %v11703_v60 = vpop.permute.xlu0 %9853  ;;  %v9861_v29 = vunpack.i.h.bf16 %v11699_v55  ;;  %v9860_v58 = vunpack.i.l.bf16 %v11699_v55  ;;  %v2008_v53 = vsel %vm1993_vm7, %v1975_v13, %v9850_v6  ;;  %v10187_v55 = vpack.i.bf16 %v805_v49, %v804_v48 }
 0x117   : > { %10148 = vrot.lane.b32.xlu1 %v11673_v39, %s11028_s29  ;;  %v9855_v15 = vunpack.i.l.bf16 %v11703_v60 }
 0x118   : > { %10143 = vrot.lane.b32.xlu0 %v11585_v56, %s11028_s29  ;;  %v9856_v56 = vunpack.i.h.bf16 %v11703_v60  ;;  %v2041_v28 = vsel %vm2026_vm8, %v2008_v53, %v9860_v58  ;;  %v2042_v42 = vsel %vm2026_vm8, %v2009_v23, %v9861_v29  ;;  %s11037_s29 = smov 96  }
 0x119   : > { %v9869_v11 = vpop.permute.xlu1 %9868  ;;  %v2039_v9 = vsel %vm2026_vm8, %v2006_v27, %v9855_v15  ;;  %v566_v15 = vld [vmem:[#allocation2 + $0xc8] sm:$0xff] }
 0x11a   : > { %v9864_v16 = vpop.permute.xlu0 %9863  ;;  %v9871_v21 = vunpack.i.h.bf16 %v9869_v11  ;;  %v9870_v22 = vunpack.i.l.bf16 %v9869_v11  ;;  %v2040_v32 = vsel %vm2026_vm8, %v2007_v18, %v9856_v56  ;;  %v565_v56 = vld [vmem:[#allocation2 + $0xc0] sm:$0xff] }
 0x11b   : > { %10158 = vrot.lane.b32.xlu1 %v11675_v31, %s11029_s30  ;;  %v9866_v24 = vunpack.i.h.bf16 %v9864_v16  ;;  %v9865_v25 = vunpack.i.l.bf16 %v9864_v16 }
 0x11c   : > { %10153 = vrot.lane.b32.xlu0 %v11639_v34, %s11029_s30  ;;  %v2074_v37 = vsel %vm2059_vm9, %v2041_v28, %v9870_v22  ;;  %v2075_v34 = vsel %vm2059_vm9, %v2042_v42, %v9871_v21 }
 0x11d   : > { %v9879_v30 = vpop.permute.xlu1 %9878  ;;  %v2072_v54 = vsel %vm2059_vm9, %v2039_v9, %v9865_v25  ;;  %v2073_v44 = vsel %vm2059_vm9, %v2040_v32, %v9866_v24 }
 0x11e   : > { %v9881_v33 = vunpack.i.h.bf16 %v9879_v30  ;;  %v9880_v35 = vunpack.i.l.bf16 %v9879_v30  ;;  %v9874_v36 = vpop.permute.xlu0 %9873 }
 0x11f   : > { %v9876_v12 = vunpack.i.h.bf16 %v9874_v36  ;;  %v9875_v38 = vunpack.i.l.bf16 %v9874_v36  ;;  %10168 = vrot.lane.b32.xlu1 %v11677_v41, %s11031_s13 }
 0x120   : > { %v2107_v45 = vsel %vm2092_vm10, %v2074_v37, %v9880_v35  ;;  %v2108_v46 = vsel %vm2092_vm10, %v2075_v34, %v9881_v33  ;;  %10163 = vrot.lane.b32.xlu0 %v11647_v14, %s11031_s13  ;;  %v836_v14 = vld [vmem:[#allocation2 + $0x19a] sm:$0xff] }
 0x121   : > { %v2105_v20 = vsel %vm2092_vm10, %v2072_v54, %v9875_v38  ;;  %v2106_v50 = vsel %vm2092_vm10, %v2073_v44, %v9876_v12  ;;  %v9889_v51 = vpop.permute.xlu1 %9888  ;;  %v2132_v52 = vpack.c.bf16 %v2108_v46, %v2107_v45  ;;  %v10197_v10 = vpack.i.bf16 %v837_v57, %v836_v14 }
 0x122   : > { %v9884_v62 = vpop.permute.xlu0 %9883  ;;  %v2131_v43 = vpack.c.bf16 %v2106_v50, %v2105_v20  ;;  %v9891_v6 = vunpack.i.h.bf16 %v9889_v51 }
 0x123   : > { %10178 = vrot.lane.b32.xlu1 %v10177_v4, %s11032_s16  ;;  %v9886_v29 = vunpack.i.h.bf16 %v9884_v62  ;;  %v9885_v58 = vunpack.i.l.bf16 %v9884_v62 }
 0x124   : > { %10173 = vrot.lane.b32.xlu0 %v11673_v39, %s11032_s16  ;;  %9442 = vmatprep.mubr.msk.bf16.mxu0 %vm2155_vm11, %v2131_v43  ;;  %v10202_v39 = vpack.i.bf16 %v2526_v26, %v2525_v47  ;;  %v1881_v22 = vsel %vm460_vm0, %v568_v8, %v9891_v6 }
 0x125   : > { %9443 = vmatmul.mubr.msk.bf16.gmra.mrb[12].mxu0 %vm2155_vm11, %v2132_v52  ;;  %v9899_v59 = vpop.permute.xlu1 %9898  ;;  %v1879_v25 = vsel %vm460_vm0, %v566_v15, %v9886_v29  ;;  %v1878_v27 = vsel %vm460_vm0, %v565_v56, %v9885_v58 }
 0x126   : > { %v9894_v60 = vpop.permute.xlu0 %9893  ;;  %v9901_v11 = vunpack.i.h.bf16 %v9899_v59  ;;  %v9900_v13 = vunpack.i.l.bf16 %v9899_v59 }
 0x127   : > { %10188 = vrot.lane.b32.xlu1 %v10187_v55, %s11033_s17  ;;  %v9895_v16 = vunpack.i.l.bf16 %v9894_v60 }
 0x128   : > { %10183 = vrot.lane.b32.xlu0 %v11675_v31, %s11033_s17  ;;  %v9890_v31 = vunpack.i.l.bf16 %v9889_v51  ;;  %v1914_v28 = vsel %vm1894_vm4, %v1881_v22, %v9901_v11 }
 0x129   : > { %v9909_v4 = vpop.permute.xlu1 %9908  ;;  %v1911_v30 = vsel %vm1894_vm4, %v1878_v27, %v9895_v16  ;;  %v10884_v16 = vld [vmem:[%s14792_s3 + $0x88] sm:$0xff]  }
 0x12a   : > { %v9904_v61 = vpop.permute.xlu0 %9903  ;;  %v9911_v19 = vunpack.i.h.bf16 %v9909_v4  ;;  %v9910_v21 = vunpack.i.l.bf16 %v9909_v4  ;;  %v1880_v53 = vsel %vm460_vm0, %v567_v7, %v9890_v31 }
 0x12b   : > { %10198 = vrot.lane.b32.xlu1 %v10197_v10, %s11034_s18  ;;  %v9906_v23 = vunpack.i.h.bf16 %v9904_v61  ;;  %v9905_v24 = vunpack.i.l.bf16 %v9904_v61  ;;  %v1913_v18 = vsel %vm1894_vm4, %v1880_v53, %v9900_v13 }
 0x12c   : > { %10193 = vrot.lane.b32.xlu0 %v11677_v41, %s11034_s18  ;;  %v9896_v41 = vunpack.i.h.bf16 %v9894_v60  ;;  %v1946_v36 = vsel %vm1927_vm5, %v1913_v18, %v9910_v21  ;;  %v1947_v37 = vsel %vm1927_vm5, %v1914_v28, %v9911_v19 }
 0x12d   : > { %v9919_v2 = vpop.permute.xlu1 %9918  ;;  %v1944_v38 = vsel %vm1927_vm5, %v1911_v30, %v9905_v24 }
 0x12e   : > { %v9914_v3 = vpop.permute.xlu0 %9913  ;;  %v1912_v9 = vsel %vm1894_vm4, %v1879_v25, %v9896_v41  ;;  %v9921_v32 = vunpack.i.h.bf16 %v9919_v2  ;;  %v9920_v33 = vunpack.i.l.bf16 %v9919_v2  ;;  %v10883_v41 = vld [vmem:[%s14792_s3 + $0x80] sm:$0xff]  }
 0x12f   : > { %10203 = vrot.lane.b32.xlu1 %v10202_v39, %s11035_s19  ;;  %v9916_v34 = vunpack.i.h.bf16 %v9914_v3  ;;  %v9915_v12 = vunpack.i.l.bf16 %v9914_v3  ;;  %v1945_v54 = vsel %vm1927_vm5, %v1912_v9, %v9906_v23  ;;  %9462 = vmatprep.subr.bf16.mxu0 %v10883_v41 }
 0x130   : > { %v1979_v51 = vsel %vm1960_vm6, %v1946_v36, %v9920_v33  ;;  %v1980_v52 = vsel %vm1960_vm6, %v1947_v37, %v9921_v32  ;;  %9463 = vmatpush3.bf16.msra.mxu0 %v10883_v41  ;;  %v571_v32 = vld [vmem:[#allocation2 + $0x108] sm:$0xff]  ;;  %v572_v33 = vld [vmem:[#allocation2 + $0x110] sm:$0xff] }
 0x131   : > { %v9929_v40 = vpop.permute.xlu1 %9928  ;;  %v1977_v14 = vsel %vm1960_vm6, %v1944_v38, %v9915_v12  ;;  %v1978_v57 = vsel %vm1960_vm6, %v1945_v54, %v9916_v34  ;;  %9464 = vmatprep.subr.bf16.mxu0 %v10884_v16  ;;  %v569_v38 = vld [vmem:[#allocation2 + $0xf0] sm:$0xff]  ;;  %v570_v54 = vld [vmem:[#allocation2 + $0xf8] sm:$0xff] }
 0x132   : > { %v9924_v17 = vpop.permute.xlu0 %9923  ;;  %v9931_v44 = vunpack.i.h.bf16 %v9929_v40  ;;  %v9930_v45 = vunpack.i.l.bf16 %v9929_v40 }
 0x133   : > { %10208 = vrot.lane.b32.xlu1 %v10207_v5, %s11036_s20  ;;  %v9926_v46 = vunpack.i.h.bf16 %v9924_v17  ;;  %v9925_v48 = vunpack.i.l.bf16 %v9924_v17 }
 0x134   : > { %v2012_v10 = vsel %vm1993_vm7, %v1979_v51, %v9930_v45  ;;  %v2013_v47 = vsel %vm1993_vm7, %v1980_v52, %v9931_v44  ;;  %9465 = vmatpush3.bf16.msra.mxu0 %v10884_v16 }
 0x135   : > { %v9939_v42 = vpop.permute.xlu1 %9938  ;;  %v2010_v61 = vsel %vm1993_vm7, %v1977_v14, %v9925_v48  ;;  %v2011_v39 = vsel %vm1993_vm7, %v1978_v57, %v9926_v46 }
 0x136   : > { %v9934_v35 = vpop.permute.xlu0 %9933  ;;  %v9941_v49 = vunpack.i.h.bf16 %v9939_v42  ;;  %v9940_v20 = vunpack.i.l.bf16 %v9939_v42 }
 0x137   : > { %v9936_v62 = vunpack.i.h.bf16 %v9934_v35  ;;  %v9935_v43 = vunpack.i.l.bf16 %v9934_v35 }
 0x138   : > { %v2045_v63 = vsel %vm2026_vm8, %v2012_v10, %v9940_v20  ;;  %v2046_v1 = vsel %vm2026_vm8, %v2013_v47, %v9941_v49 }
 0x139   : > { %v9949_v50 = vpop.permute.xlu1 %9948  ;;  %v2043_v3 = vsel %vm2026_vm8, %v2010_v61, %v9935_v43  ;;  %v2044_v5 = vsel %vm2026_vm8, %v2011_v39, %v9936_v62 }
 0x13a   : > { %v9944_v55 = vpop.permute.xlu0 %9943  ;;  %v9951_v59 = vunpack.i.h.bf16 %v9949_v50  ;;  %v9950_v60 = vunpack.i.l.bf16 %v9949_v50 }
 0x13b   : > { %v9946_v26 = vunpack.i.h.bf16 %v9944_v55  ;;  %v9945_v4 = vunpack.i.l.bf16 %v9944_v55 }
 0x13c   : > { %v2078_v8 = vsel %vm2059_vm9, %v2045_v63, %v9950_v60  ;;  %v2079_v29 = vsel %vm2059_vm9, %v2046_v1, %v9951_v59 }
 0x13d   : > { %v9959_v2 = vpop.permute.xlu1 %9958  ;;  %v2076_v13 = vsel %vm2059_vm9, %v2043_v3, %v9945_v4  ;;  %v2077_v40 = vsel %vm2059_vm9, %v2044_v5, %v9946_v26 }
 0x13e   : > { %v9961_v6 = vunpack.i.h.bf16 %v9959_v2  ;;  %v9960_v31 = vunpack.i.l.bf16 %v9959_v2  ;;  %v9954_v7 = vpop.permute.xlu0 %9953 }
 0x13f   : > { %v9956_v58 = vunpack.i.h.bf16 %v9954_v7  ;;  %v9955_v11 = vunpack.i.l.bf16 %v9954_v7 }
 0x140   : > { %v2111_v56 = vsel %vm2092_vm10, %v2078_v8, %v9960_v31  ;;  %v2112_v15 = vsel %vm2092_vm10, %v2079_v29, %v9961_v6 }
 0x141   : > { %v2109_v17 = vsel %vm2092_vm10, %v2076_v13, %v9955_v11  ;;  %v2110_v19 = vsel %vm2092_vm10, %v2077_v40, %v9956_v58  ;;  %v9969_v21 = vpop.permute.xlu1 %9968  ;;  %v2134_v22 = vpack.c.bf16 %v2112_v15, %v2111_v56 }
 0x142   : > { %v9964_v53 = vpop.permute.xlu0 %9963  ;;  %v2133_v23 = vpack.c.bf16 %v2110_v19, %v2109_v17  ;;  %v9971_v30 = vunpack.i.h.bf16 %v9969_v21  ;;  %v9970_v9 = vunpack.i.l.bf16 %v9969_v21 }
 0x143   : > { %v9966_v35 = vunpack.i.h.bf16 %v9964_v53  ;;  %v9965_v36 = vunpack.i.l.bf16 %v9964_v53 }
 0x144   : > { %9446 = vmatprep.mubr.msk.bf16.mxu0 %vm2155_vm11, %v2133_v23  ;;  %v1885_v20 = vsel %vm460_vm0, %v572_v33, %v9971_v30  ;;  %v1884_v50 = vsel %vm460_vm0, %v571_v32, %v9970_v9 }
 0x145   : > { %9447 = vmatmul.mubr.msk.bf16.gmra.mrb[16].mxu0 %vm2155_vm11, %v2134_v22  ;;  %v9979_v24 = vpop.permute.xlu1 %9978  ;;  %v1883_v62 = vsel %vm460_vm0, %v570_v54, %v9966_v35  ;;  %v1882_v43 = vsel %vm460_vm0, %v569_v38, %v9965_v36 }
 0x146   : > { %v9974_v25 = vpop.permute.xlu0 %9973  ;;  %v9981_v37 = vunpack.i.h.bf16 %v9979_v24  ;;  %v9980_v34 = vunpack.i.l.bf16 %v9979_v24 }
 0x147   : > { %v9976_v44 = vunpack.i.h.bf16 %v9974_v25  ;;  %v9975_v45 = vunpack.i.l.bf16 %v9974_v25 }
 0x148   : > { %v1917_v55 = vsel %vm1894_vm4, %v1884_v50, %v9980_v34  ;;  %v1918_v14 = vsel %vm1894_vm4, %v1885_v20, %v9981_v37 }
 0x149   : > { %v9989_v27 = vpop.permute.xlu1 %9988  ;;  %v1915_v59 = vsel %vm1894_vm4, %v1882_v43, %v9975_v45  ;;  %v1916_v60 = vsel %vm1894_vm4, %v1883_v62, %v9976_v44 }
 0x14a   : > { %v9984_v18 = vpop.permute.xlu0 %9983  ;;  %v9991_v48 = vunpack.i.h.bf16 %v9989_v27  ;;  %v9990_v49 = vunpack.i.l.bf16 %v9989_v27 }
 0x14b   : > { %v9986_v51 = vunpack.i.h.bf16 %v9984_v18  ;;  %v9985_v52 = vunpack.i.l.bf16 %v9984_v18 }
 0x14c   : > { %v1950_v4 = vsel %vm1927_vm5, %v1917_v55, %v9990_v49  ;;  %v1951_v61 = vsel %vm1927_vm5, %v1918_v14, %v9991_v48 }
 0x14d   : > { %v9999_v28 = vpop.permute.xlu1 %9998  ;;  %v1948_v1 = vsel %vm1927_vm5, %v1915_v59, %v9985_v52  ;;  %v1949_v2 = vsel %vm1927_vm5, %v1916_v60, %v9986_v51 }
 0x14e   : > { %v9994_v42 = vpop.permute.xlu0 %9993  ;;  %v10001_v10 = vunpack.i.h.bf16 %v9999_v28  ;;  %v10000_v47 = vunpack.i.l.bf16 %v9999_v28 }
 0x14f   : > { %v9996_v39 = vunpack.i.h.bf16 %v9994_v42  ;;  %v9995_v63 = vunpack.i.l.bf16 %v9994_v42 }
 0x150   : > { %v1983_v58 = vsel %vm1960_vm6, %v1950_v4, %v10000_v47  ;;  %v1984_v11 = vsel %vm1960_vm6, %v1951_v61, %v10001_v10  ;;  %v573_v4 = vld [vmem:[#allocation2 + $0x120] sm:$0xff]  ;;  %v574_v61 = vld [vmem:[#allocation2 + $0x128] sm:$0xff] }
 0x151   : > { %v10009_v12 = vpop.permute.xlu1 %10008  ;;  %v1981_v15 = vsel %vm1960_vm6, %v1948_v1, %v9995_v63  ;;  %v1982_v41 = vsel %vm1960_vm6, %v1949_v2, %v9996_v39 }
 0x152   : > { %v10004_v46 = vpop.permute.xlu0 %10003  ;;  %v10011_v3 = vunpack.i.h.bf16 %v10009_v12  ;;  %v10010_v5 = vunpack.i.l.bf16 %v10009_v12 }
 0x153   : > { %v10006_v6 = vunpack.i.h.bf16 %v10004_v46  ;;  %v10005_v31 = vunpack.i.l.bf16 %v10004_v46 }
 0x154   : > { %v2016_v19 = vsel %vm1993_vm7, %v1983_v58, %v10010_v5  ;;  %v2017_v21 = vsel %vm1993_vm7, %v1984_v11, %v10011_v3  ;;  %v11001_v5 = vld [vmem:[#allocation2 + $0x140] sm:$0xff] }
 0x155   : > { %v10019_v57 = vpop.permute.xlu1 %10018  ;;  %v2014_v23 = vsel %vm1993_vm7, %v1981_v15, %v10005_v31  ;;  %v2015_v24 = vsel %vm1993_vm7, %v1982_v41, %v10006_v6  ;;  %v11002_v31 = vld [vmem:[#allocation2 + $0x138] sm:$0xff] }
 0x156   : > { %v10014_v26 = vpop.permute.xlu0 %10013  ;;  %v10021_v7 = vunpack.i.h.bf16 %v10019_v57  ;;  %v10020_v8 = vunpack.i.l.bf16 %v10019_v57 }
 0x157   : > { %v10016_v13 = vunpack.i.h.bf16 %v10014_v26  ;;  %v10015_v40 = vunpack.i.l.bf16 %v10014_v26 }
 0x158   : > { %v2049_v25 = vsel %vm2026_vm8, %v2016_v19, %v10020_v8  ;;  %v2050_v27 = vsel %vm2026_vm8, %v2017_v21, %v10021_v7 }
 0x159   : > { %v10029_v29 = vpop.permute.xlu1 %10028  ;;  %v2047_v28 = vsel %vm2026_vm8, %v2014_v23, %v10015_v40  ;;  %v2048_v42 = vsel %vm2026_vm8, %v2015_v24, %v10016_v13 }
 0x15a   : > { %v10024_v56 = vpop.permute.xlu0 %10023  ;;  %v10031_v16 = vunpack.i.h.bf16 %v10029_v29  ;;  %v10030_v17 = vunpack.i.l.bf16 %v10029_v29 }
 0x15b   : > { %v10026_v22 = vunpack.i.h.bf16 %v10024_v56  ;;  %v10025_v53 = vunpack.i.l.bf16 %v10024_v56 }
 0x15c   : > { %v2082_v33 = vsel %vm2059_vm9, %v2049_v25, %v10030_v17  ;;  %v2083_v35 = vsel %vm2059_vm9, %v2050_v27, %v10031_v16 }
 0x15d   : > { %v10039_v18 = vpop.permute.xlu1 %10038  ;;  %v2080_v34 = vsel %vm2059_vm9, %v2047_v28, %v10025_v53  ;;  %v2081_v12 = vsel %vm2059_vm9, %v2048_v42, %v10026_v22 }
 0x15e   : > { %v10041_v30 = vunpack.i.h.bf16 %v10039_v18  ;;  %v10040_v9 = vunpack.i.l.bf16 %v10039_v18  ;;  %v10034_v32 = vpop.permute.xlu0 %10033 }
 0x15f   : > { %v10036_v36 = vunpack.i.h.bf16 %v10034_v32  ;;  %v10035_v37 = vunpack.i.l.bf16 %v10034_v32 }
 0x160   : > { %v2115_v38 = vsel %vm2092_vm10, %v2082_v33, %v10040_v9  ;;  %v2116_v54 = vsel %vm2092_vm10, %v2083_v35, %v10041_v30 }
 0x161   : > { %v2113_v44 = vsel %vm2092_vm10, %v2080_v34, %v10035_v37  ;;  %v2114_v45 = vsel %vm2092_vm10, %v2081_v12, %v10036_v36  ;;  %v10049_v46 = vpop.permute.xlu1 %10048  ;;  %v2136_v48 = vpack.c.bf16 %v2116_v54, %v2115_v38 }
 0x162   : > { %v10044_v49 = vpop.permute.xlu0 %10043  ;;  %v2135_v20 = vpack.c.bf16 %v2114_v45, %v2113_v44  ;;  %v10051_v14 = vunpack.i.h.bf16 %v10049_v46  ;;  %v10050_v57 = vunpack.i.l.bf16 %v10049_v46 }
 0x163   : > { %v10046_v59 = vunpack.i.h.bf16 %v10044_v49  ;;  %v10045_v60 = vunpack.i.l.bf16 %v10044_v49 }
 0x164   : > { %9450 = vmatprep.mubr.msk.bf16.mxu0 %vm2155_vm11, %v2135_v20  ;;  %v1889_v6 = vsel %vm460_vm0, %v11001_v5, %v10051_v14  ;;  %v1888_v7 = vsel %vm460_vm0, %v11002_v31, %v10050_v57 }
 0x165   : > { %9451 = vmatmul.mubr.msk.bf16.gmra.mrb[20].mxu0 %vm2155_vm11, %v2136_v48  ;;  %v10059_v50 = vpop.permute.xlu1 %10058  ;;  %v1887_v58 = vsel %vm460_vm0, %v574_v61, %v10046_v59  ;;  %v1886_v11 = vsel %vm460_vm0, %v573_v4, %v10045_v60 }
 0x166   : > { %v10054_v51 = vpop.permute.xlu0 %10053  ;;  %v10061_v10 = vunpack.i.h.bf16 %v10059_v50  ;;  %v10060_v47 = vunpack.i.l.bf16 %v10059_v50 }
 0x167   : > { %v10056_v39 = vunpack.i.h.bf16 %v10054_v51  ;;  %v10055_v63 = vunpack.i.l.bf16 %v10054_v51 }
 0x168   : > { %v1921_v13 = vsel %vm1894_vm4, %v1888_v7, %v10060_v47  ;;  %v1922_v40 = vsel %vm1894_vm4, %v1889_v6, %v10061_v10 }
 0x169   : > { %v10069_v52 = vpop.permute.xlu1 %10068  ;;  %v1919_v15 = vsel %vm1894_vm4, %v1886_v11, %v10055_v63  ;;  %v1920_v41 = vsel %vm1894_vm4, %v1887_v58, %v10056_v39 }
 0x16a   : > { %v10064_v62 = vpop.permute.xlu0 %10063  ;;  %v10071_v2 = vunpack.i.h.bf16 %v10069_v52  ;;  %v10070_v3 = vunpack.i.l.bf16 %v10069_v52 }
 0x16b   : > { %v10066_v8 = vunpack.i.h.bf16 %v10064_v62  ;;  %v10065_v29 = vunpack.i.l.bf16 %v10064_v62 }
 0x16c   : > { %v1954_v21 = vsel %vm1927_vm5, %v1921_v13, %v10070_v3  ;;  %v1955_v22 = vsel %vm1927_vm5, %v1922_v40, %v10071_v2 }
 0x16d   : > { %v10079_v43 = vpop.permute.xlu1 %10078  ;;  %v1952_v24 = vsel %vm1927_vm5, %v1919_v15, %v10065_v29  ;;  %v1953_v25 = vsel %vm1927_vm5, %v1920_v41, %v10066_v8  ;;  %v10886_v15 = vld [vmem:[%s14792_s3] sm:$0xff]  }
 0x16e   : > { %v10074_v55 = vpop.permute.xlu0 %10073  ;;  %v10081_v16 = vunpack.i.h.bf16 %v10079_v43  ;;  %v10080_v17 = vunpack.i.l.bf16 %v10079_v43 }
 0x16f   : > { %v10076_v53 = vunpack.i.h.bf16 %v10074_v55  ;;  %v10075_v23 = vunpack.i.l.bf16 %v10074_v55 }
 0x170   : > { %v1987_v33 = vsel %vm1960_vm6, %v1954_v21, %v10080_v17  ;;  %v1988_v35 = vsel %vm1960_vm6, %v1955_v22, %v10081_v16  ;;  %v11004_v22 = vld [vmem:[#allocation2 + $0x168] sm:$0xff] }
 0x171   : > { %v10089_v26 = vpop.permute.xlu1 %10088  ;;  %v1985_v12 = vsel %vm1960_vm6, %v1952_v24, %v10075_v23  ;;  %v1986_v38 = vsel %vm1960_vm6, %v1953_v25, %v10076_v53 }
 0x172   : > { %v10084_v1 = vpop.permute.xlu0 %10083  ;;  %v10091_v27 = vunpack.i.h.bf16 %v10089_v26  ;;  %v10090_v18 = vunpack.i.l.bf16 %v10089_v26 }
 0x173   : > { %v10086_v28 = vunpack.i.h.bf16 %v10084_v1  ;;  %v10085_v42 = vunpack.i.l.bf16 %v10084_v1 }
 0x174   : > { %v2020_v45 = vsel %vm1993_vm7, %v1987_v33, %v10090_v18  ;;  %v2021_v46 = vsel %vm1993_vm7, %v1988_v35, %v10091_v27 }
 0x175   : > { %v10099_v56 = vpop.permute.xlu1 %10098  ;;  %v2018_v20 = vsel %vm1993_vm7, %v1985_v12, %v10085_v42  ;;  %v2019_v50 = vsel %vm1993_vm7, %v1986_v38, %v10086_v28  ;;  %v10887_v28 = vld [vmem:[%s14792_s3 + $0x48] sm:$0xff]   ;;  %v11005_v42 = vld [vmem:[#allocation2 + $0x158] sm:$0xff] }
 0x176   : > { %v10094_v19 = vpop.permute.xlu0 %10093  ;;  %v10101_v30 = vunpack.i.h.bf16 %v10099_v56  ;;  %v10100_v9 = vunpack.i.l.bf16 %v10099_v56  ;;  %v10885_v56 = vld [vmem:[%s14792_s3 + $0x40] sm:$0xff]  }
 0x177   : > { %v10096_v36 = vunpack.i.h.bf16 %v10094_v19  ;;  %v10095_v37 = vunpack.i.l.bf16 %v10094_v19  ;;  %9115 = vmatprep.subr.bf16.mxu1 %v10885_v56  ;;  %v11003_v19 = vld [vmem:[#allocation2 + $0x170] sm:$0xff] }
 0x178   : > { %v2053_v51 = vsel %vm2026_vm8, %v2020_v45, %v10100_v9  ;;  %v2054_v52 = vsel %vm2026_vm8, %v2021_v46, %v10101_v30  ;;  %9116 = vmatpush3.bf16.msra.mxu1 %v10886_v15  ;;  %v11006_v9 = vld [vmem:[#allocation2 + $0x150] sm:$0xff] }
 0x179   : > { %v10109_v32 = vpop.permute.xlu1 %10108  ;;  %v2051_v43 = vsel %vm2026_vm8, %v2018_v20, %v10095_v37  ;;  %v2052_v55 = vsel %vm2026_vm8, %v2019_v50, %v10096_v36  ;;  %v10888_v37 = vld [vmem:[%s14792_s3 + $0x8] sm:$0xff]   ;;  %9117 = vmatprep.subr.bf16.mxu1 %v10887_v28 }
 0x17a   : > { %v10104_v34 = vpop.permute.xlu0 %10103  ;;  %v10111_v54 = vunpack.i.h.bf16 %v10109_v32  ;;  %v10110_v44 = vunpack.i.l.bf16 %v10109_v32 }
 0x17b   : > { %v10106_v48 = vunpack.i.h.bf16 %v10104_v34  ;;  %v10105_v49 = vunpack.i.l.bf16 %v10104_v34 }
 0x17c   : > { %v2086_v60 = vsel %vm2059_vm9, %v2053_v51, %v10110_v44  ;;  %v2087_v10 = vsel %vm2059_vm9, %v2054_v52, %v10111_v54  ;;  %9118 = vmatpush3.bf16.msra.mxu1 %v10888_v37 }
 0x17d   : > { %v10119_v62 = vpop.permute.xlu1 %10118  ;;  %v2084_v4 = vsel %vm2059_vm9, %v2051_v43, %v10105_v49  ;;  %v2085_v61 = vsel %vm2059_vm9, %v2052_v55, %v10106_v48 }
 0x17e   : > { %v10121_v14 = vunpack.i.h.bf16 %v10119_v62  ;;  %v10120_v57 = vunpack.i.l.bf16 %v10119_v62  ;;  %v10114_v59 = vpop.permute.xlu0 %10113 }
 0x17f   : > { %v10116_v47 = vunpack.i.h.bf16 %v10114_v59  ;;  %v10115_v26 = vunpack.i.l.bf16 %v10114_v59  ;;  %v12068_v59 = vld [vmem:[%s14791_s2] ss:$0 sm:$0xff] }
 0x180   : > { %v2119_v39 = vsel %vm2092_vm10, %v2086_v60, %v10120_v57  ;;  %v2120_v63 = vsel %vm2092_vm10, %v2087_v10, %v10121_v14 }
 0x181   : > { %v2117_v1 = vsel %vm2092_vm10, %v2084_v4, %v10115_v26  ;;  %v2118_v2 = vsel %vm2092_vm10, %v2085_v61, %v10116_v47  ;;  %v10129_v3 = vpop.permute.xlu1 %10128  ;;  %v2138_v5 = vpack.c.bf16 %v2120_v63, %v2119_v39  ;;  %v10889_v4 = vld [vmem:[%s14792_s3 + $0x50] sm:$0xff]  }
 0x182   : > { %v10124_v6 = vpop.permute.xlu0 %10123  ;;  %v2137_v31 = vpack.c.bf16 %v2118_v2, %v2117_v1  ;;  %v10131_v11 = vunpack.i.h.bf16 %v10129_v3  ;;  %v10130_v13 = vunpack.i.l.bf16 %v10129_v3  ;;  %v10890_v3 = vld [vmem:[%s14792_s3 + $0x10] sm:$0xff]   ;;  %9119 = vmatprep.subr.bf16.mxu1 %v10889_v4 }
 0x183   : > { %v10126_v41 = vunpack.i.h.bf16 %v10124_v6  ;;  %v10125_v16 = vunpack.i.l.bf16 %v10124_v6  ;;  %9120 = vmatpush3.bf16.msra.mxu1 %v10890_v3  ;;  %v10900_v3 = vld [vmem:[%s14792_s3 + $0x38] sm:$0xff]  }
 0x184   : > { %9454 = vmatprep.mubr.msk.bf16.mxu0 %vm2155_vm11, %v2137_v31  ;;  %v1893_v21 = vsel %vm460_vm0, %v11003_v19, %v10131_v11  ;;  %v1892_v53 = vsel %vm460_vm0, %v11004_v22, %v10130_v13  ;;  %v10891_v22 = vld [vmem:[%s14792_s3 + $0x58] sm:$0xff]  }
 0x185   : > { %9455 = vmatmul.mubr.msk.bf16.gmra.mrb[24].mxu0 %vm2155_vm11, %v2138_v5  ;;  %v10139_v7 = vpop.permute.xlu1 %10138  ;;  %v1891_v30 = vsel %vm460_vm0, %v11005_v42, %v10126_v41  ;;  %v1890_v32 = vsel %vm460_vm0, %v11006_v9, %v10125_v16  ;;  %9121 = vmatprep.subr.bf16.mxu1 %v10891_v22  ;;  %vm6221_vm0 = vcmask 1041409  }
 0x186   : > { %v10134_v8 = vpop.permute.xlu0 %10133  ;;  %v10141_v23 = vunpack.i.h.bf16 %v10139_v7  ;;  %v10140_v24 = vunpack.i.l.bf16 %v10139_v7 }
 0x187   : > { %v10136_v25 = vunpack.i.h.bf16 %v10134_v8  ;;  %v10135_v27 = vunpack.i.l.bf16 %v10134_v8 }
 0x188   : > { %v1925_v49 = vsel %vm1894_vm4, %v1892_v53, %v10140_v24  ;;  %v1926_v20 = vsel %vm1894_vm4, %v1893_v21, %v10141_v23 }
 0x189   : > { %v10149_v29 = vpop.permute.xlu1 %10148  ;;  %v1923_v50 = vsel %vm1894_vm4, %v1890_v32, %v10135_v27  ;;  %v1924_v51 = vsel %vm1894_vm4, %v1891_v30, %v10136_v25  ;;  %v10892_v27 = vld [vmem:[%s14792_s3 + $0x18] sm:$0xff]   ;;  %vm6229_vm4 = vcmask 1045509  }
 0x18a   : > { %v10144_v58 = vpop.permute.xlu0 %10143  ;;  %v10151_v33 = vunpack.i.h.bf16 %v10149_v29  ;;  %v10150_v35 = vunpack.i.l.bf16 %v10149_v29  ;;  %9122 = vmatpush3.bf16.msra.mxu1 %v10892_v27 }
 0x18b   : > { %v10146_v34 = vunpack.i.h.bf16 %v10144_v58  ;;  %v10145_v12 = vunpack.i.l.bf16 %v10144_v58 }
 0x18c   : > { %v1958_v62 = vsel %vm1927_vm5, %v1925_v49, %v10150_v35  ;;  %v1959_v43 = vsel %vm1927_vm5, %v1926_v20, %v10151_v33  ;;  %v10894_v20 = vld [vmem:[%s14792_s3 + $0x20] sm:$0xff]  }
 0x18d   : > { %v10159_v40 = vpop.permute.xlu1 %10158  ;;  %v1956_v60 = vsel %vm1927_vm5, %v1923_v50, %v10145_v12  ;;  %v1957_v10 = vsel %vm1927_vm5, %v1924_v51, %v10146_v34  ;;  %vm6231_vm5 = vcmask 1046534  }
 0x18e   : > { %v10154_v17 = vpop.permute.xlu0 %10153  ;;  %v10161_v38 = vunpack.i.h.bf16 %v10159_v40  ;;  %v10160_v54 = vunpack.i.l.bf16 %v10159_v40 }
 0x18f   : > { %v10156_v44 = vunpack.i.h.bf16 %v10154_v17  ;;  %v10155_v45 = vunpack.i.l.bf16 %v10154_v17 }
 0x190   : > { %v1991_v47 = vsel %vm1960_vm6, %v1958_v62, %v10160_v54  ;;  %v1992_v26 = vsel %vm1960_vm6, %v1959_v43, %v10161_v38  ;;  %v10895_v43 = vld [vmem:[%s14792_s3 + $0x68] sm:$0xff]  }
 0x191   : > { %v10169_v18 = vpop.permute.xlu1 %10168  ;;  %v1989_v61 = vsel %vm1960_vm6, %v1956_v60, %v10155_v45  ;;  %v1990_v39 = vsel %vm1960_vm6, %v1957_v10, %v10156_v44  ;;  %v10893_v44 = vld [vmem:[%s14792_s3 + $0x60] sm:$0xff]   ;;  %vm6233_vm6 = vcmask 1047559  }
 0x192   : > { %v10164_v36 = vpop.permute.xlu0 %10163  ;;  %v10171_v46 = vunpack.i.h.bf16 %v10169_v18  ;;  %v10170_v48 = vunpack.i.l.bf16 %v10169_v18  ;;  %9123 = vmatprep.subr.bf16.mxu1 %v10893_v44 }
 0x193   : > { %v10166_v55 = vunpack.i.h.bf16 %v10164_v36  ;;  %v10165_v14 = vunpack.i.l.bf16 %v10164_v36  ;;  %9124 = vmatpush3.bf16.msra.mxu1 %v10894_v20 }
 0x194   : > { %v2024_v63 = vsel %vm1993_vm7, %v1991_v47, %v10170_v48  ;;  %v2025_v1 = vsel %vm1993_vm7, %v1992_v26, %v10171_v46  ;;  %9125 = vmatprep.subr.bf16.mxu1 %v10895_v43 }
 0x195   : > { %v10179_v52 = vpop.permute.xlu1 %10178  ;;  %v2022_v58 = vsel %vm1993_vm7, %v1989_v61, %v10165_v14  ;;  %v2023_v11 = vsel %vm1993_vm7, %v1990_v39, %v10166_v55  ;;  %v10896_v55 = vld [vmem:[%s14792_s3 + $0x28] sm:$0xff]   ;;  %v10897_v61 = vld [vmem:[%s14792_s3 + $0x70] sm:$0xff]   ;;  %vm6928_vm7 = vcmask 517120  }
 0x196   : > { %v10174_v57 = vpop.permute.xlu0 %10173  ;;  %v10181_v5 = vunpack.i.h.bf16 %v10179_v52  ;;  %v10180_v6 = vunpack.i.l.bf16 %v10179_v52  ;;  %v10898_v39 = vld [vmem:[%s14792_s3 + $0x30] sm:$0xff]  }
 0x197   : > { %v10175_v31 = vunpack.i.l.bf16 %v10174_v57  ;;  %v10176_v13 = vunpack.i.h.bf16 %v10174_v57  ;;  %9126 = vmatpush3.bf16.msra.mxu1 %v10896_v55 }
 0x198   : > { %v9432_v2 = vpop.f32.mrb[0].mxu0  ;;  %v2057_v18 = vsel %vm2026_vm8, %v2024_v63, %v10180_v6  ;;  %v2058_v28 = vsel %vm2026_vm8, %v2025_v1, %v10181_v5  ;;  %9127 = vmatprep.subr.bf16.mxu1 %v10897_v61 }
 0x199   : > { %v2254_v7 = vadd.f32 %v9432_v2, %v12068_v59  ;;  %v2245_v8 = vpop.f32.mrb[1].mxu0  ;;  %v10189_v29 = vpop.permute.xlu1 %10188  ;;  %v2055_v42 = vsel %vm2026_vm8, %v2022_v58, %v10175_v31  ;;  %v2056_v32 = vsel %vm2026_vm8, %v2023_v11, %v10176_v13  ;;  %v10899_v2 = vld [vmem:[%s14792_s3 + $0x78] sm:$0xff]   ;;  %vm8168_vm8 = vcmask 521216  }
 0x19a   : > { %v2246_v40 = vadd.f32 %v12068_v59, %v2245_v8  ;;  %v10184_v56 = vpop.permute.xlu0 %10183  ;;  %v9433_v15 = vpop.f32.mrb[2].mxu0  ;;  %v10191_v16 = vunpack.i.h.bf16 %v10189_v29  ;;  %v10190_v17 = vunpack.i.l.bf16 %v10189_v29 }
 0x19b   : > { %v2374_v41 = vmax.f32 %v2254_v7, 0.0  ;;  %v2257_v19 = vadd.f32 %v9433_v15, %v12068_v59  ;;  %v2248_v21 = vpop.f32.mrb[3].mxu0  ;;  %v10186_v23 = vunpack.i.h.bf16 %v10184_v56  ;;  %v10185_v24 = vunpack.i.l.bf16 %v10184_v56  ;;  %9128 = vmatpush3.bf16.msra.mxu1 %v10898_v39 }
 0x19c   : > { %v2372_v53 = vmax.f32 %v2246_v40, 0.0  ;;  %v2249_v25 = vadd.f32 %v12068_v59, %v2248_v21  ;;  %v2090_v34 = vsel %vm2059_vm9, %v2057_v18, %v10190_v17  ;;  %v2091_v12 = vsel %vm2059_vm9, %v2058_v28, %v10191_v16  ;;  %9129 = vmatprep.subr.bf16.mxu1 %v10899_v2 }
 0x19d   : > { %2463 = vst.msk [vmem:[#allocation3 + $0x31] sm:$0xff] %vm2404_vm12, %v2374_v41  ;;  %v2375_v30 = vmax.f32 %v2257_v19, 0.0  ;;  %v10199_v9 = vpop.permute.xlu1 %10198  ;;  %v2088_v45 = vsel %vm2059_vm9, %v2055_v42, %v10185_v24  ;;  %v2089_v46 = vsel %vm2059_vm9, %v2056_v32, %v10186_v23  ;;  %vm8208_vm9 = vcmask 519168  }
 0x19e   : > { %2461 = vst.msk [vmem:[#allocation3 + $0x19] sm:$0xff] %vm2404_vm12, %v2372_v53  ;;  %v2373_v33 = vmax.f32 %v2249_v25, 0.0  ;;  %v10201_v35 = vunpack.i.h.bf16 %v10199_v9  ;;  %v10200_v36 = vunpack.i.l.bf16 %v10199_v9  ;;  %v10194_v37 = vpop.permute.xlu0 %10193 }
 0x19f   : > { %2464 = vst.msk [vmem:[#allocation3 + $0x39] sm:$0xff] %vm2404_vm12, %v2375_v30  ;;  %v10196_v38 = vunpack.i.h.bf16 %v10194_v37  ;;  %v10195_v54 = vunpack.i.l.bf16 %v10194_v37  ;;  %9130 = vmatpush3.bf16.msra.mxu1 %v10900_v3 }
 0x1a0   : > { %2462 = vst.msk [vmem:[#allocation3 + $0x21] sm:$0xff] %vm2404_vm12, %v2373_v33  ;;  %v2123_v48 = vsel %vm2092_vm10, %v2090_v34, %v10200_v36  ;;  %v2124_v49 = vsel %vm2092_vm10, %v2091_v12, %v10201_v35 }
 0x1a1   : > { %v2121_v50 = vsel %vm2092_vm10, %v2088_v45, %v10195_v54  ;;  %v2122_v51 = vsel %vm2092_vm10, %v2089_v46, %v10196_v38  ;;  %v2140_v52 = vpack.c.bf16 %v2124_v49, %v2123_v48  ;;  %vm11039_vm10 = vmmov 0  }
 0x1a2   : > { %v2139_v62 = vpack.c.bf16 %v2122_v51, %v2121_v50 }
 0x1a4   : > { %9458 = vmatprep.mubr.msk.bf16.mxu0 %vm2155_vm11, %v2139_v62  ;;  %v12126_v14 = vld [vmem:[#allocation3 + $0x30] sm:$0xff] }
 0x1a5   : > { %9459 = vmatmul.mubr.msk.bf16.gmra.mrb[28].mxu0 %vm2155_vm11, %v2140_v52  ;;  %v12163_v63 = vld [vmem:[#allocation3 + $0x31] sm:$0xff]  ;;  %v12187_v13 = vld [vmem:[#allocation3 + $0x19] sm:$0xff]  ;;  %vm8810_vm11 = vcmask 27648  }
 0x1a6   : > { %v2750_v57 = vld [vmem:[#allocation3 + $0x32] sm:$0xff]  ;;  %v2751_v60 = vld [vmem:[#allocation3 + $0x3a] sm:$0xff] }
 0x1a7   : > { %v12128_v10 = vld [vmem:[#allocation3 + $0x38] sm:$0xff]  ;;  %v3746_v47 = vpack.c.bf16 %v2751_v60, %v2750_v57  ;;  %v10222_v5 = vpack.i.bf16 %v2751_v60, %v2750_v57  ;;  %v2654_v31 = vld [vmem:[#allocation3 + $0x22] sm:$0xff] }
 0x1a8   : > { %v10212_v26 = vpack.i.bf16 %v12128_v10, %v12126_v14  ;;  %v12152_v4 = vld [vmem:[#allocation3 + $0x39] sm:$0xff]  ;;  %v12184_v11 = vld [vmem:[#allocation3 + $0x21] sm:$0xff] }
 0x1a9   : > { %9466 = vmatprep.mubr.msk.bf16.mxu0 %vm2404_vm12, %v3746_v47  ;;  %v10217_v1 = vpack.i.bf16 %v12152_v4, %v12163_v63  ;;  %v2653_v6 = vld [vmem:[#allocation3 + $0x1a] sm:$0xff]  ;;  %v10252_v56 = vpack.i.bf16 %v12184_v11, %v12187_v13 }
 0x1aa   : > { %10213 = vrot.lane.b32.xlu0 %v10212_v26, %s11036_s20  ;;  %10228 = vrot.lane.b32.xlu1 %v10212_v26, %s11037_s29  ;;  %v12176_v7 = vld [vmem:[#allocation3 + $0x20] sm:$0xff]  ;;  %v10242_v8 = vpack.i.bf16 %v2654_v31, %v2653_v6  ;;  %v12179_v29 = vld [vmem:[#allocation3 + $0x18] sm:$0xff] }
 0x1ab   : > { %v10247_v58 = vpack.i.bf16 %v12176_v7, %v12179_v29 }
 0x1ae   : > { %10218 = vrot.lane.b32.xlu0 %v10217_v1, %s11037_s29  ;;  %10233 = vrot.lane.b32.xlu1 %v10217_v1, %s11035_s19 }
 0x1b2   : > { %10223 = vrot.lane.b32.xlu0 %v10222_v5, %s11035_s19  ;;  %10238 = vrot.lane.b32.xlu1 %v10222_v5, %s11036_s20 }
 0x1b6   : > { %10243 = vrot.lane.b32.xlu0 %v10242_v8, %s11035_s19  ;;  %10248 = vrot.lane.b32.xlu1 %v10247_v58, %s11037_s29 }
 0x1b8   : > { %v9436_v40 = vpop.f32.mrb[4].mxu0 }
 0x1b9   : > { %v2270_v15 = vadd.f32 %v9436_v40, %v12068_v59  ;;  %v2261_v41 = vpop.f32.mrb[5].mxu0 }
 0x1ba   : > { %v2262_v16 = vadd.f32 %v12068_v59, %v2261_v41  ;;  %10253 = vrot.lane.b32.xlu1 %v10252_v56, %s11035_s19  ;;  %v9437_v17 = vpop.f32.mrb[6].mxu0 }
 0x1bb   : > { %v2378_v19 = vmax.f32 %v2270_v15, 0.0  ;;  %v2273_v21 = vadd.f32 %v9437_v17, %v12068_v59  ;;  %v2264_v22 = vpop.f32.mrb[7].mxu0 }
 0x1bc   : > { %v2376_v53 = vmax.f32 %v2262_v16, 0.0  ;;  %v2265_v23 = vadd.f32 %v12068_v59, %v2264_v22 }
 0x1bd   : > { %2467 = vst.msk [vmem:[#allocation3 + $0x61] sm:$0xff] %vm2404_vm12, %v2378_v19  ;;  %v2379_v24 = vmax.f32 %v2273_v21, 0.0 }
 0x1be   : > { %2465 = vst.msk [vmem:[#allocation3 + $0x49] sm:$0xff] %vm2404_vm12, %v2376_v53  ;;  %v2377_v25 = vmax.f32 %v2265_v23, 0.0  ;;  %10258 = vrot.lane.b32.xlu1 %v10242_v8, %s11036_s20 }
 0x1bf   : > { %2468 = vst.msk [vmem:[#allocation3 + $0x69] sm:$0xff] %vm2404_vm12, %v2379_v24 }
 0x1c0   : > { %2466 = vst.msk [vmem:[#allocation3 + $0x51] sm:$0xff] %vm2404_vm12, %v2377_v25 }
 0x1c4   : > { %v12201_v27 = vld [vmem:[#allocation3 + $0x60] sm:$0xff] }
 0x1c5   : > { %v12212_v37 = vld [vmem:[#allocation3 + $0x61] sm:$0xff]  ;;  %v12231_v46 = vld [vmem:[#allocation3 + $0x49] sm:$0xff] }
 0x1c6   : > { %v12203_v18 = vld [vmem:[#allocation3 + $0x68] sm:$0xff] }
 0x1c7   : > { %v2754_v28 = vld [vmem:[#allocation3 + $0x62] sm:$0xff]  ;;  %v2755_v42 = vld [vmem:[#allocation3 + $0x6a] sm:$0xff]  ;;  %v10262_v30 = vpack.i.bf16 %v12203_v18, %v12201_v27  ;;  %v2753_v32 = vld [vmem:[#allocation3 + $0x52] sm:$0xff] }
 0x1c8   : > { %v2752_v9 = vld [vmem:[#allocation3 + $0x4a] sm:$0xff]  ;;  %v3752_v36 = vpack.c.bf16 %v2755_v42, %v2754_v28  ;;  %v10272_v12 = vpack.i.bf16 %v2755_v42, %v2754_v28 }
 0x1c9   : > { %v3749_v33 = vpack.c.bf16 %v2753_v32, %v2752_v9  ;;  %v12207_v35 = vld [vmem:[#allocation3 + $0x69] sm:$0xff]  ;;  %10263 = vrot.lane.b32.xlu0 %v10262_v30, %s11036_s20  ;;  %10278 = vrot.lane.b32.xlu1 %v10262_v30, %s11037_s29  ;;  %v12227_v45 = vld [vmem:[#allocation3 + $0x51] sm:$0xff]  ;;  %v10302_v57 = vpack.i.bf16 %v2753_v32, %v2752_v9 }
 0x1ca   : > { %v10267_v34 = vpack.i.bf16 %v12207_v35, %v12212_v37  ;;  %v12219_v38 = vld [vmem:[#allocation3 + $0x50] sm:$0xff]  ;;  %v12223_v54 = vld [vmem:[#allocation3 + $0x48] sm:$0xff]  ;;  %v10297_v48 = vpack.i.bf16 %v12227_v45, %v12231_v46 }
 0x1cb   : > { %9467 = vmatmul.mubr.msk.bf16.vlgmr.msra.gmra.mrb[32].mxu0 %vm2404_vm12, %v3749_v33  ;;  %v10292_v44 = vpack.i.bf16 %v12219_v38, %v12223_v54 }
 0x1cc   : > { %9470 = vmatprep.mubr.msk.bf16.mxu0 %vm2404_vm12, %v3752_v36 }
 0x1cd   : > { %10268 = vrot.lane.b32.xlu0 %v10267_v34, %s11037_s29  ;;  %10283 = vrot.lane.b32.xlu1 %v10267_v34, %s11035_s19 }
 0x1d1   : > { %10273 = vrot.lane.b32.xlu0 %v10272_v12, %s11035_s19  ;;  %10288 = vrot.lane.b32.xlu1 %v10272_v12, %s11036_s20 }
 0x1d5   : > { %10293 = vrot.lane.b32.xlu0 %v10292_v44, %s11036_s20  ;;  %10308 = vrot.lane.b32.xlu1 %v10292_v44, %s11037_s29 }
 0x1d8   : > { %v9440_v49 = vpop.f32.mrb[8].mxu0 }
 0x1d9   : > { %v2286_v20 = vadd.f32 %v9440_v49, %v12068_v59  ;;  %v2277_v50 = vpop.f32.mrb[9].mxu0  ;;  %10298 = vrot.lane.b32.xlu0 %v10297_v48, %s11037_s29  ;;  %10313 = vrot.lane.b32.xlu1 %v10297_v48, %s11035_s19 }
 0x1da   : > { %v2278_v51 = vadd.f32 %v12068_v59, %v2277_v50  ;;  %v9441_v52 = vpop.f32.mrb[10].mxu0 }
 0x1db   : > { %v2382_v62 = vmax.f32 %v2286_v20, 0.0  ;;  %v2289_v43 = vadd.f32 %v9441_v52, %v12068_v59  ;;  %v2280_v55 = vpop.f32.mrb[11].mxu0 }
 0x1dc   : > { %v2380_v60 = vmax.f32 %v2278_v51, 0.0  ;;  %v2281_v47 = vadd.f32 %v12068_v59, %v2280_v55 }
 0x1dd   : > { %2471 = vst.msk [vmem:[#allocation3 + $0x91] sm:$0xff] %vm2404_vm12, %v2382_v62  ;;  %v2383_v26 = vmax.f32 %v2289_v43, 0.0  ;;  %10303 = vrot.lane.b32.xlu0 %v10302_v57, %s11035_s19  ;;  %10318 = vrot.lane.b32.xlu1 %v10302_v57, %s11036_s20 }
 0x1de   : > { %2469 = vst.msk [vmem:[#allocation3 + $0x79] sm:$0xff] %vm2404_vm12, %v2380_v60  ;;  %v2381_v61 = vmax.f32 %v2281_v47, 0.0 }
 0x1df   : > { %2472 = vst.msk [vmem:[#allocation3 + $0x99] sm:$0xff] %vm2404_vm12, %v2383_v26 }
 0x1e0   : > { %2470 = vst.msk [vmem:[#allocation3 + $0x81] sm:$0xff] %vm2404_vm12, %v2381_v61  ;;  %v10204_v61 = vpop.permute.xlu1 %10203 }
 0x1e4   : > { %v2694_v39 = vld [vmem:[#allocation3 + $0x90] sm:$0xff] }
 0x1e5   : > { %v12252_v56 = vld [vmem:[#allocation3 + $0x91] sm:$0xff]  ;;  %v2724_v22 = vld [vmem:[#allocation3 + $0x79] sm:$0xff] }
 0x1e6   : > { %v2695_v1 = vld [vmem:[#allocation3 + $0x98] sm:$0xff] }
 0x1e7   : > { %v2758_v2 = vld [vmem:[#allocation3 + $0x92] sm:$0xff]  ;;  %v2759_v3 = vld [vmem:[#allocation3 + $0x9a] sm:$0xff]  ;;  %v10322_v5 = vpack.i.bf16 %v2695_v1, %v2694_v39  ;;  %v2757_v31 = vld [vmem:[#allocation3 + $0x82] sm:$0xff] }
 0x1e8   : > { %v2756_v6 = vld [vmem:[#allocation3 + $0x7a] sm:$0xff]  ;;  %v3758_v40 = vpack.c.bf16 %v2759_v3, %v2758_v2  ;;  %v10332_v41 = vpack.i.bf16 %v2759_v3, %v2758_v2 }
 0x1e9   : > { %v3755_v8 = vpack.c.bf16 %v2757_v31, %v2756_v6  ;;  %v12247_v58 = vld [vmem:[#allocation3 + $0x99] sm:$0xff]  ;;  %10323 = vrot.lane.b32.xlu0 %v10322_v5, %s11036_s20  ;;  %10338 = vrot.lane.b32.xlu1 %v10322_v5, %s11037_s29  ;;  %v2725_v21 = vld [vmem:[#allocation3 + $0x81] sm:$0xff]  ;;  %v10362_v33 = vpack.i.bf16 %v2757_v31, %v2756_v6  ;;  %v10209_v5 = vpop.permute.xlu1 %10208 }
 0x1ea   : > { %v10327_v15 = vpack.i.bf16 %v12247_v58, %v12252_v56  ;;  %v2693_v16 = vld [vmem:[#allocation3 + $0x80] sm:$0xff]  ;;  %v2692_v17 = vld [vmem:[#allocation3 + $0x78] sm:$0xff]  ;;  %v10357_v53 = vpack.i.bf16 %v2725_v21, %v2724_v22 }
 0x1eb   : > { %9471 = vmatmul.mubr.msk.bf16.gmra.mrb[36].mxu0 %vm2404_vm12, %v3755_v8  ;;  %v10352_v19 = vpack.i.bf16 %v2693_v16, %v2692_v17 }
 0x1ec   : > { %9474 = vmatprep.mubr.msk.bf16.mxu0 %vm2404_vm12, %v3758_v40 }
 0x1ed   : > { %10328 = vrot.lane.b32.xlu0 %v10327_v15, %s11037_s29  ;;  %10343 = vrot.lane.b32.xlu1 %v10327_v15, %s11035_s19 }
 0x1f1   : > { %10333 = vrot.lane.b32.xlu0 %v10332_v41, %s11035_s19  ;;  %10348 = vrot.lane.b32.xlu1 %v10332_v41, %s11036_s20 }
 0x1f5   : > { %10353 = vrot.lane.b32.xlu0 %v10352_v19, %s11036_s20  ;;  %10368 = vrot.lane.b32.xlu1 %v10352_v19, %s11037_s29 }
 0x1f8   : > { %v9444_v23 = vpop.f32.mrb[12].mxu0 }
 0x1f9   : > { %v2302_v24 = vadd.f32 %v9444_v23, %v12068_v59  ;;  %v2293_v25 = vpop.f32.mrb[13].mxu0  ;;  %10358 = vrot.lane.b32.xlu0 %v10357_v53, %s11037_s29  ;;  %10373 = vrot.lane.b32.xlu1 %v10357_v53, %s11035_s19 }
 0x1fa   : > { %v2294_v28 = vadd.f32 %v12068_v59, %v2293_v25  ;;  %v9445_v42 = vpop.f32.mrb[14].mxu0 }
 0x1fb   : > { %v2386_v30 = vmax.f32 %v2302_v24, 0.0  ;;  %v2305_v9 = vadd.f32 %v9445_v42, %v12068_v59  ;;  %v2296_v32 = vpop.f32.mrb[15].mxu0 }
 0x1fc   : > { %v2384_v36 = vmax.f32 %v2294_v28, 0.0  ;;  %v2297_v34 = vadd.f32 %v12068_v59, %v2296_v32  ;;  %v10205_v32 = vunpack.i.l.bf16 %v10204_v61 }
 0x1fd   : > { %2475 = vst.msk [vmem:[#allocation3 + $0xc1] sm:$0xff] %vm2404_vm12, %v2386_v30  ;;  %v2387_v12 = vmax.f32 %v2305_v9, 0.0  ;;  %10363 = vrot.lane.b32.xlu0 %v10362_v33, %s11035_s19  ;;  %10378 = vrot.lane.b32.xlu1 %v10362_v33, %s11036_s20  ;;  %v10206_v9 = vunpack.i.h.bf16 %v10204_v61 }
 0x1fe   : > { %2473 = vst.msk [vmem:[#allocation3 + $0xa9] sm:$0xff] %vm2404_vm12, %v2384_v36  ;;  %v2385_v44 = vmax.f32 %v2297_v34, 0.0  ;;  %v2493_v36 = vld [vmem:[#allocation3] sm:$0xff]  ;;  %v2494_v34 = vld [vmem:[#allocation3 + $0x8] sm:$0xff] }
 0x1ff   : > { %2476 = vst.msk [vmem:[#allocation3 + $0xc9] sm:$0xff] %vm2404_vm12, %v2387_v12  ;;  %v10211_v12 = vunpack.i.h.bf16 %v10209_v5 }
 0x200   : > { %2474 = vst.msk [vmem:[#allocation3 + $0xb1] sm:$0xff] %vm2404_vm12, %v2385_v44  ;;  %v10210_v44 = vunpack.i.l.bf16 %v10209_v5 }
 0x204   : > { %v2698_v48 = vld [vmem:[#allocation3 + $0xc0] sm:$0xff] }
 0x205   : > { %v2730_v60 = vld [vmem:[#allocation3 + $0xc1] sm:$0xff]  ;;  %v2728_v6 = vld [vmem:[#allocation3 + $0xa9] sm:$0xff] }
 0x206   : > { %v2699_v49 = vld [vmem:[#allocation3 + $0xc8] sm:$0xff] }
 0x207   : > { %v2762_v20 = vld [vmem:[#allocation3 + $0xc2] sm:$0xff]  ;;  %v2763_v50 = vld [vmem:[#allocation3 + $0xca] sm:$0xff]  ;;  %v10382_v51 = vpack.i.bf16 %v2699_v49, %v2698_v48  ;;  %v2761_v62 = vld [vmem:[#allocation3 + $0xb2] sm:$0xff]  ;;  %v3551_v49 = vsel %vm2404_vm12, %v2494_v34, %v10206_v9 }
 0x208   : > { %v2760_v52 = vld [vmem:[#allocation3 + $0xaa] sm:$0xff]  ;;  %v3764_v57 = vpack.c.bf16 %v2763_v50, %v2762_v20  ;;  %v10392_v26 = vpack.i.bf16 %v2763_v50, %v2762_v20  ;;  %v3550_v20 = vsel %vm2404_vm12, %v2493_v36, %v10205_v32 }
 0x209   : > { %v3761_v43 = vpack.c.bf16 %v2761_v62, %v2760_v52  ;;  %v2731_v55 = vld [vmem:[#allocation3 + $0xc9] sm:$0xff]  ;;  %10383 = vrot.lane.b32.xlu0 %v10382_v51, %s11036_s20  ;;  %10398 = vrot.lane.b32.xlu1 %v10382_v51, %s11037_s29  ;;  %v2729_v3 = vld [vmem:[#allocation3 + $0xb1] sm:$0xff]  ;;  %v10422_v53 = vpack.i.bf16 %v2761_v62, %v2760_v52 }
 0x20a   : > { %v10387_v47 = vpack.i.bf16 %v2731_v55, %v2730_v60  ;;  %v2697_v39 = vld [vmem:[#allocation3 + $0xb0] sm:$0xff]  ;;  %v2696_v1 = vld [vmem:[#allocation3 + $0xa8] sm:$0xff]  ;;  %v10417_v31 = vpack.i.bf16 %v2729_v3, %v2728_v6 }
 0x20b   : > { %9475 = vmatmul.mubr.msk.bf16.gmra.mrb[40].mxu0 %vm2404_vm12, %v3761_v43  ;;  %v10412_v2 = vpack.i.bf16 %v2697_v39, %v2696_v1  ;;  %v3583_v39 = vsel %vm3582_vm14, %v3550_v20, %v10210_v44  ;;  %v3584_v1 = vsel %vm3582_vm14, %v3551_v49, %v10211_v12 }
 0x20c   : > { %9478 = vmatprep.mubr.msk.bf16.mxu0 %vm2404_vm12, %v3764_v57 }
 0x20d   : > { %10388 = vrot.lane.b32.xlu0 %v10387_v47, %s11037_s29  ;;  %10403 = vrot.lane.b32.xlu1 %v10387_v47, %s11035_s19 }
 0x211   : > { %10393 = vrot.lane.b32.xlu0 %v10392_v26, %s11035_s19  ;;  %10408 = vrot.lane.b32.xlu1 %v10392_v26, %s11036_s20 }
 0x215   : > { %10413 = vrot.lane.b32.xlu0 %v10412_v2, %s11036_s20  ;;  %10428 = vrot.lane.b32.xlu1 %v10412_v2, %s11037_s29 }
 0x218   : > { %v9448_v8 = vpop.f32.mrb[16].mxu0 }
 0x219   : > { %v2318_v40 = vadd.f32 %v9448_v8, %v12068_v59  ;;  %v2309_v15 = vpop.f32.mrb[17].mxu0  ;;  %10418 = vrot.lane.b32.xlu0 %v10417_v31, %s11037_s29  ;;  %10433 = vrot.lane.b32.xlu1 %v10417_v31, %s11035_s19 }
 0x21a   : > { %v2310_v41 = vadd.f32 %v12068_v59, %v2309_v15  ;;  %v9449_v16 = vpop.f32.mrb[18].mxu0 }
 0x21b   : > { %v2390_v17 = vmax.f32 %v2318_v40, 0.0  ;;  %v2321_v19 = vadd.f32 %v9449_v16, %v12068_v59  ;;  %v2312_v22 = vpop.f32.mrb[19].mxu0 }
 0x21c   : > { %v10214_v21 = vpop.permute.xlu0 %10213  ;;  %v2388_v23 = vmax.f32 %v2310_v41, 0.0  ;;  %v12290_v24 = vpop.permute.xlu1 %10228  ;;  %v2313_v25 = vadd.f32 %v12068_v59, %v2312_v22 }
 0x21d   : > { %2479 = vst.msk [vmem:[#allocation3 + $0xf1] sm:$0xff] %vm2404_vm12, %v2390_v17  ;;  %v2391_v28 = vmax.f32 %v2321_v19, 0.0  ;;  %10423 = vrot.lane.b32.xlu0 %v10422_v53, %s11035_s19  ;;  %10438 = vrot.lane.b32.xlu1 %v10422_v53, %s11036_s20  ;;  %v10216_v55 = vunpack.i.h.bf16 %v10214_v21  ;;  %v10215_v2 = vunpack.i.l.bf16 %v10214_v21 }
 0x21e   : > { %2477 = vst.msk [vmem:[#allocation3 + $0xd9] sm:$0xff] %vm2404_vm12, %v2388_v23  ;;  %v2389_v42 = vmax.f32 %v2313_v25, 0.0 }
 0x21f   : > { %2480 = vst.msk [vmem:[#allocation3 + $0xf9] sm:$0xff] %vm2404_vm12, %v2391_v28 }
 0x220   : > { %v10219_v30 = vpop.permute.xlu0 %10218  ;;  %2478 = vst.msk [vmem:[#allocation3 + $0xe1] sm:$0xff] %vm2404_vm12, %v2389_v42  ;;  %v12299_v33 = vpop.permute.xlu1 %10233 }
 0x221   : > { %v10221_v8 = vunpack.i.h.bf16 %v10219_v30  ;;  %v10220_v17 = vunpack.i.l.bf16 %v10219_v30 }
 0x224   : > { %v12301_v48 = vpop.permute.xlu0 %10223  ;;  %v12305_v50 = vpop.permute.xlu1 %10238  ;;  %v2702_v51 = vld [vmem:[#allocation3 + $0xf0] sm:$0xff] }
 0x225   : > { %v2734_v16 = vld [vmem:[#allocation3 + $0xf1] sm:$0xff]  ;;  %v12337_v49 = vld [vmem:[#allocation3 + $0xd9] sm:$0xff] }
 0x226   : > { %v2703_v52 = vld [vmem:[#allocation3 + $0xf8] sm:$0xff] }
 0x227   : > { %v2766_v62 = vld [vmem:[#allocation3 + $0xf2] sm:$0xff]  ;;  %v2767_v43 = vld [vmem:[#allocation3 + $0xfa] sm:$0xff]  ;;  %v10442_v60 = vpack.i.bf16 %v2703_v52, %v2702_v51  ;;  %v2765_v26 = vld [vmem:[#allocation3 + $0xe2] sm:$0xff] }
 0x228   : > { %v10244_v57 = vpop.permute.xlu0 %10243  ;;  %v2764_v47 = vld [vmem:[#allocation3 + $0xda] sm:$0xff]  ;;  %v10249_v6 = vpop.permute.xlu1 %10248  ;;  %v3770_v41 = vpack.c.bf16 %v2767_v43, %v2766_v62  ;;  %v10452_v9 = vpack.i.bf16 %v2767_v43, %v2766_v62 }
 0x229   : > { %v2735_v61 = vld [vmem:[#allocation3 + $0xf9] sm:$0xff]  ;;  %v10246_v3 = vunpack.i.h.bf16 %v10244_v57  ;;  %v10245_v5 = vunpack.i.l.bf16 %v10244_v57  ;;  %v3767_v31 = vpack.c.bf16 %v2765_v26, %v2764_v47  ;;  %v10251_v40 = vunpack.i.h.bf16 %v10249_v6  ;;  %10443 = vrot.lane.b32.xlu0 %v10442_v60, %s11036_s20  ;;  %10458 = vrot.lane.b32.xlu1 %v10442_v60, %s11037_s29  ;;  %v12333_v44 = vld [vmem:[#allocation3 + $0xe1] sm:$0xff] }
 0x22a   : > { %v10250_v15 = vunpack.i.l.bf16 %v10249_v6  ;;  %v10447_v19 = vpack.i.bf16 %v2735_v61, %v2734_v16  ;;  %v12325_v32 = vld [vmem:[#allocation3 + $0xe0] sm:$0xff]  ;;  %v12329_v34 = vld [vmem:[#allocation3 + $0xd8] sm:$0xff]  ;;  %v10477_v20 = vpack.i.bf16 %v12333_v44, %v12337_v49 }
 0x22b   : > { %9479 = vmatmul.mubr.msk.bf16.gmra.mrb[44].mxu0 %vm2404_vm12, %v3767_v31  ;;  %v3648_v21 = vsel %vm2404_vm12, %v12187_v13, %v10245_v5  ;;  %v3649_v22 = vsel %vm2404_vm12, %v12184_v11, %v10246_v3  ;;  %v3617_v28 = vsel %vm3615_vm15, %v3584_v1, %v10251_v40  ;;  %v10472_v12 = vpack.i.bf16 %v12325_v32, %v12329_v34 }
 0x22c   : > { %9482 = vmatprep.mubr.msk.bf16.mxu0 %vm2404_vm12, %v3770_v41  ;;  %v3680_v53 = vsel %vm3582_vm14, %v3648_v21, %v10215_v2  ;;  %v3681_v23 = vsel %vm3582_vm14, %v3649_v22, %v10216_v55  ;;  %v3616_v25 = vsel %vm3615_vm15, %v3583_v39, %v10250_v15  ;;  %v10254_v36 = vpop.permute.xlu1 %10253  ;;  %v10482_v2 = vpack.i.bf16 %v2765_v26, %v2764_v47 }
 0x22d   : > { %v3712_v42 = vsel %vm3615_vm15, %v3680_v53, %v10220_v17  ;;  %v3713_v30 = vsel %vm3615_vm15, %v3681_v23, %v10221_v8  ;;  %10448 = vrot.lane.b32.xlu0 %v10447_v19, %s11037_s29  ;;  %10463 = vrot.lane.b32.xlu1 %v10447_v19, %s11035_s19  ;;  %v3744_v11 = vpack.c.bf16 %v3617_v28, %v3616_v25  ;;  %v10256_v15 = vunpack.i.h.bf16 %v10254_v36 }
 0x22e   : > { %v3745_v13 = vpack.c.bf16 %v3713_v30, %v3712_v42  ;;  %v10255_v41 = vunpack.i.l.bf16 %v10254_v36  ;;  %v10225_v25 = vunpack.i.l.bf16 %v12301_v48 }
 0x22f   : > { %v3553_v36 = vsel %vm2404_vm12, %v12176_v7, %v10256_v15 }
 0x230   : > { %4023 = vmatprep.mubr.bf16.mxu1 %v3745_v13  ;;  %v10259_v51 = vpop.permute.xlu1 %10258 }
 0x231   : > { %4024 = vmatmul.mubr.bf16.vlgmr.msra.gmra.mrb[0].mxu1 %v3744_v11  ;;  %10453 = vrot.lane.b32.xlu0 %v10452_v9, %s11035_s19  ;;  %v10260_v16 = vunpack.i.l.bf16 %v10259_v51  ;;  %v10261_v19 = vunpack.i.h.bf16 %v10259_v51  ;;  %v10226_v11 = vunpack.i.h.bf16 %v12301_v48  ;;  %v10230_v48 = vunpack.i.l.bf16 %v12290_v24 }
 0x232   : > { %10468 = vrot.lane.b32.xlu1 %v10452_v9, %s11036_s20  ;;  %v3552_v9 = vsel %vm2404_vm12, %v12179_v29, %v10255_v41  ;;  %v10236_v41 = vunpack.i.h.bf16 %v12299_v33 }
 0x233   : > { %v3586_v7 = vsel %vm3582_vm14, %v3553_v36, %v10261_v19  ;;  %v10241_v19 = vunpack.i.h.bf16 %v12305_v50 }
 0x235   : > { %10473 = vrot.lane.b32.xlu0 %v10472_v12, %s11036_s20 }
 0x236   : > { %10488 = vrot.lane.b32.xlu1 %v10472_v12, %s11037_s29 }
 0x238   : > { %v9452_v52 = vpop.f32.mrb[20].mxu0 }
 0x239   : > { %v2334_v62 = vadd.f32 %v9452_v52, %v12068_v59  ;;  %v2325_v43 = vpop.f32.mrb[21].mxu0  ;;  %10478 = vrot.lane.b32.xlu0 %v10477_v20, %s11037_s29 }
 0x23a   : > { %10493 = vrot.lane.b32.xlu1 %v10477_v20, %s11035_s19  ;;  %v2326_v55 = vadd.f32 %v12068_v59, %v2325_v43  ;;  %v9453_v57 = vpop.f32.mrb[22].mxu0  ;;  %v3585_v43 = vsel %vm3582_vm14, %v3552_v9, %v10260_v16 }
 0x23b   : > { %v2394_v60 = vmax.f32 %v2334_v62, 0.0  ;;  %v2337_v61 = vadd.f32 %v9453_v57, %v12068_v59  ;;  %v2328_v39 = vpop.f32.mrb[23].mxu0  ;;  %v12346_v1 = vpop.permute.xlu0 %10263  ;;  %v10235_v57 = vunpack.i.l.bf16 %v12299_v33 }
 0x23c   : > { %v2392_v3 = vmax.f32 %v2326_v55, 0.0  ;;  %v2329_v5 = vadd.f32 %v12068_v59, %v2328_v39  ;;  %v12349_v6 = vpop.permute.xlu1 %10278  ;;  %v10231_v55 = vunpack.i.h.bf16 %v12290_v24  ;;  %v10266_v33 = vunpack.i.h.bf16 %v12346_v1 }
 0x23d   : > { %2483 = vst.msk [vmem:[#allocation3 + $0x121] sm:$0xff] %vm2404_vm12, %v2394_v60  ;;  %v2395_v31 = vmax.f32 %v2337_v61, 0.0  ;;  %10483 = vrot.lane.b32.xlu0 %v10482_v2, %s11035_s19  ;;  %v3650_v60 = vsel %vm2404_vm12, %v12163_v63, %v10225_v25 }
 0x23e   : > { %10498 = vrot.lane.b32.xlu1 %v10482_v2, %s11036_s20  ;;  %2481 = vst.msk [vmem:[#allocation3 + $0x109] sm:$0xff] %vm2404_vm12, %v2392_v3  ;;  %v2393_v8 = vmax.f32 %v2329_v5, 0.0  ;;  %v3651_v2 = vsel %vm2404_vm12, %v12152_v4, %v10226_v11  ;;  %v3619_v15 = vsel %vm3615_vm15, %v3586_v7, %v10231_v55 }
 0x23f   : > { %2484 = vst.msk [vmem:[#allocation3 + $0x129] sm:$0xff] %vm2404_vm12, %v2395_v31  ;;  %v12356_v40 = vpop.permute.xlu0 %10268 }
 0x240   : > { %2482 = vst.msk [vmem:[#allocation3 + $0x111] sm:$0xff] %vm2404_vm12, %v2393_v8  ;;  %v12359_v47 = vpop.permute.xlu1 %10283  ;;  %v3618_v8 = vsel %vm3615_vm15, %v3585_v43, %v10230_v48  ;;  %v3555_v43 = vsel %vm2404_vm12, %v12128_v10, %v10236_v41 }
 0x241   : > { %v3747_v36 = vpack.c.bf16 %v3619_v15, %v3618_v8 }
 0x243   : > { %v12361_v26 = vpop.permute.xlu0 %10273 }
 0x244   : > { %v2706_v17 = vld [vmem:[#allocation3 + $0x120] sm:$0xff]  ;;  %v12363_v21 = vpop.permute.xlu1 %10288 }
 0x245   : > { %v12382_v29 = vld [vmem:[#allocation3 + $0x121] sm:$0xff] }
 0x246   : > { %v2707_v22 = vld [vmem:[#allocation3 + $0x128] sm:$0xff] }
 0x247   : > { %v2770_v53 = vld [vmem:[#allocation3 + $0x122] sm:$0xff]  ;;  %v2771_v23 = vld [vmem:[#allocation3 + $0x12a] sm:$0xff]  ;;  %v10294_v28 = vpop.permute.xlu0 %10293  ;;  %v10502_v42 = vpack.i.bf16 %v2707_v22, %v2706_v17  ;;  %v12368_v13 = vld [vmem:[#allocation3 + $0x112] sm:$0xff]  ;;  %v3554_v17 = vsel %vm2404_vm12, %v12126_v14, %v10235_v57  ;;  %v10271_v14 = vunpack.i.h.bf16 %v12356_v40 }
 0x248   : > { %v12366_v30 = vld [vmem:[#allocation3 + $0x10a] sm:$0xff]  ;;  %v10296_v51 = vunpack.i.h.bf16 %v10294_v28  ;;  %v10295_v52 = vunpack.i.l.bf16 %v10294_v28  ;;  %v3776_v62 = vpack.c.bf16 %v2771_v23, %v2770_v53  ;;  %v10309_v3 = vpop.permute.xlu1 %10308  ;;  %v10512_v25 = vpack.i.bf16 %v2771_v23, %v2770_v53 }
 0x249   : > { %v3773_v12 = vpack.c.bf16 %v12368_v13, %v12366_v30  ;;  %v2739_v20 = vld [vmem:[#allocation3 + $0x129] sm:$0xff]  ;;  %10503 = vrot.lane.b32.xlu0 %v10502_v42, %s11036_s20  ;;  %10518 = vrot.lane.b32.xlu1 %v10502_v42, %s11037_s29  ;;  %v10240_v42 = vunpack.i.l.bf16 %v12305_v50  ;;  %v10270_v53 = vunpack.i.l.bf16 %v12356_v40 }
 0x24a   : > { %v10507_v39 = vpack.i.bf16 %v2739_v20, %v12382_v29  ;;  %v3682_v24 = vsel %vm3582_vm14, %v3650_v60, %v10295_v52  ;;  %v3683_v63 = vsel %vm3582_vm14, %v3651_v2, %v10296_v51  ;;  %v10265_v20 = vunpack.i.l.bf16 %v12346_v1  ;;  %v12420_v1 = vld [vmem:[#allocation3 + $0x108] sm:$0xff] }
 0x24b   : > { %9483 = vmatmul.mubr.msk.bf16.gmra.mrb[48].mxu0 %vm2404_vm12, %v3773_v12  ;;  %v10299_v61 = vpop.permute.xlu0 %10298  ;;  %v12406_v12 = vld [vmem:[#allocation3 + $0x110] sm:$0xff]  ;;  %v10311_v51 = vunpack.i.h.bf16 %v10309_v3  ;;  %v10310_v52 = vunpack.i.l.bf16 %v10309_v3  ;;  %v3587_v57 = vsel %vm3582_vm14, %v3554_v17, %v10240_v42  ;;  %v3588_v60 = vsel %vm3582_vm14, %v3555_v43, %v10241_v19 }
 0x24c   : > { %9486 = vmatprep.mubr.msk.bf16.mxu0 %vm2404_vm12, %v3776_v62  ;;  %v10301_v5 = vunpack.i.h.bf16 %v10299_v61  ;;  %v10300_v31 = vunpack.i.l.bf16 %v10299_v61  ;;  %v12413_v23 = vpop.permute.xlu1 %10313  ;;  %v10532_v48 = vpack.i.bf16 %v12406_v12, %v12420_v1  ;;  %v12438_v2 = vld [vmem:[#allocation3 + $0x109] sm:$0xff] }
 0x24d   : > { %10508 = vrot.lane.b32.xlu0 %v10507_v39, %s11037_s29  ;;  %10523 = vrot.lane.b32.xlu1 %v10507_v39, %s11035_s19  ;;  %v3620_v61 = vsel %vm3615_vm15, %v3587_v57, %v10310_v52  ;;  %v3621_v39 = vsel %vm3615_vm15, %v3588_v60, %v10311_v51 }
 0x24e   : > { %v3714_v16 = vsel %vm3615_vm15, %v3682_v24, %v10300_v31  ;;  %v3715_v4 = vsel %vm3615_vm15, %v3683_v63, %v10301_v5  ;;  %v3750_v8 = vpack.c.bf16 %v3621_v39, %v3620_v61 }
 0x24f   : > { %v10304_v22 = vpop.permute.xlu0 %10303  ;;  %v3748_v28 = vpack.c.bf16 %v3715_v4, %v3714_v16 }
 0x250   : > { %v10306_v11 = vunpack.i.h.bf16 %v10304_v22  ;;  %v10305_v9 = vunpack.i.l.bf16 %v10304_v22  ;;  %v10319_v5 = vpop.permute.xlu1 %10318  ;;  %v10542_v22 = vpack.i.bf16 %v12368_v13, %v12366_v30  ;;  %v10316_v13 = vunpack.i.h.bf16 %v12413_v23 }
 0x251   : > { %10513 = vrot.lane.b32.xlu0 %v10512_v25, %s11035_s19  ;;  %4031 = vmatprep.mubr.bf16.mxu1 %v3748_v28  ;;  %v10321_v52 = vunpack.i.h.bf16 %v10319_v5 }
 0x252   : > { %v3653_v50 = vsel %vm2404_vm12, %v12227_v45, %v10306_v11  ;;  %v3652_v62 = vsel %vm2404_vm12, %v12231_v46, %v10305_v9  ;;  %10528 = vrot.lane.b32.xlu1 %v10512_v25, %s11036_s20  ;;  %4032 = vmatmul.mubr.bf16.gmra.mrb[4].mxu1 %v3747_v36  ;;  %v12430_v46 = vld [vmem:[#allocation3 + $0x111] sm:$0xff]  ;;  %v3557_v60 = vsel %vm2404_vm12, %v12219_v38, %v10316_v13 }
 0x253   : > { %v3684_v40 = vsel %vm3582_vm14, %v3652_v62, %v10265_v20  ;;  %v3685_v7 = vsel %vm3582_vm14, %v3653_v50, %v10266_v33  ;;  %v10537_v3 = vpack.i.bf16 %v12430_v46, %v12438_v2  ;;  %v10315_v33 = vunpack.i.l.bf16 %v12413_v23 }
 0x254   : > { %v3716_v45 = vsel %vm3615_vm15, %v3684_v40, %v10270_v53  ;;  %v3717_v55 = vsel %vm3615_vm15, %v3685_v7, %v10271_v14  ;;  %v10320_v14 = vunpack.i.l.bf16 %v10319_v5  ;;  %v10275_v23 = vunpack.i.l.bf16 %v12361_v26 }
 0x255   : > { %10533 = vrot.lane.b32.xlu0 %v10532_v48, %s11036_s20  ;;  %v3751_v10 = vpack.c.bf16 %v3717_v55, %v3716_v45 }
 0x256   : > { %10548 = vrot.lane.b32.xlu1 %v10532_v48, %s11037_s29  ;;  %v10276_v48 = vunpack.i.h.bf16 %v12361_v26 }
 0x257   : > { %4039 = vmatprep.mubr.bf16.mxu1 %v3751_v10 }
 0x258   : > { %v9456_v31 = vpop.f32.mrb[24].mxu0 }
 0x259   : > { %v2350_v24 = vadd.f32 %v9456_v31, %v12068_v59  ;;  %v2341_v63 = vpop.f32.mrb[25].mxu0  ;;  %10538 = vrot.lane.b32.xlu0 %v10537_v3, %s11037_s29 }
 0x25a   : > { %v2342_v15 = vadd.f32 %v12068_v59, %v2341_v63  ;;  %10553 = vrot.lane.b32.xlu1 %v10537_v3, %s11035_s19  ;;  %v9457_v41 = vpop.f32.mrb[26].mxu0  ;;  %4040 = vmatmul.mubr.bf16.gmra.mrb[8].mxu1 %v3750_v8  ;;  %v3556_v3 = vsel %vm2404_vm12, %v12223_v54, %v10315_v33  ;;  %v3590_v63 = vsel %vm3582_vm14, %v3557_v60, %v10321_v52  ;;  %v10281_v54 = vunpack.i.h.bf16 %v12349_v6 }
 0x25b   : > { %v2398_v16 = vmax.f32 %v2350_v24, 0.0  ;;  %v2353_v4 = vadd.f32 %v9457_v41, %v12068_v59  ;;  %v2344_v17 = vpop.f32.mrb[27].mxu0  ;;  %v12447_v19 = vpop.permute.xlu0 %10323  ;;  %v3589_v24 = vsel %vm3582_vm14, %v3556_v3, %v10320_v14  ;;  %v3655_v41 = vsel %vm2404_vm12, %v12207_v35, %v10276_v48 }
 0x25c   : > { %v2396_v25 = vmax.f32 %v2342_v15, 0.0  ;;  %v2345_v28 = vadd.f32 %v12068_v59, %v2344_v17  ;;  %v12452_v42 = vpop.permute.xlu1 %10338  ;;  %v10280_v15 = vunpack.i.l.bf16 %v12349_v6  ;;  %v3623_v33 = vsel %vm3615_vm15, %v3590_v63, %v10281_v54  ;;  %v2629_v54 = vld [vmem:[#allocation3 + $0x79] sm:$0xff] }
 0x25d   : > { %2487 = vst.msk [vmem:[#allocation3 + $0x151] sm:$0xff] %vm2404_vm12, %v2398_v16  ;;  %v2399_v11 = vmax.f32 %v2353_v4, 0.0  ;;  %10543 = vrot.lane.b32.xlu0 %v10542_v22, %s11035_s19  ;;  %v10290_v48 = vunpack.i.l.bf16 %v12363_v21 }
 0x25e   : > { %2485 = vst.msk [vmem:[#allocation3 + $0x139] sm:$0xff] %vm2404_vm12, %v2396_v25  ;;  %v2397_v9 = vmax.f32 %v2345_v28, 0.0  ;;  %10558 = vrot.lane.b32.xlu1 %v10542_v22, %s11036_s20  ;;  %v3654_v22 = vsel %vm2404_vm12, %v12212_v37, %v10275_v23  ;;  %v3622_v13 = vsel %vm3615_vm15, %v3589_v24, %v10280_v15  ;;  %v10285_v37 = vunpack.i.l.bf16 %v12359_v47  ;;  %v2630_v15 = vld [vmem:[#allocation3 + $0x81] sm:$0xff] }
 0x25f   : > { %2488 = vst.msk [vmem:[#allocation3 + $0x159] sm:$0xff] %vm2404_vm12, %v2399_v11  ;;  %v12459_v36 = vpop.permute.xlu0 %10328 }
 0x260   : > { %2486 = vst.msk [vmem:[#allocation3 + $0x141] sm:$0xff] %vm2404_vm12, %v2397_v9  ;;  %v12462_v30 = vpop.permute.xlu1 %10343 }
 0x263   : > { %v12464_v59 = vpop.permute.xlu0 %10333 }
 0x264   : > { %v2710_v20 = vld [vmem:[#allocation3 + $0x150] sm:$0xff]  ;;  %v12470_v53 = vpop.permute.xlu1 %10348 }
 0x265   : > { %v12468_v51 = vld [vmem:[#allocation3 + $0x138] sm:$0xff] }
 0x266   : > { %v2711_v50 = vld [vmem:[#allocation3 + $0x158] sm:$0xff] }
 0x267   : > { %v2774_v62 = vld [vmem:[#allocation3 + $0x152] sm:$0xff]  ;;  %v2775_v43 = vld [vmem:[#allocation3 + $0x15a] sm:$0xff]  ;;  %v10354_v40 = vpop.permute.xlu0 %10353  ;;  %v12473_v7 = vpack.i.bf16 %v2711_v50, %v2710_v20  ;;  %v2773_v55 = vld [vmem:[#allocation3 + $0x142] sm:$0xff]  ;;  %v10286_v20 = vunpack.i.h.bf16 %v12359_v47  ;;  %v10291_v50 = vunpack.i.h.bf16 %v12363_v21  ;;  %v10325_v47 = vunpack.i.l.bf16 %v12447_v19 }
 0x268   : > { %v2772_v45 = vld [vmem:[#allocation3 + $0x13a] sm:$0xff]  ;;  %v10356_v5 = vunpack.i.h.bf16 %v10354_v40  ;;  %v10355_v31 = vunpack.i.l.bf16 %v10354_v40  ;;  %v3782_v8 = vpack.c.bf16 %v2775_v43, %v2774_v62  ;;  %v12495_v38 = vld [vmem:[#allocation3 + $0x151] sm:$0xff]  ;;  %v10369_v25 = vpop.permute.xlu1 %10368  ;;  %v10572_v23 = vpack.i.bf16 %v2775_v43, %v2774_v62 }
 0x269   : > { %v12475_v57 = vld [vmem:[#allocation3 + $0x140] sm:$0xff]  ;;  %v3779_v10 = vpack.c.bf16 %v2773_v55, %v2772_v45  ;;  %10563 = vrot.lane.b32.xlu0 %v12473_v7, %s11036_s20  ;;  %v10371_v24 = vunpack.i.h.bf16 %v10369_v25  ;;  %v10370_v63 = vunpack.i.l.bf16 %v10369_v25  ;;  %v10331_v21 = vunpack.i.h.bf16 %v12459_v36 }
 0x26a   : > { %v12482_v61 = vpack.i.bf16 %v12475_v57, %v12468_v51  ;;  %v12484_v39 = vld [vmem:[#allocation3 + $0x159] sm:$0xff]  ;;  %v12490_v26 = vld [vmem:[#allocation3 + $0x141] sm:$0xff]  ;;  %v3686_v35 = vsel %vm3582_vm14, %v3654_v22, %v10355_v31  ;;  %v3687_v9 = vsel %vm3582_vm14, %v3655_v41, %v10356_v5  ;;  %v10602_v5 = vpack.i.bf16 %v2773_v55, %v2772_v45 }
 0x26b   : > { %9487 = vmatmul.mubr.msk.bf16.gmra.mrb[52].mxu0 %vm2404_vm12, %v3779_v10  ;;  %v10359_v16 = vpop.permute.xlu0 %10358  ;;  %v12506_v4 = vpack.i.bf16 %v12484_v39, %v12495_v38  ;;  %v12508_v17 = vld [vmem:[#allocation3 + $0x139] sm:$0xff]  ;;  %v3753_v31 = vpack.c.bf16 %v3623_v33, %v3622_v13  ;;  %v10330_v62 = vunpack.i.l.bf16 %v12459_v36  ;;  %v3558_v41 = vsel %vm2404_vm12, %v12201_v27, %v10285_v37 }
 0x26c   : > { %10593 = vrot.lane.b32.xlu1 %v12482_v61, %s11037_s29  ;;  %9490 = vmatprep.mubr.msk.bf16.mxu0 %vm2404_vm12, %v3782_v8  ;;  %v10361_v28 = vunpack.i.h.bf16 %v10359_v16  ;;  %v10360_v11 = vunpack.i.l.bf16 %v10359_v16  ;;  %v10597_v6 = vpack.i.bf16 %v12490_v26, %v12508_v17  ;;  %v10326_v8 = vunpack.i.h.bf16 %v12447_v19  ;;  %v12532_v43 = vpop.permute.xlu1 %10373 }
 0x26d   : > { %10568 = vrot.lane.b32.xlu0 %v12506_v4, %s11037_s29  ;;  %v3559_v19 = vsel %vm2404_vm12, %v12203_v18, %v10286_v20  ;;  %v11007_v20 = vld [vmem:[%s14791_s2] ss:$0 sm:$0xff] }
 0x26e   : > { %v3718_v52 = vsel %vm3615_vm15, %v3686_v35, %v10360_v11  ;;  %v3719_v14 = vsel %vm3615_vm15, %v3687_v9, %v10361_v28  ;;  %v3591_v28 = vsel %vm3582_vm14, %v3558_v41, %v10290_v48  ;;  %v3592_v11 = vsel %vm3582_vm14, %v3559_v19, %v10291_v50 }
 0x26f   : > { %v10364_v40 = vpop.permute.xlu0 %10363  ;;  %v3754_v60 = vpack.c.bf16 %v3719_v14, %v3718_v52  ;;  %v3624_v18 = vsel %vm3615_vm15, %v3591_v28, %v10370_v63  ;;  %v3625_v27 = vsel %vm3615_vm15, %v3592_v11, %v10371_v24  ;;  %v10376_v24 = vunpack.i.h.bf16 %v12532_v43  ;;  %v2504_v63 = vld [vmem:[#allocation3 + $0x80] sm:$0xff] }
 0x270   : > { %10598 = vrot.lane.b32.xlu1 %v10597_v6, %s11035_s19  ;;  %v10366_v10 = vunpack.i.h.bf16 %v10364_v40  ;;  %v10365_v3 = vunpack.i.l.bf16 %v10364_v40  ;;  %v10379_v9 = vpop.permute.xlu1 %10378  ;;  %v3756_v33 = vpack.c.bf16 %v3625_v27, %v3624_v18 }
 0x271   : > { %10573 = vrot.lane.b32.xlu0 %v10572_v23, %s11035_s19  ;;  %4047 = vmatprep.mubr.bf16.mxu1 %v3754_v60 }
 0x272   : > { %v3657_v45 = vsel %vm2404_vm12, %v2630_v15, %v10366_v10  ;;  %v3656_v55 = vsel %vm2404_vm12, %v2629_v54, %v10365_v3  ;;  %4048 = vmatmul.mubr.bf16.gmra.mrb[12].mxu1 %v3753_v31  ;;  %v10381_v15 = vunpack.i.h.bf16 %v10379_v9 }
 0x273   : > { %v3688_v16 = vsel %vm3582_vm14, %v3656_v55, %v10325_v47  ;;  %v3689_v22 = vsel %vm3582_vm14, %v3657_v45, %v10326_v8  ;;  %v10336_v55 = vunpack.i.h.bf16 %v12464_v59 }
 0x274   : > { %10603 = vrot.lane.b32.xlu1 %v10602_v5, %s11036_s20  ;;  %v3720_v36 = vsel %vm3615_vm15, %v3688_v16, %v10330_v62  ;;  %v3721_v25 = vsel %vm3615_vm15, %v3689_v22, %v10331_v21  ;;  %v10380_v21 = vunpack.i.l.bf16 %v10379_v9 }
 0x275   : > { %10578 = vrot.lane.b32.xlu0 %v12482_v61, %s11036_s20  ;;  %v3757_v35 = vpack.c.bf16 %v3721_v25, %v3720_v36  ;;  %v10335_v36 = vunpack.i.l.bf16 %v12464_v59  ;;  %v3561_v25 = vsel %vm2404_vm12, %v2504_v63, %v10376_v24  ;;  %v2505_v63 = vld [vmem:[#allocation3 + $0x90] sm:$0xff] }
 0x277   : > { %4055 = vmatprep.mubr.bf16.mxu1 %v3757_v35 }
 0x278   : > { %10608 = vrot.lane.b32.xlu1 %v12473_v7, %s11037_s29  ;;  %v9460_v13 = vpop.f32.mrb[28].mxu0 }
 0x279   : > { %v2366_v37 = vadd.f32 %v11007_v20, %v9460_v13  ;;  %v2357_v52 = vpop.f32.mrb[29].mxu0  ;;  %10583 = vrot.lane.b32.xlu0 %v10597_v6, %s11037_s29 }
 0x27a   : > { %v2358_v61 = vadd.f32 %v11007_v20, %v2357_v52  ;;  %v9461_v14 = vpop.f32.mrb[30].mxu0  ;;  %4056 = vmatmul.mubr.bf16.gmra.mrb[16].mxu1 %v3756_v33  ;;  %v3594_v33 = vsel %vm3582_vm14, %v3561_v25, %v10381_v15  ;;  %v10345_v52 = vunpack.i.l.bf16 %v12462_v30 }
 0x27b   : > { %v2402_v50 = vmax.f32 %v2366_v37, 0.0  ;;  %v2369_v7 = vadd.f32 %v11007_v20, %v9461_v14  ;;  %v2360_v48 = vpop.f32.mrb[31].mxu0  ;;  %v12559_v40 = vpop.permute.xlu0 %10383  ;;  %v10340_v37 = vunpack.i.l.bf16 %v12452_v42 }
 0x27c   : > { %10628 = vrot.lane.b32.xlu1 %v12506_v4, %s11035_s19  ;;  %v2400_v60 = vmax.f32 %v2358_v61, 0.0  ;;  %v2361_v10 = vadd.f32 %v11007_v20, %v2360_v48  ;;  %v12561_v3 = vpop.permute.xlu1 %10398  ;;  %v10341_v20 = vunpack.i.h.bf16 %v12452_v42  ;;  %v3659_v61 = vsel %vm2404_vm12, %v12247_v58, %v10336_v55 }
 0x27d   : > { %2491 = vst.msk [vmem:[#allocation3 + $0x181] sm:$0xff] %vm2404_vm12, %v2402_v50  ;;  %v2403_v31 = vmax.f32 %v2369_v7, 0.0  ;;  %10588 = vrot.lane.b32.xlu0 %v10602_v5, %s11035_s19  ;;  %v10375_v5 = vunpack.i.l.bf16 %v12532_v43  ;;  %v2503_v43 = vld [vmem:[#allocation3 + $0x78] sm:$0xff]  ;;  %v3658_v48 = vsel %vm2404_vm12, %v12252_v56, %v10335_v36  ;;  %v10351_v55 = vunpack.i.h.bf16 %v12470_v53 }
 0x27e   : > { %2489 = vst.msk [vmem:[#allocation3 + $0x169] sm:$0xff] %vm2404_vm12, %v2400_v60  ;;  %v2401_v6 = vmax.f32 %v2361_v10, 0.0  ;;  %v3627_v24 = vsel %vm3615_vm15, %v3594_v33, %v10341_v20  ;;  %v2633_v33 = vld [vmem:[#allocation3 + $0xa9] sm:$0xff]  ;;  %v2634_v20 = vld [vmem:[#allocation3 + $0xb1] sm:$0xff] }
 0x27f   : > { %2492 = vst.msk [vmem:[#allocation3 + $0x189] sm:$0xff] %vm2404_vm12, %v2403_v31  ;;  %v12568_v4 = vpop.permute.xlu0 %10388  ;;  %v3560_v35 = vsel %vm2404_vm12, %v2503_v43, %v10375_v5  ;;  %v10346_v5 = vunpack.i.h.bf16 %v12462_v30 }
 0x280   : > { %10638 = vrot.lane.b32.xlu1 %v10572_v23, %s11036_s20  ;;  %2490 = vst.msk [vmem:[#allocation3 + $0x171] sm:$0xff] %vm2404_vm12, %v2401_v6  ;;  %v12571_v8 = vpop.permute.xlu1 %10403  ;;  %v3593_v59 = vsel %vm3582_vm14, %v3560_v35, %v10380_v21  ;;  %v3562_v21 = vsel %vm2404_vm12, %v2505_v63, %v10345_v52  ;;  %v10386_v35 = vunpack.i.h.bf16 %v12559_v40  ;;  %v10391_v52 = vunpack.i.h.bf16 %v12568_v4 }
 0x281   : > { %v3626_v6 = vsel %vm3615_vm15, %v3593_v59, %v10340_v37  ;;  %v2506_v37 = vld [vmem:[#allocation3 + $0x98] sm:$0xff] }
 0x282   : > { %v3759_v30 = vpack.c.bf16 %v3627_v24, %v3626_v6 }
 0x283   : > { %v12573_v47 = vpop.permute.xlu0 %10393 }
 0x284   : > { %v12577_v54 = vpop.permute.xlu1 %10408 }
 0x285   : > { %v12579_v23 = vld [vmem:[#allocation3 + $0x168] sm:$0xff] }
 0x286   : > { %v12581_v62 = vld [vmem:[#allocation3 + $0x182] sm:$0xff]  ;;  %v12583_v45 = vld [vmem:[#allocation3 + $0x18a] sm:$0xff] }
 0x287   : > { %v10414_v19 = vpop.permute.xlu0 %10413  ;;  %v2776_v41 = vld [vmem:[#allocation3 + $0x16a] sm:$0xff]  ;;  %v2777_v16 = vld [vmem:[#allocation3 + $0x172] sm:$0xff]  ;;  %v3788_v9 = vpack.c.bf16 %v12583_v45, %v12581_v62 }
 0x288   : > { %v12586_v22 = vld [vmem:[#allocation3 + $0x170] sm:$0xff]  ;;  %v3785_v28 = vpack.c.bf16 %v2777_v16, %v2776_v41  ;;  %v10416_v18 = vunpack.i.h.bf16 %v10414_v19  ;;  %v10415_v27 = vunpack.i.l.bf16 %v10414_v19  ;;  %v10429_v14 = vpop.permute.xlu1 %10428  ;;  %v10350_v19 = vunpack.i.l.bf16 %v12470_v53  ;;  %v2715_v53 = vld [vmem:[#allocation3 + $0x188] sm:$0xff] }
 0x289   : > { %v10612_v11 = vpack.i.bf16 %v12586_v22, %v12579_v23  ;;  %v12595_v13 = vld [vmem:[#allocation3 + $0x171] sm:$0xff]  ;;  %v12608_v7 = vld [vmem:[#allocation3 + $0x169] sm:$0xff] }
 0x28a   : > { %9491 = vmatmul.mubr.msk.bf16.gmra.mrb[56].mxu0 %vm2404_vm12, %v3785_v28  ;;  %v10617_v42 = vpack.i.bf16 %v12595_v13, %v12608_v7  ;;  %v3690_v31 = vsel %vm3582_vm14, %v3658_v48, %v10415_v27  ;;  %v3691_v58 = vsel %vm3582_vm14, %v3659_v61, %v10416_v18  ;;  %v10385_v18 = vunpack.i.l.bf16 %v12559_v40  ;;  %v12643_v6 = vld [vmem:[#allocation3 + $0x189] sm:$0xff] }
 0x28b   : > { %10613 = vrot.lane.b32.xlu0 %v10612_v11, %s11036_s20  ;;  %10648 = vrot.lane.b32.xlu1 %v10612_v11, %s11037_s29  ;;  %v10419_v50 = vpop.permute.xlu0 %10418  ;;  %v10622_v11 = vpack.i.bf16 %v2777_v16, %v2776_v41  ;;  %v10431_v27 = vunpack.i.h.bf16 %v10429_v14  ;;  %v10390_v61 = vunpack.i.l.bf16 %v12568_v4  ;;  %v3563_v40 = vsel %vm2404_vm12, %v2506_v37, %v10346_v5  ;;  %v2781_v37 = vld [vmem:[#allocation3 + $0x1a2] sm:$0xff] }
 0x28c   : > { %9494 = vmatprep.mubr.msk.bf16.mxu0 %vm2404_vm12, %v3788_v9  ;;  %v10421_v60 = vunpack.i.h.bf16 %v10419_v50  ;;  %v10420_v10 = vunpack.i.l.bf16 %v10419_v50  ;;  %v10430_v9 = vunpack.i.l.bf16 %v10429_v14  ;;  %v12628_v59 = vpop.permute.xlu1 %10433  ;;  %v2714_v14 = vld [vmem:[#allocation3 + $0x180] sm:$0xff] }
 0x28e   : > { %v3722_v56 = vsel %vm3615_vm15, %v3690_v31, %v10420_v10  ;;  %v3723_v15 = vsel %vm3615_vm15, %v3691_v58, %v10421_v60  ;;  %v3595_v60 = vsel %vm3582_vm14, %v3562_v21, %v10350_v19  ;;  %v10632_v10 = vpack.i.bf16 %v2715_v53, %v2714_v14  ;;  %v2780_v53 = vld [vmem:[#allocation3 + $0x19a] sm:$0xff] }
 0x28f   : > { %10618 = vrot.lane.b32.xlu0 %v10617_v42, %s11037_s29  ;;  %10658 = vrot.lane.b32.xlu1 %v10617_v42, %s11035_s19  ;;  %v10424_v36 = vpop.permute.xlu0 %10423  ;;  %v3760_v43 = vpack.c.bf16 %v3723_v15, %v3722_v56  ;;  %v3596_v31 = vsel %vm3582_vm14, %v3563_v40, %v10351_v55  ;;  %v3628_v24 = vsel %vm3615_vm15, %v3595_v60, %v10430_v9  ;;  %v12649_v56 = vld [vmem:[#allocation3 + $0x181] sm:$0xff]  ;;  %v10395_v60 = vunpack.i.l.bf16 %v12573_v47 }
 0x290   : > { %v10426_v25 = vunpack.i.h.bf16 %v10424_v36  ;;  %v10425_v28 = vunpack.i.l.bf16 %v10424_v36  ;;  %v3629_v63 = vsel %vm3615_vm15, %v3596_v31, %v10431_v27  ;;  %v10439_v5 = vpop.permute.xlu1 %10438  ;;  %v10642_v15 = vpack.i.bf16 %v12643_v6, %v12649_v56  ;;  %v2716_v36 = vld [vmem:[#allocation3 + $0x198] sm:$0xff]  ;;  %v2749_v9 = vld [vmem:[#allocation3 + $0x1a1] sm:$0xff] }
 0x291   : > { %4063 = vmatprep.mubr.bf16.mxu1 %v3760_v43  ;;  %v3762_v21 = vpack.c.bf16 %v3629_v63, %v3628_v24  ;;  %v2717_v43 = vld [vmem:[#allocation3 + $0x1a0] sm:$0xff]  ;;  %v10440_v40 = vunpack.i.l.bf16 %v10439_v5 }
 0x292   : > { %v3661_v41 = vsel %vm2404_vm12, %v2634_v20, %v10426_v25  ;;  %v3660_v16 = vsel %vm2404_vm12, %v2633_v33, %v10425_v28  ;;  %4064 = vmatmul.mubr.bf16.gmra.mrb[20].mxu1 %v3759_v30  ;;  %v10652_v25 = vpack.i.bf16 %v12583_v45, %v12581_v62  ;;  %v10662_v30 = vpack.i.bf16 %v2717_v43, %v2716_v36  ;;  %v2748_v27 = vld [vmem:[#allocation3 + $0x199] sm:$0xff]  ;;  %v2636_v36 = vld [vmem:[#allocation3 + $0xc9] sm:$0xff] }
 0x293   : > { %10623 = vrot.lane.b32.xlu0 %v10622_v11, %s11035_s19  ;;  %10668 = vrot.lane.b32.xlu1 %v10622_v11, %s11036_s20  ;;  %v3692_v50 = vsel %vm3582_vm14, %v3660_v16, %v10385_v18  ;;  %v3693_v48 = vsel %vm3582_vm14, %v3661_v41, %v10386_v35  ;;  %v10672_v62 = vpack.i.bf16 %v2749_v9, %v2748_v27  ;;  %v10441_v16 = vunpack.i.h.bf16 %v10439_v5 }
 0x294   : > { %v3724_v4 = vsel %vm3615_vm15, %v3692_v50, %v10390_v61  ;;  %v3725_v42 = vsel %vm3615_vm15, %v3693_v48, %v10391_v52  ;;  %v10436_v52 = vunpack.i.h.bf16 %v12628_v59  ;;  %v10435_v61 = vunpack.i.l.bf16 %v12628_v59 }
 0x295   : > { %v3763_v58 = vpack.c.bf16 %v3725_v42, %v3724_v4  ;;  %v3791_v41 = vpack.c.bf16 %v2781_v37, %v2780_v53  ;;  %v10396_v48 = vunpack.i.h.bf16 %v12573_v47  ;;  %v2508_v4 = vld [vmem:[#allocation3 + $0xb0] sm:$0xff]  ;;  %v10401_v5 = vunpack.i.h.bf16 %v12561_v3 }
 0x296   : > { %v3565_v42 = vsel %vm2404_vm12, %v2508_v4, %v10436_v52 }
 0x297   : > { %10633 = vrot.lane.b32.xlu0 %v10632_v10, %s11036_s20  ;;  %10678 = vrot.lane.b32.xlu1 %v10632_v10, %s11037_s29  ;;  %v2507_v10 = vld [vmem:[#allocation3 + $0xa8] sm:$0xff]  ;;  %v3598_v63 = vsel %vm3582_vm14, %v3565_v42, %v10441_v16  ;;  %v3663_v47 = vsel %vm2404_vm12, %v2636_v36, %v10396_v48  ;;  %v10405_v16 = vunpack.i.l.bf16 %v12571_v8 }
 0x298   : > { %4071 = vmatprep.mubr.bf16.mxu1 %v3763_v58  ;;  %9495 = vmatmul.mubr.msk.bf16.gmra.mrb[60].mxu0 %vm2404_vm12, %v3791_v41  ;;  %v3564_v59 = vsel %vm2404_vm12, %v2507_v10, %v10435_v61  ;;  %v3631_v52 = vsel %vm3615_vm15, %v3598_v63, %v10401_v5  ;;  %v10406_v41 = vunpack.i.h.bf16 %v12571_v8  ;;  %v2509_v63 = vld [vmem:[#allocation3 + $0xc0] sm:$0xff]  ;;  %v2510_v5 = vld [vmem:[#allocation3 + $0xc8] sm:$0xff] }
 0x299   : > { %v3597_v24 = vsel %vm3582_vm14, %v3564_v59, %v10440_v40  ;;  %v10411_v40 = vunpack.i.h.bf16 %v12577_v54 }
 0x29a   : > { %4072 = vmatmul.mubr.bf16.gmra.mrb[24].mxu1 %v3762_v21  ;;  %v2635_v21 = vld [vmem:[#allocation3 + $0xc1] sm:$0xff] }
 0x29b   : > { %10643 = vrot.lane.b32.xlu0 %v10642_v15, %s11037_s29  ;;  %v12654_v55 = vpop.permute.xlu0 %10443  ;;  %v12656_v19 = vpop.permute.xlu1 %10458  ;;  %v10400_v15 = vunpack.i.l.bf16 %v12561_v3 }
 0x29c   : > { %v10446_v59 = vunpack.i.h.bf16 %v12654_v55 }
 0x29d   : > { %v3630_v37 = vsel %vm3615_vm15, %v3597_v24, %v10400_v15 }
 0x29e   : > { %v12660_v28 = vpop.f32.mrb[32].mxu0  ;;  %v3765_v42 = vpack.c.bf16 %v3631_v52, %v3630_v37 }
 0x29f   : > { %v12662_v11 = vpop.f32.mrb[33].mxu0  ;;  %10653 = vrot.lane.b32.xlu0 %v10652_v25, %s11035_s19  ;;  %v12667_v18 = vpop.permute.xlu0 %10448  ;;  %v3662_v25 = vsel %vm2404_vm12, %v2635_v21, %v10395_v60  ;;  %v10410_v60 = vunpack.i.l.bf16 %v12577_v54 }
 0x2a0   : > { %v12665_v35 = vpop.f32.mrb[34].mxu0  ;;  %v12669_v33 = vpop.permute.xlu1 %10463  ;;  %v10451_v8 = vunpack.i.h.bf16 %v12667_v18  ;;  %v10450_v15 = vunpack.i.l.bf16 %v12667_v18 }
 0x2a1   : > { %v12671_v20 = vpop.f32.mrb[35].mxu0 }
 0x2a3   : > { %10663 = vrot.lane.b32.xlu0 %v10662_v30, %s11036_s20  ;;  %v12674_v45 = vpop.permute.xlu0 %10453 }
 0x2a4   : > { %v12678_v14 = vpop.permute.xlu1 %10468 }
 0x2a7   : > { %10673 = vrot.lane.b32.xlu0 %v10672_v62, %s11037_s29  ;;  %v10474_v50 = vpop.permute.xlu0 %10473 }
 0x2a8   : > { %v10476_v31 = vunpack.i.h.bf16 %v10474_v50  ;;  %v10475_v58 = vunpack.i.l.bf16 %v10474_v50  ;;  %v10489_v30 = vpop.permute.xlu1 %10488 }
 0x2a9   : > { %v10490_v24 = vunpack.i.l.bf16 %v10489_v30 }
 0x2aa   : > { %v3694_v62 = vsel %vm3582_vm14, %v3662_v25, %v10475_v58  ;;  %v3695_v53 = vsel %vm3582_vm14, %v3663_v47, %v10476_v31  ;;  %v10445_v31 = vunpack.i.l.bf16 %v12654_v55  ;;  %v10491_v58 = vunpack.i.h.bf16 %v10489_v30 }
 0x2ab   : > { %v10479_v43 = vpop.permute.xlu0 %10478  ;;  %v3566_v55 = vsel %vm2404_vm12, %v2509_v63, %v10405_v16 }
 0x2ac   : > { %v10481_v27 = vunpack.i.h.bf16 %v10479_v43  ;;  %v10480_v9 = vunpack.i.l.bf16 %v10479_v43  ;;  %v10494_v21 = vpop.permute.xlu1 %10493  ;;  %v3567_v43 = vsel %vm2404_vm12, %v2510_v5, %v10406_v41 }
 0x2ae   : > { %v3726_v3 = vsel %vm3615_vm15, %v3694_v62, %v10480_v9  ;;  %v3727_v61 = vsel %vm3615_vm15, %v3695_v53, %v10481_v27  ;;  %v3599_v27 = vsel %vm3582_vm14, %v3566_v55, %v10410_v60  ;;  %v10460_v55 = vunpack.i.l.bf16 %v12656_v19 }
 0x2af   : > { %v10484_v50 = vpop.permute.xlu0 %10483  ;;  %v3766_v48 = vpack.c.bf16 %v3727_v61, %v3726_v3 }
 0x2b0   : > { %v10486_v10 = vunpack.i.h.bf16 %v10484_v50  ;;  %v10485_v4 = vunpack.i.l.bf16 %v10484_v50  ;;  %v10499_v53 = vpop.permute.xlu1 %10498 }
 0x2b1   : > { %4079 = vmatprep.mubr.bf16.mxu1 %v3766_v48 }
 0x2b2   : > { %v3665_v54 = vsel %vm2404_vm12, %v12333_v44, %v10486_v10  ;;  %v3664_v36 = vsel %vm2404_vm12, %v12337_v49, %v10485_v4  ;;  %4080 = vmatmul.mubr.bf16.gmra.mrb[28].mxu1 %v3765_v42  ;;  %v3600_v44 = vsel %vm3582_vm14, %v3567_v43, %v10411_v40  ;;  %v3632_v49 = vsel %vm3615_vm15, %v3599_v27, %v10490_v24 }
 0x2b3   : > { %v3696_v47 = vsel %vm3582_vm14, %v3664_v36, %v10445_v31  ;;  %v3697_v25 = vsel %vm3582_vm14, %v3665_v54, %v10446_v59  ;;  %v3633_v62 = vsel %vm3615_vm15, %v3600_v44, %v10491_v58  ;;  %v10496_v10 = vunpack.i.h.bf16 %v10494_v21 }
 0x2b4   : > { %v3728_v30 = vsel %vm3615_vm15, %v3696_v47, %v10450_v15  ;;  %v3729_v18 = vsel %vm3615_vm15, %v3697_v25, %v10451_v8  ;;  %v3768_v37 = vpack.c.bf16 %v3633_v62, %v3632_v49  ;;  %v10495_v4 = vunpack.i.l.bf16 %v10494_v21  ;;  %v2639_v47 = vld [vmem:[#allocation3 + $0xf1] sm:$0xff] }
 0x2b5   : > { %v3769_v9 = vpack.c.bf16 %v3729_v18, %v3728_v30  ;;  %v10501_v42 = vunpack.i.h.bf16 %v10499_v53  ;;  %v10500_v59 = vunpack.i.l.bf16 %v10499_v53  ;;  %v10456_v58 = vunpack.i.h.bf16 %v12674_v45 }
 0x2b6   : > { %v10455_v24 = vunpack.i.l.bf16 %v12674_v45  ;;  %v3569_v5 = vsel %vm2404_vm12, %v12325_v32, %v10496_v10  ;;  %v3568_v8 = vsel %vm2404_vm12, %v12329_v34, %v10495_v4  ;;  %v10461_v43 = vunpack.i.h.bf16 %v12656_v19  ;;  %v2640_v45 = vld [vmem:[#allocation3 + $0xf9] sm:$0xff] }
 0x2b7   : > { %4087 = vmatprep.mubr.bf16.mxu1 %v3769_v9  ;;  %v3601_v36 = vsel %vm3582_vm14, %v3568_v8, %v10500_v59  ;;  %v3602_v21 = vsel %vm3582_vm14, %v3569_v5, %v10501_v42  ;;  %v3667_v30 = vsel %vm2404_vm12, %v2640_v45, %v10456_v58  ;;  %v10465_v10 = vunpack.i.l.bf16 %v12669_v33 }
 0x2b8   : > { %v3666_v32 = vsel %vm2404_vm12, %v2639_v47, %v10455_v24  ;;  %v3634_v9 = vsel %vm3615_vm15, %v3601_v36, %v10460_v55  ;;  %v3635_v49 = vsel %vm3615_vm15, %v3602_v21, %v10461_v43  ;;  %v10471_v4 = vunpack.i.h.bf16 %v12678_v14  ;;  %v2513_v21 = vld [vmem:[#allocation3 + $0xf0] sm:$0xff]  ;;  %v2514_v43 = vld [vmem:[#allocation3 + $0xf8] sm:$0xff] }
 0x2b9   : > { %v3771_v5 = vpack.c.bf16 %v3635_v49, %v3634_v9 }
 0x2ba   : > { %4088 = vmatmul.mubr.bf16.gmra.mrb[32].mxu1 %v3768_v37  ;;  %v10466_v37 = vunpack.i.h.bf16 %v12669_v33 }
 0x2bb   : > { %v12720_v52 = vpop.permute.xlu0 %10503  ;;  %v12722_v3 = vpop.permute.xlu1 %10518 }
 0x2bc   : > { %v10506_v8 = vunpack.i.h.bf16 %v12720_v52  ;;  %v3571_v45 = vsel %vm2404_vm12, %v2514_v43, %v10466_v37 }
 0x2be   : > { %v12724_v61 = vpop.f32.mrb[36].mxu0 }
 0x2bf   : > { %v12726_v41 = vpop.f32.mrb[37].mxu0  ;;  %v10509_v40 = vpop.permute.xlu0 %10508 }
 0x2c0   : > { %v12728_v16 = vpop.f32.mrb[38].mxu0  ;;  %v12732_v48 = vpop.permute.xlu1 %10523  ;;  %v10511_v55 = vunpack.i.h.bf16 %v10509_v40  ;;  %v10510_v33 = vunpack.i.l.bf16 %v10509_v40 }
 0x2c1   : > { %v12730_v50 = vpop.f32.mrb[39].mxu0 }
 0x2c3   : > { %v12734_v60 = vpop.permute.xlu0 %10513 }
 0x2c4   : > { %v12738_v63 = vpop.permute.xlu1 %10528 }
 0x2c7   : > { %v10534_v31 = vpop.permute.xlu0 %10533 }
 0x2c8   : > { %v10536_v15 = vunpack.i.h.bf16 %v10534_v31  ;;  %v10535_v54 = vunpack.i.l.bf16 %v10534_v31  ;;  %v10549_v62 = vpop.permute.xlu1 %10548  ;;  %v10470_v31 = vunpack.i.l.bf16 %v12678_v14 }
 0x2c9   : > { %v10550_v36 = vunpack.i.l.bf16 %v10549_v62 }
 0x2ca   : > { %v3698_v34 = vsel %vm3582_vm14, %v3666_v32, %v10535_v54  ;;  %v3699_v44 = vsel %vm3582_vm14, %v3667_v30, %v10536_v15  ;;  %v10505_v15 = vunpack.i.l.bf16 %v12720_v52  ;;  %v10551_v54 = vunpack.i.h.bf16 %v10549_v62 }
 0x2cb   : > { %v10539_v25 = vpop.permute.xlu0 %10538 }
 0x2cc   : > { %v10541_v18 = vunpack.i.h.bf16 %v10539_v25  ;;  %v10540_v27 = vunpack.i.l.bf16 %v10539_v25  ;;  %v3570_v25 = vsel %vm2404_vm12, %v2513_v21, %v10465_v10  ;;  %v10554_v9 = vpop.permute.xlu1 %10553 }
 0x2cd   : > { %v3603_v40 = vsel %vm3582_vm14, %v3570_v25, %v10470_v31  ;;  %v10556_v31 = vunpack.i.h.bf16 %v10554_v9  ;;  %v10520_v25 = vunpack.i.l.bf16 %v12722_v3 }
 0x2ce   : > { %v3730_v19 = vsel %vm3615_vm15, %v3698_v34, %v10540_v27  ;;  %v3731_v53 = vsel %vm3615_vm15, %v3699_v44, %v10541_v18 }
 0x2cf   : > { %v10544_v42 = vpop.permute.xlu0 %10543  ;;  %v3772_v59 = vpack.c.bf16 %v3731_v53, %v3730_v19 }
 0x2d0   : > { %v10546_v58 = vunpack.i.h.bf16 %v10544_v42  ;;  %v10545_v24 = vunpack.i.l.bf16 %v10544_v42  ;;  %v10559_v10 = vpop.permute.xlu1 %10558 }
 0x2d1   : > { %4095 = vmatprep.mubr.bf16.mxu1 %v3772_v59 }
 0x2d2   : > { %v3669_v47 = vsel %vm2404_vm12, %v12430_v46, %v10546_v58  ;;  %v3668_v14 = vsel %vm2404_vm12, %v12438_v2, %v10545_v24  ;;  %4096 = vmatmul.mubr.bf16.gmra.mrb[36].mxu1 %v3771_v5  ;;  %v3604_v46 = vsel %vm3582_vm14, %v3571_v45, %v10471_v4  ;;  %v3636_v2 = vsel %vm3615_vm15, %v3603_v40, %v10550_v36 }
 0x2d3   : > { %v3700_v52 = vsel %vm3582_vm14, %v3668_v14, %v10505_v15  ;;  %v3701_v30 = vsel %vm3582_vm14, %v3669_v47, %v10506_v8  ;;  %v3637_v34 = vsel %vm3615_vm15, %v3604_v46, %v10551_v54  ;;  %v10555_v58 = vunpack.i.l.bf16 %v10554_v9 }
 0x2d4   : > { %v3732_v32 = vsel %vm3615_vm15, %v3700_v52, %v10510_v33  ;;  %v3733_v18 = vsel %vm3615_vm15, %v3701_v30, %v10511_v55  ;;  %v3774_v44 = vpack.c.bf16 %v3637_v34, %v3636_v2  ;;  %v10561_v24 = vunpack.i.h.bf16 %v10559_v10 }
 0x2d5   : > { %v3775_v27 = vpack.c.bf16 %v3733_v18, %v3732_v32  ;;  %v10560_v5 = vunpack.i.l.bf16 %v10559_v10  ;;  %v10516_v15 = vunpack.i.h.bf16 %v12734_v60  ;;  %v10515_v54 = vunpack.i.l.bf16 %v12734_v60  ;;  %v11008_v60 = vld [vmem:[#allocation3 + $0x129] sm:$0xff] }
 0x2d6   : > { %v3573_v36 = vsel %vm2404_vm12, %v12406_v12, %v10556_v31  ;;  %v3572_v21 = vsel %vm2404_vm12, %v12420_v1, %v10555_v58  ;;  %v10521_v45 = vunpack.i.h.bf16 %v12722_v3  ;;  %v10526_v34 = vunpack.i.h.bf16 %v12732_v48 }
 0x2d7   : > { %4103 = vmatprep.mubr.bf16.mxu1 %v3775_v27  ;;  %v3605_v33 = vsel %vm3582_vm14, %v3572_v21, %v10560_v5  ;;  %v3606_v47 = vsel %vm3582_vm14, %v3573_v36, %v10561_v24  ;;  %v3671_v30 = vsel %vm2404_vm12, %v11008_v60, %v10516_v15  ;;  %v3670_v12 = vsel %vm2404_vm12, %v12382_v29, %v10515_v54 }
 0x2d8   : > { %v3638_v46 = vsel %vm3615_vm15, %v3605_v33, %v10520_v25  ;;  %v3639_v27 = vsel %vm3615_vm15, %v3606_v47, %v10521_v45  ;;  %v10531_v29 = vunpack.i.h.bf16 %v12738_v63  ;;  %v10530_v31 = vunpack.i.l.bf16 %v12738_v63  ;;  %v11009_v33 = vld [vmem:[#allocation3 + $0x128] sm:$0xff] }
 0x2d9   : > { %v3575_v47 = vsel %vm2404_vm12, %v11009_v33, %v10526_v34 }
 0x2da   : > { %4104 = vmatmul.mubr.bf16.gmra.mrb[40].mxu1 %v3774_v44  ;;  %v10525_v44 = vunpack.i.l.bf16 %v12732_v48 }
 0x2db   : > { %v12776_v49 = vpop.permute.xlu0 %10563 }
 0x2dc   : > { %v10566_v15 = vunpack.i.h.bf16 %v12776_v49  ;;  %v10565_v54 = vunpack.i.l.bf16 %v12776_v49  ;;  %v11010_v49 = vld [vmem:[#allocation3 + $0x120] sm:$0xff] }
 0x2dd   : > { %v3574_v45 = vsel %vm2404_vm12, %v11010_v49, %v10525_v44 }
 0x2de   : > { %v12778_v62 = vpop.f32.mrb[40].mxu0  ;;  %v12790_v59 = vpop.permute.xlu1 %10593 }
 0x2df   : > { %v12780_v19 = vpop.f32.mrb[41].mxu0  ;;  %v12784_v37 = vpop.permute.xlu0 %10568  ;;  %v10596_v36 = vunpack.i.h.bf16 %v12790_v59  ;;  %v10595_v21 = vunpack.i.l.bf16 %v12790_v59 }
 0x2e0   : > { %v12782_v53 = vpop.f32.mrb[42].mxu0  ;;  %v10571_v48 = vunpack.i.h.bf16 %v12784_v37 }
 0x2e1   : > { %v12786_v4 = vpop.f32.mrb[43].mxu0 }
 0x2e2   : > { %v12800_v14 = vpop.permute.xlu1 %10598 }
 0x2e3   : > { %v12788_v42 = vpop.permute.xlu0 %10573 }
 0x2e6   : > { %v10604_v58 = vpop.permute.xlu1 %10603 }
 0x2e7   : > { %v10579_v8 = vpop.permute.xlu0 %10578  ;;  %v10606_v34 = vunpack.i.h.bf16 %v10604_v58  ;;  %v10605_v44 = vunpack.i.l.bf16 %v10604_v58 }
 0x2e8   : > { %v10581_v43 = vunpack.i.h.bf16 %v10579_v8  ;;  %v10580_v55 = vunpack.i.l.bf16 %v10579_v8  ;;  %v3777_v8 = vpack.c.bf16 %v3639_v27, %v3638_v46  ;;  %v10576_v46 = vunpack.i.h.bf16 %v12788_v42 }
 0x2e9   : > { %v10575_v27 = vunpack.i.l.bf16 %v12788_v42 }
 0x2ea   : > { %v3702_v18 = vsel %vm3582_vm14, %v3670_v12, %v10580_v55  ;;  %v3703_v40 = vsel %vm3582_vm14, %v3671_v30, %v10581_v43  ;;  %v10570_v43 = vunpack.i.l.bf16 %v12784_v37  ;;  %v3608_v37 = vsel %vm3582_vm14, %v3575_v47, %v10531_v29 }
 0x2eb   : > { %v10584_v52 = vpop.permute.xlu0 %10583  ;;  %v3641_v12 = vsel %vm3615_vm15, %v3608_v37, %v10596_v36  ;;  %v3675_v58 = vsel %vm2404_vm12, %v12484_v39, %v10576_v46  ;;  %v12872_v37 = vld [vmem:[%s14793_s4] ss:$0 sm:$0xff] }
 0x2ec   : > { %v10586_v1 = vunpack.i.h.bf16 %v10584_v52  ;;  %v10585_v32 = vunpack.i.l.bf16 %v10584_v52  ;;  %v3607_v52 = vsel %vm3582_vm14, %v3574_v45, %v10530_v31 }
 0x2ed   : > { %v3640_v30 = vsel %vm3615_vm15, %v3607_v52, %v10595_v21  ;;  %v3674_v21 = vsel %vm2404_vm12, %v12495_v38, %v10575_v27 }
 0x2ee   : > { %v3734_v2 = vsel %vm3615_vm15, %v3702_v18, %v10585_v32  ;;  %v3735_v3 = vsel %vm3615_vm15, %v3703_v40, %v10586_v1  ;;  %v10609_v1 = vpop.permute.xlu1 %10608  ;;  %v3780_v32 = vpack.c.bf16 %v3641_v12, %v3640_v30  ;;  %v10601_v18 = vunpack.i.h.bf16 %v12800_v14 }
 0x2ef   : > { %v10589_v9 = vpop.permute.xlu0 %10588  ;;  %v3778_v10 = vpack.c.bf16 %v3735_v3, %v3734_v2  ;;  %v10600_v40 = vunpack.i.l.bf16 %v12800_v14  ;;  %v11038_v14 = vmov 1983009808  }
 0x2f0   : > { %v10591_v24 = vunpack.i.h.bf16 %v10589_v9  ;;  %v10590_v5 = vunpack.i.l.bf16 %v10589_v9  ;;  %v10611_v9 = vunpack.i.h.bf16 %v10609_v1  ;;  %v3577_v42 = vsel %vm2404_vm12, %v12475_v57, %v10601_v18 }
 0x2f1   : > { %4111 = vmatprep.mubr.bf16.mxu1 %v3778_v10  ;;  %v10610_v10 = vunpack.i.l.bf16 %v10609_v1  ;;  %v3576_v36 = vsel %vm2404_vm12, %v12468_v51, %v10600_v40 }
 0x2f2   : > { %v3673_v63 = vsel %vm2404_vm12, %v12490_v26, %v10591_v24  ;;  %v3672_v55 = vsel %vm2404_vm12, %v12508_v17, %v10590_v5  ;;  %4112 = vmatmul.mubr.bf16.gmra.mrb[44].mxu1 %v3777_v8  ;;  %v12841_v2 = vpop.permute.xlu1 %10628 }
 0x2f3   : > { %v3704_v59 = vsel %vm3582_vm14, %v3672_v55, %v10565_v54  ;;  %v3705_v25 = vsel %vm3582_vm14, %v3673_v63, %v10566_v15  ;;  %v4379_v15 = vunpack.c.l.s4 %v11038_v14  ;;  %v4381_v54 = vlaneseq }
 0x2f4   : > { %v3736_v26 = vsel %vm3615_vm15, %v3704_v59, %v10570_v43  ;;  %v3737_v60 = vsel %vm3615_vm15, %v3705_v25, %v10571_v48  ;;  %v3609_v63 = vsel %vm3582_vm14, %v3576_v36, %v10605_v44  ;;  %v3610_v55 = vsel %vm3582_vm14, %v3577_v42, %v10606_v34 }
 0x2f5   : > { %v3781_v17 = vpack.c.bf16 %v3737_v60, %v3736_v26  ;;  %v3642_v45 = vsel %vm3615_vm15, %v3609_v63, %v10610_v10  ;;  %v3643_v39 = vsel %vm3615_vm15, %v3610_v55, %v10611_v9  ;;  %v4380_v30 = vunpack.c.0.s8 %v4379_v15  ;;  %v11012_v55 = vld [vmem:[#allocation3 + $0x150] sm:$0xff] }
 0x2f6   : > { %v10639_v49 = vpop.permute.xlu1 %10638  ;;  %v4382_v12 = vshrl.u32 %v4381_v54, 7  ;;  %v10631_v10 = vunpack.i.h.bf16 %v12841_v2 }
 0x2f7   : > { %4119 = vmatprep.mubr.bf16.mxu1 %v3781_v17  ;;  %v10641_v15 = vunpack.i.h.bf16 %v10639_v49  ;;  %v10640_v54 = vunpack.i.l.bf16 %v10639_v49 }
 0x2f8   : > { %v12878_v44 = vsub.s32 %v4380_v30, %v4382_v12 }
 0x2fa   : > { %4120 = vmatmul.mubr.bf16.gmra.mrb[48].mxu1 %v3780_v32  ;;  %v3783_v32 = vpack.c.bf16 %v3643_v39, %v3642_v45 }
 0x2fd   : > { %v10614_v3 = vpop.permute.xlu0 %10613  ;;  %v10649_v18 = vpop.permute.xlu1 %10648 }
 0x2fe   : > { %v12843_v29 = vpop.f32.mrb[44].mxu0  ;;  %v10616_v31 = vunpack.i.h.bf16 %v10614_v3  ;;  %v10615_v24 = vunpack.i.l.bf16 %v10614_v3 }
 0x2ff   : > { %v12845_v5 = vpop.f32.mrb[45].mxu0 }
 0x300   : > { %v12847_v8 = vpop.f32.mrb[46].mxu0  ;;  %v3706_v57 = vsel %vm3582_vm14, %v3674_v21, %v10615_v24  ;;  %v3707_v51 = vsel %vm3582_vm14, %v3675_v58, %v10616_v31  ;;  %v10630_v31 = vunpack.i.l.bf16 %v12841_v2  ;;  %v10651_v2 = vunpack.i.h.bf16 %v10649_v18 }
 0x301   : > { %v12857_v48 = vpop.f32.mrb[47].mxu0  ;;  %v10619_v43 = vpop.permute.xlu0 %10618 }
 0x302   : > { %v10621_v33 = vunpack.i.h.bf16 %v10619_v43  ;;  %v10620_v47 = vunpack.i.l.bf16 %v10619_v43  ;;  %v10659_v42 = vpop.permute.xlu1 %10658 }
 0x303   : > { %v10661_v39 = vunpack.i.h.bf16 %v10659_v42 }
 0x304   : > { %v9131_v59 = vpop.f32.mrb[0].mxu1  ;;  %v3738_v38 = vsel %vm3615_vm15, %v3706_v57, %v10620_v47  ;;  %v3739_v25 = vsel %vm3615_vm15, %v3707_v51, %v10621_v33  ;;  %v3578_v33 = vsel %vm2404_vm12, %v11012_v55, %v10630_v31  ;;  %v10650_v47 = vunpack.i.l.bf16 %v10649_v18 }
 0x305   : > { %v12867_v52 = vpop.permute.xlu0 %10623  ;;  %v9132_v26 = vpop.f32.mrb[1].mxu1  ;;  %v3784_v60 = vpack.c.bf16 %v3739_v25, %v3738_v38  ;;  %v3611_v49 = vsel %vm3582_vm14, %v3578_v33, %v10640_v54 }
 0x306   : > { %v9133_v17 = vadd.f32 %v9132_v26, %v9131_v59  ;;  %v9134_v1 = vpop.f32.mrb[2].mxu1  ;;  %v10669_v12 = vpop.permute.xlu1 %10668 }
 0x307   : > { %v9135_v40 = vpop.f32.mrb[3].mxu1  ;;  %4127 = vmatprep.mubr.bf16.mxu1 %v3784_v60 }
 0x308   : > { %v4026_v46 = vadd.f32 %v9133_v17, %v12872_v37  ;;  %v9136_v27 = vadd.f32 %v9135_v40, %v9134_v1  ;;  %4128 = vmatmul.mubr.bf16.gmra.mrb[52].mxu1 %v3783_v32  ;;  %v10660_v17 = vunpack.i.l.bf16 %v10659_v42  ;;  %v12898_v32 = vsel %vm3615_vm15, %v3611_v49, %v10650_v47 }
 0x309   : > { %v12875_v3 = vpop.permute.xlu0 %10633 }
 0x30a   : > { %v4187_v34 = vadd.f32 %v12662_v11, %v4026_v46  ;;  %v4029_v9 = vadd.f32 %v9136_v27, %v12872_v37  ;;  %v11011_v11 = vld [vmem:[#allocation3 + $0x158] sm:$0xff]  ;;  %v10636_v55 = vunpack.i.h.bf16 %v12875_v3  ;;  %v10635_v33 = vunpack.i.l.bf16 %v12875_v3 }
 0x30b   : > { %v3579_v63 = vsel %vm2404_vm12, %v11011_v11, %v10631_v10  ;;  %v10670_v3 = vunpack.i.l.bf16 %v10669_v12 }
 0x30c   : > { %v4313_v24 = vmax.f32 %v4187_v34, 0.0  ;;  %v4190_v14 = vadd.f32 %v12671_v20, %v4029_v9  ;;  %v3612_v45 = vsel %vm3582_vm14, %v3579_v63, %v10641_v15  ;;  %v3581_v9 = vsel %vm2404_vm12, %v12586_v22, %v10661_v39 }
 0x30d   : > { %v12885_v43 = vpop.permute.xlu0 %10643  ;;  %v12905_v34 = vsel %vm3615_vm15, %v3612_v45, %v10651_v2  ;;  %v10671_v63 = vunpack.i.h.bf16 %v10669_v12 }
 0x30e   : > { %v4377_v36 = vcombine.high %v4313_v24, %v4313_v24  ;;  %v4384_v58 = vrot.slane %v4313_v24, %v12878_v44  ;;  %v4314_v21 = vmax.f32 %v4190_v14, 0.0 }
 0x310   : > { %v4391_v57 = vrot.slane %v4377_v36, %v12878_v44  ;;  %v4392_v20 = vcombine.high %v4384_v58, %v4384_v58  ;;  %v4394_v51 = vcombine.high %v4314_v21, %v4314_v21  ;;  %v4401_v59 = vrot.slane %v4314_v21, %v12878_v44 }
 0x311   : > { %v5049_v25 = vsel %vm2407_vm13, %v4384_v58, -inf  ;;  %v12902_v27 = vpop.permute.xlu0 %10653  ;;  %v3580_v36 = vsel %vm2404_vm12, %v12579_v23, %v10660_v17  ;;  %v10626_v58 = vunpack.i.h.bf16 %v12867_v52  ;;  %v10625_v21 = vunpack.i.l.bf16 %v12867_v52 }
 0x312   : > { %v4393_v38 = vcombine.high %v4391_v57, %v4391_v57  ;;  %v5056_v26 = vsel %vm2407_vm13, %v4392_v20, -inf  ;;  %v4408_v60 = vrot.slane %v4394_v51, %v12878_v44  ;;  %v5063_v30 = vsel %vm2407_vm13, %v4391_v57, -inf  ;;  %v12918_v57 = vpop.permute.xlu1 %10678 }
 0x313   : > { %v4409_v1 = vcombine.high %v4401_v59, %v4401_v59  ;;  %v5077_v46 = vsel %vm2407_vm13, %v4401_v59, -inf  ;;  %v5050_v10 = vrot.slane %v5049_v25, 4  ;;  %v5057_v31 = vrot.slane %v5056_v26, 4 }
 0x314   : > { %v5070_v18 = vsel %vm2407_vm13, %v4393_v38, -inf  ;;  %v4410_v40 = vcombine.high %v4408_v60, %v4408_v60  ;;  %v5091_v24 = vsel %vm2407_vm13, %v4408_v60, -inf  ;;  %v5064_v14 = vrot.slane %v5063_v30, 4 }
 0x315   : > { %v5071_v15 = vrot.slane %v5070_v18, 4  ;;  %v5084_v54 = vsel %vm2407_vm13, %v4409_v1, -inf  ;;  %v5078_v11 = vrot.slane %v5077_v46, 4  ;;  %v5092_v22 = vrot.slane %v5091_v24, 4  ;;  %v10664_v52 = vpop.permute.xlu0 %10663 }
 0x316   : > { %v5098_v42 = vsel %vm2407_vm13, %v4410_v40, -inf  ;;  %v5085_v47 = vrot.slane %v5084_v54, 4  ;;  %v10646_v20 = vunpack.i.h.bf16 %v12885_v43  ;;  %v10645_v51 = vunpack.i.l.bf16 %v12885_v43 }
 0x317   : > { %v5099_v2 = vrot.slane %v5098_v42, 4  ;;  %v5051_v23 = vmax.f32 %v5049_v25, %v5050_v10  ;;  %v5058_v49 = vmax.f32 %v5056_v26, %v5057_v31  ;;  %v5065_v45 = vmax.f32 %v5063_v30, %v5064_v14 }
 0x318   : > { %v5072_v39 = vmax.f32 %v5070_v18, %v5071_v15  ;;  %v3677_v59 = vsel %vm2404_vm12, %v12595_v13, %v10626_v58  ;;  %v3676_v38 = vsel %vm2404_vm12, %v12608_v7, %v10625_v21  ;;  %v5079_v60 = vmax.f32 %v5077_v46, %v5078_v11 }
 0x319   : > { %v5093_v17 = vmax.f32 %v5091_v24, %v5092_v22  ;;  %v3708_v1 = vsel %vm3582_vm14, %v3676_v38, %v10635_v33  ;;  %v3709_v40 = vsel %vm3582_vm14, %v3677_v59, %v10636_v55  ;;  %v10680_v43 = vunpack.i.l.bf16 %v12918_v57  ;;  %v10674_v11 = vpop.permute.xlu0 %10673 }
 0x31a   : > { %v5086_v25 = vmax.f32 %v5084_v54, %v5085_v47  ;;  %v5100_v26 = vmax.f32 %v5098_v42, %v5099_v2  ;;  %v3740_v30 = vsel %vm3615_vm15, %v3708_v1, %v10645_v51  ;;  %v3741_v18 = vsel %vm3615_vm15, %v3709_v40, %v10646_v20 }
 0x31b   : > { %v5052_v10 = vrot.slane %v5051_v23, 2  ;;  %v5059_v13 = vrot.slane %v5058_v49, 2  ;;  %v5066_v31 = vrot.slane %v5065_v45, 2  ;;  %v5073_v14 = vrot.slane %v5072_v39, 2 }
 0x31c   : > { %v3613_v12 = vsel %vm3582_vm14, %v3580_v36, %v10670_v3  ;;  %v3614_v46 = vsel %vm3582_vm14, %v3581_v9, %v10671_v63  ;;  %v5080_v24 = vrot.slane %v5079_v60, 2  ;;  %v3786_v15 = vpack.c.bf16 %v12905_v34, %v12898_v32 }
 0x31d   : > { %v5094_v42 = vrot.slane %v5093_v17, 2  ;;  %v10681_v58 = vunpack.i.h.bf16 %v12918_v57  ;;  %v10656_v21 = vunpack.i.h.bf16 %v12902_v27  ;;  %v3646_v22 = vsel %vm3615_vm15, %v3613_v12, %v10680_v43 }
 0x31e   : > { %v12931_v7 = vpop.f32.mrb[48].mxu0  ;;  %v5087_v33 = vrot.slane %v5086_v25, 2  ;;  %v5101_v36 = vrot.slane %v5100_v26, 2  ;;  %v10655_v9 = vunpack.i.l.bf16 %v12902_v27  ;;  %v3787_v63 = vpack.c.bf16 %v3741_v18, %v3740_v30 }
 0x31f   : > { %v12937_v54 = vpop.f32.mrb[49].mxu0  ;;  %v5053_v32 = vmax.f32 %v5051_v23, %v5052_v10  ;;  %v5060_v34 = vmax.f32 %v5058_v49, %v5059_v13  ;;  %v5067_v2 = vmax.f32 %v5065_v45, %v5066_v31  ;;  %v5074_v20 = vmax.f32 %v5072_v39, %v5073_v14 }
 0x320   : > { %v12942_v55 = vpop.f32.mrb[50].mxu0  ;;  %v5081_v51 = vmax.f32 %v5079_v60, %v5080_v24  ;;  %4135 = vmatprep.mubr.bf16.mxu1 %v3787_v63  ;;  %v10666_v57 = vunpack.i.h.bf16 %v10664_v52  ;;  %v10665_v59 = vunpack.i.l.bf16 %v10664_v52  ;;  %v10676_v38 = vunpack.i.h.bf16 %v10674_v11 }
 0x321   : > { %v12945_v47 = vpop.f32.mrb[51].mxu0  ;;  %v5095_v3 = vmax.f32 %v5093_v17, %v5094_v42  ;;  %v3679_v1 = vsel %vm2404_vm12, %v12643_v6, %v10656_v21  ;;  %v3678_v40 = vsel %vm2404_vm12, %v12649_v56, %v10655_v9  ;;  %4136 = vmatmul.mubr.bf16.gmra.mrb[56].mxu1 %v3786_v15  ;;  %v10675_v27 = vunpack.i.l.bf16 %v10674_v11 }
 0x322   : > { %v5088_v43 = vmax.f32 %v5086_v25, %v5087_v33  ;;  %v5102_v30 = vmax.f32 %v5100_v26, %v5101_v36  ;;  %v3710_v23 = vsel %vm3582_vm14, %v3678_v40, %v10665_v59  ;;  %v3711_v49 = vsel %vm3582_vm14, %v3679_v1, %v10666_v57 }
 0x323   : > { %v5054_v45 = vrot.slane %v5053_v32, 1  ;;  %v3742_v39 = vsel %vm3615_vm15, %v3710_v23, %v10675_v27  ;;  %v3743_v52 = vsel %vm3615_vm15, %v3711_v49, %v10676_v38  ;;  %v3647_v60 = vsel %vm3615_vm15, %v3614_v46, %v10681_v58 }
 0x324   : > { %v5061_v6 = vrot.slane %v5060_v34, 1  ;;  %v5068_v18 = vrot.slane %v5067_v2, 1  ;;  %v5075_v10 = vrot.slane %v5074_v20, 1  ;;  %v3790_v56 = vpack.c.bf16 %v3743_v52, %v3742_v39 }
 0x325   : > { %v9137_v17 = vpop.f32.mrb[4].mxu1  ;;  %v5082_v26 = vrot.slane %v5081_v51, 1  ;;  %v5089_v14 = vrot.slane %v5088_v43, 1  ;;  %v5096_v12 = vrot.slane %v5095_v3, 1  ;;  %v5103_v24 = vrot.slane %v5102_v30, 1 }
 0x326   : > { %v9138_v13 = vpop.f32.mrb[5].mxu1  ;;  %4143 = vmatprep.mubr.bf16.mxu1 %v3790_v56  ;;  %v3789_v42 = vpack.c.bf16 %v3647_v60, %v3646_v22  ;;  %v5055_v33 = vmax.f32 %v5053_v32, %v5054_v45  ;;  %v5062_v46 = vmax.f32 %v5060_v34, %v5061_v6  ;;  %v5069_v58 = vmax.f32 %v5067_v2, %v5068_v18 }
 0x327   : > { %v9139_v31 = vadd.f32 %v9138_v13, %v9137_v17  ;;  %v9140_v25 = vpop.f32.mrb[6].mxu1  ;;  %v5076_v36 = vmax.f32 %v5074_v20, %v5075_v10  ;;  %v5083_v57 = vmax.f32 %v5081_v51, %v5082_v26  ;;  %v5090_v59 = vmax.f32 %v5088_v43, %v5089_v14 }
 0x328   : > { %v9141_v15 = vpop.f32.mrb[7].mxu1  ;;  %v5097_v38 = vmax.f32 %v5095_v3, %v5096_v12  ;;  %v5104_v1 = vmax.f32 %v5102_v30, %v5103_v24  ;;  %v12961_v23 = vsel %vm2404_vm12, %v5055_v33, -inf  ;;  %v12964_v32 = vsel %vm2404_vm12, %v5062_v46, -inf }
 0x329   : > { %v4034_v21 = vadd.f32 %v9139_v31, %v12872_v37  ;;  %v9142_v11 = vadd.f32 %v9141_v15, %v9140_v25  ;;  %4144 = vmatmul.mubr.bf16.gmra.mrb[60].mxu1 %v3789_v42  ;;  %v12967_v34 = vsel %vm2404_vm12, %v5069_v58, -inf  ;;  %v12974_v30 = vsel %vm2404_vm12, %v5083_v57, -inf }
 0x32a   : > { %v12977_v49 = vsel %vm2404_vm12, %v5090_v59, -inf  ;;  %v12980_v45 = vsel %vm2404_vm12, %v5097_v38, -inf  ;;  %v12983_v39 = vsel %vm2404_vm12, %v5104_v1, -inf }
 0x32b   : > { %v4195_v9 = vadd.f32 %v12660_v28, %v4034_v21  ;;  %v4037_v63 = vadd.f32 %v9142_v11, %v12872_v37  ;;  %v12970_v28 = vsel %vm2404_vm12, %v5076_v36, -inf }
 0x32d   : > { %v4315_v40 = vmax.f32 %v4195_v9, 0.0  ;;  %v4198_v27 = vadd.f32 %v12665_v35, %v4037_v63  ;;  %v9143_v22 = vpop.f32.mrb[8].mxu1 }
 0x32e   : > { %v9144_v2 = vpop.f32.mrb[9].mxu1 }
 0x32f   : > { %v4411_v20 = vcombine.high %v4315_v40, %v4315_v40  ;;  %v4418_v51 = vrot.slane %v4315_v40, %v12878_v44  ;;  %v4316_v3 = vmax.f32 %v4198_v27, 0.0  ;;  %v9145_v43 = vadd.f32 %v9144_v2, %v9143_v22  ;;  %v9146_v35 = vpop.f32.mrb[10].mxu1 }
 0x330   : > { %v9147_v52 = vpop.f32.mrb[11].mxu1 }
 0x331   : > { %v4425_v60 = vrot.slane %v4411_v20, %v12878_v44  ;;  %v4426_v17 = vcombine.high %v4418_v51, %v4418_v51  ;;  %v5105_v6 = vsel %vm2407_vm13, %v4418_v51, -inf  ;;  %v4428_v18 = vcombine.high %v4316_v3, %v4316_v3 }
 0x332   : > { %v5106_v10 = vrot.slane %v5105_v6, 4  ;;  %v4435_v56 = vrot.slane %v4316_v3, %v12878_v44  ;;  %v12989_v13 = vadd.f32 %v9145_v43, %v12872_v37  ;;  %v12991_v31 = vadd.f32 %v9147_v52, %v9146_v35 }
 0x333   : > { %v4427_v25 = vcombine.high %v4425_v60, %v4425_v60  ;;  %v5112_v26 = vsel %vm2407_vm13, %v4426_v17, -inf  ;;  %v5119_v14 = vsel %vm2407_vm13, %v4425_v60, -inf  ;;  %v4442_v12 = vrot.slane %v4428_v18, %v12878_v44 }
 0x334   : > { %v5107_v24 = vmax.f32 %v5105_v6, %v5106_v10  ;;  %v5113_v15 = vrot.slane %v5112_v26, 4  ;;  %v5120_v42 = vrot.slane %v5119_v14, 4  ;;  %v4443_v21 = vcombine.high %v4435_v56, %v4435_v56 }
 0x335   : > { %v5126_v11 = vsel %vm2407_vm13, %v4427_v25, -inf  ;;  %v4444_v33 = vcombine.high %v4442_v12, %v4442_v12  ;;  %v5133_v46 = vsel %vm2407_vm13, %v4435_v56, -inf  ;;  %v5147_v58 = vsel %vm2407_vm13, %v4442_v12, -inf }
 0x336   : > { %v5108_v36 = vrot.slane %v5107_v24, 2  ;;  %v5114_v9 = vmax.f32 %v5112_v26, %v5113_v15  ;;  %v5121_v63 = vmax.f32 %v5119_v14, %v5120_v42  ;;  %v5127_v57 = vrot.slane %v5126_v11, 4 }
 0x337   : > { %v5134_v59 = vrot.slane %v5133_v46, 4  ;;  %v5140_v38 = vsel %vm2407_vm13, %v4443_v21, -inf  ;;  %v5148_v1 = vrot.slane %v5147_v58, 4  ;;  %v5154_v40 = vsel %vm2407_vm13, %v4444_v33, -inf }
 0x338   : > { %v5109_v27 = vmax.f32 %v5107_v24, %v5108_v36  ;;  %v5115_v22 = vrot.slane %v5114_v9, 2  ;;  %v5122_v2 = vrot.slane %v5121_v63, 2  ;;  %v5128_v20 = vmax.f32 %v5126_v11, %v5127_v57 }
 0x339   : > { %v5135_v51 = vmax.f32 %v5133_v46, %v5134_v59  ;;  %v5141_v3 = vrot.slane %v5140_v38, 4  ;;  %v5149_v43 = vmax.f32 %v5147_v58, %v5148_v1  ;;  %v5155_v35 = vrot.slane %v5154_v40, 4 }
 0x33a   : > { %v5110_v52 = vrot.slane %v5109_v27, 1  ;;  %v5116_v60 = vmax.f32 %v5114_v9, %v5115_v22  ;;  %v5123_v17 = vmax.f32 %v5121_v63, %v5122_v2  ;;  %v5129_v6 = vrot.slane %v5128_v20, 2 }
 0x33b   : > { %v5136_v18 = vrot.slane %v5135_v51, 2  ;;  %v5142_v10 = vmax.f32 %v5140_v38, %v5141_v3  ;;  %v5150_v56 = vrot.slane %v5149_v43, 2  ;;  %v5156_v25 = vmax.f32 %v5154_v40, %v5155_v35 }
 0x33c   : > { %v5111_v26 = vmax.f32 %v5109_v27, %v5110_v52  ;;  %v5117_v14 = vrot.slane %v5116_v60, 1  ;;  %v5124_v12 = vrot.slane %v5123_v17, 1  ;;  %v5130_v24 = vmax.f32 %v5128_v20, %v5129_v6 }
 0x33d   : > { %v5137_v15 = vmax.f32 %v5135_v51, %v5136_v18  ;;  %v5143_v42 = vrot.slane %v5142_v10, 2  ;;  %v5151_v21 = vmax.f32 %v5149_v43, %v5150_v56  ;;  %v5157_v11 = vrot.slane %v5156_v25, 2 }
 0x33e   : > { %v13001_v33 = vpop.f32.mrb[52].mxu0  ;;  %v5118_v46 = vmax.f32 %v5116_v60, %v5117_v14  ;;  %v5125_v58 = vmax.f32 %v5123_v17, %v5124_v12  ;;  %v5131_v36 = vrot.slane %v5130_v24, 1  ;;  %v5946_v9 = vsel %vm2404_vm12, %v5111_v26, -inf }
 0x33f   : > { %v13004_v63 = vpop.f32.mrb[53].mxu0  ;;  %v5947_v57 = vmax.f32 %v12961_v23, %v5946_v9  ;;  %v5138_v59 = vrot.slane %v5137_v15, 1  ;;  %v5144_v38 = vmax.f32 %v5142_v10, %v5143_v42  ;;  %v5152_v1 = vrot.slane %v5151_v21, 1 }
 0x340   : > { %v13007_v40 = vpop.f32.mrb[54].mxu0  ;;  %v5132_v27 = vmax.f32 %v5130_v24, %v5131_v36  ;;  %v5949_v22 = vsel %vm2404_vm12, %v5118_v46, -inf  ;;  %v5952_v2 = vsel %vm2404_vm12, %v5125_v58, -inf  ;;  %v5158_v20 = vmax.f32 %v5156_v25, %v5157_v11 }
 0x341   : > { %v13011_v51 = vpop.f32.mrb[55].mxu0  ;;  %v5950_v3 = vmax.f32 %v12964_v32, %v5949_v22  ;;  %v5953_v43 = vmax.f32 %v12967_v34, %v5952_v2  ;;  %v5139_v35 = vmax.f32 %v5137_v15, %v5138_v59  ;;  %v5145_v23 = vrot.slane %v5144_v38, 1 }
 0x342   : > { %v5955_v52 = vsel %vm2404_vm12, %v5132_v27, -inf  ;;  %v5153_v60 = vmax.f32 %v5151_v21, %v5152_v1  ;;  %v5159_v17 = vrot.slane %v5158_v20, 1  ;;  %v4203_v6 = vadd.f32 %v12726_v41, %v12989_v13 }
 0x343   : > { %v5956_v18 = vmax.f32 %v12970_v28, %v5955_v52  ;;  %v6222_v10 = vsel %vm6221_vm0, %v5950_v3, %v5947_v57  ;;  %v5146_v56 = vmax.f32 %v5144_v38, %v5145_v23  ;;  %v5958_v25 = vsel %vm2404_vm12, %v5139_v35, -inf }
 0x344   : > { %v6224_v32 = vsel %vm6223_vm1, %v5953_v43, %v6222_v10  ;;  %v5160_v26 = vmax.f32 %v5158_v20, %v5159_v17  ;;  %v5959_v34 = vmax.f32 %v12974_v30, %v5958_v25  ;;  %v5964_v14 = vsel %vm2404_vm12, %v5153_v60, -inf }
 0x345   : > { %v5961_v12 = vsel %vm2404_vm12, %v5146_v56, -inf  ;;  %v5965_v24 = vmax.f32 %v12980_v45, %v5964_v14  ;;  %v6226_v41 = vsel %vm6225_vm2, %v5956_v18, %v6224_v32  ;;  %v4317_v13 = vmax.f32 %v4203_v6, 0.0  ;;  %v9149_v28 = vpop.f32.mrb[12].mxu1 }
 0x346   : > { %v5962_v15 = vmax.f32 %v12977_v49, %v5961_v12  ;;  %v5967_v42 = vsel %vm2404_vm12, %v5160_v26, -inf  ;;  %v6228_v21 = vsel %vm6227_vm3, %v5959_v34, %v6226_v41  ;;  %v4045_v11 = vadd.f32 %v12991_v31, %v12872_v37  ;;  %v9150_v30 = vpop.f32.mrb[13].mxu1 }
 0x347   : > { %v5968_v46 = vmax.f32 %v12983_v39, %v5967_v42  ;;  %v4445_v58 = vcombine.high %v4317_v13, %v4317_v13  ;;  %v4452_v36 = vrot.slane %v4317_v13, %v12878_v44  ;;  %v9151_v45 = vadd.f32 %v9150_v30, %v9149_v28  ;;  %v9152_v9 = vpop.f32.mrb[14].mxu1 }
 0x348   : > { %v6230_v57 = vsel %vm6229_vm4, %v5962_v15, %v6228_v21  ;;  %v4206_v59 = vadd.f32 %v12730_v50, %v4045_v11  ;;  %v9153_v49 = vpop.f32.mrb[15].mxu1 }
 0x349   : > { %v6232_v38 = vsel %vm6231_vm5, %v5965_v24, %v6230_v57  ;;  %v4459_v1 = vrot.slane %v4445_v58, %v12878_v44  ;;  %v4460_v27 = vcombine.high %v4452_v36, %v4452_v36  ;;  %v5161_v31 = vsel %vm2407_vm13, %v4452_v36, -inf }
 0x34a   : > { %v6234_v22 = vsel %vm6233_vm6, %v5968_v46, %v6232_v38  ;;  %v5162_v39 = vrot.slane %v5161_v31, 4  ;;  %v4318_v2 = vmax.f32 %v4206_v59, 0.0  ;;  %v4050_v20 = vadd.f32 %v9151_v45, %v12872_v37 }
 0x34b   : > { %6293 = vst.msk [vmem:[#allocation4 + $0x11] sm:$0xff] %vm2404_vm12, %v6234_v22  ;;  %v4461_v3 = vcombine.high %v4459_v1, %v4459_v1  ;;  %v5168_v43 = vsel %vm2407_vm13, %v4460_v27, -inf  ;;  %v5175_v50 = vsel %vm2407_vm13, %v4459_v1, -inf  ;;  %v9154_v35 = vadd.f32 %v9153_v49, %v9152_v9 }
 0x34c   : > { %v5163_v23 = vmax.f32 %v5161_v31, %v5162_v39  ;;  %v5169_v52 = vrot.slane %v5168_v43, 4  ;;  %v5176_v60 = vrot.slane %v5175_v50, 4  ;;  %v4462_v17 = vcombine.high %v4318_v2, %v4318_v2 }
 0x34d   : > { %v5182_v6 = vsel %vm2407_vm13, %v4461_v3, -inf  ;;  %v4469_v18 = vrot.slane %v4318_v2, %v12878_v44  ;;  %v4211_v10 = vadd.f32 %v12724_v61, %v4050_v20  ;;  %v4053_v56 = vadd.f32 %v9154_v35, %v12872_v37  ;;  %v13048_v25 = vpop.f32.mrb[16].mxu1 }
 0x34e   : > { %v5164_v32 = vrot.slane %v5163_v23, 2  ;;  %v5170_v26 = vmax.f32 %v5168_v43, %v5169_v52  ;;  %v5177_v34 = vmax.f32 %v5175_v50, %v5176_v60  ;;  %v5183_v14 = vrot.slane %v5182_v6, 4  ;;  %v13050_v12 = vpop.f32.mrb[17].mxu1 }
 0x34f   : > { %v4476_v24 = vrot.slane %v4462_v17, %v12878_v44  ;;  %v4477_v41 = vcombine.high %v4469_v18, %v4469_v18  ;;  %v5189_v13 = vsel %vm2407_vm13, %v4469_v18, -inf  ;;  %v4319_v28 = vmax.f32 %v4211_v10, 0.0  ;;  %v13054_v15 = vpop.f32.mrb[18].mxu1 }
 0x350   : > { %v5165_v42 = vmax.f32 %v5163_v23, %v5164_v32  ;;  %v5171_v61 = vrot.slane %v5170_v26, 2  ;;  %v5178_v21 = vrot.slane %v5177_v34, 2  ;;  %v5184_v11 = vmax.f32 %v5182_v6, %v5183_v14  ;;  %v13056_v30 = vpop.f32.mrb[19].mxu1 }
 0x351   : > { %v4478_v46 = vcombine.high %v4476_v24, %v4476_v24  ;;  %v5190_v58 = vrot.slane %v5189_v13, 4  ;;  %v5196_v36 = vsel %vm2407_vm13, %v4477_v41, -inf  ;;  %v5203_v45 = vsel %vm2407_vm13, %v4476_v24, -inf }
 0x352   : > { %v5166_v9 = vrot.slane %v5165_v42, 1  ;;  %v5172_v57 = vmax.f32 %v5170_v26, %v5171_v61  ;;  %v5179_v59 = vmax.f32 %v5177_v34, %v5178_v21  ;;  %v5185_v49 = vrot.slane %v5184_v11, 2 }
 0x353   : > { %v5191_v38 = vmax.f32 %v5189_v13, %v5190_v58  ;;  %v5197_v1 = vrot.slane %v5196_v36, 4  ;;  %v5204_v27 = vrot.slane %v5203_v45, 4  ;;  %v5210_v31 = vsel %vm2407_vm13, %v4478_v46, -inf }
 0x354   : > { %v5167_v22 = vmax.f32 %v5165_v42, %v5166_v9  ;;  %v5173_v39 = vrot.slane %v5172_v57, 1  ;;  %v5180_v2 = vrot.slane %v5179_v59, 1  ;;  %v5186_v20 = vmax.f32 %v5184_v11, %v5185_v49 }
 0x355   : > { %v5192_v3 = vrot.slane %v5191_v38, 2  ;;  %v5198_v43 = vmax.f32 %v5196_v36, %v5197_v1  ;;  %v5205_v50 = vmax.f32 %v5203_v45, %v5204_v27  ;;  %v5211_v35 = vrot.slane %v5210_v31, 4 }
 0x356   : > { %v5174_v23 = vmax.f32 %v5172_v57, %v5173_v39  ;;  %v5181_v52 = vmax.f32 %v5179_v59, %v5180_v2  ;;  %v5187_v60 = vrot.slane %v5186_v20, 1  ;;  %v13062_v17 = vsel %vm2404_vm12, %v5167_v22, -inf }
 0x357   : > { %v5193_v6 = vmax.f32 %v5191_v38, %v5192_v3  ;;  %v5199_v18 = vrot.slane %v5198_v43, 2  ;;  %v5206_v10 = vrot.slane %v5205_v50, 2  ;;  %v5212_v32 = vmax.f32 %v5210_v31, %v5211_v35 }
 0x358   : > { %v5188_v26 = vmax.f32 %v5186_v20, %v5187_v60  ;;  %v13065_v34 = vsel %vm2404_vm12, %v5174_v23, -inf  ;;  %v13068_v14 = vsel %vm2404_vm12, %v5181_v52, -inf  ;;  %v4479_v24 = vcombine.high %v4319_v28, %v4319_v28 }
 0x359   : > { %v5194_v41 = vrot.slane %v5193_v6, 1  ;;  %v5200_v13 = vmax.f32 %v5198_v43, %v5199_v18  ;;  %v5207_v42 = vmax.f32 %v5205_v50, %v5206_v10  ;;  %v5213_v61 = vrot.slane %v5212_v32, 2 }
 0x35a   : > { %v13071_v21 = vsel %vm2404_vm12, %v5188_v26, -inf  ;;  %v4486_v11 = vrot.slane %v4319_v28, %v12878_v44  ;;  %v4493_v46 = vrot.slane %v4479_v24, %v12878_v44  ;;  %v4214_v58 = vadd.f32 %v12728_v16, %v4053_v56 }
 0x35b   : > { %v5195_v36 = vmax.f32 %v5193_v6, %v5194_v41  ;;  %v5201_v45 = vrot.slane %v5200_v13, 1  ;;  %v5208_v9 = vrot.slane %v5207_v42, 1  ;;  %v5214_v57 = vmax.f32 %v5212_v32, %v5213_v61 }
 0x35c   : > { %v4494_v59 = vcombine.high %v4486_v11, %v4486_v11  ;;  %v4495_v49 = vcombine.high %v4493_v46, %v4493_v46  ;;  %v5217_v38 = vsel %vm2407_vm13, %v4486_v11, -inf  ;;  %v5231_v1 = vsel %vm2407_vm13, %v4493_v46, -inf }
 0x35d   : > { %v5202_v27 = vmax.f32 %v5200_v13, %v5201_v45  ;;  %v5209_v31 = vmax.f32 %v5207_v42, %v5208_v9  ;;  %v5215_v22 = vrot.slane %v5214_v57, 1  ;;  %v13079_v39 = vsel %vm2404_vm12, %v5195_v36, -inf  ;;  %v13081_v28 = vpop.f32.mrb[56].mxu0 }
 0x35e   : > { %14804 = vst [vmem:[#allocation7_spill] sm:$0xff] %v13081_v28  ;;  %v5218_v2 = vrot.slane %v5217_v38, 4  ;;  %v5224_v16 = vsel %vm2407_vm13, %v4494_v59, -inf  ;;  %v5232_v56 = vrot.slane %v5231_v1, 4  ;;  %v5238_v20 = vsel %vm2407_vm13, %v4495_v49, -inf  ;;  %v13085_v3 = vpop.f32.mrb[57].mxu0 }
 0x35f   : > { %v5216_v43 = vmax.f32 %v5214_v57, %v5215_v22  ;;  %v13088_v50 = vsel %vm2404_vm12, %v5202_v27, -inf  ;;  %v13091_v35 = vsel %vm2404_vm12, %v5209_v31, -inf  ;;  %v5225_v23 = vrot.slane %v5224_v16, 4  ;;  %v13093_v52 = vpop.f32.mrb[58].mxu0 }
 0x360   : > { %14805 = vst [vmem:[#allocation8_spill] sm:$0xff] %v13093_v52  ;;  %v5219_v60 = vmax.f32 %v5217_v38, %v5218_v2  ;;  %v5233_v6 = vmax.f32 %v5231_v1, %v5232_v56  ;;  %v5239_v18 = vrot.slane %v5238_v20, 4  ;;  %v4320_v10 = vmax.f32 %v4214_v58, 0.0  ;;  %v13095_v32 = vpop.f32.mrb[59].mxu0 }
 0x361   : > { %v13098_v26 = vsel %vm2404_vm12, %v5216_v43, -inf  ;;  %v5226_v24 = vmax.f32 %v5224_v16, %v5225_v23  ;;  %v9157_v41 = vadd.f32 %v13050_v12, %v13048_v25  ;;  %v9160_v13 = vadd.f32 %v13056_v30, %v13054_v15 }
 0x362   : > { %v5220_v42 = vrot.slane %v5219_v60, 2  ;;  %v5234_v61 = vrot.slane %v5233_v6, 2  ;;  %v5240_v11 = vmax.f32 %v5238_v20, %v5239_v18  ;;  %v4496_v46 = vcombine.high %v4320_v10, %v4320_v10 }
 0x363   : > { %v5227_v36 = vrot.slane %v5226_v24, 2  ;;  %v4503_v45 = vrot.slane %v4320_v10, %v12878_v44  ;;  %v4058_v58 = vadd.f32 %v9157_v41, %v12872_v37  ;;  %v4061_v9 = vadd.f32 %v9160_v13, %v12872_v37 }
 0x364   : > { %v5221_v57 = vmax.f32 %v5219_v60, %v5220_v42  ;;  %v5235_v59 = vmax.f32 %v5233_v6, %v5234_v61  ;;  %v5241_v49 = vrot.slane %v5240_v11, 2  ;;  %v4510_v38 = vrot.slane %v4496_v46, %v12878_v44 }
 0x365   : > { %v5228_v25 = vmax.f32 %v5226_v24, %v5227_v36  ;;  %v4511_v12 = vcombine.high %v4503_v45, %v4503_v45  ;;  %v5245_v15 = vsel %vm2407_vm13, %v4503_v45, -inf  ;;  %v4219_v30 = vadd.f32 %v12780_v19, %v4058_v58  ;;  %v13110_v1 = vpop.f32.mrb[20].mxu1 }
 0x366   : > { %v5222_v27 = vrot.slane %v5221_v57, 1  ;;  %v5236_v31 = vrot.slane %v5235_v59, 1  ;;  %v5242_v22 = vmax.f32 %v5240_v11, %v5241_v49  ;;  %v4512_v2 = vcombine.high %v4510_v38, %v4510_v38  ;;  %v13112_v16 = vpop.f32.mrb[21].mxu1 }
 0x367   : > { %v5229_v37 = vrot.slane %v5228_v25, 1  ;;  %v5246_v56 = vrot.slane %v5245_v15, 4  ;;  %v5252_v20 = vsel %vm2407_vm13, %v4511_v12, -inf  ;;  %v5259_v43 = vsel %vm2407_vm13, %v4510_v38, -inf  ;;  %v13116_v23 = vpop.f32.mrb[22].mxu1 }
 0x368   : > { %v5223_v60 = vmax.f32 %v5221_v57, %v5222_v27  ;;  %v5237_v6 = vmax.f32 %v5235_v59, %v5236_v31  ;;  %v5243_v18 = vrot.slane %v5242_v22, 1  ;;  %v5253_v19 = vrot.slane %v5252_v20, 4  ;;  %v13118_v10 = vpop.f32.mrb[23].mxu1 }
 0x369   : > { %v5230_v24 = vmax.f32 %v5228_v25, %v5229_v37  ;;  %v5247_v41 = vmax.f32 %v5245_v15, %v5246_v56  ;;  %v5260_v13 = vrot.slane %v5259_v43, 4  ;;  %v5266_v42 = vsel %vm2407_vm13, %v4512_v2, -inf }
 0x36a   : > { %v5244_v61 = vmax.f32 %v5242_v22, %v5243_v18  ;;  %v5970_v11 = vsel %vm2404_vm12, %v5223_v60, -inf  ;;  %v5976_v46 = vsel %vm2404_vm12, %v5237_v6, -inf  ;;  %v5254_v36 = vmax.f32 %v5252_v20, %v5253_v19 }
 0x36b   : > { %v5971_v45 = vmax.f32 %v13062_v17, %v5970_v11  ;;  %v5973_v58 = vsel %vm2404_vm12, %v5230_v24, -inf  ;;  %v5977_v57 = vmax.f32 %v13068_v14, %v5976_v46  ;;  %v5248_v59 = vrot.slane %v5247_v41, 2 }
 0x36c   : > { %v5974_v49 = vmax.f32 %v13065_v34, %v5973_v58  ;;  %v5979_v38 = vsel %vm2404_vm12, %v5244_v61, -inf  ;;  %v5255_v25 = vrot.slane %v5254_v36, 2  ;;  %v5261_v12 = vmax.f32 %v5259_v43, %v5260_v13 }
 0x36d   : > { %v5980_v15 = vmax.f32 %v13071_v21, %v5979_v38  ;;  %v5249_v27 = vmax.f32 %v5247_v41, %v5248_v59  ;;  %v5267_v31 = vrot.slane %v5266_v42, 4  ;;  %v4321_v22 = vmax.f32 %v4219_v30, 0.0  ;;  %v13129_v2 = vpop.f32.mrb[24].mxu1 }
 0x36e   : > { %v6235_v17 = vsel %vm6221_vm0, %v5974_v49, %v5971_v45  ;;  %v5256_v37 = vmax.f32 %v5254_v36, %v5255_v25  ;;  %v5262_v56 = vrot.slane %v5261_v12, 2  ;;  %v4222_v14 = vadd.f32 %v12786_v4, %v4061_v9  ;;  %v13133_v20 = vpop.f32.mrb[25].mxu1 }
 0x36f   : > { %v6236_v34 = vsel %vm6223_vm1, %v5977_v57, %v6235_v17  ;;  %v5250_v60 = vrot.slane %v5249_v27, 1  ;;  %v5268_v6 = vmax.f32 %v5266_v42, %v5267_v31  ;;  %v4513_v43 = vcombine.high %v4321_v22, %v4321_v22  ;;  %v13136_v18 = vpop.f32.mrb[26].mxu1 }
 0x370   : > { %v5257_v21 = vrot.slane %v5256_v37, 1  ;;  %v5263_v19 = vmax.f32 %v5261_v12, %v5262_v56  ;;  %v6237_v30 = vsel %vm6225_vm2, %v5980_v15, %v6236_v34  ;;  %v4520_v24 = vrot.slane %v4321_v22, %v12878_v44  ;;  %v13140_v41 = vpop.f32.mrb[27].mxu1 }
 0x371   : > { %v5251_v13 = vmax.f32 %v5249_v27, %v5250_v60  ;;  %v5269_v61 = vrot.slane %v5268_v6, 2  ;;  %v4527_v4 = vrot.slane %v4513_v43, %v12878_v44  ;;  %v4322_v9 = vmax.f32 %v4222_v14, 0.0 }
 0x372   : > { %v5258_v11 = vmax.f32 %v5256_v37, %v5257_v21  ;;  %v5264_v46 = vrot.slane %v5263_v19, 1  ;;  %v4528_v36 = vcombine.high %v4520_v24, %v4520_v24  ;;  %v5273_v42 = vsel %vm2407_vm13, %v4520_v24, -inf }
 0x373   : > { %v5270_v45 = vmax.f32 %v5268_v6, %v5269_v61  ;;  %v5982_v58 = vsel %vm2404_vm12, %v5251_v13, -inf  ;;  %v4529_v57 = vcombine.high %v4527_v4, %v4527_v4  ;;  %v5274_v59 = vrot.slane %v5273_v42, 4 }
 0x374   : > { %v5265_v49 = vmax.f32 %v5263_v19, %v5264_v46  ;;  %v5983_v38 = vmax.f32 %v13079_v39, %v5982_v58  ;;  %v5985_v25 = vsel %vm2404_vm12, %v5258_v11, -inf  ;;  %v5280_v12 = vsel %vm2407_vm13, %v4528_v36, -inf }
 0x375   : > { %v5271_v15 = vrot.slane %v5270_v45, 1  ;;  %v5986_v27 = vmax.f32 %v13088_v50, %v5985_v25  ;;  %v5275_v31 = vmax.f32 %v5273_v42, %v5274_v59  ;;  %v5281_v22 = vrot.slane %v5280_v12, 4 }
 0x376   : > { %v5988_v17 = vsel %vm2404_vm12, %v5265_v49, -inf  ;;  %v6238_v37 = vsel %vm6227_vm3, %v5983_v38, %v6237_v30  ;;  %v5287_v56 = vsel %vm2407_vm13, %v4527_v4, -inf  ;;  %v5294_v14 = vsel %vm2407_vm13, %v4529_v57, -inf }
 0x377   : > { %v5272_v34 = vmax.f32 %v5270_v45, %v5271_v15  ;;  %v5989_v39 = vmax.f32 %v13091_v35, %v5988_v17  ;;  %v6239_v60 = vsel %vm6229_vm4, %v5986_v27, %v6238_v37  ;;  %v5276_v6 = vrot.slane %v5275_v31, 2  ;;  %v6309_v17 = vld [vmem:[#allocation4 + $0x1] sm:$0xff]  ;;  %v6310_v37 = vld [vmem:[#allocation4 + $0x11] sm:$0xff] }
 0x378   : > { %v5282_v43 = vmax.f32 %v5280_v12, %v5281_v22  ;;  %v5288_v21 = vrot.slane %v5287_v56, 4  ;;  %v5295_v19 = vrot.slane %v5294_v14, 4  ;;  %v4530_v50 = vcombine.high %v4322_v9, %v4322_v9 }
 0x379   : > { %v5991_v24 = vsel %vm2404_vm12, %v5272_v34, -inf  ;;  %v6240_v13 = vsel %vm6231_vm5, %v5989_v39, %v6239_v60  ;;  %v5277_v61 = vmax.f32 %v5275_v31, %v5276_v6  ;;  %v4537_v30 = vrot.slane %v4322_v9, %v12878_v44 }
 0x37a   : > { %v5992_v4 = vmax.f32 %v13098_v26, %v5991_v24  ;;  %v5283_v11 = vrot.slane %v5282_v43, 2  ;;  %v5289_v46 = vmax.f32 %v5287_v56, %v5288_v21  ;;  %v5296_v36 = vmax.f32 %v5294_v14, %v5295_v19  ;;  %v6317_v19 = vld [vmem:[#allocation4 + $0x2] sm:$0xff] }
 0x37b   : > { %v5278_v35 = vrot.slane %v5277_v61, 1  ;;  %v4544_v42 = vrot.slane %v4530_v50, %v12878_v44  ;;  %v4545_v45 = vcombine.high %v4537_v30, %v4537_v30  ;;  %v5301_v58 = vsel %vm2407_vm13, %v4537_v30, -inf  ;;  %v6318_v50 = vld [vmem:[#allocation4 + $0x12] sm:$0xff] }
 0x37c   : > { %v6241_v57 = vsel %vm6233_vm6, %v5992_v4, %v6240_v13  ;;  %v5284_v59 = vmax.f32 %v5282_v43, %v5283_v11  ;;  %v5290_v49 = vrot.slane %v5289_v46, 2  ;;  %v5297_v38 = vrot.slane %v5296_v36, 2 }
 0x37d   : > { %6294 = vst.msk [vmem:[#allocation4 + $0x21] sm:$0xff] %vm2404_vm12, %v6241_v57  ;;  %v5279_v25 = vmax.f32 %v5277_v61, %v5278_v35  ;;  %v4546_v9 = vcombine.high %v4544_v42, %v4544_v42  ;;  %v5302_v12 = vrot.slane %v5301_v58, 4  ;;  %v5308_v26 = vsel %vm2407_vm13, %v4545_v45, -inf }
 0x37e   : > { %v5285_v15 = vrot.slane %v5284_v59, 1  ;;  %v5291_v27 = vmax.f32 %v5289_v46, %v5290_v49  ;;  %v5298_v31 = vmax.f32 %v5296_v36, %v5297_v38  ;;  %v5309_v22 = vrot.slane %v5308_v26, 4 }
 0x37f   : > { %v13165_v56 = vsel %vm2404_vm12, %v5279_v25, -inf  ;;  %v5303_v14 = vmax.f32 %v5301_v58, %v5302_v12  ;;  %v5315_v34 = vsel %vm2407_vm13, %v4544_v42, -inf  ;;  %v5322_v39 = vsel %vm2407_vm13, %v4546_v9, -inf }
 0x380   : > { %v5286_v60 = vmax.f32 %v5284_v59, %v5285_v15  ;;  %v5292_v6 = vrot.slane %v5291_v27, 1  ;;  %v5299_v43 = vrot.slane %v5298_v31, 1  ;;  %v5310_v21 = vmax.f32 %v5308_v26, %v5309_v22 }
 0x381   : > { %v5304_v24 = vrot.slane %v5303_v14, 2  ;;  %v5316_v13 = vrot.slane %v5315_v34, 4  ;;  %v5323_v61 = vrot.slane %v5322_v39, 4  ;;  %v10682_v30 = vpack.i.bf16 %v6310_v37, %v6309_v17 }
 0x382   : > { %v5293_v4 = vmax.f32 %v5291_v27, %v5292_v6  ;;  %v5300_v11 = vmax.f32 %v5298_v31, %v5299_v43  ;;  %v13170_v46 = vsel %vm2404_vm12, %v5286_v60, -inf  ;;  %v5311_v36 = vrot.slane %v5310_v21, 2  ;;  %v13188_v31 = vld [vmem:[%s14793_s4] ss:$0 sm:$0xff] }
 0x383   : > { %v5305_v35 = vmax.f32 %v5303_v14, %v5304_v24  ;;  %v5317_v42 = vmax.f32 %v5315_v34, %v5316_v13  ;;  %v5324_v45 = vmax.f32 %v5322_v39, %v5323_v61  ;;  %10683 = vrot.lane.b32.xlu1 %v10682_v30, %s11035_s19  ;;  %v10687_v58 = vpack.i.bf16 %v6318_v50, %v6317_v19 }
 0x384   : > { %v13174_v57 = vsel %vm2404_vm12, %v5293_v4, -inf  ;;  %v13177_v59 = vsel %vm2404_vm12, %v5300_v11, -inf  ;;  %v5312_v49 = vmax.f32 %v5310_v21, %v5311_v36  ;;  %v9163_v38 = vadd.f32 %v13112_v16, %v13110_v1 }
 0x385   : > { %v5306_v25 = vrot.slane %v5305_v35, 1  ;;  %v5318_v9 = vrot.slane %v5317_v42, 2  ;;  %v5325_v12 = vrot.slane %v5324_v45, 2  ;;  %v9166_v26 = vadd.f32 %v13118_v10, %v13116_v23  ;;  %v13183_v15 = vpop.f32.mrb[28].mxu1 }
 0x386   : > { %v5313_v27 = vrot.slane %v5312_v49, 1  ;;  %v4066_v22 = vadd.f32 %v13188_v31, %v9163_v38  ;;  %v9169_v17 = vadd.f32 %v13133_v20, %v13129_v2  ;;  %v9172_v1 = vadd.f32 %v13140_v41, %v13136_v18  ;;  %v13195_v16 = vpop.f32.mrb[29].mxu1  ;;  %v13204_v20 = vld [vmem:[#allocation4 + $0x22] sm:$0xff] }
 0x387   : > { %v5307_v37 = vmax.f32 %v5305_v35, %v5306_v25  ;;  %v5319_v23 = vmax.f32 %v5317_v42, %v5318_v9  ;;  %v5326_v10 = vmax.f32 %v5324_v45, %v5325_v12  ;;  %10688 = vrot.lane.b32.xlu1 %v10687_v58, %s11036_s20  ;;  %v4069_v14 = vadd.f32 %v13188_v31, %v9166_v26  ;;  %v13199_v34 = vpop.f32.mrb[30].mxu1 }
 0x388   : > { %v5314_v39 = vmax.f32 %v5312_v49, %v5313_v27  ;;  %v4227_v60 = vadd.f32 %v12778_v62, %v4066_v22  ;;  %v4074_v6 = vadd.f32 %v13188_v31, %v9169_v17  ;;  %v4077_v2 = vadd.f32 %v13188_v31, %v9172_v1  ;;  %v13206_v18 = vpop.f32.mrb[31].mxu1 }
 0x389   : > { %v5320_v41 = vrot.slane %v5319_v23, 1  ;;  %v5327_v43 = vrot.slane %v5326_v10, 1  ;;  %v13209_v21 = vsel %vm2404_vm12, %v5307_v37, -inf  ;;  %v4230_v19 = vadd.f32 %v12782_v53, %v4069_v14 }
 0x38a   : > { %v13213_v24 = vsel %vm2404_vm12, %v5314_v39, -inf  ;;  %v4323_v13 = vmax.f32 %v4227_v60, 0.0  ;;  %v4235_v62 = vadd.f32 %v12845_v5, %v4074_v6  ;;  %v4238_v61 = vadd.f32 %v12857_v48, %v4077_v2 }
 0x38b   : > { %v5321_v30 = vmax.f32 %v5319_v23, %v5320_v41  ;;  %v5328_v4 = vmax.f32 %v5326_v10, %v5327_v43  ;;  %v4324_v11 = vmax.f32 %v4230_v19, 0.0  ;;  %v10692_v36 = vpack.i.bf16 %v13204_v20, %v6318_v50 }
 0x38c   : > { %v4547_v35 = vcombine.high %v4323_v13, %v4323_v13  ;;  %v4554_v42 = vrot.slane %v4323_v13, %v12878_v44  ;;  %v13219_v45 = vmax.f32 %v4235_v62, 0.0  ;;  %v13221_v58 = vmax.f32 %v4238_v61, 0.0 }
 0x38d   : > { %v13224_v53 = vsel %vm2404_vm12, %v5321_v30, -inf  ;;  %v13227_v49 = vsel %vm2404_vm12, %v5328_v4, -inf  ;;  %v4564_v5 = vcombine.high %v4324_v11, %v4324_v11  ;;  %v4571_v48 = vrot.slane %v4324_v11, %v12878_v44  ;;  %10693 = vrot.lane.b32.xlu0 %v10692_v36, %s11035_s19  ;;  %v13231_v38 = vpop.f32.mrb[32].mxu1 }
 0x38e   : > { %v4561_v50 = vrot.slane %v4547_v35, %v12878_v44  ;;  %v4562_v25 = vcombine.high %v4554_v42, %v4554_v42  ;;  %v5329_v9 = vsel %vm2407_vm13, %v4554_v42, -inf  ;;  %v13237_v26 = vpop.f32.mrb[33].mxu1 }
 0x38f   : > { %v5330_v27 = vrot.slane %v5329_v9, 4  ;;  %v4578_v22 = vrot.slane %v4564_v5, %v12878_v44  ;;  %v4579_v17 = vcombine.high %v4571_v48, %v4571_v48  ;;  %v5357_v1 = vsel %vm2407_vm13, %v4571_v48, -inf  ;;  %v13241_v37 = vpop.f32.mrb[34].mxu1 }
 0x390   : > { %v4563_v23 = vcombine.high %v4561_v50, %v4561_v50  ;;  %v5336_v10 = vsel %vm2407_vm13, %v4562_v25, -inf  ;;  %v5343_v14 = vsel %vm2407_vm13, %v4561_v50, -inf  ;;  %v5358_v39 = vrot.slane %v5357_v1, 4  ;;  %v13245_v60 = vpop.f32.mrb[35].mxu1 }
 0x391   : > { %v5331_v6 = vmax.f32 %v5329_v9, %v5330_v27  ;;  %v5337_v2 = vrot.slane %v5336_v10, 4  ;;  %v5344_v41 = vrot.slane %v5343_v14, 4  ;;  %v4580_v43 = vcombine.high %v4578_v22, %v4578_v22 }
 0x392   : > { %v5350_v19 = vsel %vm2407_vm13, %v4563_v23, -inf  ;;  %v5359_v13 = vmax.f32 %v5357_v1, %v5358_v39  ;;  %v5364_v62 = vsel %vm2407_vm13, %v4579_v17, -inf  ;;  %v5371_v61 = vsel %vm2407_vm13, %v4578_v22, -inf }
 0x393   : > { %v5332_v30 = vrot.slane %v5331_v6, 2  ;;  %v5338_v4 = vmax.f32 %v5336_v10, %v5337_v2  ;;  %v5345_v11 = vmax.f32 %v5343_v14, %v5344_v41  ;;  %v5351_v36 = vrot.slane %v5350_v19, 4  ;;  %v10901_v10 = vld [vmem:[%s14794_s5 + $0x80] sm:$0xff]  }
 0x394   : > { %v5360_v35 = vrot.slane %v5359_v13, 2  ;;  %v5365_v42 = vrot.slane %v5364_v62, 4  ;;  %v5372_v5 = vrot.slane %v5371_v61, 4  ;;  %v5378_v48 = vsel %vm2407_vm13, %v4580_v43, -inf  ;;  %9498 = vmatprep.subr.bf16.mxu1 %v10901_v10 }
 0x395   : > { %v5333_v50 = vmax.f32 %v5331_v6, %v5332_v30  ;;  %v5339_v25 = vrot.slane %v5338_v4, 2  ;;  %v5346_v9 = vrot.slane %v5345_v11, 2  ;;  %v5352_v27 = vmax.f32 %v5350_v19, %v5351_v36  ;;  %9499 = vmatpush3.bf16.msra.mxu1 %v10901_v10 }
 0x396   : > { %v5361_v0 = vmax.f32 %v5359_v13, %v5360_v35  ;;  %v5366_v23 = vmax.f32 %v5364_v62, %v5365_v42  ;;  %v5373_v1 = vmax.f32 %v5371_v61, %v5372_v5  ;;  %v5379_v39 = vrot.slane %v5378_v48, 4 }
 0x397   : > { %v5334_v17 = vrot.slane %v5333_v50, 1  ;;  %v5340_v12 = vmax.f32 %v5338_v4, %v5339_v25  ;;  %v5347_v22 = vmax.f32 %v5345_v11, %v5346_v9  ;;  %v5353_v52 = vrot.slane %v5352_v27, 2 }
 0x398   : > { %v5362_v14 = vrot.slane %v5361_v0, 1  ;;  %v5367_v2 = vrot.slane %v5366_v23, 2  ;;  %v5374_v41 = vrot.slane %v5373_v1, 2  ;;  %v5380_v43 = vmax.f32 %v5378_v48, %v5379_v39 }
 0x399   : > { %v5335_v6 = vmax.f32 %v5333_v50, %v5334_v17  ;;  %v5341_v30 = vrot.slane %v5340_v12, 1  ;;  %v5348_v28 = vrot.slane %v5347_v22, 1  ;;  %v5354_v19 = vmax.f32 %v5352_v27, %v5353_v52 }
 0x39a   : > { %v5363_v13 = vmax.f32 %v5361_v0, %v5362_v14  ;;  %v5368_v62 = vmax.f32 %v5366_v23, %v5367_v2  ;;  %v5375_v61 = vmax.f32 %v5373_v1, %v5374_v41  ;;  %v5381_v36 = vrot.slane %v5380_v43, 2 }
 0x39b   : > { %v5342_v4 = vmax.f32 %v5340_v12, %v5341_v30  ;;  %v5349_v11 = vmax.f32 %v5347_v22, %v5348_v28  ;;  %v5355_v35 = vrot.slane %v5354_v19, 1  ;;  %v5994_v42 = vsel %vm2404_vm12, %v5335_v6, -inf }
 0x39c   : > { %v5995_v5 = vmax.f32 %v13165_v56, %v5994_v42  ;;  %v5369_v25 = vrot.slane %v5368_v62, 1  ;;  %v5376_v9 = vrot.slane %v5375_v61, 1  ;;  %v5382_v48 = vmax.f32 %v5380_v43, %v5381_v36 }
 0x39d   : > { %v5356_v50 = vmax.f32 %v5354_v19, %v5355_v35  ;;  %v5997_v39 = vsel %vm2404_vm12, %v5342_v4, -inf  ;;  %v6000_v52 = vsel %vm2404_vm12, %v5349_v11, -inf  ;;  %v6006_v0 = vsel %vm2404_vm12, %v5363_v13, -inf }
 0x39e   : > { %v5998_v27 = vmax.f32 %v13170_v46, %v5997_v39  ;;  %v6001_v12 = vmax.f32 %v13174_v57, %v6000_v52  ;;  %v5370_v28 = vmax.f32 %v5368_v62, %v5369_v25  ;;  %v5377_v23 = vmax.f32 %v5375_v61, %v5376_v9  ;;  %v13287_v9 = vld [vmem:[#allocation4 + $0x20] sm:$0xff] }
 0x39f   : > { %v6003_v1 = vsel %vm2404_vm12, %v5356_v50, -inf  ;;  %v5383_v17 = vrot.slane %v5382_v48, 1  ;;  %v6007_v56 = vmax.f32 %v13209_v21, %v6006_v0  ;;  %v4588_v22 = vrot.slane %v13219_v45, %v12878_v44 }
 0x3a0   : > { %v6004_v10 = vmax.f32 %v13177_v59, %v6003_v1  ;;  %v6242_v14 = vsel %vm6221_vm0, %v5998_v27, %v5995_v5  ;;  %v6009_v2 = vsel %vm2404_vm12, %v5370_v28, -inf  ;;  %v6012_v46 = vsel %vm2404_vm12, %v5377_v23, -inf  ;;  %v6325_v1 = vld [vmem:[#allocation4 + $0x10] sm:$0xff] }
 0x3a1   : > { %v6243_v57 = vsel %vm6223_vm1, %v6001_v12, %v6242_v14  ;;  %v5384_v41 = vmax.f32 %v5382_v48, %v5383_v17  ;;  %v6010_v43 = vmax.f32 %v13213_v24, %v6009_v2  ;;  %v6013_v6 = vmax.f32 %v13224_v53, %v6012_v46 }
 0x3a2   : > { %v6244_v21 = vsel %vm6225_vm2, %v6004_v10, %v6243_v57  ;;  %v14806_v30 = vcombine.high %v13219_v45, %v13219_v45  ;;  %v4596_v19 = vcombine.high %v4588_v22, %v4588_v22  ;;  %v5385_v13 = vsel %vm2407_vm13, %v4588_v22, -inf }
 0x3a3   : > { %v6015_v62 = vsel %vm2404_vm12, %v5384_v41, -inf  ;;  %v6245_v61 = vsel %vm6227_vm3, %v6007_v56, %v6244_v21  ;;  %v5386_v36 = vrot.slane %v5385_v13, 4  ;;  %v4598_v24 = vcombine.high %v13221_v58, %v13221_v58 }
 0x3a4   : > { %v4595_v59 = vrot.slane %v14806_v30, %v12878_v44  ;;  %v6016_v53 = vmax.f32 %v13227_v49, %v6015_v62  ;;  %v6246_v4 = vsel %vm6229_vm4, %v6010_v43, %v6245_v61  ;;  %v5392_v35 = vsel %vm2407_vm13, %v4596_v19, -inf }
 0x3a5   : > { %v6247_v45 = vsel %vm6231_vm5, %v6013_v6, %v6246_v4  ;;  %v5387_v42 = vmax.f32 %v5385_v13, %v5386_v36  ;;  %v5393_v5 = vrot.slane %v5392_v35, 4  ;;  %v13289_v48 = vpop.f32.mrb[36].mxu1  ;;  %v4605_v52 = vrot.slane %v13221_v58, %v12878_v44  ;;  %v10902_v58 = vld [vmem:[%s14794_s5 + $0x88] sm:$0xff]  }
 0x3a6   : > { %v4597_v11 = vcombine.high %v4595_v59, %v4595_v59  ;;  %v5399_v25 = vsel %vm2407_vm13, %v4595_v59, -inf  ;;  %v6248_v50 = vsel %vm6233_vm6, %v6016_v53, %v6247_v45  ;;  %v13295_v0 = vpop.f32.mrb[37].mxu1  ;;  %v4612_v23 = vrot.slane %v4598_v24, %v12878_v44  ;;  %9500 = vmatprep.subr.bf16.mxu1 %v10902_v58 }
 0x3a7   : > { %v5400_v39 = vrot.slane %v5399_v25, 4  ;;  %6295 = vst.msk [vmem:[#allocation4 + $0x31] sm:$0xff] %vm2404_vm12, %v6248_v50  ;;  %v5388_v27 = vrot.slane %v5387_v42, 2  ;;  %v5394_v12 = vmax.f32 %v5392_v35, %v5393_v5  ;;  %v13299_v17 = vpop.f32.mrb[38].mxu1  ;;  %v4613_v22 = vcombine.high %v4605_v52, %v4605_v52  ;;  %9501 = vmatpush3.bf16.msra.mxu1 %v10902_v58 }
 0x3a8   : > { %v5406_v49 = vsel %vm2407_vm13, %v4597_v11, -inf  ;;  %v5413_v10 = vsel %vm2407_vm13, %v4605_v52, -inf  ;;  %v10697_v14 = vpack.i.bf16 %v13287_v9, %v6325_v1  ;;  %v13303_v2 = vpop.f32.mrb[39].mxu1  ;;  %v4614_v43 = vcombine.high %v4612_v23, %v4612_v23 }
 0x3a9   : > { %v5407_v28 = vrot.slane %v5406_v49, 4  ;;  %v5401_v56 = vmax.f32 %v5399_v25, %v5400_v39  ;;  %v5389_v46 = vmax.f32 %v5387_v42, %v5388_v27  ;;  %v5395_v57 = vrot.slane %v5394_v12, 2 }
 0x3aa   : > { %v5414_v21 = vrot.slane %v5413_v10, 4  ;;  %v5420_v30 = vsel %vm2407_vm13, %v4613_v22, -inf  ;;  %v5427_v59 = vsel %vm2407_vm13, %v4612_v23, -inf  ;;  %10698 = vrot.lane.b32.xlu1 %v10697_v14, %s11037_s29  ;;  %v5434_v4 = vsel %vm2407_vm13, %v4614_v43, -inf }
 0x3ab   : > { %v5408_v41 = vmax.f32 %v5406_v49, %v5407_v28  ;;  %v5402_v6 = vrot.slane %v5401_v56, 2  ;;  %v5390_v19 = vrot.slane %v5389_v46, 1  ;;  %v5396_v13 = vmax.f32 %v5394_v12, %v5395_v57 }
 0x3ac   : > { %v5421_v61 = vrot.slane %v5420_v30, 4  ;;  %v5415_v24 = vmax.f32 %v5413_v10, %v5414_v21  ;;  %v5428_v53 = vrot.slane %v5427_v59, 4  ;;  %v5435_v49 = vrot.slane %v5434_v4, 4 }
 0x3ad   : > { %v5409_v62 = vrot.slane %v5408_v41, 2  ;;  %v5403_v36 = vmax.f32 %v5401_v56, %v5402_v6  ;;  %v5391_v11 = vmax.f32 %v5389_v46, %v5390_v19  ;;  %v5397_v35 = vrot.slane %v5396_v13, 1  ;;  %v13312_v5 = vpop.f32.mrb[40].mxu1 }
 0x3ae   : > { %v5422_v42 = vmax.f32 %v5420_v30, %v5421_v61  ;;  %v5416_v50 = vrot.slane %v5415_v24, 2  ;;  %v5429_v39 = vmax.f32 %v5427_v59, %v5428_v53  ;;  %v13317_v23 = vpop.f32.mrb[41].mxu1  ;;  %v5436_v10 = vmax.f32 %v5434_v4, %v5435_v49 }
 0x3af   : > { %v5410_v45 = vmax.f32 %v5408_v41, %v5409_v62  ;;  %v5404_v25 = vrot.slane %v5403_v36, 1  ;;  %v5398_v52 = vmax.f32 %v5396_v13, %v5397_v35  ;;  %v13315_v12 = vsel %vm2404_vm12, %v5391_v11, -inf  ;;  %v13319_v14 = vpop.f32.mrb[42].mxu1 }
 0x3b0   : > { %v5423_v28 = vrot.slane %v5422_v42, 2  ;;  %v5417_v56 = vmax.f32 %v5415_v24, %v5416_v50  ;;  %v5430_v22 = vrot.slane %v5429_v39, 2  ;;  %v9175_v41 = vadd.f32 %v13195_v16, %v13183_v15  ;;  %v13326_v43 = vpop.f32.mrb[43].mxu1 }
 0x3b1   : > { %v5411_v27 = vrot.slane %v5410_v45, 1  ;;  %v5405_v1 = vmax.f32 %v5403_v36, %v5404_v25  ;;  %v13322_v46 = vsel %vm2404_vm12, %v5398_v52, -inf  ;;  %v5437_v59 = vrot.slane %v5436_v10, 2 }
 0x3b2   : > { %v5424_v57 = vmax.f32 %v5422_v42, %v5423_v28  ;;  %v5418_v21 = vrot.slane %v5417_v56, 1  ;;  %v5431_v30 = vmax.f32 %v5429_v39, %v5430_v22  ;;  %v4082_v62 = vadd.f32 %v13188_v31, %v9175_v41  ;;  %v13354_v39 = vld [vmem:[#allocation4 + $0x30] sm:$0xff]  ;;  %v6311_v22 = vld [vmem:[#allocation4 + $0x21] sm:$0xff] }
 0x3b3   : > { %v5412_v58 = vmax.f32 %v5410_v45, %v5411_v27  ;;  %v13329_v6 = vsel %vm2404_vm12, %v5405_v1, -inf  ;;  %v9178_v61 = vadd.f32 %v13206_v18, %v13199_v34  ;;  %v5438_v15 = vmax.f32 %v5436_v10, %v5437_v59  ;;  %v13343_v45 = vld [vmem:[#allocation4 + $0x32] sm:$0xff] }
 0x3b4   : > { %v5425_v13 = vrot.slane %v5424_v57, 1  ;;  %v5419_v36 = vmax.f32 %v5417_v56, %v5418_v21  ;;  %v5432_v24 = vrot.slane %v5431_v30, 1  ;;  %v9181_v16 = vadd.f32 %v13237_v26, %v13231_v38 }
 0x3b5   : > { %v13332_v19 = vsel %vm2404_vm12, %v5412_v58, -inf  ;;  %v4243_v4 = vadd.f32 %v12843_v29, %v4082_v62  ;;  %v4085_v11 = vadd.f32 %v13188_v31, %v9178_v61  ;;  %v9184_v35 = vadd.f32 %v13245_v60, %v13241_v37  ;;  %v6312_v37 = vld [vmem:[#allocation4 + $0x31] sm:$0xff] }
 0x3b6   : > { %v5426_v53 = vmax.f32 %v5424_v57, %v5425_v13  ;;  %v5433_v42 = vmax.f32 %v5431_v30, %v5432_v24  ;;  %v5439_v25 = vrot.slane %v5438_v15, 1  ;;  %v13346_v34 = vsel %vm2404_vm12, %v5419_v36, -inf }
 0x3b7   : > { %v4090_v18 = vadd.f32 %v13188_v31, %v9181_v16  ;;  %v4327_v38 = vmax.f32 %v4243_v4, 0.0  ;;  %v4246_v29 = vadd.f32 %v12847_v8, %v4085_v11  ;;  %v4093_v26 = vadd.f32 %v13188_v31, %v9184_v35 }
 0x3b8   : > { %v13350_v50 = vsel %vm2404_vm12, %v5426_v53, -inf  ;;  %v5440_v60 = vmax.f32 %v5438_v15, %v5439_v25  ;;  %v13357_v49 = vsel %vm2404_vm12, %v5433_v42, -inf  ;;  %v6616_v27 = vpack.c.bf16 %v13343_v45, %v13204_v20 }
 0x3b9   : > { %v4251_v52 = vadd.f32 %v12937_v54, %v4090_v18  ;;  %v4615_v28 = vcombine.high %v4327_v38, %v4327_v38  ;;  %v4622_v1 = vrot.slane %v4327_v38, %v12878_v44  ;;  %v4328_v56 = vmax.f32 %v4246_v29, 0.0 }
 0x3ba   : > { %v13364_v8 = vadd.f32 %v12945_v47, %v4093_v26  ;;  %v13367_v10 = vsel %vm2404_vm12, %v5440_v60, -inf  ;;  %9502 = vmatprep.mubr.msk.bf16.mxu1 %vm2404_vm12, %v6616_v27  ;;  %v10702_v54 = vpack.i.bf16 %v13354_v39, %v13287_v9  ;;  %v10712_v57 = vpack.i.bf16 %v6312_v37, %v6311_v22 }
 0x3bb   : > { %v13369_v58 = vmax.f32 %v4251_v52, 0.0  ;;  %v4629_v41 = vrot.slane %v4615_v28, %v12878_v44  ;;  %v4630_v21 = vcombine.high %v4622_v1, %v4622_v1  ;;  %v5441_v30 = vsel %vm2407_vm13, %v4622_v1, -inf }
 0x3bc   : > { %v4632_v59 = vcombine.high %v4328_v56, %v4328_v56  ;;  %v5442_v47 = vrot.slane %v5441_v30, 4  ;;  %v4639_v13 = vrot.slane %v4328_v56, %v12878_v44  ;;  %10703 = vrot.lane.b32.xlu0 %v10702_v54, %s11036_s20  ;;  %10713 = vrot.lane.b32.xlu1 %v10712_v57, %s11035_s19 }
 0x3bd   : > { %v13381_v61 = vrot.slane %v13369_v58, %v12878_v44  ;;  %v4631_v9 = vcombine.high %v4629_v41, %v4629_v41  ;;  %v5448_v36 = vsel %vm2407_vm13, %v4630_v21, -inf  ;;  %v5455_v24 = vsel %vm2407_vm13, %v4629_v41, -inf }
 0x3be   : > { %v4646_v15 = vrot.slane %v4632_v59, %v12878_v44  ;;  %v5443_v16 = vmax.f32 %v5441_v30, %v5442_v47  ;;  %v5449_v53 = vrot.slane %v5448_v36, 4  ;;  %v5456_v4 = vrot.slane %v5455_v24, 4 }
 0x3bf   : > { %v4647_v11 = vcombine.high %v4639_v13, %v4639_v13  ;;  %v5462_v35 = vsel %vm2407_vm13, %v4631_v9, -inf  ;;  %v5469_v25 = vsel %vm2407_vm13, %v4639_v13, -inf }
 0x3c0   : > { %v4648_v42 = vcombine.high %v4646_v15, %v4646_v15  ;;  %v5483_v18 = vsel %vm2407_vm13, %v4646_v15, -inf  ;;  %v5444_v38 = vrot.slane %v5443_v16, 2  ;;  %v5450_v29 = vmax.f32 %v5448_v36, %v5449_v53  ;;  %10708 = vrot.lane.b32.xlu0 %v10712_v57, %s11037_s29 }
 0x3c1   : > { %v5457_v26 = vmax.f32 %v5455_v24, %v5456_v4  ;;  %v5463_v37 = vrot.slane %v5462_v35, 4  ;;  %v5470_v60 = vrot.slane %v5469_v25, 4  ;;  %v5476_v52 = vsel %vm2407_vm13, %v4647_v11, -inf }
 0x3c2   : > { %v5484_v27 = vrot.slane %v5483_v18, 4  ;;  %v5490_v28 = vsel %vm2407_vm13, %v4648_v42, -inf  ;;  %v5445_v1 = vmax.f32 %v5443_v16, %v5444_v38  ;;  %v5451_v56 = vrot.slane %v5450_v29, 2 }
 0x3c3   : > { %v5458_v22 = vrot.slane %v5457_v26, 2  ;;  %v5464_v54 = vmax.f32 %v5462_v35, %v5463_v37  ;;  %v5471_v41 = vmax.f32 %v5469_v25, %v5470_v60  ;;  %v5477_v21 = vrot.slane %v5476_v52, 4 }
 0x3c4   : > { %v5485_v30 = vmax.f32 %v5483_v18, %v5484_v27  ;;  %v5491_v59 = vrot.slane %v5490_v28, 4  ;;  %v5446_v47 = vrot.slane %v5445_v1, 1  ;;  %v5452_v13 = vmax.f32 %v5450_v29, %v5451_v56 }
 0x3c5   : > { %v5459_v9 = vmax.f32 %v5457_v26, %v5458_v22  ;;  %v5465_v36 = vrot.slane %v5464_v54, 2  ;;  %v5472_v24 = vrot.slane %v5471_v41, 2  ;;  %v5478_v57 = vmax.f32 %v5476_v52, %v5477_v21  ;;  %v13394_v4 = vpop.f32.mrb[44].mxu1 }
 0x3c6   : > { %v5486_v15 = vrot.slane %v5485_v30, 2  ;;  %v5492_v53 = vmax.f32 %v5490_v28, %v5491_v59  ;;  %v5447_v11 = vmax.f32 %v5445_v1, %v5446_v47  ;;  %v5453_v42 = vrot.slane %v5452_v13, 1  ;;  %v13396_v62 = vpop.f32.mrb[45].mxu1 }
 0x3c7   : > { %v5460_v16 = vrot.slane %v5459_v9, 1  ;;  %v5466_v38 = vmax.f32 %v5464_v54, %v5465_v36  ;;  %v5473_v35 = vmax.f32 %v5471_v41, %v5472_v24  ;;  %v5479_v25 = vrot.slane %v5478_v57, 2  ;;  %v13398_v60 = vpop.f32.mrb[46].mxu1 }
 0x3c8   : > { %v5487_v18 = vmax.f32 %v5485_v30, %v5486_v15  ;;  %v5493_v37 = vrot.slane %v5492_v53, 2  ;;  %v5454_v29 = vmax.f32 %v5452_v13, %v5453_v42  ;;  %v6018_v52 = vsel %vm2404_vm12, %v5447_v11, -inf  ;;  %v13401_v28 = vpop.f32.mrb[47].mxu1 }
 0x3c9   : > { %v5461_v26 = vmax.f32 %v5459_v9, %v5460_v16  ;;  %v5467_v27 = vrot.slane %v5466_v38, 1  ;;  %v6019_v1 = vmax.f32 %v13315_v12, %v6018_v52  ;;  %v5474_v56 = vrot.slane %v5473_v35, 1 }
 0x3ca   : > { %v5480_v22 = vmax.f32 %v5478_v57, %v5479_v25  ;;  %v5488_v54 = vrot.slane %v5487_v18, 1  ;;  %v6021_v41 = vsel %vm2404_vm12, %v5454_v29, -inf  ;;  %v5494_v59 = vmax.f32 %v5492_v53, %v5493_v37 }
 0x3cb   : > { %v5468_v21 = vmax.f32 %v5466_v38, %v5467_v27  ;;  %v6024_v30 = vsel %vm2404_vm12, %v5461_v26, -inf  ;;  %v6022_v47 = vmax.f32 %v13322_v46, %v6021_v41  ;;  %v5475_v9 = vmax.f32 %v5473_v35, %v5474_v56 }
 0x3cc   : > { %v6025_v13 = vmax.f32 %v13329_v6, %v6024_v30  ;;  %v5481_v36 = vrot.slane %v5480_v22, 1  ;;  %v5489_v15 = vmax.f32 %v5487_v18, %v5488_v54  ;;  %v5495_v11 = vrot.slane %v5494_v59, 1 }
 0x3cd   : > { %v6027_v24 = vsel %vm2404_vm12, %v5468_v21, -inf  ;;  %v14807_v12 = vcombine.high %v13369_v58, %v13369_v58  ;;  %v6249_v16 = vsel %vm6221_vm0, %v6022_v47, %v6019_v1  ;;  %v6030_v46 = vsel %vm2404_vm12, %v5475_v9, -inf  ;;  %v13416_v38 = vpop.f32.mrb[48].mxu1 }
 0x3ce   : > { %v6028_v42 = vmax.f32 %v13332_v19, %v6027_v24  ;;  %v5482_v53 = vmax.f32 %v5480_v22, %v5481_v36  ;;  %v6250_v6 = vsel %vm6223_vm1, %v6025_v13, %v6249_v16  ;;  %v5496_v35 = vmax.f32 %v5494_v59, %v5495_v11  ;;  %v13421_v37 = vpop.f32.mrb[49].mxu1 }
 0x3cf   : > { %v4663_v57 = vrot.slane %v14807_v12, %v12878_v44  ;;  %v6031_v25 = vmax.f32 %v13346_v34, %v6030_v46  ;;  %v6036_v18 = vsel %vm2404_vm12, %v5489_v15, -inf  ;;  %v4664_v26 = vcombine.high %v13381_v61, %v13381_v61  ;;  %v13428_v27 = vpop.f32.mrb[50].mxu1 }
 0x3d0   : > { %v6033_v58 = vsel %vm2404_vm12, %v5482_v53, -inf  ;;  %v6037_v19 = vmax.f32 %v13357_v49, %v6036_v18  ;;  %v6251_v29 = vsel %vm6225_vm2, %v6028_v42, %v6250_v6  ;;  %v6039_v1 = vsel %vm2404_vm12, %v5496_v35, -inf  ;;  %v13433_v22 = vpop.f32.mrb[51].mxu1 }
 0x3d1   : > { %v6034_v52 = vmax.f32 %v13350_v50, %v6033_v58  ;;  %v6252_v34 = vsel %vm6227_vm3, %v6031_v25, %v6251_v29  ;;  %v4665_v56 = vcombine.high %v4663_v57, %v4663_v57  ;;  %v6040_v54 = vmax.f32 %v13367_v10, %v6039_v1 }
 0x3d2   : > { %v5497_v49 = vsel %vm2407_vm13, %v13381_v61, -inf  ;;  %v5504_v21 = vsel %vm2407_vm13, %v4664_v26, -inf  ;;  %v5511_v41 = vsel %vm2407_vm13, %v4663_v57, -inf  ;;  %v4330_v36 = vmax.f32 %v13364_v8, 0.0 }
 0x3d3   : > { %v6253_v30 = vsel %vm6229_vm4, %v6034_v52, %v6252_v34  ;;  %v5498_v59 = vrot.slane %v5497_v49, 4  ;;  %v5505_v50 = vrot.slane %v5504_v21, 4  ;;  %v5512_v47 = vrot.slane %v5511_v41, 4 }
 0x3d4   : > { %v6254_v13 = vsel %vm6231_vm5, %v6037_v19, %v6253_v30  ;;  %v5518_v9 = vsel %vm2407_vm13, %v4665_v56, -inf  ;;  %v10717_v10 = vpack.i.bf16 %v13343_v45, %v13204_v20  ;;  %v4666_v57 = vcombine.high %v4330_v36, %v4330_v36 }
 0x3d5   : > { %v6255_v61 = vsel %vm6233_vm6, %v6040_v54, %v6254_v13  ;;  %v5499_v24 = vmax.f32 %v5497_v49, %v5498_v59  ;;  %v5506_v15 = vmax.f32 %v5504_v21, %v5505_v50  ;;  %v5513_v11 = vmax.f32 %v5511_v41, %v5512_v47  ;;  %v13460_v49 = vpop.f32.mrb[60].mxu0 }
 0x3d6   : > { %6296 = vst.msk [vmem:[#allocation4 + $0x41] sm:$0xff] %vm2404_vm12, %v6255_v61  ;;  %v5519_v12 = vrot.slane %v5518_v9, 4  ;;  %v4673_v42 = vrot.slane %v4330_v36, %v12878_v44  ;;  %10718 = vrot.lane.b32.xlu1 %v10717_v10, %s11036_s20  ;;  %v9187_v16 = vadd.f32 %v13295_v0, %v13289_v48  ;;  %v9190_v20 = vadd.f32 %v13303_v2, %v13299_v17  ;;  %v13465_v47 = vpop.f32.mrb[61].mxu0 }
 0x3d7   : > { %v5500_v8 = vrot.slane %v5499_v24, 2  ;;  %v5507_v53 = vrot.slane %v5506_v15, 2  ;;  %v5514_v46 = vrot.slane %v5513_v11, 2  ;;  %v4680_v35 = vrot.slane %v4666_v57, %v12878_v44  ;;  %14808 = vst [vmem:[#allocation9_spill] sm:$0xff] %v13460_v49 }
 0x3d8   : > { %v5520_v6 = vmax.f32 %v5518_v9, %v5519_v12  ;;  %v4681_v25 = vcombine.high %v4673_v42, %v4673_v42  ;;  %v5525_v18 = vsel %vm2407_vm13, %v4673_v42, -inf }
 0x3d9   : > { %v5501_v58 = vmax.f32 %v5499_v24, %v5500_v8  ;;  %v5508_v19 = vmax.f32 %v5506_v15, %v5507_v53  ;;  %v5515_v29 = vmax.f32 %v5513_v11, %v5514_v46  ;;  %v5526_v26 = vrot.slane %v5525_v18, 4  ;;  %v13469_v24 = vpop.f32.mrb[62].mxu0 }
 0x3da   : > { %v5521_v52 = vrot.slane %v5520_v6, 2  ;;  %v4682_v1 = vcombine.high %v4680_v35, %v4680_v35  ;;  %v5532_v48 = vsel %vm2407_vm13, %v4681_v25, -inf  ;;  %v5539_v0 = vsel %vm2407_vm13, %v4680_v35, -inf  ;;  %14809 = vst [vmem:[#allocation10_spill] sm:$0xff] %v13469_v24  ;;  %v13473_v8 = vpop.f32.mrb[63].mxu0 }
 0x3db   : > { %v5502_v34 = vrot.slane %v5501_v58, 1  ;;  %v5509_v56 = vrot.slane %v5508_v19, 1  ;;  %v5516_v54 = vrot.slane %v5515_v29, 1  ;;  %v5527_v17 = vmax.f32 %v5525_v18, %v5526_v26  ;;  %v13458_v2 = vpop.f32.mrb[52].mxu1 }
 0x3dc   : > { %v5522_v21 = vmax.f32 %v5520_v6, %v5521_v52  ;;  %v5533_v41 = vrot.slane %v5532_v48, 4  ;;  %v5540_v30 = vrot.slane %v5539_v0, 4  ;;  %v5546_v59 = vsel %vm2407_vm13, %v4682_v1, -inf  ;;  %v13463_v50 = vpop.f32.mrb[53].mxu1 }
 0x3dd   : > { %v5503_v13 = vmax.f32 %v5501_v58, %v5502_v34  ;;  %v5510_v9 = vmax.f32 %v5508_v19, %v5509_v56  ;;  %v5517_v36 = vmax.f32 %v5515_v29, %v5516_v54  ;;  %v5528_v10 = vrot.slane %v5527_v17, 2  ;;  %v13467_v61 = vpop.f32.mrb[54].mxu1 }
 0x3de   : > { %v5523_v15 = vrot.slane %v5522_v21, 1  ;;  %v5534_v11 = vmax.f32 %v5532_v48, %v5533_v41  ;;  %v5541_v12 = vmax.f32 %v5539_v0, %v5540_v30  ;;  %v5547_v57 = vrot.slane %v5546_v59, 4  ;;  %v13471_v42 = vpop.f32.mrb[55].mxu1 }
 0x3df   : > { %v13476_v53 = vsel %vm2404_vm12, %v5503_v13, -inf  ;;  %v13479_v46 = vsel %vm2404_vm12, %v5510_v9, -inf  ;;  %v13482_v6 = vsel %vm2404_vm12, %v5517_v36, -inf  ;;  %v5529_v35 = vmax.f32 %v5527_v17, %v5528_v10 }
 0x3e0   : > { %v5524_v25 = vmax.f32 %v5522_v21, %v5523_v15  ;;  %v5535_v18 = vrot.slane %v5534_v11, 2  ;;  %v5542_v58 = vrot.slane %v5541_v12, 2  ;;  %v5548_v19 = vmax.f32 %v5546_v59, %v5547_v57  ;;  %v10904_v59 = vld [vmem:[%s14794_s5] sm:$0xff]  }
 0x3e1   : > { %v5530_v29 = vrot.slane %v5529_v35, 1  ;;  %v4098_v26 = vadd.f32 %v13188_v31, %v9187_v16  ;;  %v4101_v52 = vadd.f32 %v13188_v31, %v9190_v20  ;;  %v9193_v1 = vadd.f32 %v13317_v23, %v13312_v5  ;;  %v10903_v16 = vld [vmem:[%s14794_s5 + $0x40] sm:$0xff]  }
 0x3e2   : > { %v13489_v48 = vsel %vm2404_vm12, %v5524_v25, -inf  ;;  %v5536_v0 = vmax.f32 %v5534_v11, %v5535_v18  ;;  %v5543_v34 = vmax.f32 %v5541_v12, %v5542_v58  ;;  %v5549_v56 = vrot.slane %v5548_v19, 2  ;;  %9245 = vmatprep.subr.bf16.mxu0 %v10903_v16 }
 0x3e3   : > { %v5531_v54 = vmax.f32 %v5529_v35, %v5530_v29  ;;  %v4259_v17 = vadd.f32 %v12931_v7, %v4098_v26  ;;  %v4262_v21 = vadd.f32 %v12942_v55, %v4101_v52  ;;  %v4106_v41 = vadd.f32 %v13188_v31, %v9193_v1  ;;  %9246 = vmatpush3.bf16.msra.mxu0 %v10904_v59 }
 0x3e4   : > { %v5537_v20 = vrot.slane %v5536_v0, 1  ;;  %v5544_v30 = vrot.slane %v5543_v34, 1  ;;  %v5550_v5 = vmax.f32 %v5548_v19, %v5549_v56  ;;  %v9196_v23 = vadd.f32 %v13326_v43, %v13319_v14 }
 0x3e5   : > { %v13503_v7 = vsel %vm2404_vm12, %v5531_v54, -inf  ;;  %v4331_v55 = vmax.f32 %v4259_v17, 0.0  ;;  %v4332_v13 = vmax.f32 %v4262_v21, 0.0  ;;  %v4267_v9 = vadd.f32 %v13004_v63, %v4106_v41 }
 0x3e6   : > { %v5538_v36 = vmax.f32 %v5536_v0, %v5537_v20  ;;  %v5545_v10 = vmax.f32 %v5543_v34, %v5544_v30  ;;  %v5551_v15 = vrot.slane %v5550_v5, 1  ;;  %v13507_v11 = vadd.f32 %v13188_v31, %v9196_v23 }
 0x3e7   : > { %v4683_v14 = vcombine.high %v4331_v55, %v4331_v55  ;;  %v4690_v43 = vrot.slane %v4331_v55, %v12878_v44  ;;  %v4700_v12 = vcombine.high %v4332_v13, %v4332_v13  ;;  %v4707_v57 = vrot.slane %v4332_v13, %v12878_v44 }
 0x3e8   : > { %v5552_v35 = vmax.f32 %v5550_v5, %v5551_v15  ;;  %v13512_v25 = vsel %vm2404_vm12, %v5538_v36, -inf  ;;  %v13515_v63 = vsel %vm2404_vm12, %v5545_v10, -inf  ;;  %v13517_v18 = vmax.f32 %v4267_v9, 0.0 }
 0x3e9   : > { %v4697_v58 = vrot.slane %v4683_v14, %v12878_v44  ;;  %v4698_v31 = vcombine.high %v4690_v43, %v4690_v43  ;;  %v5553_v19 = vsel %vm2407_vm13, %v4690_v43, -inf  ;;  %v4714_v29 = vrot.slane %v4700_v12, %v12878_v44 }
 0x3ea   : > { %v13523_v26 = vsel %vm2404_vm12, %v5552_v35, -inf  ;;  %v5554_v52 = vrot.slane %v5553_v19, 4  ;;  %v4715_v1 = vcombine.high %v4707_v57, %v4707_v57  ;;  %v5581_v0 = vsel %vm2407_vm13, %v4707_v57, -inf }
 0x3eb   : > { %v4699_v34 = vcombine.high %v4697_v58, %v4697_v58  ;;  %v5560_v56 = vsel %vm2407_vm13, %v4698_v31, -inf  ;;  %v5567_v54 = vsel %vm2407_vm13, %v4697_v58, -inf  ;;  %v4716_v17 = vcombine.high %v4714_v29, %v4714_v29 }
 0x3ec   : > { %v5555_v21 = vmax.f32 %v5553_v19, %v5554_v52  ;;  %v5561_v41 = vrot.slane %v5560_v56, 4  ;;  %v5568_v16 = vrot.slane %v5567_v54, 4  ;;  %v5582_v20 = vrot.slane %v5581_v0, 4 }
 0x3ed   : > { %v5574_v30 = vsel %vm2407_vm13, %v4699_v34, -inf  ;;  %v5588_v5 = vsel %vm2407_vm13, %v4715_v1, -inf  ;;  %v5595_v23 = vsel %vm2407_vm13, %v4714_v29, -inf  ;;  %v5602_v59 = vsel %vm2407_vm13, %v4716_v17, -inf }
 0x3ee   : > { %v5556_v55 = vrot.slane %v5555_v21, 2  ;;  %v5562_v13 = vmax.f32 %v5560_v56, %v5561_v41  ;;  %v5569_v9 = vmax.f32 %v5567_v54, %v5568_v16  ;;  %v5575_v36 = vrot.slane %v5574_v30, 4 }
 0x3ef   : > { %v5583_v10 = vmax.f32 %v5581_v0, %v5582_v20  ;;  %v5589_v15 = vrot.slane %v5588_v5, 4  ;;  %v5596_v14 = vrot.slane %v5595_v23, 4  ;;  %v5603_v43 = vrot.slane %v5602_v59, 4  ;;  %v10905_v0 = vld [vmem:[%s14794_s5 + $0x48] sm:$0xff]  }
 0x3f0   : > { %v5557_v12 = vmax.f32 %v5555_v21, %v5556_v55  ;;  %v5563_v57 = vrot.slane %v5562_v13, 2  ;;  %v5570_v35 = vrot.slane %v5569_v9, 2  ;;  %v5576_v58 = vmax.f32 %v5574_v30, %v5575_v36  ;;  %9247 = vmatprep.subr.bf16.mxu0 %v10905_v0 }
 0x3f1   : > { %v5584_v31 = vrot.slane %v5583_v10, 2  ;;  %v5590_v19 = vmax.f32 %v5588_v5, %v5589_v15  ;;  %v5597_v52 = vmax.f32 %v5595_v23, %v5596_v14  ;;  %v5604_v1 = vmax.f32 %v5602_v59, %v5603_v43  ;;  %v10906_v5 = vld [vmem:[%s14794_s5 + $0x8] sm:$0xff]  }
 0x3f2   : > { %v5558_v34 = vrot.slane %v5557_v12, 1  ;;  %v5564_v29 = vmax.f32 %v5562_v13, %v5563_v57  ;;  %v5571_v24 = vmax.f32 %v5569_v9, %v5570_v35  ;;  %v5577_v17 = vrot.slane %v5576_v58, 2  ;;  %9248 = vmatpush3.bf16.msra.mxu0 %v10906_v5  ;;  %v13566_v5 = vld [vmem:[#allocation4 + $0x42] sm:$0xff] }
 0x3f3   : > { %v5585_v49 = vmax.f32 %v5583_v10, %v5584_v31  ;;  %v5591_v56 = vrot.slane %v5590_v19, 2  ;;  %v5598_v54 = vrot.slane %v5597_v52, 2  ;;  %v5605_v41 = vrot.slane %v5604_v1, 2 }
 0x3f4   : > { %v5559_v21 = vmax.f32 %v5557_v12, %v5558_v34  ;;  %v5565_v16 = vrot.slane %v5564_v29, 1  ;;  %v5572_v20 = vrot.slane %v5571_v24, 1  ;;  %v5578_v30 = vmax.f32 %v5576_v58, %v5577_v17  ;;  %v13540_v35 = vpop.f32.mrb[56].mxu1  ;;  %v10907_v58 = vld [vmem:[%s14794_s5 + $0x50] sm:$0xff]  }
 0x3f5   : > { %v5586_v23 = vrot.slane %v5585_v49, 1  ;;  %v5592_v59 = vmax.f32 %v5590_v19, %v5591_v56  ;;  %v5599_v55 = vmax.f32 %v5597_v52, %v5598_v54  ;;  %v5606_v13 = vmax.f32 %v5604_v1, %v5605_v41  ;;  %v13547_v1 = vpop.f32.mrb[57].mxu1  ;;  %9249 = vmatprep.subr.bf16.mxu0 %v10907_v58 }
 0x3f6   : > { %v5566_v9 = vmax.f32 %v5564_v29, %v5565_v16  ;;  %v5573_v36 = vmax.f32 %v5571_v24, %v5572_v20  ;;  %v5579_v10 = vrot.slane %v5578_v30, 1  ;;  %v6042_v15 = vsel %vm2404_vm12, %v5559_v21, -inf  ;;  %v13554_v56 = vpop.f32.mrb[58].mxu1 }
 0x3f7   : > { %v6043_v14 = vmax.f32 %v13476_v53, %v6042_v15  ;;  %v5587_v43 = vmax.f32 %v5585_v49, %v5586_v23  ;;  %v5593_v12 = vrot.slane %v5592_v59, 1  ;;  %v5600_v57 = vrot.slane %v5599_v55, 1  ;;  %v10908_v49 = vld [vmem:[%s14794_s5 + $0x10] sm:$0xff]   ;;  %v13560_v16 = vpop.f32.mrb[59].mxu1  ;;  %v10909_v23 = vld [vmem:[%s14794_s5 + $0x58] sm:$0xff]  }
 0x3f8   : > { %v5580_v31 = vmax.f32 %v5578_v30, %v5579_v10  ;;  %v6045_v19 = vsel %vm2404_vm12, %v5566_v9, -inf  ;;  %v6048_v24 = vsel %vm2404_vm12, %v5573_v36, -inf  ;;  %v5607_v52 = vrot.slane %v5606_v13, 1  ;;  %9250 = vmatpush3.bf16.msra.mxu0 %v10908_v49  ;;  %v13575_v9 = vld [vmem:[#allocation4 + $0x40] sm:$0xff] }
 0x3f9   : > { %v6046_v53 = vmax.f32 %v13479_v46, %v6045_v19  ;;  %v6049_v34 = vmax.f32 %v13482_v6, %v6048_v24  ;;  %v5594_v29 = vmax.f32 %v5592_v59, %v5593_v12  ;;  %v5601_v17 = vmax.f32 %v5599_v55, %v5600_v57  ;;  %9251 = vmatprep.subr.bf16.mxu0 %v10909_v23  ;;  %v10911_v19 = vld [vmem:[%s14794_s5 + $0x60] sm:$0xff]  }
 0x3fa   : > { %v6051_v54 = vsel %vm2404_vm12, %v5580_v31, -inf  ;;  %v5608_v41 = vmax.f32 %v5606_v13, %v5607_v52  ;;  %v6054_v0 = vsel %vm2404_vm12, %v5587_v43, -inf  ;;  %v4717_v21 = vcombine.high %v13517_v18, %v13517_v18 }
 0x3fb   : > { %v6052_v46 = vmax.f32 %v13489_v48, %v6051_v54  ;;  %v6256_v6 = vsel %vm6221_vm0, %v6046_v53, %v6043_v14  ;;  %v6055_v20 = vmax.f32 %v13503_v7, %v6054_v0  ;;  %v6057_v30 = vsel %vm2404_vm12, %v5594_v29, -inf  ;;  %v10910_v7 = vld [vmem:[%s14794_s5 + $0x18] sm:$0xff]  }
 0x3fc   : > { %v6257_v59 = vsel %vm6223_vm1, %v6049_v34, %v6256_v6  ;;  %v6058_v55 = vmax.f32 %v13512_v25, %v6057_v30  ;;  %v6060_v13 = vsel %vm2404_vm12, %v5601_v17, -inf  ;;  %v6063_v48 = vsel %vm2404_vm12, %v5608_v41, -inf  ;;  %9252 = vmatpush3.bf16.msra.mxu0 %v10910_v7  ;;  %v13595_v31 = vpop.f32.mrb[60].mxu1 }
 0x3fd   : > { %v6061_v36 = vmax.f32 %v13515_v63, %v6060_v13  ;;  %v6064_v10 = vmax.f32 %v13523_v26, %v6063_v48  ;;  %v6258_v15 = vsel %vm6225_vm2, %v6052_v46, %v6257_v59  ;;  %v4724_v14 = vrot.slane %v13517_v18, %v12878_v44  ;;  %v13603_v52 = vpop.f32.mrb[61].mxu1  ;;  %9253 = vmatprep.subr.bf16.mxu0 %v10911_v19  ;;  %v10913_v59 = vld [vmem:[%s14794_s5 + $0x68] sm:$0xff]   ;;  %v13626_v48 = vld [vmem:[%s14793_s4] ss:$0 sm:$0xff] }
 0x3fe   : > { %v6259_v25 = vsel %vm6227_vm3, %v6055_v20, %v6258_v15  ;;  %v4731_v43 = vrot.slane %v4717_v21, %v12878_v44  ;;  %v4270_v12 = vadd.f32 %v13011_v51, %v13507_v11  ;;  %v10722_v57 = vpack.i.bf16 %v13566_v5, %v13343_v45  ;;  %v13611_v17 = vpop.f32.mrb[62].mxu1 }
 0x3ff   : > { %v6260_v63 = vsel %vm6229_vm4, %v6058_v55, %v6259_v25  ;;  %v4732_v26 = vcombine.high %v4724_v14, %v4724_v14  ;;  %v5609_v58 = vsel %vm2407_vm13, %v4724_v14, -inf  ;;  %v10727_v18 = vpack.i.bf16 %v13575_v9, %v13354_v39  ;;  %v10912_v39 = vld [vmem:[%s14794_s5 + $0x20] sm:$0xff]   ;;  %v13617_v46 = vpop.f32.mrb[63].mxu1 }
 0x400   : > { %v6261_v51 = vsel %vm6231_vm5, %v6061_v36, %v6260_v63  ;;  %v4733_v11 = vcombine.high %v4731_v43, %v4731_v43  ;;  %v5610_v24 = vrot.slane %v5609_v58, 4  ;;  %v5623_v45 = vsel %vm2407_vm13, %v4731_v43, -inf  ;;  %10723 = vrot.lane.b32.xlu0 %v10722_v57, %s11035_s19  ;;  %9254 = vmatpush3.bf16.msra.mxu0 %v10912_v39 }
 0x401   : > { %v6262_v49 = vsel %vm6233_vm6, %v6064_v10, %v6261_v51  ;;  %v5616_v53 = vsel %vm2407_vm13, %v4732_v26, -inf  ;;  %v5624_v34 = vrot.slane %v5623_v45, 4  ;;  %v4334_v29 = vmax.f32 %v4270_v12, 0.0  ;;  %10728 = vrot.lane.b32.xlu1 %v10727_v18, %s11037_s29  ;;  %9255 = vmatprep.subr.bf16.mxu0 %v10913_v59  ;;  %v10915_v18 = vld [vmem:[%s14794_s5 + $0x70] sm:$0xff]  }
 0x402   : > { %6297 = vst.msk [vmem:[#allocation4 + $0x51] sm:$0xff] %vm2404_vm12, %v6262_v49  ;;  %v5611_v54 = vmax.f32 %v5609_v58, %v5610_v24  ;;  %v5617_v41 = vrot.slane %v5616_v53, 4  ;;  %v5630_v0 = vsel %vm2407_vm13, %v4733_v11, -inf  ;;  %v9199_v21 = vadd.f32 %v13396_v62, %v13394_v4  ;;  %v10914_v4 = vld [vmem:[%s14794_s5 + $0x28] sm:$0xff]   ;;  %v10916_v24 = vld [vmem:[%s14794_s5 + $0x30] sm:$0xff]  }
 0x403   : > { %v5625_v6 = vmax.f32 %v5623_v45, %v5624_v34  ;;  %v5631_v20 = vrot.slane %v5630_v0, 4  ;;  %v4734_v30 = vcombine.high %v4334_v29, %v4334_v29  ;;  %v4741_v23 = vrot.slane %v4334_v29, %v12878_v44 }
 0x404   : > { %v5612_v55 = vrot.slane %v5611_v54, 2  ;;  %v5618_v13 = vmax.f32 %v5616_v53, %v5617_v41  ;;  %v4114_v62 = vadd.f32 %v13626_v48, %v9199_v21  ;;  %9256 = vmatpush3.bf16.msra.mxu0 %v10914_v4 }
 0x405   : > { %v5626_v7 = vrot.slane %v5625_v6, 2  ;;  %v5632_v36 = vmax.f32 %v5630_v0, %v5631_v20  ;;  %v4748_v10 = vrot.slane %v4734_v30, %v12878_v44  ;;  %v4749_v15 = vcombine.high %v4741_v23, %v4741_v23  ;;  %9257 = vmatprep.subr.bf16.mxu0 %v10915_v18  ;;  %v10917_v0 = vld [vmem:[%s14794_s5 + $0x78] sm:$0xff]  }
 0x406   : > { %v5613_v14 = vmax.f32 %v5611_v54, %v5612_v55  ;;  %v5619_v25 = vrot.slane %v5618_v13, 2  ;;  %v5637_v43 = vsel %vm2407_vm13, %v4741_v23, -inf  ;;  %v4275_v12 = vadd.f32 %v13001_v33, %v4114_v62 }
 0x407   : > { %v5627_v57 = vmax.f32 %v5625_v6, %v5626_v7  ;;  %v5633_v63 = vrot.slane %v5632_v36, 2  ;;  %v4750_v26 = vcombine.high %v4748_v10, %v4748_v10  ;;  %v5638_v58 = vrot.slane %v5637_v43, 4 }
 0x408   : > { %v5614_v19 = vrot.slane %v5613_v14, 1  ;;  %v5644_v51 = vsel %vm2407_vm13, %v4749_v15, -inf  ;;  %v5651_v11 = vsel %vm2407_vm13, %v4748_v10, -inf  ;;  %v5620_v45 = vmax.f32 %v5618_v13, %v5619_v25  ;;  %9258 = vmatpush3.bf16.msra.mxu0 %v10916_v24  ;;  %v10918_v13 = vld [vmem:[%s14794_s5 + $0x38] sm:$0xff]  }
 0x409   : > { %v5634_v33 = vmax.f32 %v5632_v36, %v5633_v63  ;;  %v5639_v39 = vmax.f32 %v5637_v43, %v5638_v58  ;;  %v5645_v49 = vrot.slane %v5644_v51, 4  ;;  %v5652_v53 = vrot.slane %v5651_v11, 4  ;;  %9259 = vmatprep.subr.bf16.mxu0 %v10917_v0 }
 0x40a   : > { %v5658_v34 = vsel %vm2407_vm13, %v4750_v26, -inf  ;;  %v5628_v29 = vrot.slane %v5627_v57, 1  ;;  %v5615_v21 = vmax.f32 %v5613_v14, %v5614_v19  ;;  %v5621_v30 = vrot.slane %v5620_v45, 1 }
 0x40b   : > { %v5640_v54 = vrot.slane %v5639_v39, 2  ;;  %v5646_v41 = vmax.f32 %v5644_v51, %v5645_v49  ;;  %v5653_v6 = vmax.f32 %v5651_v11, %v5652_v53  ;;  %v5659_v20 = vrot.slane %v5658_v34, 4 }
 0x40c   : > { %v5635_v23 = vrot.slane %v5634_v33, 1  ;;  %v4335_v7 = vmax.f32 %v4275_v12, 0.0  ;;  %v5629_v36 = vmax.f32 %v5627_v57, %v5628_v29  ;;  %9260 = vmatpush3.bf16.msra.mxu0 %v10918_v13  ;;  %v5622_v26 = vmax.f32 %v5620_v45, %v5621_v30 }
 0x40d   : > { %v5641_v59 = vmax.f32 %v5639_v39, %v5640_v54  ;;  %v5647_v55 = vrot.slane %v5646_v41, 2  ;;  %v5654_v62 = vrot.slane %v5653_v6, 2  ;;  %v5660_v4 = vmax.f32 %v5658_v34, %v5659_v20 }
 0x40e   : > { %v4751_v43 = vcombine.high %v4335_v7, %v4335_v7  ;;  %v4758_v63 = vrot.slane %v4335_v7, %v12878_v44  ;;  %v5636_v58 = vmax.f32 %v5634_v33, %v5635_v23  ;;  %v13652_v18 = vsel %vm2404_vm12, %v5615_v21, -inf }
 0x40f   : > { %v5642_v10 = vrot.slane %v5641_v59, 1  ;;  %v5648_v15 = vmax.f32 %v5646_v41, %v5647_v55  ;;  %v5655_v25 = vmax.f32 %v5653_v6, %v5654_v62  ;;  %v5661_v14 = vrot.slane %v5660_v4, 2 }
 0x410   : > { %v4765_v24 = vrot.slane %v4751_v43, %v12878_v44  ;;  %v4766_v12 = vcombine.high %v4758_v63, %v4758_v63  ;;  %v13656_v57 = vsel %vm2404_vm12, %v5629_v36, -inf  ;;  %v5665_v49 = vsel %vm2407_vm13, %v4758_v63, -inf }
 0x411   : > { %v5649_v19 = vrot.slane %v5648_v15, 1  ;;  %v5656_v51 = vrot.slane %v5655_v25, 1  ;;  %v5662_v11 = vmax.f32 %v5660_v4, %v5661_v14  ;;  %v5643_v39 = vmax.f32 %v5641_v59, %v5642_v10 }
 0x412   : > { %v9202_v53 = vadd.f32 %v13401_v28, %v13398_v60  ;;  %v4767_v34 = vcombine.high %v4765_v24, %v4765_v24  ;;  %v5666_v29 = vrot.slane %v5665_v49, 4  ;;  %v5672_v41 = vsel %vm2407_vm13, %v4766_v12, -inf }
 0x413   : > { %v5650_v45 = vmax.f32 %v5648_v15, %v5649_v19  ;;  %v5663_v33 = vrot.slane %v5662_v11, 1  ;;  %v5657_v54 = vmax.f32 %v5655_v25, %v5656_v51  ;;  %v5679_v0 = vsel %vm2407_vm13, %v4765_v24, -inf }
 0x414   : > { %v4117_v21 = vadd.f32 %v13626_v48, %v9202_v53  ;;  %v13665_v6 = vsel %vm2404_vm12, %v5622_v26, -inf  ;;  %v13668_v20 = vsel %vm2404_vm12, %v5636_v58, -inf  ;;  %v5667_v30 = vmax.f32 %v5665_v49, %v5666_v29 }
 0x415   : > { %v5673_v23 = vrot.slane %v5672_v41, 4  ;;  %v5664_v60 = vmax.f32 %v5662_v11, %v5663_v33  ;;  %v5680_v28 = vrot.slane %v5679_v0, 4  ;;  %v5686_v59 = vsel %vm2407_vm13, %v4767_v34, -inf }
 0x416   : > { %v4278_v55 = vadd.f32 %v13007_v40, %v4117_v21  ;;  %v13673_v13 = vsel %vm2404_vm12, %v5643_v39, -inf  ;;  %v5668_v62 = vrot.slane %v5667_v30, 2  ;;  %v5687_v7 = vrot.slane %v5686_v59, 4 }
 0x417   : > { %v5674_v4 = vmax.f32 %v5672_v41, %v5673_v23  ;;  %v13676_v36 = vsel %vm2404_vm12, %v5650_v45, -inf  ;;  %v13679_v10 = vsel %vm2404_vm12, %v5657_v54, -inf  ;;  %v5681_v15 = vmax.f32 %v5679_v0, %v5680_v28 }
 0x418   : > { %v4336_v25 = vmax.f32 %v4278_v55, 0.0  ;;  %v5669_v14 = vmax.f32 %v5667_v30, %v5668_v62  ;;  %v5688_v63 = vmax.f32 %v5686_v59, %v5687_v7  ;;  %v9205_v40 = vadd.f32 %v13421_v37, %v13416_v38 }
 0x419   : > { %v5675_v43 = vrot.slane %v5674_v4, 2  ;;  %v13684_v26 = vsel %vm2404_vm12, %v5664_v60, -inf  ;;  %v5682_v58 = vrot.slane %v5681_v15, 2 }
 0x41a   : > { %v4768_v19 = vcombine.high %v4336_v25, %v4336_v25  ;;  %v4775_v51 = vrot.slane %v4336_v25, %v12878_v44  ;;  %v5670_v11 = vrot.slane %v5669_v14, 1  ;;  %v5689_v12 = vrot.slane %v5688_v63, 2 }
 0x41b   : > { %v5676_v24 = vmax.f32 %v5674_v4, %v5675_v43  ;;  %v4122_v39 = vadd.f32 %v13626_v48, %v9205_v40  ;;  %v5683_v49 = vmax.f32 %v5681_v15, %v5682_v58 }
 0x41c   : > { %v4782_v53 = vrot.slane %v4768_v19, %v12878_v44  ;;  %v4783_v45 = vcombine.high %v4775_v51, %v4775_v51  ;;  %v5693_v33 = vsel %vm2407_vm13, %v4775_v51, -inf  ;;  %v5671_v34 = vmax.f32 %v5669_v14, %v5670_v11 }
 0x41d   : > { %v5677_v38 = vrot.slane %v5676_v24, 1  ;;  %v5690_v37 = vmax.f32 %v5688_v63, %v5689_v12  ;;  %v5694_v29 = vrot.slane %v5693_v33, 4  ;;  %v5684_v54 = vrot.slane %v5683_v49, 1 }
 0x41e   : > { %v4784_v41 = vcombine.high %v4782_v53, %v4782_v53  ;;  %v5700_v0 = vsel %vm2407_vm13, %v4783_v45, -inf  ;;  %v5707_v21 = vsel %vm2407_vm13, %v4782_v53, -inf  ;;  %v6066_v60 = vsel %vm2404_vm12, %v5671_v34, -inf  ;;  %v13702_v45 = vld [vmem:[#allocation4 + $0x52] sm:$0xff] }
 0x41f   : > { %v5678_v30 = vmax.f32 %v5676_v24, %v5677_v38  ;;  %v5691_v23 = vrot.slane %v5690_v37, 1  ;;  %v5695_v28 = vmax.f32 %v5693_v33, %v5694_v29  ;;  %v5685_v59 = vmax.f32 %v5683_v49, %v5684_v54 }
 0x420   : > { %v6067_v55 = vmax.f32 %v13652_v18, %v6066_v60  ;;  %v5701_v62 = vrot.slane %v5700_v0, 4  ;;  %v5708_v4 = vrot.slane %v5707_v21, 4  ;;  %v5714_v14 = vsel %vm2407_vm13, %v4784_v41, -inf }
 0x421   : > { %v5692_v7 = vmax.f32 %v5690_v37, %v5691_v23  ;;  %v6069_v15 = vsel %vm2404_vm12, %v5678_v30, -inf  ;;  %v5696_v25 = vrot.slane %v5695_v28, 2  ;;  %v6072_v63 = vsel %vm2404_vm12, %v5685_v59, -inf  ;;  %v13706_v37 = vld [vmem:[#allocation4 + $0x50] sm:$0xff] }
 0x422   : > { %v6070_v43 = vmax.f32 %v13665_v6, %v6069_v15  ;;  %v5702_v40 = vmax.f32 %v5700_v0, %v5701_v62  ;;  %v5709_v58 = vmax.f32 %v5707_v21, %v5708_v4  ;;  %v6073_v19 = vmax.f32 %v13656_v57, %v6072_v63 }
 0x423   : > { %v6075_v51 = vsel %vm2404_vm12, %v5692_v7, -inf  ;;  %v5697_v11 = vmax.f32 %v5695_v28, %v5696_v25  ;;  %v5715_v18 = vrot.slane %v5714_v14, 4  ;;  %v4283_v38 = vadd.f32 %v13085_v3, %v4122_v39 }
 0x424   : > { %v6076_v24 = vmax.f32 %v13668_v20, %v6075_v51  ;;  %v6263_v12 = vsel %vm6221_vm0, %v6070_v43, %v6067_v55  ;;  %v5703_v49 = vrot.slane %v5702_v40, 2  ;;  %v5710_v53 = vrot.slane %v5709_v58, 2 }
 0x425   : > { %v6264_v6 = vsel %vm6223_vm1, %v6073_v19, %v6263_v12  ;;  %v5698_v33 = vrot.slane %v5697_v11, 1  ;;  %v5716_v34 = vmax.f32 %v5714_v14, %v5715_v18  ;;  %v9208_v20 = vadd.f32 %v13433_v22, %v13428_v27 }
 0x426   : > { %v5704_v57 = vmax.f32 %v5702_v40, %v5703_v49  ;;  %v5711_v29 = vmax.f32 %v5709_v58, %v5710_v53  ;;  %v6265_v54 = vsel %vm6225_vm2, %v6076_v24, %v6264_v6  ;;  %v4337_v21 = vmax.f32 %v4283_v38, 0.0 }
 0x427   : > { %v5699_v41 = vmax.f32 %v5697_v11, %v5698_v33  ;;  %v5717_v0 = vrot.slane %v5716_v34, 2  ;;  %v6619_v30 = vpack.c.bf16 %v13702_v45, %v13566_v5  ;;  %v4125_v28 = vadd.f32 %v13626_v48, %v9208_v20 }
 0x428   : > { %v5705_v23 = vrot.slane %v5704_v57, 1  ;;  %v5712_v60 = vrot.slane %v5711_v29, 1  ;;  %v10732_v3 = vpack.i.bf16 %v13706_v37, %v13575_v9  ;;  %v4785_v55 = vcombine.high %v4337_v21, %v4337_v21 }
 0x429   : > { %v5718_v39 = vmax.f32 %v5716_v34, %v5717_v0  ;;  %v6078_v59 = vsel %vm2404_vm12, %v5699_v41, -inf  ;;  %v4792_v62 = vrot.slane %v4337_v21, %v12878_v44  ;;  %9503 = vmatmul.mubr.msk.bf16.vlgmr.msra.gmra.mrb[64].mxu1 %vm2404_vm12, %v6619_v30  ;;  %v4286_v7 = vadd.f32 %v13095_v32, %v4125_v28  ;;  %v13733_v34 = vld [vmem:[#allocation4 + $0x51] sm:$0xff]  ;;  %v13738_v0 = vld [vmem:[#allocation4 + $0x41] sm:$0xff] }
 0x42a   : > { %v5706_v27 = vmax.f32 %v5704_v57, %v5705_v23  ;;  %v5713_v22 = vmax.f32 %v5711_v29, %v5712_v60  ;;  %v6079_v4 = vmax.f32 %v13673_v13, %v6078_v59  ;;  %10733 = vrot.lane.b32.xlu0 %v10732_v3, %s11036_s20  ;;  %v4799_v25 = vrot.slane %v4785_v55, %v12878_v44 }
 0x42b   : > { %v5719_v15 = vrot.slane %v5718_v39, 1  ;;  %v4800_v9 = vcombine.high %v4792_v62, %v4792_v62  ;;  %v5721_v14 = vsel %vm2407_vm13, %v4792_v62, -inf  ;;  %v4338_v12 = vmax.f32 %v4286_v7, 0.0 }
 0x42c   : > { %v6081_v43 = vsel %vm2404_vm12, %v5706_v27, -inf  ;;  %v6084_v63 = vsel %vm2404_vm12, %v5713_v22, -inf  ;;  %v6266_v40 = vsel %vm6227_vm3, %v6079_v4, %v6265_v54  ;;  %v5722_v58 = vrot.slane %v5721_v14, 4  ;;  %v13749_v4 = vpop.permute.xlu1 %10683 }
 0x42d   : > { %v5720_v19 = vmax.f32 %v5718_v39, %v5719_v15  ;;  %v6082_v13 = vmax.f32 %v13676_v36, %v6081_v43  ;;  %v6085_v32 = vmax.f32 %v13679_v10, %v6084_v63  ;;  %v4801_v51 = vcombine.high %v4799_v25, %v4799_v25 }
 0x42e   : > { %v5723_v11 = vmax.f32 %v5721_v14, %v5722_v58  ;;  %v5728_v18 = vsel %vm2407_vm13, %v4800_v9, -inf  ;;  %v5735_v24 = vsel %vm2407_vm13, %v4799_v25, -inf  ;;  %v4802_v41 = vcombine.high %v4338_v12, %v4338_v12 }
 0x42f   : > { %v6087_v49 = vsel %vm2404_vm12, %v5720_v19, -inf  ;;  %v6267_v53 = vsel %vm6229_vm4, %v6082_v13, %v6266_v40  ;;  %v5729_v6 = vrot.slane %v5728_v18, 4  ;;  %v5736_v33 = vrot.slane %v5735_v24, 4 }
 0x430   : > { %v6088_v38 = vmax.f32 %v13684_v26, %v6087_v49  ;;  %v6268_v36 = vsel %vm6231_vm5, %v6085_v32, %v6267_v53  ;;  %v5724_v10 = vrot.slane %v5723_v11, 2  ;;  %v5742_v57 = vsel %vm2407_vm13, %v4801_v51, -inf }
 0x431   : > { %v5730_v29 = vmax.f32 %v5728_v18, %v5729_v6  ;;  %v5737_v54 = vmax.f32 %v5735_v24, %v5736_v33  ;;  %v5743_v20 = vrot.slane %v5742_v57, 4  ;;  %v4809_v30 = vrot.slane %v4338_v12, %v12878_v44 }
 0x432   : > { %v6269_v21 = vsel %vm6233_vm6, %v6088_v38, %v6268_v36  ;;  %v10742_v23 = vpack.i.bf16 %v13733_v34, %v13738_v0  ;;  %v4816_v3 = vrot.slane %v4802_v41, %v12878_v44  ;;  %v5725_v55 = vmax.f32 %v5723_v11, %v5724_v10 }
 0x433   : > { %6298 = vst.msk [vmem:[#allocation4 + $0x61] sm:$0xff] %vm2404_vm12, %v6269_v21  ;;  %v5731_v26 = vrot.slane %v5730_v29, 2  ;;  %v5738_v60 = vrot.slane %v5737_v54, 2  ;;  %v5744_v28 = vmax.f32 %v5742_v57, %v5743_v20  ;;  %v4817_v39 = vcombine.high %v4809_v30, %v4809_v30  ;;  %v13764_v21 = vpop.permute.xlu1 %10688 }
 0x434   : > { %v5749_v59 = vsel %vm2407_vm13, %v4809_v30, -inf  ;;  %10743 = vrot.lane.b32.xlu1 %v10742_v23, %s11035_s19  ;;  %10738 = vrot.lane.b32.xlu0 %v10742_v23, %s11037_s29  ;;  %v4818_v22 = vcombine.high %v4816_v3, %v4816_v3  ;;  %v5763_v25 = vsel %vm2407_vm13, %v4816_v3, -inf  ;;  %v10747_v9 = vpack.i.bf16 %v13702_v45, %v13566_v5  ;;  %v14810_v23 = vld [vmem:[#allocation7_spill] sm:$0xff] }
 0x435   : > { %v5732_v62 = vmax.f32 %v5730_v29, %v5731_v26  ;;  %v5745_v27 = vrot.slane %v5744_v28, 2  ;;  %v5750_v7 = vrot.slane %v5749_v59, 4  ;;  %v5756_v15 = vsel %vm2407_vm13, %v4817_v39, -inf }
 0x436   : > { %v5739_v14 = vmax.f32 %v5737_v54, %v5738_v60  ;;  %v5757_v63 = vrot.slane %v5756_v15, 4  ;;  %v5764_v58 = vrot.slane %v5763_v25, 4  ;;  %v5770_v19 = vsel %vm2407_vm13, %v4818_v22, -inf }
 0x437   : > { %v5746_v43 = vmax.f32 %v5744_v28, %v5745_v27  ;;  %v5751_v40 = vmax.f32 %v5749_v59, %v5750_v7  ;;  %v10686_v13 = vunpack.i.h.bf16 %v13749_v4  ;;  %v5726_v32 = vrot.slane %v5725_v55, 1  ;;  %v14811_v7 = vld [vmem:[#allocation8_spill] sm:$0xff] }
 0x438   : > { %10748 = vrot.lane.b32.xlu1 %v10747_v9, %s11036_s20  ;;  %v5733_v51 = vrot.slane %v5732_v62, 1  ;;  %v5758_v11 = vmax.f32 %v5756_v15, %v5757_v63  ;;  %v5765_v24 = vmax.f32 %v5763_v25, %v5764_v58  ;;  %v5771_v12 = vrot.slane %v5770_v19, 4 }
 0x439   : > { %v5752_v18 = vrot.slane %v5751_v40, 2  ;;  %v9211_v5 = vadd.f32 %v13463_v50, %v13458_v2  ;;  %v10685_v49 = vunpack.i.l.bf16 %v13749_v4  ;;  %v5740_v53 = vrot.slane %v5739_v14, 1 }
 0x43a   : > { %v5747_v6 = vrot.slane %v5746_v43, 1  ;;  %v5759_v33 = vrot.slane %v5758_v11, 2  ;;  %v5766_v36 = vrot.slane %v5765_v24, 2  ;;  %v5772_v10 = vmax.f32 %v5770_v19, %v5771_v12 }
 0x43b   : > { %v5753_v38 = vmax.f32 %v5751_v40, %v5752_v18  ;;  %v4130_v57 = vadd.f32 %v13626_v48, %v9211_v5  ;;  %v5727_v29 = vmax.f32 %v5725_v55, %v5726_v32  ;;  %v5734_v54 = vmax.f32 %v5732_v62, %v5733_v51 }
 0x43c   : > { %v5760_v20 = vmax.f32 %v5758_v11, %v5759_v33  ;;  %v9214_v41 = vadd.f32 %v13471_v42, %v13467_v61  ;;  %v5767_v2 = vmax.f32 %v5765_v24, %v5766_v36  ;;  %v5773_v50 = vrot.slane %v5772_v10, 2 }
 0x43d   : > { %v5754_v30 = vrot.slane %v5753_v38, 1  ;;  %v4291_v26 = vadd.f32 %v14810_v23, %v4130_v57  ;;  %v5741_v60 = vmax.f32 %v5739_v14, %v5740_v53  ;;  %v5748_v28 = vmax.f32 %v5746_v43, %v5747_v6 }
 0x43e   : > { %v5761_v3 = vrot.slane %v5760_v20, 1  ;;  %v4133_v39 = vadd.f32 %v13626_v48, %v9214_v41  ;;  %v5768_v27 = vrot.slane %v5767_v2, 1  ;;  %v5774_v55 = vmax.f32 %v5772_v10, %v5773_v50 }
 0x43f   : > { %v5755_v59 = vmax.f32 %v5753_v38, %v5754_v30  ;;  %v4339_v62 = vmax.f32 %v4291_v26, 0.0  ;;  %v10691_v22 = vunpack.i.h.bf16 %v13764_v21  ;;  %v10690_v61 = vunpack.i.l.bf16 %v13764_v21 }
 0x440   : > { %v5762_v42 = vmax.f32 %v5760_v20, %v5761_v3  ;;  %v4294_v15 = vadd.f32 %v14811_v7, %v4133_v39  ;;  %v13772_v25 = vsel %vm2404_vm12, %v5727_v29, -inf  ;;  %v13775_v9 = vsel %vm2404_vm12, %v5734_v54, -inf }
 0x441   : > { %v5775_v14 = vrot.slane %v5774_v55, 1  ;;  %v4819_v43 = vcombine.high %v4339_v62, %v4339_v62  ;;  %v13778_v63 = vsel %vm2404_vm12, %v5741_v60, -inf  ;;  %v13781_v40 = vsel %vm2404_vm12, %v5748_v28, -inf }
 0x442   : > { %v4826_v58 = vrot.slane %v4339_v62, %v12878_v44  ;;  %v4340_v19 = vmax.f32 %v4294_v15, 0.0  ;;  %v13784_v32 = vmax.f32 %v5767_v2, %v5768_v27  ;;  %v13787_v51 = vsel %vm2404_vm12, %v5755_v59, -inf }
 0x443   : > { %v13790_v11 = vsel %vm2404_vm12, %v5762_v42, -inf  ;;  %v4833_v18 = vrot.slane %v4819_v43, %v12878_v44  ;;  %v13795_v6 = vmax.f32 %v5774_v55, %v5775_v14 }
 0x444   : > { %v4834_v24 = vcombine.high %v4826_v58, %v4826_v58  ;;  %v5777_v12 = vsel %vm2407_vm13, %v4826_v58, -inf  ;;  %v4836_v5 = vcombine.high %v4340_v19, %v4340_v19  ;;  %v4843_v53 = vrot.slane %v4340_v19, %v12878_v44 }
 0x445   : > { %v4835_v33 = vcombine.high %v4833_v18, %v4833_v18  ;;  %v5778_v38 = vrot.slane %v5777_v12, 4  ;;  %v5791_v36 = vsel %vm2407_vm13, %v4833_v18, -inf }
 0x446   : > { %v5784_v10 = vsel %vm2407_vm13, %v4834_v24, -inf  ;;  %v5792_v57 = vrot.slane %v5791_v36, 4  ;;  %v4850_v29 = vrot.slane %v4836_v5, %v12878_v44  ;;  %v4851_v54 = vcombine.high %v4843_v53, %v4843_v53 }
 0x447   : > { %v5779_v20 = vmax.f32 %v5777_v12, %v5778_v38  ;;  %v5785_v41 = vrot.slane %v5784_v10, 4  ;;  %v5798_v30 = vsel %vm2407_vm13, %v4835_v33, -inf  ;;  %v5805_v2 = vsel %vm2407_vm13, %v4843_v53, -inf }
 0x448   : > { %v5793_v50 = vmax.f32 %v5791_v36, %v5792_v57  ;;  %v5799_v23 = vrot.slane %v5798_v30, 4  ;;  %v4852_v26 = vcombine.high %v4850_v29, %v4850_v29  ;;  %v5806_v60 = vrot.slane %v5805_v2, 4 }
 0x449   : > { %v5780_v28 = vrot.slane %v5779_v20, 2  ;;  %v5786_v3 = vmax.f32 %v5784_v10, %v5785_v41  ;;  %v5812_v39 = vsel %vm2407_vm13, %v4851_v54, -inf  ;;  %v5819_v59 = vsel %vm2407_vm13, %v4850_v29, -inf }
 0x44a   : > { %v5794_v27 = vrot.slane %v5793_v50, 2  ;;  %v5800_v55 = vmax.f32 %v5798_v30, %v5799_v23  ;;  %v5807_v62 = vmax.f32 %v5805_v2, %v5806_v60  ;;  %v5813_v42 = vrot.slane %v5812_v39, 4 }
 0x44b   : > { %v5781_v7 = vmax.f32 %v5779_v20, %v5780_v28  ;;  %v5787_v15 = vrot.slane %v5786_v3, 2  ;;  %v5820_v14 = vrot.slane %v5819_v59, 4  ;;  %v5826_v43 = vsel %vm2407_vm13, %v4852_v26, -inf }
 0x44c   : > { %v5795_v58 = vmax.f32 %v5793_v50, %v5794_v27  ;;  %v5801_v19 = vrot.slane %v5800_v55, 2  ;;  %v5808_v18 = vrot.slane %v5807_v62, 2  ;;  %v5814_v24 = vmax.f32 %v5812_v39, %v5813_v42 }
 0x44d   : > { %v5782_v12 = vrot.slane %v5781_v7, 1  ;;  %v5788_v5 = vmax.f32 %v5786_v3, %v5787_v15  ;;  %v5821_v53 = vmax.f32 %v5819_v59, %v5820_v14  ;;  %v5827_v33 = vrot.slane %v5826_v43, 4 }
 0x44e   : > { %v5796_v38 = vrot.slane %v5795_v58, 1  ;;  %v5802_v36 = vmax.f32 %v5800_v55, %v5801_v19  ;;  %v5809_v10 = vmax.f32 %v5807_v62, %v5808_v18  ;;  %v5815_v57 = vrot.slane %v5814_v24, 2 }
 0x44f   : > { %v5783_v29 = vmax.f32 %v5781_v7, %v5782_v12  ;;  %v5789_v54 = vrot.slane %v5788_v5, 1  ;;  %v5822_v41 = vrot.slane %v5821_v53, 2  ;;  %v5828_v20 = vmax.f32 %v5826_v43, %v5827_v33 }
 0x450   : > { %v5797_v30 = vmax.f32 %v5795_v58, %v5796_v38  ;;  %v5803_v2 = vrot.slane %v5802_v36, 1  ;;  %v5810_v23 = vrot.slane %v5809_v10, 1  ;;  %v5816_v26 = vmax.f32 %v5814_v24, %v5815_v57 }
 0x451   : > { %v5790_v50 = vmax.f32 %v5788_v5, %v5789_v54  ;;  %v6090_v60 = vsel %vm2404_vm12, %v5783_v29, -inf  ;;  %v5823_v28 = vmax.f32 %v5821_v53, %v5822_v41  ;;  %v5829_v39 = vrot.slane %v5828_v20, 2 }
 0x452   : > { %v5804_v3 = vmax.f32 %v5802_v36, %v5803_v2  ;;  %v6091_v59 = vmax.f32 %v13772_v25, %v6090_v60  ;;  %v6096_v27 = vsel %vm2404_vm12, %v5797_v30, -inf  ;;  %v5811_v55 = vmax.f32 %v5809_v10, %v5810_v23  ;;  %v13825_v10 = vld [vmem:[#allocation4 + $0x62] sm:$0xff]  ;;  %v13844_v60 = vpop.permute.xlu0 %10693 }
 0x453   : > { %v6093_v62 = vsel %vm2404_vm12, %v5790_v50, -inf  ;;  %v6097_v42 = vmax.f32 %v13778_v63, %v6096_v27  ;;  %v5817_v7 = vrot.slane %v5816_v26, 1  ;;  %v5824_v15 = vrot.slane %v5823_v28, 1 }
 0x454   : > { %v6094_v14 = vmax.f32 %v13775_v9, %v6093_v62  ;;  %v6099_v43 = vsel %vm2404_vm12, %v5804_v3, -inf  ;;  %v5830_v58 = vmax.f32 %v5828_v20, %v5829_v39  ;;  %v6102_v19 = vsel %vm2404_vm12, %v5811_v55, -inf  ;;  %v13860_v39 = vpop.permute.xlu1 %10698 }
 0x455   : > { %v6100_v18 = vmax.f32 %v13781_v40, %v6099_v43  ;;  %v5818_v24 = vmax.f32 %v5816_v26, %v5817_v7  ;;  %v5825_v25 = vmax.f32 %v5823_v28, %v5824_v15  ;;  %v6103_v12 = vmax.f32 %v13787_v51, %v6102_v19  ;;  %v13827_v51 = vld [vmem:[#allocation4 + $0x60] sm:$0xff]  ;;  %v14813_v7 = vld [vmem:[#allocation10_spill] sm:$0xff] }
 0x456   : > { %v6107_v5 = vsel %vm2404_vm12, %v13784_v32, -inf  ;;  %v6270_v63 = vsel %vm6221_vm0, %v6094_v14, %v6091_v59  ;;  %v5831_v53 = vrot.slane %v5830_v58, 1  ;;  %v9217_v9 = vadd.f32 %v13547_v1, %v13540_v35  ;;  %v6301_v35 = vld [vmem:[#allocation4] sm:$0xff] }
 0x457   : > { %v6110_v33 = vsel %vm2404_vm12, %v13795_v6, -inf  ;;  %v6271_v38 = vsel %vm6223_vm1, %v6097_v42, %v6270_v63  ;;  %v6105_v40 = vsel %vm2404_vm12, %v5818_v24, -inf  ;;  %v6108_v36 = vsel %vm2404_vm12, %v5825_v25, -inf  ;;  %v13878_v42 = vpop.permute.xlu0 %10703 }
 0x458   : > { %v5832_v32 = vmax.f32 %v5830_v58, %v5831_v53  ;;  %v6106_v57 = vmax.f32 %v13790_v11, %v6105_v40  ;;  %v6109_v29 = vmax.f32 %v6107_v5, %v6108_v36  ;;  %v6272_v54 = vsel %vm6225_vm2, %v6100_v18, %v6271_v38 }
 0x459   : > { %v6273_v1 = vsel %vm6227_vm3, %v6103_v12, %v6272_v54  ;;  %v9220_v6 = vadd.f32 %v13560_v16, %v13554_v56  ;;  %v4138_v41 = vadd.f32 %v13626_v48, %v9217_v9  ;;  %v9223_v20 = vadd.f32 %v13603_v52, %v13595_v31 }
 0x45a   : > { %v6111_v30 = vsel %vm2404_vm12, %v5832_v32, -inf  ;;  %v6274_v2 = vsel %vm6229_vm4, %v6106_v57, %v6273_v1  ;;  %v10752_v11 = vpack.i.bf16 %v13825_v10, %v13702_v45  ;;  %v10757_v23 = vpack.i.bf16 %v13827_v51, %v13706_v37  ;;  %v11015_v37 = vld [vmem:[#allocation4 + $0x10] sm:$0xff] }
 0x45b   : > { %v6112_v26 = vmax.f32 %v6110_v33, %v6111_v30  ;;  %v6275_v50 = vsel %vm6231_vm5, %v6109_v29, %v6274_v2  ;;  %v4299_v56 = vadd.f32 %v13465_v47, %v4138_v41  ;;  %v4141_v16 = vadd.f32 %v13626_v48, %v9220_v6 }
 0x45c   : > { %v6566_v31 = vsel %vm2404_vm12, %v6301_v35, %v10685_v49  ;;  %v4146_v52 = vadd.f32 %v13626_v48, %v9223_v20  ;;  %10753 = vrot.lane.b32.xlu0 %v10752_v11, %s11035_s19  ;;  %10758 = vrot.lane.b32.xlu1 %v10757_v23, %s11037_s29  ;;  %v9226_v45 = vadd.f32 %v13617_v46, %v13611_v17  ;;  %v14812_v46 = vld [vmem:[#allocation9_spill] sm:$0xff]  ;;  %v10696_v27 = vunpack.i.h.bf16 %v13844_v60 }
 0x45d   : > { %v6567_v47 = vsel %vm2404_vm12, %v11015_v37, %v10686_v13  ;;  %v6276_v28 = vsel %vm6233_vm6, %v6112_v26, %v6275_v50  ;;  %v4341_v3 = vmax.f32 %v4299_v56, 0.0  ;;  %v4302_v49 = vadd.f32 %v13473_v8, %v4141_v16 }
 0x45e   : > { %v13866_v59 = vsel %vm3582_vm14, %v6566_v31, %v10690_v61  ;;  %v13871_v17 = vsel %vm3582_vm14, %v6567_v47, %v10691_v22  ;;  %6299 = vst.msk [vmem:[#allocation4 + $0x71] sm:$0xff] %vm2404_vm12, %v6276_v28  ;;  %v4307_v4 = vadd.f32 %v14812_v46, %v4146_v52  ;;  %v4149_v13 = vadd.f32 %v13626_v48, %v9226_v45 }
 0x45f   : > { %v4853_v55 = vcombine.high %v4341_v3, %v4341_v3  ;;  %v4860_v8 = vrot.slane %v4341_v3, %v12878_v44  ;;  %v4342_v62 = vmax.f32 %v4302_v49, 0.0  ;;  %v10695_v61 = vunpack.i.l.bf16 %v13844_v60 }
 0x460   : > { %v10701_v21 = vunpack.i.h.bf16 %v13860_v39  ;;  %v10700_v22 = vunpack.i.l.bf16 %v13860_v39  ;;  %v13884_v15 = vadd.f32 %v14813_v7, %v4149_v13  ;;  %v4343_v24 = vmax.f32 %v4307_v4, 0.0  ;;  %v6334_v4 = vld [vmem:[#allocation4 + $0x21] sm:$0xff] }
 0x461   : > { %v4867_v14 = vrot.slane %v4853_v55, %v12878_v44  ;;  %v4868_v48 = vcombine.high %v4860_v8, %v4860_v8  ;;  %v5833_v43 = vsel %vm2407_vm13, %v4860_v8, -inf  ;;  %v4870_v58 = vcombine.high %v4342_v62, %v4342_v62 }
 0x462   : > { %v5834_v19 = vrot.slane %v5833_v43, 4  ;;  %v4877_v18 = vrot.slane %v4342_v62, %v12878_v44  ;;  %v10706_v25 = vunpack.i.h.bf16 %v13878_v42  ;;  %v4887_v8 = vcombine.high %v4343_v24, %v4343_v24 }
 0x463   : > { %v4869_v12 = vcombine.high %v4867_v14, %v4867_v14  ;;  %v5840_v5 = vsel %vm2407_vm13, %v4868_v48, -inf  ;;  %v5847_v63 = vsel %vm2407_vm13, %v4867_v14, -inf  ;;  %v4884_v53 = vrot.slane %v4870_v58, %v12878_v44  ;;  %v6333_v14 = vld [vmem:[#allocation4 + $0x11] sm:$0xff] }
 0x464   : > { %v5835_v9 = vmax.f32 %v5833_v43, %v5834_v19  ;;  %v5841_v33 = vrot.slane %v5840_v5, 4  ;;  %v5848_v38 = vrot.slane %v5847_v63, 4  ;;  %v4885_v40 = vcombine.high %v4877_v18, %v4877_v18 }
 0x465   : > { %v5854_v36 = vsel %vm2407_vm13, %v4869_v12, -inf  ;;  %v4886_v32 = vcombine.high %v4884_v53, %v4884_v53  ;;  %v5861_v57 = vsel %vm2407_vm13, %v4877_v18, -inf  ;;  %v5875_v29 = vsel %vm2407_vm13, %v4884_v53, -inf }
 0x466   : > { %v5836_v54 = vrot.slane %v5835_v9, 2  ;;  %v5842_v35 = vmax.f32 %v5840_v5, %v5841_v33  ;;  %v5849_v1 = vmax.f32 %v5847_v63, %v5848_v38  ;;  %v5855_v6 = vrot.slane %v5854_v36, 4  ;;  %v13906_v63 = vpop.permute.xlu0 %10708 }
 0x467   : > { %v5862_v41 = vrot.slane %v5861_v57, 4  ;;  %v5868_v20 = vsel %vm2407_vm13, %v4885_v40, -inf  ;;  %v5876_v30 = vrot.slane %v5875_v29, 4  ;;  %v5882_v2 = vsel %vm2407_vm13, %v4886_v32, -inf }
 0x468   : > { %v5837_v11 = vmax.f32 %v5835_v9, %v5836_v54  ;;  %v5843_v23 = vrot.slane %v5842_v35, 2  ;;  %v5850_v26 = vrot.slane %v5849_v1, 2  ;;  %v5856_v50 = vmax.f32 %v5854_v36, %v5855_v6 }
 0x469   : > { %v5863_v60 = vmax.f32 %v5861_v57, %v5862_v41  ;;  %v5869_v56 = vrot.slane %v5868_v20, 4  ;;  %v5877_v16 = vmax.f32 %v5875_v29, %v5876_v30  ;;  %v5883_v31 = vrot.slane %v5882_v2, 4  ;;  %v13941_v30 = vld [vmem:[#allocation4 + $0x70] sm:$0xff] }
 0x46a   : > { %v5838_v52 = vrot.slane %v5837_v11, 1  ;;  %v5844_v45 = vmax.f32 %v5842_v35, %v5843_v23  ;;  %v5851_v37 = vmax.f32 %v5849_v1, %v5850_v26  ;;  %v5857_v47 = vrot.slane %v5856_v50, 2 }
 0x46b   : > { %v5864_v28 = vrot.slane %v5863_v60, 2  ;;  %v5870_v3 = vmax.f32 %v5868_v20, %v5869_v56  ;;  %v5878_v49 = vrot.slane %v5877_v16, 2  ;;  %v5884_v46 = vmax.f32 %v5882_v2, %v5883_v31  ;;  %v13939_v20 = vld [vmem:[#allocation4 + $0x72] sm:$0xff] }
 0x46c   : > { %v5845_v13 = vrot.slane %v5844_v45, 1  ;;  %v5858_v55 = vmax.f32 %v5856_v50, %v5857_v47  ;;  %v10705_v62 = vunpack.i.l.bf16 %v13878_v42  ;;  %v6591_v7 = vsel %vm2404_vm12, %v6334_v4, %v10696_v27  ;;  %v13950_v31 = vld [vmem:[#allocation4 + $0x71] sm:$0xff]  ;;  %v13957_v4 = vld [vmem:[#allocation4 + $0x61] sm:$0xff] }
 0x46d   : > { %v5839_v48 = vmax.f32 %v5837_v11, %v5838_v52  ;;  %v5852_v43 = vrot.slane %v5851_v37, 1  ;;  %v5865_v58 = vmax.f32 %v5863_v60, %v5864_v28  ;;  %v6590_v19 = vsel %vm2404_vm12, %v6333_v14, %v10695_v61 }
 0x46e   : > { %v13903_v18 = vsel %vm3615_vm15, %v13871_v17, %v10701_v21  ;;  %v5871_v12 = vrot.slane %v5870_v3, 2  ;;  %v4894_v5 = vrot.slane %v4343_v24, %v12878_v44  ;;  %v5846_v53 = vmax.f32 %v5844_v45, %v5845_v13 }
 0x46f   : > { %v5859_v9 = vrot.slane %v5858_v55, 1  ;;  %v13908_v42 = vmax.f32 %v5877_v16, %v5878_v49  ;;  %v5885_v27 = vrot.slane %v5884_v46, 2  ;;  %v13914_v33 = vsel %vm3615_vm15, %v13866_v59, %v10700_v22 }
 0x470   : > { %v4901_v61 = vrot.slane %v4887_v8, %v12878_v44  ;;  %v13918_v17 = vsel %vm3582_vm14, %v6590_v19, %v10705_v62  ;;  %v13921_v21 = vsel %vm3582_vm14, %v6591_v7, %v10706_v25  ;;  %v5853_v24 = vmax.f32 %v5851_v37, %v5852_v43 }
 0x471   : > { %v13924_v38 = vsel %vm2404_vm12, %v5839_v48, -inf  ;;  %v5866_v40 = vrot.slane %v5865_v58, 1  ;;  %v10711_v36 = vunpack.i.h.bf16 %v13906_v63  ;;  %v13927_v39 = vmax.f32 %v5870_v3, %v5871_v12 }
 0x472   : > { %v4902_v32 = vcombine.high %v4894_v5, %v4894_v5  ;;  %v4903_v59 = vcombine.high %v4901_v61, %v4901_v61  ;;  %v5889_v22 = vsel %vm2407_vm13, %v4894_v5, -inf  ;;  %v5860_v57 = vmax.f32 %v5858_v55, %v5859_v9 }
 0x473   : > { %v13931_v29 = vsel %vm2404_vm12, %v5846_v53, -inf  ;;  %v5880_v25 = vrot.slane %v13908_v42, 1  ;;  %v13934_v54 = vmax.f32 %v5884_v46, %v5885_v27  ;;  %v5890_v35 = vrot.slane %v5889_v22, 4 }
 0x474   : > { %v5896_v1 = vsel %vm2407_vm13, %v4902_v32, -inf  ;;  %v5903_v6 = vsel %vm2407_vm13, %v4901_v61, -inf  ;;  %v5910_v41 = vsel %vm2407_vm13, %v4903_v59, -inf  ;;  %v13944_v2 = vsel %vm2404_vm12, %v5853_v24, -inf }
 0x475   : > { %v13946_v11 = vmax.f32 %v5865_v58, %v5866_v40  ;;  %v5897_v23 = vrot.slane %v5896_v1, 4  ;;  %v5904_v26 = vrot.slane %v5903_v6, 4  ;;  %v5873_v50 = vrot.slane %v13927_v39, 1 }
 0x476   : > { %v5891_v60 = vmax.f32 %v5889_v22, %v5890_v35  ;;  %v5911_v56 = vrot.slane %v5910_v41, 4  ;;  %v4344_v16 = vmax.f32 %v13884_v15, 0.0  ;;  %v6622_v37 = vpack.c.bf16 %v13939_v20, %v13825_v10 }
 0x477   : > { %v5898_v52 = vmax.f32 %v5896_v1, %v5897_v23  ;;  %v5905_v45 = vmax.f32 %v5903_v6, %v5904_v26  ;;  %v10762_v47 = vpack.i.bf16 %v13941_v30, %v13827_v51  ;;  %v6122_v13 = vsel %vm2404_vm12, %v5860_v57, -inf }
 0x478   : > { %v5892_v28 = vrot.slane %v5891_v60, 2  ;;  %v5912_v3 = vmax.f32 %v5910_v41, %v5911_v56  ;;  %v4904_v49 = vcombine.high %v4344_v16, %v4344_v16  ;;  %v4911_v46 = vrot.slane %v4344_v16, %v12878_v44  ;;  %9506 = vmatprep.mubr.msk.bf16.mxu1 %vm2404_vm12, %v6622_v37 }
 0x479   : > { %v5899_v15 = vrot.slane %v5898_v52, 2  ;;  %v5906_v55 = vrot.slane %v5905_v45, 2  ;;  %10763 = vrot.lane.b32.xlu0 %v10762_v47, %s11036_s20  ;;  %v10772_v8 = vpack.i.bf16 %v13950_v31, %v13957_v4  ;;  %v10710_v12 = vunpack.i.l.bf16 %v13906_v63 }
 0x47a   : > { %v5893_v62 = vmax.f32 %v5891_v60, %v5892_v28  ;;  %v5913_v7 = vrot.slane %v5912_v3, 2  ;;  %v4918_v14 = vrot.slane %v4904_v49, %v12878_v44  ;;  %v4919_v48 = vcombine.high %v4911_v46, %v4911_v46 }
 0x47b   : > { %v5900_v43 = vmax.f32 %v5898_v52, %v5899_v15  ;;  %v5907_v58 = vmax.f32 %v5905_v45, %v5906_v55  ;;  %v5917_v19 = vsel %vm2407_vm13, %v4911_v46, -inf  ;;  %10773 = vrot.lane.b32.xlu1 %v10772_v8, %s11035_s19 }
 0x47c   : > { %v5894_v5 = vrot.slane %v5893_v62, 1  ;;  %v5914_v53 = vmax.f32 %v5912_v3, %v5913_v7  ;;  %v4920_v9 = vcombine.high %v4918_v14, %v4918_v14  ;;  %v5918_v27 = vrot.slane %v5917_v19, 4 }
 0x47d   : > { %v5901_v61 = vrot.slane %v5900_v43, 1  ;;  %v5908_v24 = vrot.slane %v5907_v58, 1  ;;  %v5924_v40 = vsel %vm2407_vm13, %v4919_v48, -inf  ;;  %v5931_v32 = vsel %vm2407_vm13, %v4918_v14, -inf  ;;  %10768 = vrot.lane.b32.xlu0 %v10772_v8, %s11037_s29 }
 0x47e   : > { %v5895_v59 = vmax.f32 %v5893_v62, %v5894_v5  ;;  %v5915_v22 = vrot.slane %v5914_v53, 1  ;;  %v5919_v57 = vmax.f32 %v5917_v19, %v5918_v27  ;;  %v5925_v35 = vrot.slane %v5924_v40, 4 }
 0x47f   : > { %v5902_v1 = vmax.f32 %v5900_v43, %v5901_v61  ;;  %v5909_v6 = vmax.f32 %v5907_v58, %v5908_v24  ;;  %v5932_v41 = vrot.slane %v5931_v32, 4  ;;  %v5938_v23 = vsel %vm2407_vm13, %v4920_v9, -inf }
 0x480   : > { %v5916_v26 = vmax.f32 %v5914_v53, %v5915_v22  ;;  %v6114_v60 = vsel %vm2404_vm12, %v5895_v59, -inf  ;;  %v5920_v56 = vrot.slane %v5919_v57, 2  ;;  %v5926_v16 = vmax.f32 %v5924_v40, %v5925_v35 }
 0x481   : > { %v6115_v52 = vmax.f32 %v13924_v38, %v6114_v60  ;;  %v6117_v45 = vsel %vm2404_vm12, %v5902_v1, -inf  ;;  %v6120_v37 = vsel %vm2404_vm12, %v5909_v6, -inf  ;;  %v5933_v47 = vmax.f32 %v5931_v32, %v5932_v41  ;;  %v10714_v60 = vpop.permute.xlu1 %10713 }
 0x482   : > { %v6118_v28 = vmax.f32 %v13931_v29, %v6117_v45  ;;  %v6121_v3 = vmax.f32 %v13944_v2, %v6120_v37  ;;  %v6123_v49 = vsel %vm2404_vm12, %v5916_v26, -inf  ;;  %v5921_v46 = vmax.f32 %v5919_v57, %v5920_v56  ;;  %v6373_v56 = vld [vmem:[#allocation4 + $0x92] sm:$0xff] }
 0x483   : > { %v6124_v15 = vmax.f32 %v6122_v13, %v6123_v49  ;;  %v5927_v55 = vrot.slane %v5926_v16, 2  ;;  %v5934_v8 = vrot.slane %v5933_v47, 2  ;;  %v5939_v62 = vrot.slane %v5938_v23, 4  ;;  %v6357_v49 = vld [vmem:[#allocation4 + $0x90] sm:$0xff] }
 0x484   : > { %v5881_v38 = vmax.f32 %v13908_v42, %v5880_v25  ;;  %v5887_v7 = vrot.slane %v13934_v54, 1  ;;  %v6277_v14 = vsel %vm6221_vm0, %v6118_v28, %v6115_v52  ;;  %v5922_v48 = vrot.slane %v5921_v46, 1 }
 0x485   : > { %v6278_v29 = vsel %vm6223_vm1, %v6121_v3, %v6277_v14  ;;  %v5928_v43 = vmax.f32 %v5926_v16, %v5927_v55  ;;  %v5935_v2 = vmax.f32 %v5933_v47, %v5934_v8  ;;  %v5940_v58 = vmax.f32 %v5938_v23, %v5939_v62  ;;  %v10719_v45 = vpop.permute.xlu1 %10718  ;;  %v10724_v3 = vpop.permute.xlu0 %10723 }
 0x486   : > { %v5874_v13 = vmax.f32 %v13927_v39, %v5873_v50  ;;  %v5923_v19 = vmax.f32 %v5921_v46, %v5922_v48  ;;  %v6279_v5 = vsel %vm6225_vm2, %v6124_v15, %v6278_v29  ;;  %v10777_v42 = vpack.i.bf16 %v13939_v20, %v13825_v10 }
 0x487   : > { %v5929_v25 = vrot.slane %v5928_v43, 1  ;;  %v5936_v53 = vrot.slane %v5935_v2, 1  ;;  %v5941_v9 = vrot.slane %v5940_v58, 2  ;;  %v6606_v27 = vsel %vm3615_vm15, %v13918_v17, %v10710_v12 }
 0x488   : > { %v6614_v61 = vpack.c.bf16 %v13903_v18, %v13914_v33  ;;  %v6125_v24 = vsel %vm2404_vm12, %v13946_v11, -inf  ;;  %v6126_v39 = vsel %vm2404_vm12, %v5923_v19, -inf  ;;  %10778 = vrot.lane.b32.xlu1 %v10777_v42, %s11036_s20  ;;  %v6607_v10 = vsel %vm3615_vm15, %v13921_v21, %v10711_v36 }
 0x489   : > { %v5930_v50 = vmax.f32 %v5928_v43, %v5929_v25  ;;  %v5937_v40 = vmax.f32 %v5935_v2, %v5936_v53  ;;  %v5942_v32 = vmax.f32 %v5940_v58, %v5941_v9  ;;  %v6127_v59 = vmax.f32 %v6125_v24, %v6126_v39  ;;  %v10729_v15 = vpop.permute.xlu1 %10728  ;;  %v6303_v2 = vld [vmem:[#allocation4 + $0x20] sm:$0xff]  ;;  %v6304_v58 = vld [vmem:[#allocation4 + $0x30] sm:$0xff] }
 0x48a   : > { %v5888_v17 = vmax.f32 %v13934_v54, %v5887_v7  ;;  %v6128_v18 = vsel %vm2404_vm12, %v5874_v13, -inf  ;;  %v6131_v33 = vsel %vm2404_vm12, %v5881_v38, -inf  ;;  %v6615_v11 = vpack.c.bf16 %v6607_v10, %v6606_v27  ;;  %v6365_v7 = vld [vmem:[#allocation4 + $0x91] sm:$0xff] }
 0x48b   : > { %v5943_v12 = vrot.slane %v5942_v32, 1  ;;  %v6129_v22 = vsel %vm2404_vm12, %v5930_v50, -inf  ;;  %v6132_v57 = vsel %vm2404_vm12, %v5937_v40, -inf  ;;  %v6280_v63 = vsel %vm6227_vm3, %v6127_v59, %v6279_v5 }
 0x48c   : > { %v6130_v35 = vmax.f32 %v6128_v18, %v6129_v22  ;;  %v6133_v21 = vmax.f32 %v6131_v33, %v6132_v57  ;;  %6821 = vmatprep.mubr.bf16.mxu0 %v6615_v11  ;;  %v6134_v54 = vsel %vm2404_vm12, %v5888_v17, -inf  ;;  %v10716_v8 = vunpack.i.h.bf16 %v10714_v60 }
 0x48d   : > { %v5944_v36 = vmax.f32 %v5942_v32, %v5943_v12  ;;  %6822 = vmatmul.mubr.bf16.vlgmr.msra.gmra.mrb[64].mxu0 %v6614_v61  ;;  %v10715_v62 = vunpack.i.l.bf16 %v10714_v60  ;;  %v10721_v14 = vunpack.i.h.bf16 %v10719_v45  ;;  %v10726_v48 = vunpack.i.h.bf16 %v10724_v3  ;;  %v6335_v61 = vld [vmem:[#allocation4 + $0x31] sm:$0xff]  ;;  %v6305_v60 = vld [vmem:[#allocation4 + $0x40] sm:$0xff] }
 0x48e   : > { %v6281_v1 = vsel %vm6229_vm4, %v6130_v35, %v6280_v63  ;;  %v10725_v29 = vunpack.i.l.bf16 %v10724_v3  ;;  %v10731_v43 = vunpack.i.h.bf16 %v10729_v15  ;;  %v10730_v13 = vunpack.i.l.bf16 %v10729_v15 }
 0x48f   : > { %v6135_v6 = vsel %vm2404_vm12, %v5944_v36, -inf  ;;  %v6282_v41 = vsel %vm6231_vm5, %v6133_v21, %v6281_v1  ;;  %v6569_v25 = vsel %vm2404_vm12, %v6304_v58, %v10716_v8  ;;  %v6568_v53 = vsel %vm2404_vm12, %v6303_v2, %v10715_v62 }
 0x490   : > { %v6136_v23 = vmax.f32 %v6134_v54, %v6135_v6  ;;  %v6577_v27 = vsel %vm3582_vm14, %v6569_v25, %v10721_v14  ;;  %v6593_v39 = vsel %vm2404_vm12, %v13738_v0, %v10726_v48  ;;  %v6592_v10 = vsel %vm2404_vm12, %v6335_v61, %v10725_v29 }
 0x491   : > { %v6585_v18 = vsel %vm3615_vm15, %v6577_v27, %v10731_v43  ;;  %v14814_v35 = vmov 0.0  }
 0x492   : > { %v6283_v26 = vsel %vm6233_vm6, %v6136_v23, %v6282_v41  ;;  %6931 = vst.msk [vmem:[#allocation5 + $0x18] sm:$0x3] %vm6928_vm7, %v14814_v35  ;;  %6929 = vst.msk [vmem:[#allocation5 + $0x8] sm:$0x3] %vm6928_vm7, %v14814_v35 }
 0x493   : > { %6300 = vst.msk [vmem:[#allocation4 + $0x81] sm:$0xff] %vm2404_vm12, %v6283_v26 }
 0x494   : > { %6933 = vst.msk [vmem:[#allocation5 + $0x28] sm:$0x3] %vm6928_vm7, %v14814_v35  ;;  %6935 = vst.msk [vmem:[#allocation5 + $0x38] sm:$0x3] %vm6928_vm7, %v14814_v35 }
 0x495   : > { %6937 = vst.msk [vmem:[#allocation5 + $0x48] sm:$0x3] %vm6928_vm7, %v14814_v35  ;;  %6939 = vst.msk [vmem:[#allocation5 + $0x58] sm:$0x3] %vm6928_vm7, %v14814_v35 }
 0x496   : > { %6941 = vst.msk [vmem:[#allocation5 + $0x68] sm:$0x3] %vm6928_vm7, %v14814_v35  ;;  %6943 = vst.msk [vmem:[#allocation5 + $0x78] sm:$0x3] %vm6928_vm7, %v14814_v35 }
 0x497   : > { %6945 = vst.msk [vmem:[#allocation5 + $0x88] sm:$0x3] %vm6928_vm7, %v14814_v35  ;;  %6947 = vst.msk [vmem:[#allocation5 + $0x98] sm:$0x3] %vm6928_vm7, %v14814_v35 }
 0x498   : > { %8171 = vst.msk [vmem:[#allocation6 + $0x10] sm:$0x3f] %vm8168_vm8, %v14814_v35  ;;  %8169 = vst.msk [vmem:[#allocation6] sm:$0x3f] %vm8168_vm8, %v14814_v35 }
 0x499   : > { %8170 = vst.msk [vmem:[#allocation6 + $0x8] sm:$0x3f] %vm8168_vm8, %v14814_v35  ;;  %8172 = vst.msk [vmem:[#allocation6 + $0x18] sm:$0x3f] %vm8168_vm8, %v14814_v35 }
 0x49a   : > { %v6372_v16 = vld [vmem:[#allocation4 + $0x82] sm:$0xff]  ;;  %8173 = vst.msk [vmem:[#allocation6 + $0x20] sm:$0x3f] %vm8168_vm8, %v14814_v35  ;;  %8174 = vst.msk [vmem:[#allocation6 + $0x28] sm:$0x3f] %vm8168_vm8, %v14814_v35 }
 0x49b   : > { %v6332_v52 = vld [vmem:[#allocation4 + $0x80] sm:$0xff]  ;;  %v6625_v37 = vpack.c.bf16 %v6373_v56, %v6372_v16  ;;  %v10782_v47 = vpack.i.bf16 %v6372_v16, %v13939_v20  ;;  %v10720_v20 = vunpack.i.l.bf16 %v10719_v45 }
 0x49c   : > { %v10797_v28 = vpack.i.bf16 %v6332_v52, %v13941_v30  ;;  %v10787_v46 = vpack.i.bf16 %v6357_v49, %v6332_v52  ;;  %v10734_v55 = vpop.permute.xlu0 %10733  ;;  %v14020_v38 = vld [vmem:[#allocation4 + $0x81] sm:$0xff] }
 0x49d   : > { %9507 = vmatmul.mubr.msk.bf16.gmra.mrb[68].mxu1 %vm2404_vm12, %v6625_v37  ;;  %10783 = vrot.lane.b32.xlu0 %v10782_v47, %s11035_s19  ;;  %v10792_v19 = vpack.i.bf16 %v6365_v7, %v14020_v38  ;;  %v10736_v5 = vunpack.i.h.bf16 %v10734_v55  ;;  %v10735_v42 = vunpack.i.l.bf16 %v10734_v55  ;;  %v6576_v9 = vsel %vm3582_vm14, %v6568_v53, %v10720_v20  ;;  %v11016_v37 = vld [vmem:[#allocation4 + $0x50] sm:$0xff] }
 0x49e   : > { %10798 = vrot.lane.b32.xlu1 %v10797_v28, %s11037_s29  ;;  %v6584_v17 = vsel %vm3615_vm15, %v6576_v9, %v10730_v13 }
 0x49f   : > { %v6600_v32 = vsel %vm3582_vm14, %v6592_v10, %v10735_v42  ;;  %v6601_v59 = vsel %vm3582_vm14, %v6593_v39, %v10736_v5  ;;  %v6617_v22 = vpack.c.bf16 %v6585_v18, %v6584_v17 }
 0x4a1   : > { %10788 = vrot.lane.b32.xlu0 %v10787_v46, %s11036_s20 }
 0x4a5   : > { %10793 = vrot.lane.b32.xlu0 %v10792_v19, %s11037_s29 }
 0x4a6   : > { %v10739_v24 = vpop.permute.xlu0 %10738  ;;  %v10744_v0 = vpop.permute.xlu1 %10743 }
 0x4a7   : > { %v10741_v50 = vunpack.i.h.bf16 %v10739_v24  ;;  %v10740_v40 = vunpack.i.l.bf16 %v10739_v24  ;;  %v10746_v21 = vunpack.i.h.bf16 %v10744_v0  ;;  %v10745_v36 = vunpack.i.l.bf16 %v10744_v0 }
 0x4a9   : > { %v6608_v33 = vsel %vm3615_vm15, %v6600_v32, %v10740_v40  ;;  %v6609_v11 = vsel %vm3615_vm15, %v6601_v59, %v10741_v50  ;;  %v6571_v47 = vsel %vm2404_vm12, %v11016_v37, %v10746_v21  ;;  %v6570_v28 = vsel %vm2404_vm12, %v6305_v60, %v10745_v36  ;;  %v10922_v60 = vld [vmem:[%s14796_s7 + $0x8] sm:$0xff]   ;;  %v10927_v37 = vld [vmem:[%s14796_s7 + $0x60] sm:$0xff]  }
 0x4aa   : > { %v6618_v12 = vpack.c.bf16 %v6609_v11, %v6608_v33  ;;  %v10749_v57 = vpop.permute.xlu1 %10748 }
 0x4ab   : > { %v10751_v54 = vunpack.i.h.bf16 %v10749_v57  ;;  %v10750_v6 = vunpack.i.l.bf16 %v10749_v57 }
 0x4ac   : > { %6829 = vmatprep.mubr.bf16.mxu0 %v6618_v12 }
 0x4ad   : > { %6830 = vmatmul.mubr.bf16.gmra.mrb[68].mxu0 %v6617_v22  ;;  %v6578_v3 = vsel %vm3582_vm14, %v6570_v28, %v10750_v6  ;;  %v6579_v49 = vsel %vm3582_vm14, %v6571_v47, %v10751_v54  ;;  %v10919_v54 = vld [vmem:[%s14796_s7 + $0x40] sm:$0xff]   ;;  %v10929_v28 = vld [vmem:[%s14796_s7 + $0x68] sm:$0xff]  }
 0x4ae   : > { %9291 = vmatprep.subr.bf16.mxu0 %v10919_v54  ;;  %v10928_v47 = vld [vmem:[%s14796_s7 + $0x20] sm:$0xff]  }
 0x4ce   : > { %v10754_v63 = vpop.permute.xlu0 %10753  ;;  %v10759_v1 = vpop.permute.xlu1 %10758 }
 0x4cf   : > { %v10756_v23 = vunpack.i.h.bf16 %v10754_v63  ;;  %v10755_v26 = vunpack.i.l.bf16 %v10754_v63  ;;  %v10761_v56 = vunpack.i.h.bf16 %v10759_v1  ;;  %v10760_v16 = vunpack.i.l.bf16 %v10759_v1 }
 0x4d1   : > { %v6595_v15 = vsel %vm2404_vm12, %v13957_v4, %v10756_v23  ;;  %v6594_v55 = vsel %vm2404_vm12, %v13733_v34, %v10755_v26  ;;  %v6586_v20 = vsel %vm3615_vm15, %v6578_v3, %v10760_v16  ;;  %v6587_v48 = vsel %vm3615_vm15, %v6579_v49, %v10761_v56  ;;  %v10923_v56 = vld [vmem:[%s14796_s7 + $0x50] sm:$0xff]   ;;  %v10930_v3 = vld [vmem:[%s14796_s7 + $0x28] sm:$0xff]  }
 0x4d2   : > { %v6620_v58 = vpack.c.bf16 %v6587_v48, %v6586_v20  ;;  %v10924_v16 = vld [vmem:[%s14796_s7 + $0x10] sm:$0xff]  }
 0x4eb   : > { %v10764_v41 = vpop.permute.xlu0 %10763 }
 0x4ec   : > { %v10766_v52 = vunpack.i.h.bf16 %v10764_v41  ;;  %v10765_v45 = vunpack.i.l.bf16 %v10764_v41 }
 0x4ed   : > { %v10774_v5 = vpop.permute.xlu1 %10773 }
 0x4ee   : > { %v6602_v7 = vsel %vm3582_vm14, %v6594_v55, %v10765_v45  ;;  %v6603_v14 = vsel %vm3582_vm14, %v6595_v15, %v10766_v52  ;;  %v10776_v53 = vunpack.i.h.bf16 %v10774_v5  ;;  %v10775_v9 = vunpack.i.l.bf16 %v10774_v5  ;;  %v10925_v52 = vld [vmem:[%s14796_s7 + $0x58] sm:$0xff]  }
 0x4ef   : > { %v10769_v46 = vpop.permute.xlu0 %10768  ;;  %v10926_v45 = vld [vmem:[%s14796_s7 + $0x18] sm:$0xff]  }
 0x4f0   : > { %v10771_v8 = vunpack.i.h.bf16 %v10769_v46  ;;  %v10770_v62 = vunpack.i.l.bf16 %v10769_v46  ;;  %v6573_v18 = vsel %vm2404_vm12, %v13941_v30, %v10776_v53  ;;  %v6572_v33 = vsel %vm2404_vm12, %v13827_v51, %v10775_v9  ;;  %v14135_v46 = vld [vmem:[%s14795_s6] ss:$0 sm:$0xff] }
 0x4f2   : > { %v6610_v29 = vsel %vm3615_vm15, %v6602_v7, %v10770_v62  ;;  %v6611_v43 = vsel %vm3615_vm15, %v6603_v14, %v10771_v8 }
 0x4f3   : > { %v6621_v2 = vpack.c.bf16 %v6611_v43, %v6610_v29 }
 0x4f5   : > { %6837 = vmatprep.mubr.bf16.mxu0 %v6621_v2  ;;  %v10931_v2 = vld [vmem:[%s14796_s7 + $0x70] sm:$0xff]  }
 0x4f6   : > { %6838 = vmatmul.mubr.bf16.gmra.mrb[72].mxu0 %v6620_v58  ;;  %v10932_v58 = vld [vmem:[%s14796_s7 + $0x30] sm:$0xff]  }
 0x4fa   : > { %v10779_v42 = vpop.permute.xlu1 %10778 }
 0x4fb   : > { %v10781_v61 = vunpack.i.h.bf16 %v10779_v42  ;;  %v10780_v24 = vunpack.i.l.bf16 %v10779_v42  ;;  %v6965_v42 = vld [vmem:[#allocation5 + $0x1] sm:$0xff] }
 0x4fc   : > { %v14072_v4 = vpop.f32.mrb[64].mxu1 }
 0x4fd   : > { %v14074_v34 = vpop.f32.mrb[65].mxu1  ;;  %v6580_v11 = vsel %vm3582_vm14, %v6572_v33, %v10780_v24  ;;  %v6581_v12 = vsel %vm3582_vm14, %v6573_v18, %v10781_v61 }
 0x4fe   : > { %v14076_v13 = vpop.f32.mrb[66].mxu1 }
 0x4ff   : > { %v14078_v19 = vpop.f32.mrb[67].mxu1 }
 0x50f   : > { %v10784_v25 = vpop.permute.xlu0 %10783 }
 0x510   : > { %v10799_v27 = vpop.permute.xlu1 %10798  ;;  %v10786_v10 = vunpack.i.h.bf16 %v10784_v25  ;;  %v10785_v50 = vunpack.i.l.bf16 %v10784_v25 }
 0x511   : > { %v10801_v40 = vunpack.i.h.bf16 %v10799_v27  ;;  %v10800_v32 = vunpack.i.l.bf16 %v10799_v27 }
 0x512   : > { %v6597_v0 = vsel %vm2404_vm12, %v14020_v38, %v10786_v10  ;;  %v6596_v57 = vsel %vm2404_vm12, %v13950_v31, %v10785_v50  ;;  %v10920_v38 = vld [vmem:[%s14796_s7] sm:$0xff]   ;;  %v10921_v31 = vld [vmem:[%s14796_s7 + $0x48] sm:$0xff]  }
 0x513   : > { %v10789_v39 = vpop.permute.xlu0 %10788  ;;  %v6588_v1 = vsel %vm3615_vm15, %v6580_v11, %v10800_v32  ;;  %v6589_v51 = vsel %vm3615_vm15, %v6581_v12, %v10801_v40  ;;  %9292 = vmatpush3.bf16.msra.mxu0 %v10920_v38 }
 0x514   : > { %v10791_v59 = vunpack.i.h.bf16 %v10789_v39  ;;  %v10790_v17 = vunpack.i.l.bf16 %v10789_v39  ;;  %v6623_v26 = vpack.c.bf16 %v6589_v51, %v6588_v1  ;;  %9293 = vmatprep.subr.bf16.mxu0 %v10921_v31  ;;  %v10938_v31 = vld [vmem:[%s14796_s7 + $0x88] sm:$0xff]  }
 0x516   : > { %v6604_v36 = vsel %vm3582_vm14, %v6596_v57, %v10790_v17  ;;  %v6605_v30 = vsel %vm3582_vm14, %v6597_v0, %v10791_v59 }
 0x517   : > { %v10794_v22 = vpop.permute.xlu0 %10793  ;;  %9294 = vmatpush3.bf16.msra.mxu0 %v10922_v60  ;;  %v10940_v60 = vld [vmem:[%s14796_s7 + $0x90] sm:$0xff]  }
 0x518   : > { %v10796_v63 = vunpack.i.h.bf16 %v10794_v22  ;;  %v10795_v21 = vunpack.i.l.bf16 %v10794_v22  ;;  %9295 = vmatprep.subr.bf16.mxu0 %v10923_v56  ;;  %v10941_v56 = vld [vmem:[%s14796_s7 + $0xd8] sm:$0xff]  }
 0x51a   : > { %v6612_v6 = vsel %vm3615_vm15, %v6604_v36, %v10795_v21  ;;  %v6613_v41 = vsel %vm3615_vm15, %v6605_v30, %v10796_v63  ;;  %v10935_v21 = vld [vmem:[%s14796_s7 + $0xc0] sm:$0xff]  }
 0x51b   : > { %v6624_v23 = vpack.c.bf16 %v6613_v41, %v6612_v6  ;;  %9296 = vmatpush3.bf16.msra.mxu0 %v10924_v16  ;;  %v10936_v36 = vld [vmem:[%s14796_s7 + $0x80] sm:$0xff]   ;;  %9331 = vmatprep.subr.bf16.mxu1 %v10935_v21  ;;  %v10939_v41 = vld [vmem:[%s14796_s7 + $0xd0] sm:$0xff]   ;;  %v10942_v16 = vld [vmem:[%s14796_s7 + $0x98] sm:$0xff]  }
 0x51c   : > { %9297 = vmatprep.subr.bf16.mxu0 %v10925_v52  ;;  %9332 = vmatpush3.bf16.msra.mxu1 %v10936_v36  ;;  %v10943_v52 = vld [vmem:[%s14796_s7 + $0xe0] sm:$0xff]  }
 0x51d   : > { %6845 = vmatprep.mubr.bf16.mxu0 %v6624_v23 }
 0x51e   : > { %6846 = vmatmul.mubr.bf16.gmra.mrb[76].mxu0 %v6623_v26 }
 0x51f   : > { %9298 = vmatpush3.bf16.msra.mxu0 %v10926_v45  ;;  %v10944_v45 = vld [vmem:[%s14796_s7 + $0xa0] sm:$0xff]  }
 0x520   : > { %9299 = vmatprep.subr.bf16.mxu0 %v10927_v37  ;;  %v10945_v37 = vld [vmem:[%s14796_s7 + $0xe8] sm:$0xff]  }
 0x523   : > { %9300 = vmatpush3.bf16.msra.mxu0 %v10928_v47  ;;  %v10946_v47 = vld [vmem:[%s14796_s7 + $0xa8] sm:$0xff]  }
 0x524   : > { %9301 = vmatprep.subr.bf16.mxu0 %v10929_v28  ;;  %v10947_v28 = vld [vmem:[%s14796_s7 + $0xf0] sm:$0xff]  }
 0x527   : > { %9302 = vmatpush3.bf16.msra.mxu0 %v10930_v3  ;;  %v10948_v3 = vld [vmem:[%s14796_s7 + $0xb0] sm:$0xff]  }
 0x528   : > { %9303 = vmatprep.subr.bf16.mxu0 %v10931_v2 }
 0x52b   : > { %9304 = vmatpush3.bf16.msra.mxu0 %v10932_v58 }
 0x560   : > { %v9261_v49 = vpop.f32.mrb[64].mxu0 }
 0x561   : > { %v9262_v15 = vpop.f32.mrb[65].mxu0 }
 0x562   : > { %v9263_v55 = vadd.f32 %v9262_v15, %v9261_v49  ;;  %v9264_v8 = vpop.f32.mrb[66].mxu0  ;;  %v10949_v49 = vld [vmem:[%s14796_s7 + $0xf8] sm:$0xff]  }
 0x563   : > { %v9265_v62 = vpop.f32.mrb[67].mxu0  ;;  %v10950_v15 = vld [vmem:[%s14796_s7 + $0xb8] sm:$0xff]  }
 0x564   : > { %v6824_v7 = vadd.f32 %v9263_v55, %v14135_v46  ;;  %v9266_v14 = vadd.f32 %v9265_v62, %v9264_v8 }
 0x566   : > { %v6889_v20 = vadd.f32 %v14074_v34, %v6824_v7  ;;  %v6827_v48 = vadd.f32 %v9266_v14, %v14135_v46  ;;  %v10933_v34 = vld [vmem:[%s14796_s7 + $0x78] sm:$0xff]  }
 0x567   : > { %9305 = vmatprep.subr.bf16.mxu0 %v10933_v34 }
 0x568   : > { %v6919_v29 = vmax.f32 %v6889_v20, 0.0  ;;  %v6892_v43 = vadd.f32 %v14078_v19, %v6827_v48  ;;  %v10934_v19 = vld [vmem:[%s14796_s7 + $0x38] sm:$0xff]  }
 0x569   : > { %9306 = vmatpush3.bf16.msra.mxu0 %v10934_v19 }
 0x56a   : > { %6949 = vst.msk [vmem:[#allocation5 + $0x11] sm:$0xff] %vm3582_vm14, %v6919_v29  ;;  %v6920_v5 = vmax.f32 %v6892_v43, 0.0 }
 0x56c   : > { %6950 = vst.msk [vmem:[#allocation5 + $0x21] sm:$0xff] %vm3582_vm14, %v6920_v5 }
 0x570   : > { %v14155_v25 = vpop.f32.mrb[68].mxu1 }
 0x571   : > { %v14157_v53 = vpop.f32.mrb[69].mxu1  ;;  %v14159_v9 = vld [vmem:[#allocation5 + $0x11] sm:$0xff] }
 0x572   : > { %v14161_v27 = vpop.f32.mrb[70].mxu1  ;;  %v10807_v61 = vpack.i.bf16 %v14159_v9, %v6965_v42  ;;  %v14166_v39 = vld [vmem:[#allocation5 + $0x10] sm:$0xff] }
 0x573   : > { %v14164_v24 = vpop.f32.mrb[71].mxu1  ;;  %v14168_v10 = vld [vmem:[#allocation5 + $0x20] sm:$0xff]  ;;  %v14210_v23 = vld [vmem:[#allocation5 + $0x12] sm:$0xff] }
 0x574   : > { %10808 = vrot.lane.b32.xlu1 %v10807_v61, %s11036_s20  ;;  %v10802_v50 = vpack.i.bf16 %v14168_v10, %v14166_v39  ;;  %v14189_v30 = vld [vmem:[#allocation5 + $0x21] sm:$0xff] }
 0x575   : > { %v14195_v51 = vld [vmem:[#allocation5 + $0x22] sm:$0xff] }
 0x576   : > { %10803 = vrot.lane.b32.xlu0 %v10802_v50, %s11036_s20  ;;  %v10827_v26 = vpack.i.bf16 %v14195_v51, %v14210_v23 }
 0x580   : > { %v9267_v40 = vpop.f32.mrb[68].mxu0 }
 0x581   : > { %v9268_v32 = vpop.f32.mrb[69].mxu0 }
 0x582   : > { %v9269_v59 = vadd.f32 %v9268_v32, %v9267_v40  ;;  %v9270_v17 = vpop.f32.mrb[70].mxu0  ;;  %v10951_v40 = vld [vmem:[%s14796_s7 + $0x100] sm:$0xff]  }
 0x583   : > { %v9271_v18 = vpop.f32.mrb[71].mxu0  ;;  %9510 = vmatprep.subr.bf16.mxu0 %v10951_v40 }
 0x584   : > { %v6832_v33 = vadd.f32 %v9269_v59, %v14135_v46  ;;  %v9272_v11 = vadd.f32 %v9271_v18, %v9270_v17  ;;  %v6957_v18 = vld [vmem:[#allocation5] sm:$0xff] }
 0x586   : > { %v6897_v12 = vadd.f32 %v14072_v4, %v6832_v33  ;;  %v6835_v22 = vadd.f32 %v9272_v11, %v14135_v46  ;;  %v10937_v4 = vld [vmem:[%s14796_s7 + $0xc8] sm:$0xff]  }
 0x587   : > { %9333 = vmatprep.subr.bf16.mxu1 %v10937_v4 }
 0x588   : > { %v6921_v0 = vmax.f32 %v6897_v12, 0.0  ;;  %v6900_v57 = vadd.f32 %v14076_v13, %v6835_v22  ;;  %9334 = vmatpush3.bf16.msra.mxu1 %v10938_v31  ;;  %v6973_v22 = vld [vmem:[#allocation5 + $0x2] sm:$0xff] }
 0x589   : > { %9335 = vmatprep.subr.bf16.mxu1 %v10939_v41 }
 0x58a   : > { %6951 = vst.msk [vmem:[#allocation5 + $0x31] sm:$0xff] %vm3582_vm14, %v6921_v0  ;;  %v6922_v63 = vmax.f32 %v6900_v57, 0.0 }
 0x58c   : > { %6952 = vst.msk [vmem:[#allocation5 + $0x41] sm:$0xff] %vm3582_vm14, %v6922_v63  ;;  %9336 = vmatpush3.bf16.msra.mxu1 %v10940_v60 }
 0x58d   : > { %9337 = vmatprep.subr.bf16.mxu1 %v10941_v56 }
 0x590   : > { %9338 = vmatpush3.bf16.msra.mxu1 %v10942_v16 }
 0x591   : > { %v14191_v13 = vld [vmem:[#allocation5 + $0x31] sm:$0xff]  ;;  %9339 = vmatprep.subr.bf16.mxu1 %v10943_v52 }
 0x592   : > { %v10812_v1 = vpack.i.bf16 %v14191_v13, %v14189_v30  ;;  %v14197_v54 = vld [vmem:[#allocation5 + $0x30] sm:$0xff] }
 0x593   : > { %v14199_v38 = vld [vmem:[#allocation5 + $0x40] sm:$0xff]  ;;  %v14274_v32 = vld [vmem:[#allocation5 + $0x32] sm:$0xff] }
 0x594   : > { %10813 = vrot.lane.b32.xlu1 %v10812_v1, %s11036_s20  ;;  %v10817_v6 = vpack.i.bf16 %v14199_v38, %v14197_v54  ;;  %9340 = vmatpush3.bf16.msra.mxu1 %v10944_v45  ;;  %v14256_v34 = vld [vmem:[#allocation5 + $0x41] sm:$0xff] }
 0x595   : > { %9341 = vmatprep.subr.bf16.mxu1 %v10945_v37  ;;  %v14266_v50 = vld [vmem:[#allocation5 + $0x42] sm:$0xff]  ;;  %v10953_v37 = vld [vmem:[%s14796_s7 + $0x110] sm:$0xff]  }
 0x596   : > { %10818 = vrot.lane.b32.xlu0 %v10817_v6, %s11036_s20  ;;  %v10847_v59 = vpack.i.bf16 %v14266_v50, %v14274_v32  ;;  %v10952_v6 = vld [vmem:[%s14796_s7 + $0x108] sm:$0xff]  }
 0x598   : > { %10828 = vrot.lane.b32.xlu1 %v10827_v26, %s11036_s20  ;;  %9342 = vmatpush3.bf16.msra.mxu1 %v10946_v47 }
 0x599   : > { %9343 = vmatprep.subr.bf16.mxu1 %v10947_v28 }
 0x59a   : > { %10823 = vrot.lane.b32.xlu0 %v10812_v1, %s11036_s20 }
 0x59c   : > { %9344 = vmatpush3.bf16.msra.mxu1 %v10948_v3 }
 0x59d   : > { %9345 = vmatprep.subr.bf16.mxu1 %v10949_v49 }
 0x5a0   : > { %9346 = vmatpush3.bf16.msra.mxu1 %v10950_v15 }
 0x5c9   : > { %v9273_v55 = vpop.f32.mrb[72].mxu0 }
 0x5ca   : > { %v9274_v8 = vpop.f32.mrb[73].mxu0 }
 0x5cb   : > { %v9275_v62 = vadd.f32 %v9274_v8, %v9273_v55  ;;  %v9276_v7 = vpop.f32.mrb[74].mxu0 }
 0x5cc   : > { %v9277_v14 = vpop.f32.mrb[75].mxu0 }
 0x5cd   : > { %v6840_v20 = vadd.f32 %v9275_v62, %v14135_v46  ;;  %v9278_v48 = vadd.f32 %v9277_v14, %v9276_v7 }
 0x5cf   : > { %v6905_v29 = vadd.f32 %v14157_v53, %v6840_v20  ;;  %v6843_v43 = vadd.f32 %v9278_v48, %v14135_v46 }
 0x5d1   : > { %v6923_v2 = vmax.f32 %v6905_v29, 0.0  ;;  %v6908_v58 = vadd.f32 %v14164_v24, %v6843_v43 }
 0x5d3   : > { %6953 = vst.msk [vmem:[#allocation5 + $0x51] sm:$0xff] %vm3582_vm14, %v6923_v2  ;;  %v6924_v5 = vmax.f32 %v6908_v58, 0.0 }
 0x5d5   : > { %6954 = vst.msk [vmem:[#allocation5 + $0x61] sm:$0xff] %vm3582_vm14, %v6924_v5 }
 0x5da   : > { %v14258_v19 = vld [vmem:[#allocation5 + $0x51] sm:$0xff] }
 0x5db   : > { %v10832_v42 = vpack.i.bf16 %v14258_v19, %v14256_v34  ;;  %v14262_v61 = vld [vmem:[#allocation5 + $0x50] sm:$0xff] }
 0x5dc   : > { %v14264_v53 = vld [vmem:[#allocation5 + $0x60] sm:$0xff]  ;;  %v14317_v14 = vld [vmem:[#allocation5 + $0x52] sm:$0xff] }
 0x5dd   : > { %10833 = vrot.lane.b32.xlu1 %v10832_v42, %s11036_s20  ;;  %v10837_v24 = vpack.i.bf16 %v14264_v53, %v14262_v61  ;;  %v14302_v49 = vld [vmem:[#allocation5 + $0x61] sm:$0xff] }
 0x5de   : > { %v14312_v8 = vld [vmem:[#allocation5 + $0x62] sm:$0xff] }
 0x5df   : > { %10838 = vrot.lane.b32.xlu0 %v10837_v24, %s11036_s20  ;;  %v10867_v29 = vpack.i.bf16 %v14312_v8, %v14317_v14 }
 0x5e1   : > { %10848 = vrot.lane.b32.xlu1 %v10847_v59, %s11036_s20 }
 0x5e3   : > { %10843 = vrot.lane.b32.xlu0 %v10832_v42, %s11036_s20 }
 0x5e6   : > { %v10809_v17 = vpop.permute.xlu1 %10808 }
 0x5e7   : > { %v10811_v33 = vunpack.i.h.bf16 %v10809_v17  ;;  %v10810_v11 = vunpack.i.l.bf16 %v10809_v17 }
 0x5e8   : > { %v10804_v12 = vpop.permute.xlu0 %10803 }
 0x5e9   : > { %v10806_v0 = vunpack.i.h.bf16 %v10804_v12  ;;  %v10805_v57 = vunpack.i.l.bf16 %v10804_v12  ;;  %v7158_v63 = vsel %vm3582_vm14, %v6957_v18, %v10810_v11  ;;  %v7159_v21 = vsel %vm3582_vm14, %v14166_v39, %v10811_v33  ;;  %v7021_v18 = vld [vmem:[#allocation5 + $0x91] sm:$0xff] }
 0x5ea   : > { %v7190_v31 = vpack.c.bf16 %v7159_v21, %v7158_v63 }
 0x5eb   : > { %v7166_v36 = vsel %vm3582_vm14, %v6973_v22, %v10805_v57  ;;  %v7167_v4 = vsel %vm3582_vm14, %v14210_v23, %v10806_v0 }
 0x5ec   : > { %v7191_v1 = vpack.c.bf16 %v7167_v4, %v7166_v36 }
 0x5ee   : > { %7549 = vmatprep.mubr.bf16.mxu0 %v7191_v1 }
 0x5ef   : > { %7550 = vmatmul.mubr.bf16.vlgmr.msra.gmra.mrb[80].mxu0 %v7190_v31 }
 0x5f0   : > { %9511 = vmatpush3.bf16.msra.mxu0 %v10951_v40 }
 0x5f1   : > { %v9279_v41 = vpop.f32.mrb[76].mxu0  ;;  %9512 = vmatprep.subr.bf16.mxu0 %v10952_v6 }
 0x5f2   : > { %v9280_v26 = vpop.f32.mrb[77].mxu0 }
 0x5f3   : > { %v9281_v60 = vadd.f32 %v9280_v26, %v9279_v41  ;;  %v9282_v56 = vpop.f32.mrb[78].mxu0 }
 0x5f4   : > { %v9283_v39 = vpop.f32.mrb[79].mxu0  ;;  %9513 = vmatpush3.bf16.msra.mxu0 %v10952_v6 }
 0x5f5   : > { %v6848_v16 = vadd.f32 %v9281_v60, %v14135_v46  ;;  %v9284_v52 = vadd.f32 %v9283_v39, %v9282_v56  ;;  %9514 = vmatprep.subr.bf16.mxu0 %v10953_v37 }
 0x5f7   : > { %v6913_v23 = vadd.f32 %v14155_v25, %v6848_v16  ;;  %v6851_v45 = vadd.f32 %v9284_v52, %v14135_v46  ;;  %v10954_v25 = vld [vmem:[%s14796_s7 + $0x118] sm:$0xff]  }
 0x5f8   : > { %9515 = vmatpush3.bf16.msra.mxu0 %v10953_v37 }
 0x5f9   : > { %v6925_v47 = vmax.f32 %v6913_v23, 0.0  ;;  %v6916_v28 = vadd.f32 %v14161_v27, %v6851_v45  ;;  %9516 = vmatprep.subr.bf16.mxu0 %v10954_v25 }
 0x5fb   : > { %6955 = vst.msk [vmem:[#allocation5 + $0x71] sm:$0xff] %vm3582_vm14, %v6925_v47  ;;  %v6926_v3 = vmax.f32 %v6916_v28, 0.0 }
 0x5fc   : > { %9517 = vmatpush3.bf16.msra.mxu0 %v10954_v25 }
 0x5fd   : > { %6956 = vst.msk [vmem:[#allocation5 + $0x81] sm:$0xff] %vm3582_vm14, %v6926_v3 }
 0x602   : > { %v14304_v46 = vld [vmem:[#allocation5 + $0x71] sm:$0xff] }
 0x603   : > { %v10852_v15 = vpack.i.bf16 %v14304_v46, %v14302_v49  ;;  %v14308_v27 = vld [vmem:[#allocation5 + $0x70] sm:$0xff] }
 0x604   : > { %v14310_v55 = vld [vmem:[#allocation5 + $0x80] sm:$0xff]  ;;  %v14329_v59 = vld [vmem:[#allocation5 + $0x72] sm:$0xff] }
 0x605   : > { %10853 = vrot.lane.b32.xlu1 %v10852_v15, %s11036_s20  ;;  %v10857_v62 = vpack.i.bf16 %v14310_v55, %v14308_v27  ;;  %v14322_v2 = vld [vmem:[#allocation5 + $0x82] sm:$0xff] }
 0x606   : > { %v10814_v7 = vpop.permute.xlu1 %10813  ;;  %v14331_v17 = vld [vmem:[#allocation5 + $0x81] sm:$0xff]  ;;  %v10877_v0 = vpack.i.bf16 %v14322_v2, %v14329_v59 }
 0x607   : > { %v10816_v20 = vunpack.i.h.bf16 %v10814_v7  ;;  %v10815_v48 = vunpack.i.l.bf16 %v10814_v7  ;;  %10858 = vrot.lane.b32.xlu0 %v10857_v62, %s11036_s20  ;;  %v10872_v1 = vpack.i.bf16 %v7021_v18, %v14331_v17 }
 0x608   : > { %v10819_v43 = vpop.permute.xlu0 %10818 }
 0x609   : > { %v10821_v58 = vunpack.i.h.bf16 %v10819_v43  ;;  %v10820_v5 = vunpack.i.l.bf16 %v10819_v43  ;;  %10868 = vrot.lane.b32.xlu1 %v10867_v29, %s11036_s20  ;;  %v7160_v24 = vsel %vm3582_vm14, %v14168_v10, %v10815_v48  ;;  %v7161_v40 = vsel %vm3582_vm14, %v14197_v54, %v10816_v20 }
 0x60a   : > { %v10829_v42 = vpop.permute.xlu1 %10828  ;;  %v7195_v4 = vpack.c.bf16 %v7161_v40, %v7160_v24 }
 0x60b   : > { %v10831_v33 = vunpack.i.h.bf16 %v10829_v42  ;;  %v10830_v11 = vunpack.i.l.bf16 %v10829_v42  ;;  %v7168_v12 = vsel %vm3582_vm14, %v14195_v51, %v10820_v5  ;;  %v7169_v22 = vsel %vm3582_vm14, %v14274_v32, %v10821_v58  ;;  %10863 = vrot.lane.b32.xlu0 %v10852_v15, %s11036_s20 }
 0x60c   : > { %v10824_v57 = vpop.permute.xlu0 %10823  ;;  %v7196_v63 = vpack.c.bf16 %v7169_v22, %v7168_v12 }
 0x60d   : > { %v10826_v21 = vunpack.i.h.bf16 %v10824_v57  ;;  %v10825_v36 = vunpack.i.l.bf16 %v10824_v57  ;;  %10878 = vrot.lane.b32.xlu1 %v10877_v0, %s11036_s20  ;;  %v7175_v31 = vsel %vm3582_vm14, %v14189_v30, %v10831_v33  ;;  %v7174_v6 = vsel %vm3582_vm14, %v14159_v9, %v10830_v11 }
 0x60e   : > { %7557 = vmatprep.mubr.bf16.mxu0 %v7196_v63  ;;  %v7192_v56 = vpack.c.bf16 %v7175_v31, %v7174_v6  ;;  %v7194_v31 = vpack.c.bf16 %v14274_v32, %v14195_v51 }
 0x60f   : > { %7558 = vmatmul.mubr.bf16.gmra.mrb[84].mxu0 %v7195_v4  ;;  %v7182_v41 = vsel %vm3582_vm14, %v14168_v10, %v10825_v36  ;;  %v7183_v26 = vsel %vm3582_vm14, %v14197_v54, %v10826_v21  ;;  %10873 = vrot.lane.b32.xlu0 %v10872_v1, %s11036_s20 }
 0x610   : > { %v7193_v60 = vpack.c.bf16 %v7183_v26, %v7182_v41 }
 0x612   : > { %7614 = vmatprep.mubr.bf16.mxu1 %v7193_v60 }
 0x613   : > { %7615 = vmatmul.mubr.bf16.vlgmr.msra.gmra.mrb[72].mxu1 %v7192_v56 }
 0x64f   : > { %v10834_v39 = vpop.permute.xlu1 %10833 }
 0x650   : > { %v10836_v16 = vunpack.i.h.bf16 %v10834_v39  ;;  %v10835_v30 = vunpack.i.l.bf16 %v10834_v39 }
 0x651   : > { %v10839_v52 = vpop.permute.xlu0 %10838 }
 0x652   : > { %v10841_v23 = vunpack.i.h.bf16 %v10839_v52  ;;  %v10840_v9 = vunpack.i.l.bf16 %v10839_v52  ;;  %v7162_v37 = vsel %vm3582_vm14, %v14199_v38, %v10835_v30  ;;  %v7163_v10 = vsel %vm3582_vm14, %v14262_v61, %v10836_v16  ;;  %v7013_v30 = vld [vmem:[#allocation5 + $0x90] sm:$0xff] }
 0x653   : > { %v10849_v45 = vpop.permute.xlu1 %10848  ;;  %v7200_v20 = vpack.c.bf16 %v7163_v10, %v7162_v37 }
 0x654   : > { %v10851_v54 = vunpack.i.h.bf16 %v10849_v45  ;;  %v10850_v47 = vunpack.i.l.bf16 %v10849_v45  ;;  %v7170_v28 = vsel %vm3582_vm14, %v14266_v50, %v10840_v9  ;;  %v7171_v3 = vsel %vm3582_vm14, %v14317_v14, %v10841_v23 }
 0x655   : > { %v10844_v25 = vpop.permute.xlu0 %10843  ;;  %v7201_v15 = vpack.c.bf16 %v7171_v3, %v7170_v28  ;;  %v7204_v45 = vpack.c.bf16 %v14329_v59, %v14312_v8 }
 0x656   : > { %v10846_v62 = vunpack.i.h.bf16 %v10844_v25  ;;  %v10845_v7 = vunpack.i.l.bf16 %v10844_v25  ;;  %v7176_v48 = vsel %vm3582_vm14, %v14191_v13, %v10850_v47  ;;  %v7177_v29 = vsel %vm3582_vm14, %v14256_v34, %v10851_v54  ;;  %v7029_v54 = vld [vmem:[#allocation5 + $0x92] sm:$0xff] }
 0x657   : > { %7565 = vmatprep.mubr.bf16.mxu0 %v7201_v15  ;;  %v7197_v42 = vpack.c.bf16 %v7177_v29, %v7176_v48  ;;  %v7209_v47 = vpack.c.bf16 %v7029_v54, %v14322_v2 }
 0x658   : > { %7566 = vmatmul.mubr.bf16.gmra.mrb[88].mxu0 %v7200_v20  ;;  %v7184_v43 = vsel %vm3582_vm14, %v14199_v38, %v10845_v7  ;;  %v7185_v58 = vsel %vm3582_vm14, %v14262_v61, %v10846_v62  ;;  %v14404_v62 = vld [vmem:[%s14797_s8] ss:$0 sm:$0xff] }
 0x659   : > { %v7198_v5 = vpack.c.bf16 %v7185_v58, %v7184_v43 }
 0x65b   : > { %7622 = vmatprep.mubr.bf16.mxu1 %v7198_v5 }
 0x65c   : > { %7623 = vmatmul.mubr.bf16.gmra.mrb[76].mxu1 %v7197_v42 }
 0x677   : > { %v10854_v24 = vpop.permute.xlu1 %10853 }
 0x678   : > { %v10856_v40 = vunpack.i.h.bf16 %v10854_v24  ;;  %v10855_v18 = vunpack.i.l.bf16 %v10854_v24 }
 0x679   : > { %v10859_v33 = vpop.permute.xlu0 %10858 }
 0x67a   : > { %v10861_v11 = vunpack.i.h.bf16 %v10859_v33  ;;  %v10860_v13 = vunpack.i.l.bf16 %v10859_v33  ;;  %v7164_v34 = vsel %vm3582_vm14, %v14264_v53, %v10855_v18  ;;  %v7165_v38 = vsel %vm3582_vm14, %v14308_v27, %v10856_v40 }
 0x67b   : > { %v10869_v12 = vpop.permute.xlu1 %10868  ;;  %v7205_v1 = vpack.c.bf16 %v7165_v38, %v7164_v34 }
 0x67c   : > { %v10871_v22 = vunpack.i.h.bf16 %v10869_v12  ;;  %v10870_v0 = vunpack.i.l.bf16 %v10869_v12  ;;  %v7172_v61 = vsel %vm3582_vm14, %v14312_v8, %v10860_v13  ;;  %v7173_v57 = vsel %vm3582_vm14, %v14329_v59, %v10861_v11 }
 0x67d   : > { %v10864_v63 = vpop.permute.xlu0 %10863  ;;  %v7206_v21 = vpack.c.bf16 %v7173_v57, %v7172_v61 }
 0x67e   : > { %v10866_v36 = vunpack.i.h.bf16 %v10864_v63  ;;  %v10865_v4 = vunpack.i.l.bf16 %v10864_v63  ;;  %v7178_v6 = vsel %vm3582_vm14, %v14258_v19, %v10870_v0  ;;  %v7179_v41 = vsel %vm3582_vm14, %v14302_v49, %v10871_v22 }
 0x67f   : > { %7573 = vmatprep.mubr.bf16.mxu0 %v7206_v21  ;;  %v10879_v26 = vpop.permute.xlu1 %10878  ;;  %v7202_v52 = vpack.c.bf16 %v7179_v41, %v7178_v6  ;;  %v10955_v41 = vld [vmem:[%s14798_s9 + $0x40] sm:$0xff]  }
 0x680   : > { %7574 = vmatmul.mubr.bf16.gmra.mrb[92].mxu0 %v7205_v1  ;;  %v7186_v60 = vsel %vm3582_vm14, %v14264_v53, %v10865_v4  ;;  %v7187_v56 = vsel %vm3582_vm14, %v14308_v27, %v10866_v36  ;;  %v10881_v19 = vunpack.i.h.bf16 %v10879_v26  ;;  %v10880_v23 = vunpack.i.l.bf16 %v10879_v26  ;;  %v10956_v26 = vld [vmem:[%s14798_s9] sm:$0xff]   ;;  %9379 = vmatprep.subr.bf16.mxu1 %v10955_v41 }
 0x681   : > { %v10874_v39 = vpop.permute.xlu0 %10873  ;;  %9518 = vmatprep.mubr.msk.bf16.mxu0 %vm3582_vm14, %v7194_v31  ;;  %v7203_v16 = vpack.c.bf16 %v7187_v56, %v7186_v60  ;;  %v7199_v27 = vpack.c.bf16 %v14317_v14, %v14266_v50  ;;  %v8217_v31 = vld [vmem:[#allocation6 + $0x1] sm:$0xf]  ;;  %v10957_v60 = vld [vmem:[%s14798_s9 + $0x48] sm:$0xff]   ;;  %9380 = vmatpush3.bf16.msra.mxu1 %v10956_v26 }
 0x682   : > { %v10876_v51 = vunpack.i.h.bf16 %v10874_v39  ;;  %v10875_v32 = vunpack.i.l.bf16 %v10874_v39  ;;  %v7180_v37 = vsel %vm3582_vm14, %v14304_v46, %v10880_v23  ;;  %v7181_v10 = vsel %vm3582_vm14, %v14331_v17, %v10881_v19  ;;  %8254 = vrot.lane.b32.xlu0 %v8217_v31, %s11036_s20  ;;  %9381 = vmatprep.subr.bf16.mxu1 %v10957_v60 }
 0x683   : > { %7630 = vmatprep.mubr.bf16.mxu1 %v7203_v16  ;;  %v10958_v16 = vld [vmem:[%s14798_s9 + $0x8] sm:$0xff]  }
 0x684   : > { %7631 = vmatmul.mubr.bf16.gmra.mrb[80].mxu1 %v7202_v52  ;;  %v7188_v49 = vsel %vm3582_vm14, %v14310_v55, %v10875_v32  ;;  %v7189_v53 = vsel %vm3582_vm14, %v7013_v30, %v10876_v51  ;;  %v7207_v55 = vpack.c.bf16 %v7181_v10, %v7180_v37  ;;  %v10959_v32 = vld [vmem:[%s14798_s9 + $0x50] sm:$0xff]  }
 0x685   : > { %v7208_v9 = vpack.c.bf16 %v7189_v53, %v7188_v49  ;;  %9382 = vmatpush3.bf16.msra.mxu1 %v10958_v16  ;;  %v10960_v53 = vld [vmem:[%s14798_s9 + $0x10] sm:$0xff]  }
 0x686   : > { %9383 = vmatprep.subr.bf16.mxu1 %v10959_v32 }
 0x687   : > { %7638 = vmatprep.mubr.bf16.mxu1 %v7208_v9 }
 0x688   : > { %9519 = vmatmul.mubr.msk.bf16.vlgmr.msra.gmra.mrb[96].mxu0 %vm3582_vm14, %v7199_v27 }
 0x689   : > { %9522 = vmatprep.mubr.msk.bf16.mxu0 %vm3582_vm14, %v7204_v45  ;;  %9384 = vmatpush3.bf16.msra.mxu1 %v10960_v53 }
 0x68c   : > { %7639 = vmatmul.mubr.bf16.gmra.mrb[84].mxu1 %v7207_v55 }
 0x690   : > { %9523 = vmatmul.mubr.msk.bf16.gmra.mrb[100].mxu0 %vm3582_vm14, %v7209_v47 }
 0x6c2   : > { %v9307_v50 = vpop.f32.mrb[80].mxu0 }
 0x6c3   : > { %v9308_v14 = vpop.f32.mrb[81].mxu0 }
 0x6c4   : > { %v9309_v8 = vadd.f32 %v9308_v14, %v9307_v50  ;;  %v9310_v59 = vpop.f32.mrb[82].mxu0 }
 0x6c5   : > { %v9311_v28 = vpop.f32.mrb[83].mxu0 }
 0x6c6   : > { %v9312_v46 = vadd.f32 %v9311_v28, %v9310_v59  ;;  %v7552_v29 = vadd.f32 %v9309_v8, %v14404_v62 }
 0x6c8   : > { %v7555_v42 = vadd.f32 %v9312_v46, %v14404_v62 }
 0x6e2   : > { %v9313_v3 = vpop.f32.mrb[84].mxu0 }
 0x6e3   : > { %v9314_v25 = vpop.f32.mrb[85].mxu0 }
 0x6e4   : > { %v9315_v17 = vadd.f32 %v9314_v25, %v9313_v3  ;;  %v9316_v15 = vpop.f32.mrb[86].mxu0 }
 0x6e5   : > { %v9317_v7 = vpop.f32.mrb[87].mxu0 }
 0x6e6   : > { %v9318_v20 = vadd.f32 %v9317_v7, %v9316_v15  ;;  %v9347_v2 = vpop.f32.mrb[72].mxu1  ;;  %v7560_v61 = vadd.f32 %v9315_v17, %v14404_v62 }
 0x6e7   : > { %v9348_v48 = vpop.f32.mrb[73].mxu1 }
 0x6e8   : > { %v9349_v43 = vadd.f32 %v9348_v48, %v9347_v2  ;;  %v9350_v58 = vpop.f32.mrb[74].mxu1  ;;  %v7563_v36 = vadd.f32 %v9318_v20, %v14404_v62 }
 0x6e9   : > { %v9351_v5 = vpop.f32.mrb[75].mxu1 }
 0x6ea   : > { %v9352_v24 = vadd.f32 %v9351_v5, %v9350_v58  ;;  %v7617_v40 = vadd.f32 %v9349_v43, %v7552_v29 }
 0x6ec   : > { %v14408_v18 = vadd.f32 %v9352_v24, %v7555_v42 }
 0x72b   : > { %v9319_v33 = vpop.f32.mrb[88].mxu0 }
 0x72c   : > { %v9320_v11 = vpop.f32.mrb[89].mxu0 }
 0x72d   : > { %v9321_v13 = vadd.f32 %v9320_v11, %v9319_v33  ;;  %v9322_v12 = vpop.f32.mrb[90].mxu0 }
 0x72e   : > { %v9323_v34 = vpop.f32.mrb[91].mxu0 }
 0x72f   : > { %v9324_v38 = vadd.f32 %v9323_v34, %v9322_v12  ;;  %v9353_v22 = vpop.f32.mrb[76].mxu1  ;;  %v7568_v9 = vadd.f32 %v9321_v13, %v14404_v62 }
 0x730   : > { %v9354_v0 = vpop.f32.mrb[77].mxu1 }
 0x731   : > { %v9355_v57 = vadd.f32 %v9354_v0, %v9353_v22  ;;  %v9356_v63 = vpop.f32.mrb[78].mxu1  ;;  %v7571_v10 = vadd.f32 %v9324_v38, %v14404_v62 }
 0x732   : > { %v9357_v21 = vpop.f32.mrb[79].mxu1 }
 0x733   : > { %v9358_v4 = vadd.f32 %v9357_v21, %v9356_v63  ;;  %v7625_v1 = vadd.f32 %v9355_v57, %v7560_v61 }
 0x735   : > { %v7628_v6 = vadd.f32 %v9358_v4, %v7563_v36 }
 0x753   : > { %v9325_v56 = vpop.f32.mrb[92].mxu0 }
 0x754   : > { %v9326_v39 = vpop.f32.mrb[93].mxu0 }
 0x755   : > { %v9327_v30 = vadd.f32 %v9326_v39, %v9325_v56  ;;  %v9328_v51 = vpop.f32.mrb[94].mxu0 }
 0x756   : > { %v9329_v52 = vpop.f32.mrb[95].mxu0 }
 0x757   : > { %v9330_v19 = vadd.f32 %v9329_v52, %v9328_v51  ;;  %v9359_v23 = vpop.f32.mrb[80].mxu1  ;;  %v14444_v17 = vadd.f32 %v9327_v30, %v14404_v62 }
 0x758   : > { %v9360_v49 = vpop.f32.mrb[81].mxu1 }
 0x759   : > { %v9361_v27 = vadd.f32 %v9360_v49, %v9359_v23  ;;  %v9362_v45 = vpop.f32.mrb[82].mxu1  ;;  %v14448_v2 = vadd.f32 %v9330_v19, %v14404_v62 }
 0x75a   : > { %v9363_v37 = vpop.f32.mrb[83].mxu1 }
 0x75b   : > { %v9364_v55 = vadd.f32 %v9363_v37, %v9362_v45  ;;  %v9520_v54 = vpop.f32.mrb[96].mxu0  ;;  %v14439_v47 = vadd.f32 %v9361_v27, %v7568_v9 }
 0x75c   : > { %v7690_v50 = vadd.f32 %v9520_v54, %v7625_v1  ;;  %v7681_v14 = vpop.f32.mrb[97].mxu0 }
 0x75d   : > { %v7682_v8 = vadd.f32 %v7681_v14, %v7617_v40  ;;  %v9521_v59 = vpop.f32.mrb[98].mxu0  ;;  %v14441_v28 = vadd.f32 %v9364_v55, %v7571_v10 }
 0x75e   : > { %v7714_v46 = vmax.f32 %v7690_v50, 0.0  ;;  %v7693_v3 = vadd.f32 %v9521_v59, %v7628_v6  ;;  %v7684_v25 = vpop.f32.mrb[99].mxu0 }
 0x75f   : > { %v7712_v15 = vmax.f32 %v7682_v8, 0.0  ;;  %v7685_v7 = vadd.f32 %v7684_v25, %v14408_v18  ;;  %v9365_v20 = vpop.f32.mrb[84].mxu1 }
 0x760   : > { %v7762_v48 = vcombine.high %v7714_v46, %v7714_v46  ;;  %v7769_v29 = vrot.slane %v7714_v46, %v12878_v44  ;;  %v14451_v43 = vmax.f32 %v7693_v3, 0.0  ;;  %v9366_v58 = vpop.f32.mrb[85].mxu1 }
 0x761   : > { %v7728_v5 = vcombine.high %v7712_v15, %v7712_v15  ;;  %v7735_v42 = vrot.slane %v7712_v15, %v12878_v44  ;;  %v14454_v24 = vmax.f32 %v7685_v7, 0.0  ;;  %v14456_v40 = vadd.f32 %v9366_v58, %v9365_v20  ;;  %v14458_v33 = vpop.f32.mrb[86].mxu1 }
 0x762   : > { %v7776_v18 = vrot.slane %v7762_v48, %v12878_v44  ;;  %v7777_v11 = vcombine.high %v7769_v29, %v7769_v29  ;;  %v7952_v62 = vsel %vm6928_vm7, %v7769_v29, -inf  ;;  %v7779_v13 = vcombine.high %v14451_v43, %v14451_v43  ;;  %v14464_v12 = vpop.f32.mrb[87].mxu1 }
 0x763   : > { %v7953_v34 = vrot.slane %v7952_v62, 4  ;;  %v7742_v38 = vrot.slane %v7728_v5, %v12878_v44  ;;  %v7743_v22 = vcombine.high %v7735_v42, %v7735_v42  ;;  %v7896_v0 = vsel %vm6928_vm7, %v7735_v42, -inf  ;;  %v14468_v61 = vpop.f32.mrb[100].mxu0 }
 0x764   : > { %v7778_v57 = vcombine.high %v7776_v18, %v7776_v18  ;;  %v7959_v63 = vsel %vm6928_vm7, %v7777_v11, -inf  ;;  %v7966_v21 = vsel %vm6928_vm7, %v7776_v18, -inf  ;;  %v7897_v36 = vrot.slane %v7896_v0, 4  ;;  %v14472_v4 = vpop.f32.mrb[101].mxu0 }
 0x765   : > { %v7954_v1 = vmax.f32 %v7952_v62, %v7953_v34  ;;  %v7960_v31 = vrot.slane %v7959_v63, 4  ;;  %v7967_v6 = vrot.slane %v7966_v21, 4  ;;  %v7744_v41 = vcombine.high %v7742_v38, %v7742_v38  ;;  %v14474_v26 = vpop.f32.mrb[102].mxu0 }
 0x766   : > { %v7973_v60 = vsel %vm6928_vm7, %v7778_v57, -inf  ;;  %v7898_v56 = vmax.f32 %v7896_v0, %v7897_v36  ;;  %v7903_v39 = vsel %vm6928_vm7, %v7743_v22, -inf  ;;  %v7910_v16 = vsel %vm6928_vm7, %v7742_v38, -inf  ;;  %v14479_v30 = vpop.f32.mrb[103].mxu0 }
 0x767   : > { %v7955_v51 = vrot.slane %v7954_v1, 2  ;;  %v7961_v32 = vmax.f32 %v7959_v63, %v7960_v31  ;;  %v7968_v52 = vmax.f32 %v7966_v21, %v7967_v6  ;;  %v7974_v19 = vrot.slane %v7973_v60, 4 }
 0x768   : > { %v7899_v23 = vrot.slane %v7898_v56, 2  ;;  %v7904_v49 = vrot.slane %v7903_v39, 4  ;;  %v7911_v53 = vrot.slane %v7910_v16, 4  ;;  %v7917_v9 = vsel %vm6928_vm7, %v7744_v41, -inf }
 0x769   : > { %v7956_v27 = vmax.f32 %v7954_v1, %v7955_v51  ;;  %v7962_v45 = vrot.slane %v7961_v32, 2  ;;  %v7969_v37 = vrot.slane %v7968_v52, 2  ;;  %v7975_v10 = vmax.f32 %v7973_v60, %v7974_v19 }
 0x76a   : > { %v7900_v55 = vmax.f32 %v7898_v56, %v7899_v23  ;;  %v7905_v54 = vmax.f32 %v7903_v39, %v7904_v49  ;;  %v7912_v50 = vmax.f32 %v7910_v16, %v7911_v53  ;;  %v7918_v14 = vrot.slane %v7917_v9, 4 }
 0x76b   : > { %v7957_v8 = vrot.slane %v7956_v27, 1  ;;  %v7963_v59 = vmax.f32 %v7961_v32, %v7962_v45  ;;  %v7970_v46 = vmax.f32 %v7968_v52, %v7969_v37  ;;  %v7976_v3 = vrot.slane %v7975_v10, 2 }
 0x76c   : > { %v7901_v25 = vrot.slane %v7900_v55, 1  ;;  %v7906_v15 = vrot.slane %v7905_v54, 2  ;;  %v7913_v7 = vrot.slane %v7912_v50, 2  ;;  %v7919_v20 = vmax.f32 %v7917_v9, %v7918_v14 }
 0x76d   : > { %v7958_v48 = vmax.f32 %v7956_v27, %v7957_v8  ;;  %v7964_v29 = vrot.slane %v7963_v59, 1  ;;  %v7971_v58 = vrot.slane %v7970_v46, 1  ;;  %v7977_v5 = vmax.f32 %v7975_v10, %v7976_v3 }
 0x76e   : > { %v7902_v42 = vmax.f32 %v7900_v55, %v7901_v25  ;;  %v7907_v18 = vmax.f32 %v7905_v54, %v7906_v15  ;;  %v7914_v11 = vmax.f32 %v7912_v50, %v7913_v7  ;;  %v7920_v62 = vrot.slane %v7919_v20, 2 }
 0x76f   : > { %v7965_v34 = vmax.f32 %v7963_v59, %v7964_v29  ;;  %v7972_v38 = vmax.f32 %v7970_v46, %v7971_v58  ;;  %v7978_v22 = vrot.slane %v7977_v5, 1  ;;  %v14483_v0 = vsel %vm3582_vm14, %v7958_v48, -inf }
 0x770   : > { %v7908_v57 = vrot.slane %v7907_v18, 1  ;;  %v7915_v63 = vrot.slane %v7914_v11, 1  ;;  %v7921_v21 = vmax.f32 %v7919_v20, %v7920_v62  ;;  %v14486_v36 = vsel %vm3582_vm14, %v7902_v42, -inf }
 0x771   : > { %v7979_v1 = vmax.f32 %v7977_v5, %v7978_v22  ;;  %v14489_v31 = vsel %vm3582_vm14, %v7965_v34, -inf  ;;  %v14492_v6 = vsel %vm3582_vm14, %v7972_v38, -inf  ;;  %v7786_v41 = vrot.slane %v14451_v43, %v12878_v44 }
 0x772   : > { %v7909_v60 = vmax.f32 %v7907_v18, %v7908_v57  ;;  %v7916_v56 = vmax.f32 %v7914_v11, %v7915_v63  ;;  %v7922_v39 = vrot.slane %v7921_v21, 1  ;;  %v7793_v16 = vrot.slane %v7779_v13, %v12878_v44 }
 0x773   : > { %v14501_v51 = vsel %vm3582_vm14, %v7979_v1, -inf  ;;  %v7794_v32 = vcombine.high %v7786_v41, %v7786_v41  ;;  %v7980_v52 = vsel %vm6928_vm7, %v7786_v41, -inf  ;;  %v7745_v19 = vcombine.high %v14454_v24, %v14454_v24 }
 0x774   : > { %v7923_v23 = vmax.f32 %v7921_v21, %v7922_v39  ;;  %v14507_v49 = vsel %vm3582_vm14, %v7909_v60, -inf  ;;  %v14510_v53 = vsel %vm3582_vm14, %v7916_v56, -inf  ;;  %v7795_v9 = vcombine.high %v7793_v16, %v7793_v16 }
 0x775   : > { %v7981_v27 = vrot.slane %v7980_v52, 4  ;;  %v7987_v43 = vsel %vm6928_vm7, %v7794_v32, -inf  ;;  %v7994_v13 = vsel %vm6928_vm7, %v7793_v16, -inf  ;;  %v7752_v45 = vrot.slane %v14454_v24, %v12878_v44 }
 0x776   : > { %v14517_v37 = vsel %vm3582_vm14, %v7923_v23, -inf  ;;  %v7988_v10 = vrot.slane %v7987_v43, 4  ;;  %v7995_v55 = vrot.slane %v7994_v13, 4  ;;  %v8001_v54 = vsel %vm6928_vm7, %v7795_v9, -inf }
 0x777   : > { %v7982_v50 = vmax.f32 %v7980_v52, %v7981_v27  ;;  %v8002_v14 = vrot.slane %v8001_v54, 4  ;;  %v7759_v8 = vrot.slane %v7745_v19, %v12878_v44  ;;  %v7760_v59 = vcombine.high %v7752_v45, %v7752_v45 }
 0x778   : > { %v7989_v46 = vmax.f32 %v7987_v43, %v7988_v10  ;;  %v7996_v3 = vmax.f32 %v7994_v13, %v7995_v55  ;;  %v7924_v25 = vsel %vm6928_vm7, %v7752_v45, -inf  ;;  %v14524_v15 = vadd.f32 %v14464_v12, %v14458_v33 }
 0x779   : > { %v7983_v24 = vrot.slane %v7982_v50, 2  ;;  %v8003_v7 = vmax.f32 %v8001_v54, %v8002_v14  ;;  %v7761_v20 = vcombine.high %v7759_v8, %v7759_v8  ;;  %v7925_v48 = vrot.slane %v7924_v25, 4 }
 0x77a   : > { %v7990_v29 = vrot.slane %v7989_v46, 2  ;;  %v7997_v58 = vrot.slane %v7996_v3, 2  ;;  %v7931_v5 = vsel %vm6928_vm7, %v7760_v59, -inf  ;;  %v7938_v42 = vsel %vm6928_vm7, %v7759_v8, -inf }
 0x77b   : > { %v7984_v18 = vmax.f32 %v7982_v50, %v7983_v24  ;;  %v8004_v11 = vrot.slane %v8003_v7, 2  ;;  %v7926_v62 = vmax.f32 %v7924_v25, %v7925_v48  ;;  %v7932_v34 = vrot.slane %v7931_v5, 4  ;;  %v10961_v24 = vld [vmem:[%s14798_s9 + $0x58] sm:$0xff]  }
 0x77c   : > { %v7991_v38 = vmax.f32 %v7989_v46, %v7990_v29  ;;  %v7998_v22 = vmax.f32 %v7996_v3, %v7997_v58  ;;  %v7939_v57 = vrot.slane %v7938_v42, 4  ;;  %v7945_v33 = vsel %vm6928_vm7, %v7761_v20, -inf  ;;  %v10964_v29 = vld [vmem:[%s14798_s9 + $0x80] sm:$0xff]   ;;  %9385 = vmatprep.subr.bf16.mxu1 %v10961_v24 }
 0x77d   : > { %v7985_v12 = vrot.slane %v7984_v18, 1  ;;  %v8005_v63 = vmax.f32 %v8003_v7, %v8004_v11  ;;  %v7927_v21 = vrot.slane %v7926_v62, 2  ;;  %v7933_v1 = vmax.f32 %v7931_v5, %v7932_v34  ;;  %v10963_v7 = vld [vmem:[%s14798_s9 + $0xc0] sm:$0xff]  }
 0x77e   : > { %v7992_v41 = vrot.slane %v7991_v38, 1  ;;  %v7999_v60 = vrot.slane %v7998_v22, 1  ;;  %v7940_v56 = vmax.f32 %v7938_v42, %v7939_v57  ;;  %v7946_v39 = vrot.slane %v7945_v33, 4  ;;  %9401 = vmatprep.subr.bf16.mxu0 %v10963_v7 }
 0x77f   : > { %v7986_v16 = vmax.f32 %v7984_v18, %v7985_v12  ;;  %v8006_v32 = vrot.slane %v8005_v63, 1  ;;  %v7928_v52 = vmax.f32 %v7926_v62, %v7927_v21  ;;  %v7934_v19 = vrot.slane %v7933_v1, 2  ;;  %9402 = vmatpush3.bf16.msra.mxu0 %v10964_v29 }
 0x780   : > { %v7993_v23 = vmax.f32 %v7991_v38, %v7992_v41  ;;  %v8000_v9 = vmax.f32 %v7998_v22, %v7999_v60  ;;  %v7941_v27 = vrot.slane %v7940_v56, 2  ;;  %v7947_v43 = vmax.f32 %v7945_v33, %v7946_v39 }
 0x781   : > { %v8007_v13 = vmax.f32 %v8005_v63, %v8006_v32  ;;  %v8133_v45 = vsel %vm3582_vm14, %v7986_v16, -inf  ;;  %v7929_v10 = vrot.slane %v7928_v52, 1  ;;  %v7935_v55 = vmax.f32 %v7933_v1, %v7934_v19 }
 0x782   : > { %v8134_v54 = vmax.f32 %v14483_v0, %v8133_v45  ;;  %v8136_v50 = vsel %vm3582_vm14, %v7993_v23, -inf  ;;  %v8139_v14 = vsel %vm3582_vm14, %v8000_v9, -inf  ;;  %v7942_v8 = vmax.f32 %v7940_v56, %v7941_v27  ;;  %v10962_v0 = vld [vmem:[%s14798_s9 + $0x18] sm:$0xff]   ;;  %v10968_v27 = vld [vmem:[%s14798_s9 + $0x88] sm:$0xff]  }
 0x783   : > { %v8137_v59 = vmax.f32 %v14489_v31, %v8136_v50  ;;  %v8140_v46 = vmax.f32 %v14492_v6, %v8139_v14  ;;  %v8142_v3 = vsel %vm3582_vm14, %v8007_v13, -inf  ;;  %v7930_v25 = vmax.f32 %v7928_v52, %v7929_v10  ;;  %9386 = vmatpush3.bf16.msra.mxu1 %v10962_v0 }
 0x784   : > { %v8143_v20 = vmax.f32 %v14501_v51, %v8142_v3  ;;  %v7936_v31 = vrot.slane %v7935_v55, 1  ;;  %v7943_v48 = vrot.slane %v7942_v8, 1  ;;  %v7948_v6 = vrot.slane %v7947_v43, 2 }
 0x785   : > { %v8194_v58 = vsel %vm6221_vm0, %v8137_v59, %v8134_v54  ;;  %v8121_v5 = vsel %vm3582_vm14, %v7930_v25, -inf  ;;  %v7641_v42 = vadd.f32 %v14456_v40, %v14444_v17  ;;  %v7698_v18 = vadd.f32 %v14472_v4, %v14439_v47 }
 0x786   : > { %v8195_v51 = vsel %vm6223_vm1, %v8140_v46, %v8194_v58  ;;  %v7937_v11 = vmax.f32 %v7935_v55, %v7936_v31  ;;  %v7944_v62 = vmax.f32 %v7942_v8, %v7943_v48  ;;  %v7949_v34 = vmax.f32 %v7947_v43, %v7948_v6 }
 0x787   : > { %v8196_v38 = vsel %vm6225_vm2, %v8143_v20, %v8195_v51  ;;  %v8122_v22 = vmax.f32 %v14486_v36, %v8121_v5  ;;  %v7706_v57 = vadd.f32 %v14468_v61, %v7641_v42  ;;  %v7716_v33 = vmax.f32 %v7698_v18, 0.0 }
 0x788   : > { %8210 = vst.msk [vmem:[#allocation6 + $0x11] sm:$0xf] %vm8208_vm9, %v8196_v38  ;;  %v7950_v17 = vrot.slane %v7949_v34, 1  ;;  %v8124_v47 = vsel %vm3582_vm14, %v7937_v11, -inf  ;;  %v8127_v40 = vsel %vm3582_vm14, %v7944_v62, -inf  ;;  %v7644_v4 = vadd.f32 %v14524_v15, %v14448_v2 }
 0x789   : > { %v8125_v12 = vmax.f32 %v14507_v49, %v8124_v47  ;;  %v8128_v63 = vmax.f32 %v14510_v53, %v8127_v40  ;;  %v7718_v21 = vmax.f32 %v7706_v57, 0.0  ;;  %v7796_v36 = vcombine.high %v7716_v33, %v7716_v33 }
 0x78a   : > { %v7951_v1 = vmax.f32 %v7949_v34, %v7950_v17  ;;  %v7803_v61 = vrot.slane %v7716_v33, %v12878_v44  ;;  %v14568_v41 = vadd.f32 %v14474_v26, %v7644_v4  ;;  %v14572_v60 = vadd.f32 %v14479_v30, %v14441_v28  ;;  %v10965_v26 = vld [vmem:[%s14798_s9 + $0x60] sm:$0xff]   ;;  %v10967_v30 = vld [vmem:[%s14798_s9 + $0xc8] sm:$0xff]  }
 0x78b   : > { %v8191_v56 = vsel %vm6221_vm0, %v8125_v12, %v8122_v22  ;;  %v7830_v39 = vcombine.high %v7718_v21, %v7718_v21  ;;  %v7837_v2 = vrot.slane %v7718_v21, %v12878_v44  ;;  %v7810_v49 = vrot.slane %v7796_v36, %v12878_v44  ;;  %v10966_v28 = vld [vmem:[%s14798_s9 + $0x20] sm:$0xff]   ;;  %9387 = vmatprep.subr.bf16.mxu1 %v10965_v26 }
 0x78c   : > { %v8130_v53 = vsel %vm3582_vm14, %v7951_v1, -inf  ;;  %v8192_v15 = vsel %vm6223_vm1, %v8128_v63, %v8191_v56  ;;  %v7811_v16 = vcombine.high %v7803_v61, %v7803_v61  ;;  %v8008_v32 = vsel %vm6928_vm7, %v7803_v61, -inf  ;;  %9403 = vmatprep.subr.bf16.mxu0 %v10967_v30  ;;  %9388 = vmatpush3.bf16.msra.mxu1 %v10966_v28 }
 0x78d   : > { %v8131_v52 = vmax.f32 %v14517_v37, %v8130_v53  ;;  %v7844_v19 = vrot.slane %v7830_v39, %v12878_v44  ;;  %v7845_v23 = vcombine.high %v7837_v2, %v7837_v2  ;;  %v8064_v9 = vsel %vm6928_vm7, %v7837_v2, -inf  ;;  %9404 = vmatpush3.bf16.msra.mxu0 %v10968_v27 }
 0x78e   : > { %v8065_v43 = vrot.slane %v8064_v9, 4  ;;  %v7812_v13 = vcombine.high %v7810_v49, %v7810_v49  ;;  %v8009_v45 = vrot.slane %v8008_v32, 4  ;;  %v8015_v10 = vsel %vm6928_vm7, %v7811_v16, -inf }
 0x78f   : > { %v8193_v55 = vsel %vm6225_vm2, %v8131_v52, %v8192_v15  ;;  %v7846_v54 = vcombine.high %v7844_v19, %v7844_v19  ;;  %v8071_v37 = vsel %vm6928_vm7, %v7845_v23, -inf  ;;  %v8078_v50 = vsel %vm6928_vm7, %v7844_v19, -inf  ;;  %v8226_v14 = vld [vmem:[#allocation6 + $0x10] sm:$0xf] }
 0x790   : > { %v8219_v8 = vld [vmem:[#allocation6 + $0x11] sm:$0xf]  ;;  %8209 = vst.msk [vmem:[#allocation6 + $0x9] sm:$0xf] %vm8208_vm9, %v8193_v55  ;;  %v8066_v59 = vmax.f32 %v8064_v9, %v8065_v43  ;;  %v8072_v46 = vrot.slane %v8071_v37, 4  ;;  %v8079_v3 = vrot.slane %v8078_v50, 4  ;;  %v8010_v25 = vmax.f32 %v8008_v32, %v8009_v45  ;;  %8272 = vrot.lane.b32.xlu1 %v8226_v14, %s11036_s20 }
 0x791   : > { %8258 = vrot.lane.b32.xlu0 %v8219_v8, %s11036_s20  ;;  %v8085_v24 = vsel %vm6928_vm7, %v7846_v54, -inf  ;;  %v8016_v0 = vrot.slane %v8015_v10, 4  ;;  %v8022_v7 = vsel %vm6928_vm7, %v7810_v49, -inf  ;;  %v8029_v20 = vsel %vm6928_vm7, %v7812_v13, -inf  ;;  %v8242_v51 = vld [vmem:[#allocation6 + $0x11] sm:$0xf] }
 0x792   : > { %v8067_v31 = vrot.slane %v8066_v59, 2  ;;  %v8073_v48 = vmax.f32 %v8071_v37, %v8072_v46  ;;  %v8080_v6 = vmax.f32 %v8078_v50, %v8079_v3  ;;  %v8086_v29 = vrot.slane %v8085_v24, 4 }
 0x793   : > { %v8011_v58 = vrot.slane %v8010_v25, 2  ;;  %v8017_v5 = vmax.f32 %v8015_v10, %v8016_v0  ;;  %v8023_v42 = vrot.slane %v8022_v7, 4  ;;  %v8030_v18 = vrot.slane %v8029_v20, 4 }
 0x794   : > { %v8068_v11 = vmax.f32 %v8066_v59, %v8067_v31  ;;  %v8074_v62 = vrot.slane %v8073_v48, 2  ;;  %v8081_v34 = vrot.slane %v8080_v6, 2  ;;  %v8087_v38 = vmax.f32 %v8085_v24, %v8086_v29 }
 0x795   : > { %8302 = vrot.lane.b32.xlu0 %v8242_v51, %s11036_s20  ;;  %v8012_v22 = vmax.f32 %v8010_v25, %v8011_v58  ;;  %v8018_v57 = vrot.slane %v8017_v5, 2  ;;  %v8024_v33 = vmax.f32 %v8022_v7, %v8023_v42  ;;  %v8031_v17 = vmax.f32 %v8029_v20, %v8030_v18 }
 0x796   : > { %v8069_v47 = vrot.slane %v8068_v11, 1  ;;  %v8075_v40 = vmax.f32 %v8073_v48, %v8074_v62  ;;  %v8082_v4 = vmax.f32 %v8080_v6, %v8081_v34  ;;  %v8088_v12 = vrot.slane %v8087_v38, 2 }
 0x797   : > { %v8013_v63 = vrot.slane %v8012_v22, 1  ;;  %v8019_v21 = vmax.f32 %v8017_v5, %v8018_v57  ;;  %v8025_v36 = vrot.slane %v8024_v33, 2  ;;  %v8032_v1 = vrot.slane %v8031_v17, 2  ;;  %v8218_v61 = vld [vmem:[#allocation6 + $0x9] sm:$0xf] }
 0x798   : > { %v8070_v56 = vmax.f32 %v8068_v11, %v8069_v47  ;;  %v8076_v39 = vrot.slane %v8075_v40, 1  ;;  %v8083_v2 = vrot.slane %v8082_v4, 1  ;;  %v8089_v49 = vmax.f32 %v8087_v38, %v8088_v12  ;;  %8256 = vrot.lane.b32.xlu1 %v8218_v61, %s11036_s20  ;;  %v8225_v53 = vld [vmem:[#allocation6 + $0x8] sm:$0xf] }
 0x799   : > { %v8014_v15 = vmax.f32 %v8012_v22, %v8013_v63  ;;  %v8020_v16 = vrot.slane %v8019_v21, 1  ;;  %v8026_v32 = vmax.f32 %v8024_v33, %v8025_v36  ;;  %v8033_v26 = vmax.f32 %v8031_v17, %v8032_v1  ;;  %8270 = vrot.lane.b32.xlu0 %v8225_v53, %s11036_s20 }
 0x79a   : > { %v8077_v28 = vmax.f32 %v8075_v40, %v8076_v39  ;;  %v8084_v30 = vmax.f32 %v8082_v4, %v8083_v2  ;;  %v8090_v52 = vrot.slane %v8089_v49, 1  ;;  %v7719_v43 = vmax.f32 %v14568_v41, 0.0 }
 0x79b   : > { %v8021_v19 = vmax.f32 %v8019_v21, %v8020_v16  ;;  %v8027_v23 = vrot.slane %v8026_v32, 1  ;;  %v8034_v9 = vrot.slane %v8033_v26, 1  ;;  %v14610_v13 = vsel %vm3582_vm14, %v8070_v56, -inf }
 0x79c   : > { %v8091_v27 = vmax.f32 %v8089_v49, %v8090_v52  ;;  %v14613_v45 = vsel %vm3582_vm14, %v8077_v28, -inf  ;;  %v14616_v10 = vsel %vm3582_vm14, %v8014_v15, -inf  ;;  %v7717_v55 = vmax.f32 %v14572_v60, 0.0 }
 0x79d   : > { %v14620_v54 = vsel %vm3582_vm14, %v8084_v30, -inf  ;;  %v14622_v37 = vmax.f32 %v8026_v32, %v8027_v23  ;;  %v7847_v50 = vcombine.high %v7719_v43, %v7719_v43  ;;  %v7854_v14 = vrot.slane %v7719_v43, %v12878_v44 }
 0x79e   : > { %v14625_v41 = vmax.f32 %v8033_v26, %v8034_v9  ;;  %v14628_v8 = vsel %vm3582_vm14, %v8021_v19, -inf  ;;  %v7813_v59 = vcombine.high %v7717_v55, %v7717_v55  ;;  %v7820_v46 = vrot.slane %v7717_v55, %v12878_v44 }
 0x79f   : > { %v14632_v3 = vsel %vm3582_vm14, %v8091_v27, -inf  ;;  %v7861_v60 = vrot.slane %v7847_v50, %v12878_v44  ;;  %v7862_v25 = vcombine.high %v7854_v14, %v7854_v14  ;;  %v8092_v24 = vsel %vm6928_vm7, %v7854_v14, -inf }
 0x7a0   : > { %v8093_v0 = vrot.slane %v8092_v24, 4  ;;  %v7827_v7 = vrot.slane %v7813_v59, %v12878_v44  ;;  %v7828_v20 = vcombine.high %v7820_v46, %v7820_v46  ;;  %v8036_v31 = vsel %vm6928_vm7, %v7820_v46, -inf }
 0x7a1   : > { %v7863_v48 = vcombine.high %v7861_v60, %v7861_v60  ;;  %v8099_v6 = vsel %vm6928_vm7, %v7862_v25, -inf  ;;  %v8106_v29 = vsel %vm6928_vm7, %v7861_v60, -inf  ;;  %v8037_v58 = vrot.slane %v8036_v31, 4 }
 0x7a2   : > { %v8094_v5 = vmax.f32 %v8092_v24, %v8093_v0  ;;  %v8100_v42 = vrot.slane %v8099_v6, 4  ;;  %v8107_v18 = vrot.slane %v8106_v29, 4  ;;  %v7829_v51 = vcombine.high %v7827_v7, %v7827_v7 }
 0x7a3   : > { %v8113_v11 = vsel %vm6928_vm7, %v7863_v48, -inf  ;;  %v8038_v62 = vmax.f32 %v8036_v31, %v8037_v58  ;;  %v8043_v34 = vsel %vm6928_vm7, %v7828_v20, -inf  ;;  %v8050_v44 = vsel %vm6928_vm7, %v7827_v7, -inf }
 0x7a4   : > { %v8095_v38 = vrot.slane %v8094_v5, 2  ;;  %v8101_v22 = vmax.f32 %v8099_v6, %v8100_v42  ;;  %v8108_v57 = vmax.f32 %v8106_v29, %v8107_v18  ;;  %v8114_v33 = vrot.slane %v8113_v11, 4  ;;  %v10970_v42 = vld [vmem:[%s14798_s9 + $0x28] sm:$0xff]   ;;  %v10971_v18 = vld [vmem:[%s14798_s9 + $0xd0] sm:$0xff]  }
 0x7a5   : > { %v8039_v17 = vrot.slane %v8038_v62, 2  ;;  %v8044_v47 = vrot.slane %v8043_v34, 4  ;;  %v8051_v40 = vrot.slane %v8050_v44, 4  ;;  %v8057_v4 = vsel %vm6928_vm7, %v7829_v51, -inf  ;;  %9405 = vmatprep.subr.bf16.mxu0 %v10971_v18  ;;  %v8214_v18 = vld [vmem:[#allocation6 + $0x8] sm:$0xf] }
 0x7a6   : > { %v8096_v12 = vmax.f32 %v8094_v5, %v8095_v38  ;;  %v8102_v63 = vrot.slane %v8101_v22, 2  ;;  %v8109_v21 = vrot.slane %v8108_v57, 2  ;;  %v8115_v36 = vmax.f32 %v8113_v11, %v8114_v33 }
 0x7a7   : > { %v8040_v1 = vmax.f32 %v8038_v62, %v8039_v17  ;;  %v8045_v61 = vmax.f32 %v8043_v34, %v8044_v47  ;;  %v8052_v56 = vmax.f32 %v8050_v44, %v8051_v40  ;;  %v8058_v39 = vrot.slane %v8057_v4, 4  ;;  %v10972_v62 = vld [vmem:[%s14798_s9 + $0x90] sm:$0xff]  }
 0x7a8   : > { %v8097_v2 = vrot.slane %v8096_v12, 1  ;;  %v8103_v49 = vmax.f32 %v8101_v22, %v8102_v63  ;;  %v8110_v53 = vmax.f32 %v8108_v57, %v8109_v21  ;;  %v8116_v15 = vrot.slane %v8115_v36, 2  ;;  %9406 = vmatpush3.bf16.msra.mxu0 %v10972_v62  ;;  %v10976_v21 = vld [vmem:[%s14798_s9 + $0x98] sm:$0xff]  }
 0x7a9   : > { %v8041_v16 = vrot.slane %v8040_v1, 1  ;;  %v8046_v32 = vrot.slane %v8045_v61, 2  ;;  %v8053_v26 = vrot.slane %v8052_v56, 2  ;;  %v8059_v28 = vmax.f32 %v8057_v4, %v8058_v39  ;;  %v10973_v4 = vld [vmem:[%s14798_s9 + $0x70] sm:$0xff]  }
 0x7aa   : > { %v8098_v30 = vmax.f32 %v8096_v12, %v8097_v2  ;;  %v8104_v52 = vrot.slane %v8103_v49, 1  ;;  %v8111_v19 = vrot.slane %v8110_v53, 1  ;;  %v8117_v23 = vmax.f32 %v8115_v36, %v8116_v15  ;;  %v10980_v2 = vld [vmem:[%s14798_s9 + $0xa0] sm:$0xff]   ;;  %v10983_v15 = vld [vmem:[%s14798_s9 + $0xa8] sm:$0xff]  }
 0x7ab   : > { %v8042_v9 = vmax.f32 %v8040_v1, %v8041_v16  ;;  %v8047_v27 = vmax.f32 %v8045_v61, %v8046_v32  ;;  %v8054_v43 = vmax.f32 %v8052_v56, %v8053_v26  ;;  %v8060_v55 = vrot.slane %v8059_v28, 2  ;;  %v10977_v1 = vld [vmem:[%s14798_s9 + $0x78] sm:$0xff]   ;;  %v10979_v56 = vld [vmem:[%s14798_s9 + $0xe0] sm:$0xff]   ;;  %v10984_v32 = vld [vmem:[%s14798_s9 + $0xf0] sm:$0xff]  }
 0x7ac   : > { %v8105_v50 = vmax.f32 %v8103_v49, %v8104_v52  ;;  %v8112_v14 = vmax.f32 %v8110_v53, %v8111_v19  ;;  %v8118_v59 = vrot.slane %v8117_v23, 1  ;;  %v8157_v46 = vsel %vm3582_vm14, %v8098_v30, -inf  ;;  %v10978_v61 = vld [vmem:[%s14798_s9 + $0x38] sm:$0xff]   ;;  %v10981_v49 = vld [vmem:[%s14798_s9 + $0xe8] sm:$0xff]   ;;  %v10986_v26 = vld [vmem:[%s14798_s9 + $0xb0] sm:$0xff]  }
 0x7ad   : > { %v8158_v60 = vmax.f32 %v14610_v13, %v8157_v46  ;;  %v8048_v25 = vrot.slane %v8047_v27, 1  ;;  %v8055_v24 = vrot.slane %v8054_v43, 1  ;;  %v8061_v0 = vmax.f32 %v8059_v28, %v8060_v55  ;;  %v10969_v13 = vld [vmem:[%s14798_s9 + $0x68] sm:$0xff]   ;;  %v10987_v52 = vld [vmem:[%s14798_s9 + $0xf8] sm:$0xff]  }
 0x7ae   : > { %v8119_v7 = vmax.f32 %v8117_v23, %v8118_v59  ;;  %v8160_v20 = vsel %vm3582_vm14, %v8105_v50, -inf  ;;  %v8163_v31 = vsel %vm3582_vm14, %v8112_v14, -inf  ;;  %v8145_v48 = vsel %vm3582_vm14, %v8042_v9, -inf  ;;  %9389 = vmatprep.subr.bf16.mxu1 %v10969_v13  ;;  %v8245_v53 = vld [vmem:[#allocation6 + $0x29] sm:$0xf]  ;;  %v10989_v19 = vld [vmem:[%s14798_s9 + $0xb8] sm:$0xff]   ;;  %v8255_v50 = vpop.permute.xlu0 %8254 }
 0x7af   : > { %v8161_v6 = vmax.f32 %v14613_v45, %v8160_v20  ;;  %v8164_v29 = vmax.f32 %v14620_v54, %v8163_v31  ;;  %v8049_v58 = vmax.f32 %v8047_v27, %v8048_v25  ;;  %v8056_v5 = vmax.f32 %v8054_v43, %v8055_v24  ;;  %9390 = vmatpush3.bf16.msra.mxu1 %v10970_v42  ;;  %v8233_v23 = vld [vmem:[#allocation6 + $0xa] sm:$0xf]  ;;  %v8234_v9 = vld [vmem:[#allocation6 + $0x12] sm:$0xf]  ;;  %v8221_v24 = vld [vmem:[#allocation6 + $0x2] sm:$0xf] }
 0x7b0   : > { %v8150_v51 = vsel %vm3582_vm14, %v14622_v37, -inf  ;;  %v8166_v45 = vsel %vm3582_vm14, %v8119_v7, -inf  ;;  %v8062_v54 = vrot.slane %v8061_v0, 1  ;;  %v8146_v11 = vmax.f32 %v14616_v10, %v8145_v48  ;;  %9391 = vmatprep.subr.bf16.mxu1 %v10973_v4  ;;  %v8222_v20 = vld [vmem:[#allocation6 + $0xa] sm:$0xf] }
 0x7b1   : > { %v8167_v34 = vmax.f32 %v14632_v3, %v8166_v45  ;;  %v8200_v44 = vsel %vm6221_vm0, %v8161_v6, %v8158_v60  ;;  %v8148_v38 = vsel %vm3582_vm14, %v8049_v58, -inf  ;;  %v8151_v22 = vsel %vm3582_vm14, %v8056_v5, -inf  ;;  %v8223_v48 = vld [vmem:[#allocation6 + $0x12] sm:$0xf]  ;;  %v8213_v42 = vld [vmem:[#allocation6] sm:$0xf] }
 0x7b2   : > { %v8201_v37 = vsel %vm6223_vm1, %v8164_v29, %v8200_v44  ;;  %v8063_v57 = vmax.f32 %v8061_v0, %v8062_v54  ;;  %v8149_v33 = vmax.f32 %v14628_v8, %v8148_v38  ;;  %v8152_v10 = vmax.f32 %v8150_v51, %v8151_v22  ;;  %v10974_v8 = vld [vmem:[%s14798_s9 + $0x30] sm:$0xff]   ;;  %v8241_v4 = vld [vmem:[#allocation6 + $0x28] sm:$0xf] }
 0x7b3   : > { %v8202_v17 = vsel %vm6225_vm2, %v8167_v34, %v8201_v37  ;;  %v8153_v3 = vsel %vm3582_vm14, %v14625_v41, -inf  ;;  %v10975_v41 = vld [vmem:[%s14798_s9 + $0xd8] sm:$0xff]   ;;  %9392 = vmatpush3.bf16.msra.mxu1 %v10974_v8  ;;  %v8314_v22 = vsel %vm3582_vm14, %v8213_v42, %v8255_v50 }
 0x7b4   : > { %8212 = vst.msk [vmem:[#allocation6 + $0x21] sm:$0xf] %vm8208_vm9, %v8202_v17  ;;  %v8154_v47 = vsel %vm3582_vm14, %v8063_v57, -inf  ;;  %v8197_v40 = vsel %vm6221_vm0, %v8149_v33, %v8146_v11  ;;  %9407 = vmatprep.subr.bf16.mxu0 %v10975_v41  ;;  %9393 = vmatprep.subr.bf16.mxu1 %v10977_v1  ;;  %v8215_v11 = vld [vmem:[#allocation6 + $0x10] sm:$0xf]  ;;  %v10982_v17 = vld [vmem:[%s14798_s9 + $0x100] sm:$0xff]  }
 0x7b5   : > { %v8155_v12 = vmax.f32 %v8153_v3, %v8154_v47  ;;  %v8198_v63 = vsel %vm6223_vm1, %v8152_v10, %v8197_v40  ;;  %9408 = vmatpush3.bf16.msra.mxu0 %v10976_v21  ;;  %v8238_v41 = vld [vmem:[#allocation6 + $0x10] sm:$0xf] }
 0x7b6   : > { %9409 = vmatprep.subr.bf16.mxu0 %v10979_v56 }
 0x7b7   : > { %v8199_v36 = vsel %vm6225_vm2, %v8155_v12, %v8198_v63  ;;  %9394 = vmatpush3.bf16.msra.mxu1 %v10978_v61  ;;  %v10985_v63 = vld [vmem:[%s14798_s9 + $0x108] sm:$0xff]  }
 0x7b8   : > { %8211 = vst.msk [vmem:[#allocation6 + $0x19] sm:$0xf] %vm8208_vm9, %v8199_v36  ;;  %9526 = vmatprep.subr.bf16.mxu1 %v14814_v35 }
 0x7b9   : > { %9410 = vmatpush3.bf16.msra.mxu0 %v10980_v2  ;;  %v8229_v2 = vld [vmem:[#allocation6 + $0x9] sm:$0xf] }
 0x7ba   : > { %9411 = vmatprep.subr.bf16.mxu0 %v10981_v49  ;;  %v8230_v49 = vld [vmem:[#allocation6 + $0x11] sm:$0xf] }
 0x7bb   : > { %v8228_v39 = vld [vmem:[#allocation6 + $0x20] sm:$0xf] }
 0x7bc   : > { %8276 = vrot.lane.b32.xlu1 %v8228_v39, %s11036_s20  ;;  %v8244_v28 = vld [vmem:[#allocation6 + $0x21] sm:$0xf] }
 0x7bd   : > { %9412 = vmatpush3.bf16.msra.mxu0 %v10983_v15  ;;  %v8236_v55 = vld [vmem:[#allocation6 + $0x22] sm:$0xf] }
 0x7be   : > { %9413 = vmatprep.subr.bf16.mxu0 %v10984_v32  ;;  %v8240_v8 = vld [vmem:[#allocation6 + $0x20] sm:$0xf] }
 0x7bf   : > { %v8227_v16 = vld [vmem:[#allocation6 + $0x18] sm:$0xf] }
 0x7c0   : > { %8274 = vrot.lane.b32.xlu0 %v8227_v16, %s11036_s20  ;;  %8308 = vrot.lane.b32.xlu1 %v8245_v53, %s11036_s20  ;;  %v8220_v30 = vld [vmem:[#allocation6 + $0x19] sm:$0xf] }
 0x7c1   : > { %9414 = vmatpush3.bf16.msra.mxu0 %v10986_v26  ;;  %v8235_v27 = vld [vmem:[#allocation6 + $0x1a] sm:$0xf]  ;;  %v10988_v26 = vld [vmem:[%s14798_s9 + $0x110] sm:$0xff]  }
 0x7c2   : > { %9415 = vmatprep.subr.bf16.mxu0 %v10987_v52  ;;  %v8243_v43 = vld [vmem:[#allocation6 + $0x19] sm:$0xf] }
 0x7c3   : > { %v8224_v31 = vld [vmem:[#allocation6 + $0x1a] sm:$0xf] }
 0x7c4   : > { %8306 = vrot.lane.b32.xlu0 %v8244_v28, %s11036_s20  ;;  %8260 = vrot.lane.b32.xlu1 %v8220_v30, %s11036_s20  ;;  %v8216_v34 = vld [vmem:[#allocation6 + $0x18] sm:$0xf]  ;;  %v8232_v30 = vld [vmem:[#allocation6 + $0x21] sm:$0xf] }
 0x7c5   : > { %9416 = vmatpush3.bf16.msra.mxu0 %v10989_v19  ;;  %v8239_v21 = vld [vmem:[#allocation6 + $0x18] sm:$0xf] }
 0x7c6   : > { %v8231_v28 = vld [vmem:[#allocation6 + $0x19] sm:$0xf] }
 0x7c8   : > { %8286 = vrot.lane.b32.xlu0 %v8233_v23, %s11036_s20  ;;  %8288 = vrot.lane.b32.xlu1 %v8234_v9, %s11036_s20 }
 0x7cc   : > { %8290 = vrot.lane.b32.xlu0 %v8235_v27, %s11036_s20  ;;  %8304 = vrot.lane.b32.xlu1 %v8243_v43, %s11036_s20 }
 0x7d0   : > { %8292 = vrot.lane.b32.xlu1 %v8236_v55, %s11036_s20  ;;  %v10990_v55 = vld [vmem:[%s14798_s9 + $0x118] sm:$0xff]   ;;  %s426_s20 = scalar_lea.vmem %s14801_s12, %s9096_s24 }
 0x802   : > { %v8273_v59 = vpop.permute.xlu1 %8272 }
 0x803   : > { %v8259_v14 = vpop.permute.xlu0 %8258  ;;  %v8319_v58 = vsel %vm3582_vm14, %v8222_v20, %v8273_v59  ;;  %v10992_v59 = vld [vmem:[#allocation6 + $0x22] ss:$8 sps:$4 sm:$0xff]  }
 0x804   : > { %v8316_v37 = vsel %vm3582_vm14, %v8215_v11, %v8259_v14  ;;  %v10991_v14 = vld [vmem:[#allocation6 + $0x12] ss:$8 sps:$4 sm:$0xff]  }
 0x807   : > { %v8303_v46 = vpop.permute.xlu0 %8302 }
 0x808   : > { %v8326_v1 = vsel %vm3582_vm14, %v8238_v41, %v8303_v46  ;;  %v8382_v46 = vpack.c.bf16 %v10992_v59, %v10991_v14 }
 0x80a   : > { %v8257_v60 = vpop.permute.xlu1 %8256 }
 0x80b   : > { %v8271_v25 = vpop.permute.xlu0 %8270  ;;  %v8315_v54 = vsel %vm3582_vm14, %v8214_v18, %v8257_v60 }
 0x80c   : > { %v8318_v7 = vsel %vm3582_vm14, %v8221_v24, %v8271_v25  ;;  %v9047_v33 = vcombine.low %v8314_v22, %v8315_v54 }
 0x80d   : > { %v9048_v51 = vcombine.low %v8318_v7, %v8319_v58 }
 0x82e   : > { %v8277_v0 = vpop.permute.xlu1 %8276 }
 0x82f   : > { %v8321_v5 = vsel %vm3582_vm14, %v8224_v31, %v8277_v0  ;;  %v9055_v31 = vld [vmem:[%s14799_s10] ss:$0 sm:$0xff] }
 0x832   : > { %v8275_v6 = vpop.permute.xlu0 %8274  ;;  %v8309_v29 = vpop.permute.xlu1 %8308 }
 0x833   : > { %v8320_v13 = vsel %vm3582_vm14, %v8223_v48, %v8275_v6  ;;  %v8329_v61 = vsel %vm3582_vm14, %v8241_v4, %v8309_v29 }
 0x834   : > { %v9052_v45 = vcombine.low %v8320_v13, %v8321_v5 }
 0x836   : > { %v8307_v62 = vpop.permute.xlu0 %8306  ;;  %v8261_v44 = vpop.permute.xlu1 %8260  ;;  %v8379_v38 = vpack.c.bf16 %v9052_v45, %v9048_v51 }
 0x837   : > { %v8317_v57 = vsel %vm3582_vm14, %v8216_v34, %v8261_v44  ;;  %v8328_v12 = vsel %vm3582_vm14, %v8240_v8, %v8307_v62 }
 0x838   : > { %v9051_v10 = vcombine.low %v8316_v37, %v8317_v57  ;;  %8713 = vmatprep.mubr.bf16.mxu1 %v8379_v38  ;;  %v9054_v39 = vcombine.low %v8328_v12, %v8329_v61 }
 0x83a   : > { %v8378_v3 = vpack.c.bf16 %v9051_v10, %v9047_v33  ;;  %v8287_v47 = vpop.permute.xlu0 %8286  ;;  %v8289_v40 = vpop.permute.xlu1 %8288 }
 0x83b   : > { %v8322_v16 = vsel %vm3582_vm14, %v8229_v2, %v8287_v47  ;;  %v8323_v32 = vsel %vm3582_vm14, %v8230_v49, %v8289_v40 }
 0x83c   : > { %8714 = vmatmul.mubr.bf16.vlgmr.msra.gmra.mrb[88].mxu1 %v8378_v3  ;;  %v9049_v27 = vcombine.low %v8322_v16, %v8323_v32 }
 0x83d   : > { %9527 = vmatpush3.bf16.msra.mxu1 %v10982_v17  ;;  %9534 = vmatprep.mubr.msk.bf16.mxu1 %vm11039_vm10, %v14814_v35 }
 0x83e   : > { %v8305_v36 = vpop.permute.xlu1 %8304  ;;  %9528 = vmatprep.subr.bf16.mxu1 %v14814_v35  ;;  %v8291_v53 = vpop.permute.xlu0 %8290 }
 0x83f   : > { %v8327_v56 = vsel %vm3582_vm14, %v8239_v21, %v8305_v36  ;;  %v8324_v23 = vsel %vm3582_vm14, %v8231_v28, %v8291_v53 }
 0x840   : > { %v9050_v15 = vcombine.low %v8326_v1, %v8327_v56 }
 0x841   : > { %9529 = vmatpush3.bf16.msra.mxu1 %v10985_v63 }
 0x842   : > { %v8293_v52 = vpop.permute.xlu1 %8292  ;;  %9530 = vmatprep.subr.bf16.mxu1 %v14814_v35  ;;  %v8381_v19 = vpack.c.bf16 %v9054_v39, %v9050_v15 }
 0x843   : > { %v8325_v9 = vsel %vm3582_vm14, %v8232_v30, %v8293_v52 }
 0x844   : > { %v9053_v43 = vcombine.low %v8324_v23, %v8325_v9  ;;  %8754 = vmatprep.mubr.bf16.mxu0 %v8381_v19 }
 0x845   : > { %9531 = vmatpush3.bf16.msra.mxu1 %v10988_v26 }
 0x846   : > { %v8380_v50 = vpack.c.bf16 %v9053_v43, %v9049_v27  ;;  %9532 = vmatprep.subr.bf16.mxu1 %v14814_v35 }
 0x848   : > { %8755 = vmatmul.mubr.bf16.vlgmr.msra.gmra.mrb[104].mxu0 %v8380_v50 }
 0x849   : > { %9533 = vmatpush3.bf16.msra.mxu1 %v10990_v55 }
 0x84c   : > { %9535 = vmatmul.mubr.msk.bf16.vlgmr.msra.gmra.mrb[92].mxu1 %vm3582_vm14, %v8382_v46 }
 0x90f   : > { %v9395_v60 = vpop.f32.mrb[88].mxu1 }
 0x910   : > { %v9396_v25 = vpop.f32.mrb[89].mxu1 }
 0x911   : > { %v9397_v24 = vadd.f32 %v9396_v25, %v9395_v60  ;;  %v9398_v0 = vpop.f32.mrb[90].mxu1 }
 0x912   : > { %v9399_v7 = vpop.f32.mrb[91].mxu1 }
 0x913   : > { %v9400_v20 = vadd.f32 %v9399_v7, %v9398_v0  ;;  %v8716_v6 = vadd.f32 %v9397_v24, %v9055_v31 }
 0x915   : > { %v8719_v13 = vadd.f32 %v9400_v20, %v9055_v31 }
 0x91b   : > { %v9417_v48 = vpop.f32.mrb[104].mxu0 }
 0x91c   : > { %v9418_v35 = vpop.f32.mrb[105].mxu0 }
 0x91d   : > { %v9419_v29 = vadd.f32 %v9418_v35, %v9417_v48  ;;  %v9420_v58 = vpop.f32.mrb[106].mxu0 }
 0x91e   : > { %v9421_v5 = vpop.f32.mrb[107].mxu0 }
 0x91f   : > { %v9422_v42 = vadd.f32 %v9421_v5, %v9420_v58  ;;  %v8757_v18 = vadd.f32 %v9419_v29, %v8716_v6  ;;  %v8797_v51 = vpop.f32.mrb[92].mxu1 }
 0x920   : > { %v9536_v45 = vpop.f32.mrb[93].mxu1 }
 0x921   : > { %v8798_v54 = vadd.f32 %v8797_v51, %v8757_v18  ;;  %v8760_v11 = vadd.f32 %v9422_v42, %v8719_v13  ;;  %v8800_v62 = vpop.f32.mrb[94].mxu1 }
 0x922   : > { %v9537_v34 = vpop.f32.mrb[95].mxu1 }
 0x923   : > { %v8806_v44 = vcombine.high %v8798_v54, %v8798_v54  ;;  %8811 = vst.msk [vmem:[%s421_s25] sm:$0xf] %vm8810_vm11, %v8798_v54  ;;  %v8801_v38 = vadd.f32 %v8800_v62, %v8760_v11  ;;  %8815 = vrot.lane.b32.xlu0 %v8798_v54, %s11040_s22 }
 0x925   : > { %8812 = vst.msk [vmem:[%s421_s25 + $0x4] sm:$0xf] %vm8810_vm11, %v8806_v44  ;;  %v8807_v22 = vcombine.high %v8801_v38, %v8801_v38  ;;  %8813 = vst.msk [vmem:[%s421_s25 + $0x8] sm:$0xf] %vm8810_vm11, %v8801_v38  ;;  %8817 = vrot.lane.b32.xlu1 %v8806_v44, %s11040_s22 }
 0x927   : > { %8814 = vst.msk [vmem:[%s421_s25 + $0xc] sm:$0xf] %vm8810_vm11, %v8807_v22  ;;  %8819 = vrot.lane.b32.xlu0 %v8801_v38, %s11040_s22 }
 0x929   : > { %8821 = vrot.lane.b32.xlu1 %v8807_v22, %s11040_s22 }
 0x995   : > { %v8816_v37 = vpop.permute.xlu0 %8815 }
 0x996   : > { %8827 = vst.msk [vmem:[%s426_s20] sm:$0xf] %vm8810_vm11, %v8816_v37 }
 0x997   : > { %v8818_v57 = vpop.permute.xlu1 %8817 }
 0x998   : > { %8828 = vst.msk [vmem:[%s426_s20 + $0x4] sm:$0xf] %vm8810_vm11, %v8818_v57 }
 0x999   : > { %v8820_v33 = vpop.permute.xlu0 %8819 }
 0x99a   : > { %8829 = vst.msk [vmem:[%s426_s20 + $0x8] sm:$0xf] %vm8810_vm11, %v8820_v33 }
 0x99b   : > { %v8822_v10 = vpop.permute.xlu1 %8821 }
 0x99c   : > { %8830 = vst.msk [vmem:[%s426_s20 + $0xc] sm:$0xf] %vm8810_vm11, %v8822_v10 }
 0x99d PF: > { %s23_s21 = sadd.s32 1, %s11023_s21  }
 0x99e   : > { %p20_p4 = scmp.ge.s32.totalorder %s23_s21, 4  }
 0x9a0   :  { %22 = sbr.rel (!%p20_p4) target bundleno = 1 (0x1), region = 116 }

</bundles_post_ra>
